<compile_context>
chip_gen: v7x
topology: tpu7x:2x2x1
jax: 0.10.0
libtpu: 0.0.40
codegen_flags: <defaults>
</compile_context>

<pallas_src>
from functools import partial

import jax
import jax.numpy as jnp
from jax import lax
from jax.experimental import pallas as pl
from jax.experimental.pallas import tpu as pltpu


def _cdiv(a, b):
    return -(-a // b)


def _round_up(x, m):
    return ((x + m - 1) // m) * m


# ----------------------------------------------------------------------------
# Pallas kernel: fused  relu( (patches_bf16 @ W'_bf16)_f32acc + bias_f32 )
# BN scale is pre-folded into W' in the wrapper; N padded to x128 so the store
# is lane-dense; the output is stored directly in bf16.
# ----------------------------------------------------------------------------
def _mm_bias_relu_kernel(p_ref, w_ref, b_ref, o_ref):
    acc = jnp.dot(p_ref[...], w_ref[...], preferred_element_type=jnp.float32)
    o_ref[...] = jnp.maximum(acc + b_ref[...], 0.0).astype(o_ref.dtype)


def _choose_m_tiling(m):
    """Rows-per-tile and number of grid steps (even when M allows, tiles<=1024)."""
    if m < 64:
        return _round_up(max(m, 1), 8), 1
    steps = 2 * _cdiv(m, 2048)            # even step count, <= 1024 rows / tile
    tm = _round_up(_cdiv(m, steps), 8)
    return tm, steps


def fused_matmul_bias_relu(patches, weight, bias):
    """patches (M, Kp) bf16, weight (Kp, Np) bf16, bias (1, Np) f32 -> (M, Np) bf16."""
    M, Kp = patches.shape
    Np = weight.shape[1]
    tm, steps = _choose_m_tiling(M)
    Mp = tm * steps
    if Mp != M:
        patches = jnp.pad(patches, ((0, Mp - M), (0, 0)))

    cost = pl.CostEstimate(
        flops=2 * Mp * Kp * Np,
        transcendentals=0,
        bytes_accessed=Mp * Kp * 2 + Kp * Np * 2 + Np * 4 + Mp * Np * 2,
    )

    out = pl.pallas_call(
        _mm_bias_relu_kernel,
        out_shape=jax.ShapeDtypeStruct((Mp, Np), jnp.bfloat16),
        grid=(steps,),
        in_specs=[
            pl.BlockSpec((tm, Kp), lambda i: (i, 0)),   # active-row patch tile
            pl.BlockSpec((Kp, Np), lambda i: (0, 0)),   # scale-folded weight (resident)
            pl.BlockSpec((1, Np), lambda i: (0, 0)),    # BN bias (resident)
        ],
        out_specs=pl.BlockSpec((tm, Np), lambda i: (i, 0)),
        compiler_params=pltpu.CompilerParams(
            dimension_semantics=("parallel",),
        ),
        cost_estimate=cost,
    )(patches, weight, bias)
    return out[:M]


# ----------------------------------------------------------------------------
# One (SubM/Sparse)Conv3d + BatchNorm1d(eval) + ReLU block, fully under jit:
# static-capacity active list -> sparse im2col gather -> fused Pallas matmul
# -> scatter back into the dense zero output.
# ----------------------------------------------------------------------------
def sparse_conv_bn_relu(x, mask, layer, stride, padding, subm, cap_in):
    w, gamma, beta, rmean, rvar = layer
    kd, kh, kw, cin, cout = w.shape
    sd, sh, sw = stride
    pd, ph, pw = padding
    B, D, H, W, _ = x.shape
    Do = (D + 2 * pd - kd) // sd + 1
    Ho = (H + 2 * ph - kh) // sh + 1
    Wo = (W + 2 * pw - kw) // sw + 1

    # ---- active output set & static capacity ---------------------------------
    if subm:
        out_mask = mask                          # submanifold: same active set
        cap = cap_in
    else:
        pooled = lax.reduce_window(
            mask, jnp.zeros((), mask.dtype), lax.max,
            window_dimensions=(1, kd, kh, kw),
            window_strides=(1, sd, sh, sw),
            padding=((0, 0), (pd, pd), (ph, ph), (pw, pw)))
        out_mask = (pooled > 0.0).astype(jnp.float32)
        cap = min(B * Do * Ho * Wo, cap_in * kd * kh * kw)

    # static-capacity active index list (jit friendly, no host sync)
    flat = jnp.nonzero(out_mask.reshape(-1) > 0.5, size=cap, fill_value=0)[0]
    count = jnp.sum(out_mask > 0.5)
    valid = jnp.arange(cap) < count
    bi = flat // (Do * Ho * Wo)
    rem = flat % (Do * Ho * Wo)
    zi = rem // (Ho * Wo)
    yi = (rem // Wo) % Ho
    xi = rem % Wo

    # ---- sparse im2col: gather receptive fields of the (<=cap) active rows ---
    xp = jnp.pad(x, ((0, 0), (pd, pd), (ph, ph), (pw, pw), (0, 0)))   # bf16
    oz = zi[:, None] * sd + jnp.arange(kd)[None, :]                   # (cap, kd)
    oy = yi[:, None] * sh + jnp.arange(kh)[None, :]                   # (cap, kh)
    ox = xi[:, None] * sw + jnp.arange(kw)[None, :]                   # (cap, kw)
    patches = xp[bi[:, None, None, None],
                 oz[:, :, None, None],
                 oy[:, None, :, None],
                 ox[:, None, None, :]]                # (cap, kd, kh, kw, cin)
    K = kd * kh * kw * cin
    P = patches.reshape(cap, K)

    # ---- fold BN(eval) into weight/bias, pad K & N to x128, cast bf16 --------
    eps = 1e-3
    scale = gamma * lax.rsqrt(rvar + eps)             # (cout,)
    bias = beta - rmean * scale                       # (cout,)
    Kp = _round_up(K, 128)
    Np = _round_up(cout, 128)
    P = jnp.pad(P, ((0, 0), (0, Kp - K)))
    Wm = w.reshape(K, cout) * scale[None, :]
    Wm = jnp.pad(Wm, ((0, Kp - K), (0, Np - cout))).astype(jnp.bfloat16)
    biasp = jnp.pad(bias, (0, Np - cout)).reshape(1, Np).astype(jnp.float32)

    rows = fused_matmul_bias_relu(P, Wm, biasp)[:, :cout]       # (cap, cout) bf16
    rows = jnp.where(valid[:, None], rows, jnp.zeros((), rows.dtype))

    # ---- scatter back to the dense zero output (padding rows add 0 at origin)
    y = jnp.zeros((B, Do, Ho, Wo, cout), jnp.bfloat16)
    y = y.at[bi, zi, yi, xi].add(rows)
    return y, out_mask, cap


# ----------------------------------------------------------------------------
# Parameters (deterministic synthetic init; BN stats kept explicitly so a real
# checkpoint's running_mean / running_var would be folded correctly)
# ----------------------------------------------------------------------------
def _make_layer(key, ksize, cin, cout):
    kd, kh, kw = ksize
    kw_, kg_, kb_ = jax.random.split(key, 3)
    w = 0.05 * jax.random.normal(kw_, (kd, kh, kw, cin, cout), jnp.float32)
    gamma = 1.0 + 0.1 * jax.random.normal(kg_, (cout,), jnp.float32)
    beta = 0.1 * jax.random.normal(kb_, (cout,), jnp.float32)
    rmean = jnp.zeros((cout,), jnp.float32)
    rvar = jnp.ones((cout,), jnp.float32)
    return (w, gamma, beta, rmean, rvar)


def init_params(key, input_channels, num_features_out=128):
    keys = iter(jax.random.split(key, 16))
    p = {}
    p["conv_input"] = _make_layer(next(keys), (3, 3, 3), input_channels, 16)
    p["conv1"] = [_make_layer(next(keys), (3, 3, 3), 16, 16)]
    p["conv2"] = [
        _make_layer(next(keys), (3, 3, 3), 16, 32),
        _make_layer(next(keys), (3, 3, 3), 32, 32),
        _make_layer(next(keys), (3, 3, 3), 32, 32),
    ]
    p["conv3"] = [
        _make_layer(next(keys), (3, 3, 3), 32, 64),
        _make_layer(next(keys), (3, 3, 3), 64, 64),
        _make_layer(next(keys), (3, 3, 3), 64, 64),
    ]
    p["conv4"] = [
        _make_layer(next(keys), (3, 3, 3), 64, 64),
        _make_layer(next(keys), (3, 3, 3), 64, 64),
        _make_layer(next(keys), (3, 3, 3), 64, 64),
    ]
    p["conv_out"] = _make_layer(next(keys), (3, 1, 1), 64, num_features_out)
    return p


# ----------------------------------------------------------------------------
# VoxelBackBone8x forward (shapes are static; wrap the whole thing in jax.jit)
# ----------------------------------------------------------------------------
def voxel_backbone_8x(params, voxel_features, voxel_coords, batch_size, grid_size):
    # sparse_shape = grid_size[::-1] + [1, 0, 0]   (grid_size = [X, Y, Z])
    D = int(grid_size[2]) + 1
    H = int(grid_size[1])
    W = int(grid_size[0])
    cin = voxel_features.shape[1]
    nvox = voxel_features.shape[0]

    # Densify (voxel coordinates are assumed unique, as in spconv); bf16 carrier.
    b, z, y, x = (voxel_coords[:, 0], voxel_coords[:, 1],
                  voxel_coords[:, 2], voxel_coords[:, 3])
    dense = jnp.zeros((batch_size, D, H, W, cin), jnp.bfloat16)
    dense = dense.at[b, z, y, x].set(voxel_features.astype(jnp.bfloat16))
    mask = jnp.zeros((batch_size, D, H, W), jnp.float32).at[b, z, y, x].set(1.0)

    s1, p1 = (1, 1, 1), (1, 1, 1)

    # conv_input: SubMConv3d(cin->16, k3, pad1) + BN + ReLU
    xf, m, c = sparse_conv_bn_relu(dense, mask, params["conv_input"], s1, p1, True, nvox)

    # conv1: subm 16->16
    x1, m1, c1 = sparse_conv_bn_relu(xf, m, params["conv1"][0], s1, p1, True, c)

    # conv2: spconv 16->32 s2 p1, subm 32->32 x2
    x2, m2, c2 = sparse_conv_bn_relu(x1, m1, params["conv2"][0], (2, 2, 2), (1, 1, 1), False, c1)
    x2, m2, c2 = sparse_conv_bn_relu(x2, m2, params["conv2"][1], s1, p1, True, c2)
    x2, m2, c2 = sparse_conv_bn_relu(x2, m2, params["conv2"][2], s1, p1, True, c2)

    # conv3: spconv 32->64 s2 p1, subm 64->64 x2
    x3, m3, c3 = sparse_conv_bn_relu(x2, m2, params["conv3"][0], (2, 2, 2), (1, 1, 1), False, c2)
    x3, m3, c3 = sparse_conv_bn_relu(x3, m3, params["conv3"][1], s1, p1, True, c3)
    x3, m3, c3 = sparse_conv_bn_relu(x3, m3, params["conv3"][2], s1, p1, True, c3)

    # conv4: spconv 64->64 s2 pad (0,1,1), subm 64->64 x2
    x4, m4, c4 = sparse_conv_bn_relu(x3, m3, params["conv4"][0], (2, 2, 2), (0, 1, 1), False, c3)
    x4, m4, c4 = sparse_conv_bn_relu(x4, m4, params["conv4"][1], s1, p1, True, c4)
    x4, m4, c4 = sparse_conv_bn_relu(x4, m4, params["conv4"][2], s1, p1, True, c4)

    # conv_out: spconv 64->128 k(3,1,1) s(2,1,1) pad 0
    xo, mo, _ = sparse_conv_bn_relu(x4, m4, params["conv_out"], (2, 1, 1), (0, 0, 0), False, c4)

    return {
        "encoded_spconv_tensor": {"features": xo, "mask": mo},
        "encoded_spconv_tensor_stride": 8,
        "multi_scale_3d_features": {
            "x_conv1": {"features": x1, "mask": m1},
            "x_conv2": {"features": x2, "mask": m2},
            "x_conv3": {"features": x3, "mask": m3},
            "x_conv4": {"features": x4, "mask": m4},
        },
        "multi_scale_3d_strides": {"x_conv1": 1, "x_conv2": 2, "x_conv3": 4, "x_conv4": 8},
    }


# ----------------------------------------------------------------------------
if __name__ == "__main__":
    key = jax.random.PRNGKey(0)
    k_params, k_coords, k_feats = jax.random.split(key, 3)

    batch_size = 2
    input_channels = 4
    grid_size = (16, 16, 24)          # [X, Y, Z] -> sparse_shape (25, 16, 16)
    num_voxels = 400

    params = init_params(k_params, input_channels, num_features_out=128)

    # Deterministic synthetic sparse input (unique voxel coordinates).
    D, H, W = grid_size[2] + 1, grid_size[1], grid_size[0]
    total = batch_size * D * H * W
    lin = jax.random.permutation(k_coords, total)[:num_voxels]
    assert int(jnp.unique(lin).shape[0]) == num_voxels  # unique voxel coords
    b = lin // (D * H * W)
    rem = lin % (D * H * W)
    z = rem // (H * W)
    y = (rem // W) % H
    x = rem % W
    voxel_coords = jnp.stack([b, z, y, x], axis=1).astype(jnp.int32)
    voxel_features = jax.random.normal(k_feats, (num_voxels, input_channels), jnp.float32)

    fwd = jax.jit(partial(voxel_backbone_8x,
                          batch_size=batch_size, grid_size=grid_size))
    out = fwd(params, voxel_features, voxel_coords)
    enc = out["encoded_spconv_tensor"]["features"]
    jax.block_until_ready(enc)

    assert enc.shape == (batch_size, 1, 2, 2, 128), enc.shape
    assert bool(jnp.all(jnp.isfinite(enc.astype(jnp.float32))))
    for name, shp in [("x_conv1", (2, 25, 16, 16, 16)),
                      ("x_conv2", (2, 13, 8, 8, 32)),
                      ("x_conv3", (2, 7, 4, 4, 64)),
                      ("x_conv4", (2, 3, 2, 2, 64))]:
        assert out["multi_scale_3d_features"][name]["features"].shape == shp

    print("KERNEL_OK")
</pallas_src>

<mosaic_0001>
module attributes {stable_mosaic.version = 11 : i64} {
  func.func private @main(%arg0: i32) attributes {dimension_semantics = [#tpu.dimension_semantics<core_parallel>], iteration_bounds = array<i64: 2>, tpu.core_type = #tpu.core_type<sc_scalar_subcore>, window_params = []} {
    return
  }
}

module attributes {stable_mosaic.version = 11 : i64} {
  func.func private @main(%arg0: i32) attributes {dimension_semantics = [#tpu.dimension_semantics<core_parallel>], iteration_bounds = array<i64: 2>, tpu.core_type = #tpu.core_type<sc_scalar_subcore>, window_params = []} {
    return
  }
}

module attributes {stable_mosaic.version = 11 : i64} {
  func.func @_mm_bias_relu_kernel(%arg0: i32, %arg1: memref<200x128xbf16, #tpu.memory_space<vmem>>, %arg2: memref<128x128xbf16, #tpu.memory_space<vmem>>, %arg3: memref<1x128xf32, #tpu.memory_space<vmem>>, %arg4: memref<200x128xbf16, #tpu.memory_space<vmem>>) attributes {dimension_semantics = [#tpu.dimension_semantics<parallel>], iteration_bounds = array<i64: 2>, scalar_prefetch = 0 : i64, scratch_operands = 0 : i64, tpu.core_type = #tpu.core_type<tc>, window_params = [{transform_indices = @transform_0, window_bounds = array<i64: 200, 128>}, {pipeline_mode = #tpu.pipeline_mode<synchronous>, transform_indices = @transform_1, window_bounds = array<i64: 128, 128>}, {pipeline_mode = #tpu.pipeline_mode<synchronous>, transform_indices = @transform_2, window_bounds = array<i64: 1, 128>}, {transform_indices = @transform_3, window_bounds = array<i64: 200, 128>}]} {
    %c0 = arith.constant 0 : index
    %c0_0 = arith.constant 0 : index
    %0 = vector.load %arg1[%c0, %c0_0] : memref<200x128xbf16, #tpu.memory_space<vmem>>, vector<200x128xbf16>
    %c0_1 = arith.constant 0 : index
    %c0_2 = arith.constant 0 : index
    %1 = vector.load %arg2[%c0_1, %c0_2] : memref<128x128xbf16, #tpu.memory_space<vmem>>, vector<128x128xbf16>
    %cst = arith.constant dense<0.000000e+00> : vector<200x128xf32>
    %2 = tpu.matmul %0, %1, %cst {dimension_numbers = #tpu.dot_dimension_numbers<[1], [0], [0], [1], [0, 0, 1, 1], [], []>} : vector<200x128xbf16>, vector<128x128xbf16>, vector<200x128xf32> -> vector<200x128xf32>
    %c0_3 = arith.constant 0 : index
    %c0_4 = arith.constant 0 : index
    %3 = vector.load %arg3[%c0_3, %c0_4] : memref<1x128xf32, #tpu.memory_space<vmem>>, vector<1x128xf32>
    %4 = vector.broadcast %3 : vector<1x128xf32> to vector<200x128xf32>
    %5 = arith.addf %2, %4 : vector<200x128xf32>
    %cst_5 = arith.constant 0.000000e+00 : f32
    %6 = vector.broadcast %cst_5 : f32 to vector<200x128xf32>
    %7 = arith.maximumf %5, %6 : vector<200x128xf32>
    %8 = arith.truncf %7 : vector<200x128xf32> to vector<200x128xbf16>
    %c0_6 = arith.constant 0 : index
    %c0_7 = arith.constant 0 : index
    %9 = vector.load %arg4[%c0_6, %c0_7] : memref<200x128xbf16, #tpu.memory_space<vmem>>, vector<200x128xbf16>
    tpu.vector_store %arg4[%c0_6, %c0_7], %8 {strides = array<i32>} : memref<200x128xbf16, #tpu.memory_space<vmem>>, vector<200x128xbf16>,
    return
  }
  func.func @transform_0(%arg0: i32) -> (i32, i32) {
    %c0_i32 = arith.constant 0 : i32
    %c0_i32_0 = arith.constant 0 : i32
    return %arg0, %c0_i32 : i32, i32
  }
  func.func @transform_1(%arg0: i32) -> (i32, i32) {
    %c0_i32 = arith.constant 0 : i32
    %c0_i32_0 = arith.constant 0 : i32
    %c0_i32_1 = arith.constant 0 : i32
    return %c0_i32, %c0_i32_0 : i32, i32
  }
  func.func @transform_2(%arg0: i32) -> (i32, i32) {
    %c0_i32 = arith.constant 0 : i32
    %c0_i32_0 = arith.constant 0 : i32
    %c0_i32_1 = arith.constant 0 : i32
    return %c0_i32, %c0_i32_0 : i32, i32
  }
  func.func @transform_3(%arg0: i32) -> (i32, i32) {
    %c0_i32 = arith.constant 0 : i32
    %c0_i32_0 = arith.constant 0 : i32
    return %arg0, %c0_i32 : i32, i32
  }
}

module attributes {stable_mosaic.version = 11 : i64} {
  func.func @_mm_bias_relu_kernel(%arg0: i32, %arg1: memref<200x512xbf16, #tpu.memory_space<vmem>>, %arg2: memref<512x128xbf16, #tpu.memory_space<vmem>>, %arg3: memref<1x128xf32, #tpu.memory_space<vmem>>, %arg4: memref<200x128xbf16, #tpu.memory_space<vmem>>) attributes {dimension_semantics = [#tpu.dimension_semantics<parallel>], iteration_bounds = array<i64: 2>, scalar_prefetch = 0 : i64, scratch_operands = 0 : i64, tpu.core_type = #tpu.core_type<tc>, window_params = [{transform_indices = @transform_0, window_bounds = array<i64: 200, 512>}, {pipeline_mode = #tpu.pipeline_mode<synchronous>, transform_indices = @transform_1, window_bounds = array<i64: 512, 128>}, {pipeline_mode = #tpu.pipeline_mode<synchronous>, transform_indices = @transform_2, window_bounds = array<i64: 1, 128>}, {transform_indices = @transform_3, window_bounds = array<i64: 200, 128>}]} {
    %c0 = arith.constant 0 : index
    %c0_0 = arith.constant 0 : index
    %0 = vector.load %arg1[%c0, %c0_0] : memref<200x512xbf16, #tpu.memory_space<vmem>>, vector<200x512xbf16>
    %c0_1 = arith.constant 0 : index
    %c0_2 = arith.constant 0 : index
    %1 = vector.load %arg2[%c0_1, %c0_2] : memref<512x128xbf16, #tpu.memory_space<vmem>>, vector<512x128xbf16>
    %cst = arith.constant dense<0.000000e+00> : vector<200x128xf32>
    %2 = tpu.matmul %0, %1, %cst {dimension_numbers = #tpu.dot_dimension_numbers<[1], [0], [0], [1], [0, 0, 1, 1], [], []>} : vector<200x512xbf16>, vector<512x128xbf16>, vector<200x128xf32> -> vector<200x128xf32>
    %c0_3 = arith.constant 0 : index
    %c0_4 = arith.constant 0 : index
    %3 = vector.load %arg3[%c0_3, %c0_4] : memref<1x128xf32, #tpu.memory_space<vmem>>, vector<1x128xf32>
    %4 = vector.broadcast %3 : vector<1x128xf32> to vector<200x128xf32>
    %5 = arith.addf %2, %4 : vector<200x128xf32>
    %cst_5 = arith.constant 0.000000e+00 : f32
    %6 = vector.broadcast %cst_5 : f32 to vector<200x128xf32>
    %7 = arith.maximumf %5, %6 : vector<200x128xf32>
    %8 = arith.truncf %7 : vector<200x128xf32> to vector<200x128xbf16>
    %c0_6 = arith.constant 0 : index
    %c0_7 = arith.constant 0 : index
    %9 = vector.load %arg4[%c0_6, %c0_7] : memref<200x128xbf16, #tpu.memory_space<vmem>>, vector<200x128xbf16>
    tpu.vector_store %arg4[%c0_6, %c0_7], %8 {strides = array<i32>} : memref<200x128xbf16, #tpu.memory_space<vmem>>, vector<200x128xbf16>,
    return
  }
  func.func @transform_0(%arg0: i32) -> (i32, i32) {
    %c0_i32 = arith.constant 0 : i32
    %c0_i32_0 = arith.constant 0 : i32
    return %arg0, %c0_i32 : i32, i32
  }
  func.func @transform_1(%arg0: i32) -> (i32, i32) {
    %c0_i32 = arith.constant 0 : i32
    %c0_i32_0 = arith.constant 0 : i32
    %c0_i32_1 = arith.constant 0 : i32
    return %c0_i32, %c0_i32_0 : i32, i32
  }
  func.func @transform_2(%arg0: i32) -> (i32, i32) {
    %c0_i32 = arith.constant 0 : i32
    %c0_i32_0 = arith.constant 0 : i32
    %c0_i32_1 = arith.constant 0 : i32
    return %c0_i32, %c0_i32_0 : i32, i32
  }
  func.func @transform_3(%arg0: i32) -> (i32, i32) {
    %c0_i32 = arith.constant 0 : i32
    %c0_i32_0 = arith.constant 0 : i32
    return %arg0, %c0_i32 : i32, i32
  }
}

module attributes {stable_mosaic.version = 11 : i64} {
  func.func @_mm_bias_relu_kernel(%arg0: i32, %arg1: memref<832x512xbf16, #tpu.memory_space<vmem>>, %arg2: memref<512x128xbf16, #tpu.memory_space<vmem>>, %arg3: memref<1x128xf32, #tpu.memory_space<vmem>>, %arg4: memref<832x128xbf16, #tpu.memory_space<vmem>>) attributes {dimension_semantics = [#tpu.dimension_semantics<parallel>], iteration_bounds = array<i64: 2>, scalar_prefetch = 0 : i64, scratch_operands = 0 : i64, tpu.core_type = #tpu.core_type<tc>, window_params = [{transform_indices = @transform_0, window_bounds = array<i64: 832, 512>}, {pipeline_mode = #tpu.pipeline_mode<synchronous>, transform_indices = @transform_1, window_bounds = array<i64: 512, 128>}, {pipeline_mode = #tpu.pipeline_mode<synchronous>, transform_indices = @transform_2, window_bounds = array<i64: 1, 128>}, {transform_indices = @transform_3, window_bounds = array<i64: 832, 128>}]} {
    %c0 = arith.constant 0 : index
    %c0_0 = arith.constant 0 : index
    %0 = vector.load %arg1[%c0, %c0_0] : memref<832x512xbf16, #tpu.memory_space<vmem>>, vector<832x512xbf16>
    %c0_1 = arith.constant 0 : index
    %c0_2 = arith.constant 0 : index
    %1 = vector.load %arg2[%c0_1, %c0_2] : memref<512x128xbf16, #tpu.memory_space<vmem>>, vector<512x128xbf16>
    %cst = arith.constant dense<0.000000e+00> : vector<832x128xf32>
    %2 = tpu.matmul %0, %1, %cst {dimension_numbers = #tpu.dot_dimension_numbers<[1], [0], [0], [1], [0, 0, 1, 1], [], []>} : vector<832x512xbf16>, vector<512x128xbf16>, vector<832x128xf32> -> vector<832x128xf32>
    %c0_3 = arith.constant 0 : index
    %c0_4 = arith.constant 0 : index
    %3 = vector.load %arg3[%c0_3, %c0_4] : memref<1x128xf32, #tpu.memory_space<vmem>>, vector<1x128xf32>
    %4 = vector.broadcast %3 : vector<1x128xf32> to vector<832x128xf32>
    %5 = arith.addf %2, %4 : vector<832x128xf32>
    %cst_5 = arith.constant 0.000000e+00 : f32
    %6 = vector.broadcast %cst_5 : f32 to vector<832x128xf32>
    %7 = arith.maximumf %5, %6 : vector<832x128xf32>
    %8 = arith.truncf %7 : vector<832x128xf32> to vector<832x128xbf16>
    %c0_6 = arith.constant 0 : index
    %c0_7 = arith.constant 0 : index
    %9 = vector.load %arg4[%c0_6, %c0_7] : memref<832x128xbf16, #tpu.memory_space<vmem>>, vector<832x128xbf16>
    tpu.vector_store %arg4[%c0_6, %c0_7], %8 {strides = array<i32>} : memref<832x128xbf16, #tpu.memory_space<vmem>>, vector<832x128xbf16>,
    return
  }
  func.func @transform_0(%arg0: i32) -> (i32, i32) {
    %c0_i32 = arith.constant 0 : i32
    %c0_i32_0 = arith.constant 0 : i32
    return %arg0, %c0_i32 : i32, i32
  }
  func.func @transform_1(%arg0: i32) -> (i32, i32) {
    %c0_i32 = arith.constant 0 : i32
    %c0_i32_0 = arith.constant 0 : i32
    %c0_i32_1 = arith.constant 0 : i32
    return %c0_i32, %c0_i32_0 : i32, i32
  }
  func.func @transform_2(%arg0: i32) -> (i32, i32) {
    %c0_i32 = arith.constant 0 : i32
    %c0_i32_0 = arith.constant 0 : i32
    %c0_i32_1 = arith.constant 0 : i32
    return %c0_i32, %c0_i32_0 : i32, i32
  }
  func.func @transform_3(%arg0: i32) -> (i32, i32) {
    %c0_i32 = arith.constant 0 : i32
    %c0_i32_0 = arith.constant 0 : i32
    return %arg0, %c0_i32 : i32, i32
  }
}

module attributes {stable_mosaic.version = 11 : i64} {
  func.func @_mm_bias_relu_kernel(%arg0: i32, %arg1: memref<832x896xbf16, #tpu.memory_space<vmem>>, %arg2: memref<896x128xbf16, #tpu.memory_space<vmem>>, %arg3: memref<1x128xf32, #tpu.memory_space<vmem>>, %arg4: memref<832x128xbf16, #tpu.memory_space<vmem>>) attributes {dimension_semantics = [#tpu.dimension_semantics<parallel>], iteration_bounds = array<i64: 2>, scalar_prefetch = 0 : i64, scratch_operands = 0 : i64, tpu.core_type = #tpu.core_type<tc>, window_params = [{transform_indices = @transform_0, window_bounds = array<i64: 832, 896>}, {pipeline_mode = #tpu.pipeline_mode<synchronous>, transform_indices = @transform_1, window_bounds = array<i64: 896, 128>}, {pipeline_mode = #tpu.pipeline_mode<synchronous>, transform_indices = @transform_2, window_bounds = array<i64: 1, 128>}, {transform_indices = @transform_3, window_bounds = array<i64: 832, 128>}]} {
    %c0 = arith.constant 0 : index
    %c0_0 = arith.constant 0 : index
    %0 = vector.load %arg1[%c0, %c0_0] : memref<832x896xbf16, #tpu.memory_space<vmem>>, vector<832x896xbf16>
    %c0_1 = arith.constant 0 : index
    %c0_2 = arith.constant 0 : index
    %1 = vector.load %arg2[%c0_1, %c0_2] : memref<896x128xbf16, #tpu.memory_space<vmem>>, vector<896x128xbf16>
    %cst = arith.constant dense<0.000000e+00> : vector<832x128xf32>
    %2 = tpu.matmul %0, %1, %cst {dimension_numbers = #tpu.dot_dimension_numbers<[1], [0], [0], [1], [0, 0, 1, 1], [], []>} : vector<832x896xbf16>, vector<896x128xbf16>, vector<832x128xf32> -> vector<832x128xf32>
    %c0_3 = arith.constant 0 : index
    %c0_4 = arith.constant 0 : index
    %3 = vector.load %arg3[%c0_3, %c0_4] : memref<1x128xf32, #tpu.memory_space<vmem>>, vector<1x128xf32>
    %4 = vector.broadcast %3 : vector<1x128xf32> to vector<832x128xf32>
    %5 = arith.addf %2, %4 : vector<832x128xf32>
    %cst_5 = arith.constant 0.000000e+00 : f32
    %6 = vector.broadcast %cst_5 : f32 to vector<832x128xf32>
    %7 = arith.maximumf %5, %6 : vector<832x128xf32>
    %8 = arith.truncf %7 : vector<832x128xf32> to vector<832x128xbf16>
    %c0_6 = arith.constant 0 : index
    %c0_7 = arith.constant 0 : index
    %9 = vector.load %arg4[%c0_6, %c0_7] : memref<832x128xbf16, #tpu.memory_space<vmem>>, vector<832x128xbf16>
    tpu.vector_store %arg4[%c0_6, %c0_7], %8 {strides = array<i32>} : memref<832x128xbf16, #tpu.memory_space<vmem>>, vector<832x128xbf16>,
    return
  }
  func.func @transform_0(%arg0: i32) -> (i32, i32) {
    %c0_i32 = arith.constant 0 : i32
    %c0_i32_0 = arith.constant 0 : i32
    return %arg0, %c0_i32 : i32, i32
  }
  func.func @transform_1(%arg0: i32) -> (i32, i32) {
    %c0_i32 = arith.constant 0 : i32
    %c0_i32_0 = arith.constant 0 : i32
    %c0_i32_1 = arith.constant 0 : i32
    return %c0_i32, %c0_i32_0 : i32, i32
  }
  func.func @transform_2(%arg0: i32) -> (i32, i32) {
    %c0_i32 = arith.constant 0 : i32
    %c0_i32_0 = arith.constant 0 : i32
    %c0_i32_1 = arith.constant 0 : i32
    return %c0_i32, %c0_i32_0 : i32, i32
  }
  func.func @transform_3(%arg0: i32) -> (i32, i32) {
    %c0_i32 = arith.constant 0 : i32
    %c0_i32_0 = arith.constant 0 : i32
    return %arg0, %c0_i32 : i32, i32
  }
}

module attributes {stable_mosaic.version = 11 : i64} {
  func.func @_mm_bias_relu_kernel(%arg0: i32, %arg1: memref<112x896xbf16, #tpu.memory_space<vmem>>, %arg2: memref<896x128xbf16, #tpu.memory_space<vmem>>, %arg3: memref<1x128xf32, #tpu.memory_space<vmem>>, %arg4: memref<112x128xbf16, #tpu.memory_space<vmem>>) attributes {dimension_semantics = [#tpu.dimension_semantics<parallel>], iteration_bounds = array<i64: 2>, scalar_prefetch = 0 : i64, scratch_operands = 0 : i64, tpu.core_type = #tpu.core_type<tc>, window_params = [{transform_indices = @transform_0, window_bounds = array<i64: 112, 896>}, {pipeline_mode = #tpu.pipeline_mode<synchronous>, transform_indices = @transform_1, window_bounds = array<i64: 896, 128>}, {pipeline_mode = #tpu.pipeline_mode<synchronous>, transform_indices = @transform_2, window_bounds = array<i64: 1, 128>}, {transform_indices = @transform_3, window_bounds = array<i64: 112, 128>}]} {
    %c0 = arith.constant 0 : index
    %c0_0 = arith.constant 0 : index
    %0 = vector.load %arg1[%c0, %c0_0] : memref<112x896xbf16, #tpu.memory_space<vmem>>, vector<112x896xbf16>
    %c0_1 = arith.constant 0 : index
    %c0_2 = arith.constant 0 : index
    %1 = vector.load %arg2[%c0_1, %c0_2] : memref<896x128xbf16, #tpu.memory_space<vmem>>, vector<896x128xbf16>
    %cst = arith.constant dense<0.000000e+00> : vector<112x128xf32>
    %2 = tpu.matmul %0, %1, %cst {dimension_numbers = #tpu.dot_dimension_numbers<[1], [0], [0], [1], [0, 0, 1, 1], [], []>} : vector<112x896xbf16>, vector<896x128xbf16>, vector<112x128xf32> -> vector<112x128xf32>
    %c0_3 = arith.constant 0 : index
    %c0_4 = arith.constant 0 : index
    %3 = vector.load %arg3[%c0_3, %c0_4] : memref<1x128xf32, #tpu.memory_space<vmem>>, vector<1x128xf32>
    %4 = vector.broadcast %3 : vector<1x128xf32> to vector<112x128xf32>
    %5 = arith.addf %2, %4 : vector<112x128xf32>
    %cst_5 = arith.constant 0.000000e+00 : f32
    %6 = vector.broadcast %cst_5 : f32 to vector<112x128xf32>
    %7 = arith.maximumf %5, %6 : vector<112x128xf32>
    %8 = arith.truncf %7 : vector<112x128xf32> to vector<112x128xbf16>
    %c0_6 = arith.constant 0 : index
    %c0_7 = arith.constant 0 : index
    %9 = vector.load %arg4[%c0_6, %c0_7] : memref<112x128xbf16, #tpu.memory_space<vmem>>, vector<112x128xbf16>
    tpu.vector_store %arg4[%c0_6, %c0_7], %8 {strides = array<i32>} : memref<112x128xbf16, #tpu.memory_space<vmem>>, vector<112x128xbf16>,
    return
  }
  func.func @transform_0(%arg0: i32) -> (i32, i32) {
    %c0_i32 = arith.constant 0 : i32
    %c0_i32_0 = arith.constant 0 : i32
    return %arg0, %c0_i32 : i32, i32
  }
  func.func @transform_1(%arg0: i32) -> (i32, i32) {
    %c0_i32 = arith.constant 0 : i32
    %c0_i32_0 = arith.constant 0 : i32
    %c0_i32_1 = arith.constant 0 : i32
    return %c0_i32, %c0_i32_0 : i32, i32
  }
  func.func @transform_2(%arg0: i32) -> (i32, i32) {
    %c0_i32 = arith.constant 0 : i32
    %c0_i32_0 = arith.constant 0 : i32
    %c0_i32_1 = arith.constant 0 : i32
    return %c0_i32, %c0_i32_0 : i32, i32
  }
  func.func @transform_3(%arg0: i32) -> (i32, i32) {
    %c0_i32 = arith.constant 0 : i32
    %c0_i32_0 = arith.constant 0 : i32
    return %arg0, %c0_i32 : i32, i32
  }
}

module attributes {stable_mosaic.version = 11 : i64} {
  func.func @_mm_bias_relu_kernel(%arg0: i32, %arg1: memref<112x1792xbf16, #tpu.memory_space<vmem>>, %arg2: memref<1792x128xbf16, #tpu.memory_space<vmem>>, %arg3: memref<1x128xf32, #tpu.memory_space<vmem>>, %arg4: memref<112x128xbf16, #tpu.memory_space<vmem>>) attributes {dimension_semantics = [#tpu.dimension_semantics<parallel>], iteration_bounds = array<i64: 2>, scalar_prefetch = 0 : i64, scratch_operands = 0 : i64, tpu.core_type = #tpu.core_type<tc>, window_params = [{transform_indices = @transform_0, window_bounds = array<i64: 112, 1792>}, {pipeline_mode = #tpu.pipeline_mode<synchronous>, transform_indices = @transform_1, window_bounds = array<i64: 1792, 128>}, {pipeline_mode = #tpu.pipeline_mode<synchronous>, transform_indices = @transform_2, window_bounds = array<i64: 1, 128>}, {transform_indices = @transform_3, window_bounds = array<i64: 112, 128>}]} {
    %c0 = arith.constant 0 : index
    %c0_0 = arith.constant 0 : index
    %0 = vector.load %arg1[%c0, %c0_0] : memref<112x1792xbf16, #tpu.memory_space<vmem>>, vector<112x1792xbf16>
    %c0_1 = arith.constant 0 : index
    %c0_2 = arith.constant 0 : index
    %1 = vector.load %arg2[%c0_1, %c0_2] : memref<1792x128xbf16, #tpu.memory_space<vmem>>, vector<1792x128xbf16>
    %cst = arith.constant dense<0.000000e+00> : vector<112x128xf32>
    %2 = tpu.matmul %0, %1, %cst {dimension_numbers = #tpu.dot_dimension_numbers<[1], [0], [0], [1], [0, 0, 1, 1], [], []>} : vector<112x1792xbf16>, vector<1792x128xbf16>, vector<112x128xf32> -> vector<112x128xf32>
    %c0_3 = arith.constant 0 : index
    %c0_4 = arith.constant 0 : index
    %3 = vector.load %arg3[%c0_3, %c0_4] : memref<1x128xf32, #tpu.memory_space<vmem>>, vector<1x128xf32>
    %4 = vector.broadcast %3 : vector<1x128xf32> to vector<112x128xf32>
    %5 = arith.addf %2, %4 : vector<112x128xf32>
    %cst_5 = arith.constant 0.000000e+00 : f32
    %6 = vector.broadcast %cst_5 : f32 to vector<112x128xf32>
    %7 = arith.maximumf %5, %6 : vector<112x128xf32>
    %8 = arith.truncf %7 : vector<112x128xf32> to vector<112x128xbf16>
    %c0_6 = arith.constant 0 : index
    %c0_7 = arith.constant 0 : index
    %9 = vector.load %arg4[%c0_6, %c0_7] : memref<112x128xbf16, #tpu.memory_space<vmem>>, vector<112x128xbf16>
    tpu.vector_store %arg4[%c0_6, %c0_7], %8 {strides = array<i32>} : memref<112x128xbf16, #tpu.memory_space<vmem>>, vector<112x128xbf16>,
    return
  }
  func.func @transform_0(%arg0: i32) -> (i32, i32) {
    %c0_i32 = arith.constant 0 : i32
    %c0_i32_0 = arith.constant 0 : i32
    return %arg0, %c0_i32 : i32, i32
  }
  func.func @transform_1(%arg0: i32) -> (i32, i32) {
    %c0_i32 = arith.constant 0 : i32
    %c0_i32_0 = arith.constant 0 : i32
    %c0_i32_1 = arith.constant 0 : i32
    return %c0_i32, %c0_i32_0 : i32, i32
  }
  func.func @transform_2(%arg0: i32) -> (i32, i32) {
    %c0_i32 = arith.constant 0 : i32
    %c0_i32_0 = arith.constant 0 : i32
    %c0_i32_1 = arith.constant 0 : i32
    return %c0_i32, %c0_i32_0 : i32, i32
  }
  func.func @transform_3(%arg0: i32) -> (i32, i32) {
    %c0_i32 = arith.constant 0 : i32
    %c0_i32_0 = arith.constant 0 : i32
    return %arg0, %c0_i32 : i32, i32
  }
}

module attributes {stable_mosaic.version = 11 : i64} {
  func.func @_mm_bias_relu_kernel(%arg0: i32, %arg1: memref<24x1792xbf16, #tpu.memory_space<vmem>>, %arg2: memref<1792x128xbf16, #tpu.memory_space<vmem>>, %arg3: memref<1x128xf32, #tpu.memory_space<vmem>>, %arg4: memref<24x128xbf16, #tpu.memory_space<vmem>>) attributes {dimension_semantics = [#tpu.dimension_semantics<parallel>], iteration_bounds = array<i64: 1>, scalar_prefetch = 0 : i64, scratch_operands = 0 : i64, tpu.core_type = #tpu.core_type<tc>, window_params = [{transform_indices = @transform_0, window_bounds = array<i64: 24, 1792>}, {pipeline_mode = #tpu.pipeline_mode<synchronous>, transform_indices = @transform_1, window_bounds = array<i64: 1792, 128>}, {pipeline_mode = #tpu.pipeline_mode<synchronous>, transform_indices = @transform_2, window_bounds = array<i64: 1, 128>}, {transform_indices = @transform_3, window_bounds = array<i64: 24, 128>}]} {
    %c0 = arith.constant 0 : index
    %c0_0 = arith.constant 0 : index
    %0 = vector.load %arg1[%c0, %c0_0] : memref<24x1792xbf16, #tpu.memory_space<vmem>>, vector<24x1792xbf16>
    %c0_1 = arith.constant 0 : index
    %c0_2 = arith.constant 0 : index
    %1 = vector.load %arg2[%c0_1, %c0_2] : memref<1792x128xbf16, #tpu.memory_space<vmem>>, vector<1792x128xbf16>
    %cst = arith.constant dense<0.000000e+00> : vector<24x128xf32>
    %2 = tpu.matmul %0, %1, %cst {dimension_numbers = #tpu.dot_dimension_numbers<[1], [0], [0], [1], [0, 0, 1, 1], [], []>} : vector<24x1792xbf16>, vector<1792x128xbf16>, vector<24x128xf32> -> vector<24x128xf32>
    %c0_3 = arith.constant 0 : index
    %c0_4 = arith.constant 0 : index
    %3 = vector.load %arg3[%c0_3, %c0_4] : memref<1x128xf32, #tpu.memory_space<vmem>>, vector<1x128xf32>
    %4 = vector.broadcast %3 : vector<1x128xf32> to vector<24x128xf32>
    %5 = arith.addf %2, %4 : vector<24x128xf32>
    %cst_5 = arith.constant 0.000000e+00 : f32
    %6 = vector.broadcast %cst_5 : f32 to vector<24x128xf32>
    %7 = arith.maximumf %5, %6 : vector<24x128xf32>
    %8 = arith.truncf %7 : vector<24x128xf32> to vector<24x128xbf16>
    %c0_6 = arith.constant 0 : index
    %c0_7 = arith.constant 0 : index
    %9 = vector.load %arg4[%c0_6, %c0_7] : memref<24x128xbf16, #tpu.memory_space<vmem>>, vector<24x128xbf16>
    tpu.vector_store %arg4[%c0_6, %c0_7], %8 {strides = array<i32>} : memref<24x128xbf16, #tpu.memory_space<vmem>>, vector<24x128xbf16>,
    return
  }
  func.func @transform_0(%arg0: i32) -> (i32, i32) {
    %c0_i32 = arith.constant 0 : i32
    %c0_i32_0 = arith.constant 0 : i32
    return %arg0, %c0_i32 : i32, i32
  }
  func.func @transform_1(%arg0: i32) -> (i32, i32) {
    %c0_i32 = arith.constant 0 : i32
    %c0_i32_0 = arith.constant 0 : i32
    %c0_i32_1 = arith.constant 0 : i32
    return %c0_i32, %c0_i32_0 : i32, i32
  }
  func.func @transform_2(%arg0: i32) -> (i32, i32) {
    %c0_i32 = arith.constant 0 : i32
    %c0_i32_0 = arith.constant 0 : i32
    %c0_i32_1 = arith.constant 0 : i32
    return %c0_i32, %c0_i32_0 : i32, i32
  }
  func.func @transform_3(%arg0: i32) -> (i32, i32) {
    %c0_i32 = arith.constant 0 : i32
    %c0_i32_0 = arith.constant 0 : i32
    return %arg0, %c0_i32 : i32, i32
  }
}

module attributes {stable_mosaic.version = 11 : i64} {
  func.func @_mm_bias_relu_kernel(%arg0: i32, %arg1: memref<8x256xbf16, #tpu.memory_space<vmem>>, %arg2: memref<256x128xbf16, #tpu.memory_space<vmem>>, %arg3: memref<1x128xf32, #tpu.memory_space<vmem>>, %arg4: memref<8x128xbf16, #tpu.memory_space<vmem>>) attributes {dimension_semantics = [#tpu.dimension_semantics<parallel>], iteration_bounds = array<i64: 1>, scalar_prefetch = 0 : i64, scratch_operands = 0 : i64, tpu.core_type = #tpu.core_type<tc>, window_params = [{transform_indices = @transform_0, window_bounds = array<i64: 8, 256>}, {pipeline_mode = #tpu.pipeline_mode<synchronous>, transform_indices = @transform_1, window_bounds = array<i64: 256, 128>}, {pipeline_mode = #tpu.pipeline_mode<synchronous>, transform_indices = @transform_2, window_bounds = array<i64: 1, 128>}, {transform_indices = @transform_3, window_bounds = array<i64: 8, 128>}]} {
    %c0 = arith.constant 0 : index
    %c0_0 = arith.constant 0 : index
    %0 = vector.load %arg1[%c0, %c0_0] : memref<8x256xbf16, #tpu.memory_space<vmem>>, vector<8x256xbf16>
    %c0_1 = arith.constant 0 : index
    %c0_2 = arith.constant 0 : index
    %1 = vector.load %arg2[%c0_1, %c0_2] : memref<256x128xbf16, #tpu.memory_space<vmem>>, vector<256x128xbf16>
    %cst = arith.constant dense<0.000000e+00> : vector<8x128xf32>
    %2 = tpu.matmul %0, %1, %cst {dimension_numbers = #tpu.dot_dimension_numbers<[1], [0], [0], [1], [0, 0, 1, 1], [], []>} : vector<8x256xbf16>, vector<256x128xbf16>, vector<8x128xf32> -> vector<8x128xf32>
    %c0_3 = arith.constant 0 : index
    %c0_4 = arith.constant 0 : index
    %3 = vector.load %arg3[%c0_3, %c0_4] : memref<1x128xf32, #tpu.memory_space<vmem>>, vector<1x128xf32>
    %4 = vector.broadcast %3 : vector<1x128xf32> to vector<8x128xf32>
    %5 = arith.addf %2, %4 : vector<8x128xf32>
    %cst_5 = arith.constant 0.000000e+00 : f32
    %6 = vector.broadcast %cst_5 : f32 to vector<8x128xf32>
    %7 = arith.maximumf %5, %6 : vector<8x128xf32>
    %8 = arith.truncf %7 : vector<8x128xf32> to vector<8x128xbf16>
    %c0_6 = arith.constant 0 : index
    %c0_7 = arith.constant 0 : index
    %9 = vector.load %arg4[%c0_6, %c0_7] : memref<8x128xbf16, #tpu.memory_space<vmem>>, vector<8x128xbf16>
    tpu.vector_store %arg4[%c0_6, %c0_7], %8 {strides = array<i32>} : memref<8x128xbf16, #tpu.memory_space<vmem>>, vector<8x128xbf16>,
    return
  }
  func.func @transform_0(%arg0: i32) -> (i32, i32) {
    %c0_i32 = arith.constant 0 : i32
    %c0_i32_0 = arith.constant 0 : i32
    return %arg0, %c0_i32 : i32, i32
  }
  func.func @transform_1(%arg0: i32) -> (i32, i32) {
    %c0_i32 = arith.constant 0 : i32
    %c0_i32_0 = arith.constant 0 : i32
    %c0_i32_1 = arith.constant 0 : i32
    return %c0_i32, %c0_i32_0 : i32, i32
  }
  func.func @transform_2(%arg0: i32) -> (i32, i32) {
    %c0_i32 = arith.constant 0 : i32
    %c0_i32_0 = arith.constant 0 : i32
    %c0_i32_1 = arith.constant 0 : i32
    return %c0_i32, %c0_i32_0 : i32, i32
  }
  func.func @transform_3(%arg0: i32) -> (i32, i32) {
    %c0_i32 = arith.constant 0 : i32
    %c0_i32_0 = arith.constant 0 : i32
    return %arg0, %c0_i32 : i32, i32
  }
}

</mosaic_0001>

<bundles_post_ra>
// kernel: voxel_backbone_8x.12
= control target key start
LH: loop header
LB: loop body
LE: loop exit
PB: predicated region body
PF: predicated region fallthrough
CT: control target
= control target key end

     0   :  { %s1008_s12 = smov 0   ;;  %s1158_s0 = inlined_call_operand.vmem [shape: bf16[400,128], index: 0, kind: input, shape index: {}]   ;;  %s1159_s1 = inlined_call_operand.vmem [shape: bf16[128,128], index: 1, kind: input, shape index: {}]   ;;  %s1160_s2 = inlined_call_operand.vmem [shape: f32[1,128], index: 2, kind: input, shape index: {}]   ;;  %s1161_s3 = inlined_call_operand.vmem [shape: bf16[400,128], index: 3, kind: output, shape index: {}]  }
   0x1 LB: > { %s690_s13 = sadd.s32 4294967295, %s984_s12   ;;  %p694_p0 = scmp.ge.s32.totalorder %s984_s12, 1  ;;  %s984_s12 = sphi %s1008_s12, %s13_s12  }
   0x2   : > { %p138_p1 = scmp.lt.s32.totalorder %s984_s12, 3 }
   0x4   : > { %p139_p2 = pnand %p694_p0, %p138_p1 }
   0x5   : > { %v957_v0 = vld [vmem:[%s1159_s1] sm:$0xff] (!%p139_p2)   ;;  %v986_v1 = vmov (!%p139_p2), 0.0   ;;  %v958_v2 = vld [vmem:[%s1159_s1 + $0x8] sm:$0xff] (!%p139_p2)   ;;  %s162_s18 = smul.u32 (!%p139_p2), 25, %s690_s13  ;;  %vm987_vm0 = vmmov (!%p139_p2), 0   ;;  %v959_v3 = vld [vmem:[%s1159_s1 + $0x10] sm:$0xff] (!%p139_p2)  }
   0x6   : > { %142 = sbr.rel (%p139_p2) target bundleno = 307 (0x133), region = 32  ;;  %863 = vmatprep.subr.bf16.mxu0 (!%p139_p2), %v986_v1  ;;  %931 = vmatprep.subr.bf16.mxu1 (!%p139_p2), %v986_v1  ;;  %v960_v4 = vld [vmem:[%s1159_s1 + $0x18] sm:$0xff] (!%p139_p2)   ;;  %v961_v5 = vld [vmem:[%s1159_s1 + $0x20] sm:$0xff] (!%p139_p2)   ;;  %v962_v6 = vld [vmem:[%s1159_s1 + $0x28] sm:$0xff] (!%p139_p2)  }
   0x7   : > { %864 = vmatpush3.bf16.msra.mxu0 (!%p139_p2), %v957_v0  ;;  %939 = vmatpush3.bf16.msra.mxu1 (!%p139_p2), %v957_v0  ;;  %p163_p3 = scmp.lt.s32.totalorder (!%p139_p2), %s162_s18, 49  ;;  %v963_v7 = vld [vmem:[%s1159_s1 + $0x30] sm:$0xff] (!%p139_p2)   ;;  %v964_v8 = vld [vmem:[%s1159_s1 + $0x38] sm:$0xff] (!%p139_p2)   ;;  %v1108_v22 = vld [vmem:[%s1160_s2] ss:$0 sm:$0xff] (!%p139_p2) }
   0x8   : > { %865 = vmatprep.subr.bf16.mxu0 (!%p139_p2), %v986_v1  ;;  %932 = vmatprep.subr.bf16.mxu1 (!%p139_p2), %v986_v1 }
   0x9   : > { %879 = vmatprep.mubr.msk.bf16.mxu0 (!%p139_p2), %vm987_vm0, %v986_v1  ;;  %907 = vmatprep.mubr.msk.bf16.mxu1 (!%p139_p2), %vm987_vm0, %v986_v1 }
   0xb   : > { %866 = vmatpush3.bf16.msra.mxu0 (!%p139_p2), %v958_v2  ;;  %940 = vmatpush3.bf16.msra.mxu1 (!%p139_p2), %v958_v2 }
   0xc   : > { %867 = vmatprep.subr.bf16.mxu0 (!%p139_p2), %v986_v1  ;;  %933 = vmatprep.subr.bf16.mxu1 (!%p139_p2), %v986_v1 }
   0xd   : > { %s1163_s18 = smov (!%p163_p3, %s162_s18), 49 }
   0xe   : > { %s695_s21 = sshll.u32 %s1163_s18, 2 }
   0xf   : > { %s1043_s24 = scalar_lea.vmem %s1158_s0, %s695_s21  ;;  %868 = vmatpush3.bf16.msra.mxu0 %v959_v3  ;;  %941 = vmatpush3.bf16.msra.mxu1 %v959_v3  ;;  %s1119_s13 = scalar_lea.vmem %s1161_s3, %s695_s21 }
  0x10   : > { %869 = vmatprep.subr.bf16.mxu0 %v986_v1  ;;  %934 = vmatprep.subr.bf16.mxu1 %v986_v1  ;;  %v965_v9 = vld [vmem:[%s1043_s24] sm:$0xff]   ;;  %v966_v10 = vld [vmem:[%s1043_s24 + $0x38] sm:$0xff]   ;;  %v967_v11 = vld [vmem:[%s1043_s24 + $0x8] sm:$0xff]  }
  0x11   : > { %v968_v12 = vld [vmem:[%s1043_s24 + $0x40] sm:$0xff]   ;;  %v969_v13 = vld [vmem:[%s1043_s24 + $0x10] sm:$0xff]   ;;  %v970_v14 = vld [vmem:[%s1043_s24 + $0x48] sm:$0xff]  }
  0x12   : > { %v971_v15 = vld [vmem:[%s1043_s24 + $0x18] sm:$0xff]   ;;  %v972_v16 = vld [vmem:[%s1043_s24 + $0x50] sm:$0xff]   ;;  %v973_v17 = vld [vmem:[%s1043_s24 + $0x20] sm:$0xff]  }
  0x13   : > { %870 = vmatpush3.bf16.msra.mxu0 %v960_v4  ;;  %942 = vmatpush3.bf16.msra.mxu1 %v960_v4  ;;  %v974_v18 = vld [vmem:[%s1043_s24 + $0x58] sm:$0xff]   ;;  %v975_v19 = vld [vmem:[%s1043_s24 + $0x28] sm:$0xff]   ;;  %v976_v20 = vld [vmem:[%s1043_s24 + $0x60] ss:$0 sps:$4 sm:$0xff]  }
  0x14   : > { %871 = vmatprep.subr.bf16.mxu0 %v986_v1  ;;  %935 = vmatprep.subr.bf16.mxu1 %v986_v1  ;;  %v977_v21 = vld [vmem:[%s1043_s24 + $0x30] sm:$0xff]  }
  0x17   : > { %872 = vmatpush3.bf16.msra.mxu0 %v961_v5  ;;  %943 = vmatpush3.bf16.msra.mxu1 %v961_v5 }
  0x18   : > { %873 = vmatprep.subr.bf16.mxu0 %v986_v1  ;;  %936 = vmatprep.subr.bf16.mxu1 %v986_v1 }
  0x1b   : > { %874 = vmatpush3.bf16.msra.mxu0 %v962_v6  ;;  %944 = vmatpush3.bf16.msra.mxu1 %v962_v6 }
  0x1c   : > { %875 = vmatprep.subr.bf16.mxu0 %v986_v1  ;;  %937 = vmatprep.subr.bf16.mxu1 %v986_v1 }
  0x1f   : > { %876 = vmatpush3.bf16.msra.mxu0 %v963_v7  ;;  %945 = vmatpush3.bf16.msra.mxu1 %v963_v7 }
  0x20   : > { %877 = vmatprep.subr.bf16.mxu0 %v986_v1  ;;  %938 = vmatprep.subr.bf16.mxu1 %v986_v1 }
  0x23   : > { %878 = vmatpush3.bf16.msra.mxu0 %v964_v8  ;;  %946 = vmatpush3.bf16.msra.mxu1 %v964_v8 }
  0x26   : > { %880 = vmatmul.mubr.bf16.vlgmr.msra.gmra.mrb[0].mxu0 %v965_v9  ;;  %908 = vmatmul.mubr.bf16.vlgmr.msra.gmra.mrb[0].mxu1 %v966_v10 }
  0x27   : > { %883 = vmatprep.mubr.msk.bf16.mxu0 %vm987_vm0, %v986_v1  ;;  %911 = vmatprep.mubr.msk.bf16.mxu1 %vm987_vm0, %v986_v1 }
  0x2e   : > { %884 = vmatmul.mubr.bf16.gmra.mrb[4].mxu0 %v967_v11  ;;  %912 = vmatmul.mubr.bf16.gmra.mrb[4].mxu1 %v968_v12 }
  0x2f   : > { %887 = vmatprep.mubr.msk.bf16.mxu0 %vm987_vm0, %v986_v1  ;;  %915 = vmatprep.mubr.msk.bf16.mxu1 %vm987_vm0, %v986_v1 }
  0x36   : > { %888 = vmatmul.mubr.bf16.gmra.mrb[8].mxu0 %v969_v13  ;;  %916 = vmatmul.mubr.bf16.gmra.mrb[8].mxu1 %v970_v14 }
  0x37   : > { %891 = vmatprep.mubr.msk.bf16.mxu0 %vm987_vm0, %v986_v1  ;;  %919 = vmatprep.mubr.msk.bf16.mxu1 %vm987_vm0, %v986_v1 }
  0x3e   : > { %892 = vmatmul.mubr.bf16.gmra.mrb[12].mxu0 %v971_v15  ;;  %920 = vmatmul.mubr.bf16.gmra.mrb[12].mxu1 %v972_v16 }
  0x3f   : > { %895 = vmatprep.mubr.msk.bf16.mxu0 %vm987_vm0, %v986_v1  ;;  %923 = vmatprep.mubr.msk.bf16.mxu1 %vm987_vm0, %v986_v1 }
  0x46   : > { %896 = vmatmul.mubr.bf16.gmra.mrb[16].mxu0 %v973_v17  ;;  %924 = vmatmul.mubr.bf16.gmra.mrb[16].mxu1 %v974_v18 }
  0x47   : > { %899 = vmatprep.mubr.msk.bf16.mxu0 %vm987_vm0, %v986_v1  ;;  %927 = vmatprep.mubr.msk.bf16.mxu1 %vm987_vm0, %v986_v1 }
  0x4e   : > { %900 = vmatmul.mubr.bf16.gmra.mrb[20].mxu0 %v975_v19  ;;  %928 = vmatmul.mubr.bf16.gmra.mrb[20].mxu1 %v976_v20 }
  0x4f   : > { %903 = vmatprep.mubr.msk.bf16.mxu0 %vm987_vm0, %v986_v1 }
  0x56   : > { %904 = vmatmul.mubr.bf16.gmra.mrb[24].mxu0 %v977_v21 }
  0xf9   : > { %v381_v23 = vpop.f32.mrb[0].mxu0  ;;  %v437_v24 = vpop.f32.mrb[0].mxu1 }
  0xfa   : > { %v382_v25 = vadd.f32 %v1108_v22, %v381_v23  ;;  %v881_v26 = vpop.f32.mrb[1].mxu0  ;;  %v438_v27 = vadd.f32 %v1108_v22, %v437_v24  ;;  %v909_v28 = vpop.f32.mrb[1].mxu1 }
  0xfb   : > { %v384_v29 = vpop.f32.mrb[2].mxu0  ;;  %v440_v30 = vpop.f32.mrb[2].mxu1 }
  0xfc   : > { %v385_v31 = vadd.f32 %v1108_v22, %v384_v29  ;;  %v882_v32 = vpop.f32.mrb[3].mxu0  ;;  %v497_v33 = vmax.f32 %v438_v27, 0.0  ;;  %v441_v34 = vadd.f32 %v1108_v22, %v440_v30  ;;  %v910_v35 = vpop.f32.mrb[3].mxu1  ;;  %v483_v36 = vmax.f32 %v382_v25, 0.0 }
  0xfe   : > { %v484_v37 = vmax.f32 %v385_v31, 0.0  ;;  %v498_v38 = vmax.f32 %v441_v34, 0.0 }
 0x100   : > { %v774_v39 = vpack.c.bf16 %v484_v37, %v483_v36  ;;  %v809_v40 = vpack.c.bf16 %v498_v38, %v497_v33 }
 0x101   : > { %v389_v41 = vpop.f32.mrb[4].mxu0  ;;  %v445_v42 = vpop.f32.mrb[4].mxu1 }
 0x102   : > { %775 = vst [vmem:[%s1119_s13] sm:$0xff] %v774_v39   ;;  %v390_v43 = vadd.f32 %v1108_v22, %v389_v41  ;;  %v885_v44 = vpop.f32.mrb[5].mxu0  ;;  %837 = vst [vmem:[%s1119_s13 + $0x38] sm:$0xff] %v809_v40   ;;  %v446_v45 = vadd.f32 %v1108_v22, %v445_v42  ;;  %v913_v46 = vpop.f32.mrb[5].mxu1 }
 0x103   : > { %v392_v47 = vpop.f32.mrb[6].mxu0  ;;  %v448_v48 = vpop.f32.mrb[6].mxu1 }
 0x104   : > { %v393_v49 = vadd.f32 %v1108_v22, %v392_v47  ;;  %v886_v50 = vpop.f32.mrb[7].mxu0  ;;  %v499_v51 = vmax.f32 %v446_v45, 0.0  ;;  %v449_v52 = vadd.f32 %v1108_v22, %v448_v48  ;;  %v914_v53 = vpop.f32.mrb[7].mxu1  ;;  %v485_v54 = vmax.f32 %v390_v43, 0.0 }
 0x106   : > { %v486_v55 = vmax.f32 %v393_v49, 0.0  ;;  %v500_v56 = vmax.f32 %v449_v52, 0.0 }
 0x108   : > { %v779_v57 = vpack.c.bf16 %v486_v55, %v485_v54  ;;  %v814_v58 = vpack.c.bf16 %v500_v56, %v499_v51 }
 0x109   : > { %v397_v59 = vpop.f32.mrb[8].mxu0  ;;  %v453_v60 = vpop.f32.mrb[8].mxu1 }
 0x10a   : > { %831 = vst [vmem:[%s1119_s13 + $0x8] sm:$0xff] %v779_v57   ;;  %v398_v61 = vadd.f32 %v1108_v22, %v397_v59  ;;  %v889_v62 = vpop.f32.mrb[9].mxu0  ;;  %838 = vst [vmem:[%s1119_s13 + $0x40] sm:$0xff] %v814_v58   ;;  %v454_v63 = vadd.f32 %v1108_v22, %v453_v60  ;;  %v917_v0 = vpop.f32.mrb[9].mxu1 }
 0x10b   : > { %v400_v1 = vpop.f32.mrb[10].mxu0  ;;  %v456_v2 = vpop.f32.mrb[10].mxu1 }
 0x10c   : > { %v401_v3 = vadd.f32 %v1108_v22, %v400_v1  ;;  %v890_v4 = vpop.f32.mrb[11].mxu0  ;;  %v501_v5 = vmax.f32 %v454_v63, 0.0  ;;  %v457_v6 = vadd.f32 %v1108_v22, %v456_v2  ;;  %v918_v7 = vpop.f32.mrb[11].mxu1  ;;  %v487_v8 = vmax.f32 %v398_v61, 0.0 }
 0x10e   : > { %v488_v9 = vmax.f32 %v401_v3, 0.0  ;;  %v502_v10 = vmax.f32 %v457_v6, 0.0 }
 0x110   : > { %v784_v11 = vpack.c.bf16 %v488_v9, %v487_v8  ;;  %v819_v12 = vpack.c.bf16 %v502_v10, %v501_v5 }
 0x111   : > { %v405_v13 = vpop.f32.mrb[12].mxu0  ;;  %v461_v14 = vpop.f32.mrb[12].mxu1 }
 0x112   : > { %832 = vst [vmem:[%s1119_s13 + $0x10] sm:$0xff] %v784_v11   ;;  %v406_v15 = vadd.f32 %v1108_v22, %v405_v13  ;;  %v893_v16 = vpop.f32.mrb[13].mxu0  ;;  %839 = vst [vmem:[%s1119_s13 + $0x48] sm:$0xff] %v819_v12   ;;  %v462_v17 = vadd.f32 %v1108_v22, %v461_v14  ;;  %v921_v18 = vpop.f32.mrb[13].mxu1 }
 0x113   : > { %v408_v19 = vpop.f32.mrb[14].mxu0  ;;  %v464_v20 = vpop.f32.mrb[14].mxu1 }
 0x114   : > { %v409_v21 = vadd.f32 %v1108_v22, %v408_v19  ;;  %v894_v23 = vpop.f32.mrb[15].mxu0  ;;  %v503_v24 = vmax.f32 %v462_v17, 0.0  ;;  %v465_v25 = vadd.f32 %v1108_v22, %v464_v20  ;;  %v922_v26 = vpop.f32.mrb[15].mxu1  ;;  %v489_v27 = vmax.f32 %v406_v15, 0.0 }
 0x116   : > { %v490_v28 = vmax.f32 %v409_v21, 0.0  ;;  %v504_v29 = vmax.f32 %v465_v25, 0.0 }
 0x118   : > { %v789_v30 = vpack.c.bf16 %v490_v28, %v489_v27  ;;  %v824_v31 = vpack.c.bf16 %v504_v29, %v503_v24 }
 0x119   : > { %v413_v32 = vpop.f32.mrb[16].mxu0  ;;  %v469_v33 = vpop.f32.mrb[16].mxu1 }
 0x11a   : > { %833 = vst [vmem:[%s1119_s13 + $0x18] sm:$0xff] %v789_v30   ;;  %v414_v34 = vadd.f32 %v1108_v22, %v413_v32  ;;  %v897_v35 = vpop.f32.mrb[17].mxu0  ;;  %840 = vst [vmem:[%s1119_s13 + $0x50] sm:$0xff] %v824_v31   ;;  %v470_v36 = vadd.f32 %v1108_v22, %v469_v33  ;;  %v925_v37 = vpop.f32.mrb[17].mxu1 }
 0x11b   : > { %v416_v38 = vpop.f32.mrb[18].mxu0  ;;  %v472_v39 = vpop.f32.mrb[18].mxu1 }
 0x11c   : > { %v417_v40 = vadd.f32 %v1108_v22, %v416_v38  ;;  %v898_v41 = vpop.f32.mrb[19].mxu0  ;;  %v505_v42 = vmax.f32 %v470_v36, 0.0  ;;  %v473_v43 = vadd.f32 %v1108_v22, %v472_v39  ;;  %v926_v44 = vpop.f32.mrb[19].mxu1  ;;  %v491_v45 = vmax.f32 %v414_v34, 0.0 }
 0x11e   : > { %v492_v46 = vmax.f32 %v417_v40, 0.0  ;;  %v506_v47 = vmax.f32 %v473_v43, 0.0 }
 0x120   : > { %v794_v48 = vpack.c.bf16 %v492_v46, %v491_v45  ;;  %v829_v49 = vpack.c.bf16 %v506_v47, %v505_v42 }
 0x121   : > { %v421_v50 = vpop.f32.mrb[20].mxu0  ;;  %v477_v51 = vpop.f32.mrb[20].mxu1 }
 0x122   : > { %834 = vst [vmem:[%s1119_s13 + $0x20] sm:$0xff] %v794_v48   ;;  %v422_v52 = vadd.f32 %v1108_v22, %v421_v50  ;;  %v901_v53 = vpop.f32.mrb[21].mxu0  ;;  %841 = vst [vmem:[%s1119_s13 + $0x58] sm:$0xff] %v829_v49   ;;  %v478_v54 = vadd.f32 %v1108_v22, %v477_v51  ;;  %v929_v55 = vpop.f32.mrb[21].mxu1 }
 0x123   : > { %v424_v56 = vpop.f32.mrb[22].mxu0  ;;  %v480_v57 = vpop.f32.mrb[22].mxu1 }
 0x124   : > { %v425_v58 = vadd.f32 %v1108_v22, %v424_v56  ;;  %v902_v59 = vpop.f32.mrb[23].mxu0  ;;  %v507_v60 = vmax.f32 %v478_v54, 0.0  ;;  %v930_v61 = vpop.f32.mrb[23].mxu1  ;;  %v493_v62 = vmax.f32 %v422_v52, 0.0 }
 0x126   : > { %v494_v63 = vmax.f32 %v425_v58, 0.0  ;;  %v770_v0 = vpack.c.bf16 %v507_v60, %v507_v60 }
 0x128   : > { %v799_v1 = vpack.c.bf16 %v494_v63, %v493_v62  ;;  %633 = vst [vmem:[%s1119_s13 + $0x60] sm:$0xf] %v770_v0 }
 0x129   : > { %v429_v2 = vpop.f32.mrb[24].mxu0 }
 0x12a   : > { %835 = vst [vmem:[%s1119_s13 + $0x28] sm:$0xff] %v799_v1   ;;  %v430_v3 = vadd.f32 %v1108_v22, %v429_v2  ;;  %v905_v4 = vpop.f32.mrb[25].mxu0 }
 0x12b   : > { %v432_v5 = vpop.f32.mrb[26].mxu0 }
 0x12c   : > { %v433_v6 = vadd.f32 %v1108_v22, %v432_v5  ;;  %v906_v7 = vpop.f32.mrb[27].mxu0  ;;  %v495_v8 = vmax.f32 %v430_v3, 0.0 }
 0x12e   : > { %v496_v9 = vmax.f32 %v433_v6, 0.0 }
 0x130   : > { %v804_v10 = vpack.c.bf16 %v496_v9, %v495_v8 }
 0x132   : > { %836 = vst [vmem:[%s1119_s13 + $0x30] sm:$0xff] %v804_v10  }
 0x133 PF: > { %s13_s12 = sadd.s32 1, %s984_s12  }
 0x134   : > { %p10_p4 = scmp.ge.s32.totalorder %s13_s12, 4  }
 0x136   :  { %12 = sbr.rel (!%p10_p4) target bundleno = 1 (0x1), region = 62 }

// kernel: voxel_backbone_8x.13
= control target key start
LH: loop header
LB: loop body
LE: loop exit
PB: predicated region body
PF: predicated region fallthrough
CT: control target
= control target key end

     0   :  { %s1773_s12 = smov 0   ;;  %s1989_s0 = inlined_call_operand.vmem [shape: bf16[400,512], index: 0, kind: input, shape index: {}]   ;;  %s1990_s1 = inlined_call_operand.vmem [shape: bf16[512,128], index: 1, kind: input, shape index: {}]   ;;  %s1991_s2 = inlined_call_operand.vmem [shape: f32[1,128], index: 2, kind: input, shape index: {}]   ;;  %s1992_s3 = inlined_call_operand.vmem [shape: bf16[400,128], index: 3, kind: output, shape index: {}]  }
   0x1 LB: > { %s1224_s13 = sadd.s32 4294967295, %s1751_s12   ;;  %p1228_p0 = scmp.ge.s32.totalorder %s1751_s12, 1  ;;  %s1751_s12 = sphi %s1773_s12, %s13_s12  }
   0x2   : > { %p139_p1 = scmp.lt.s32.totalorder %s1751_s12, 3 }
   0x4   : > { %p140_p2 = pnand %p1228_p0, %p139_p1 }
   0x5   : > { %v1637_v0 = vld [vmem:[%s1990_s1 + $0x40] sm:$0xff] (!%p140_p2)   ;;  %v1641_v4 = vld [vmem:[%s1990_s1 + $0x48] sm:$0xff] (!%p140_p2)   ;;  %v1645_v8 = vld [vmem:[%s1990_s1 + $0x50] sm:$0xff] (!%p140_p2)   ;;  %s164_s19 = smul.u32 (!%p140_p2), 25, %s1224_s13 }
   0x6   : > { %143 = sbr.rel (%p140_p2) target bundleno = 359 (0x167), region = 32  ;;  %v1638_v1 = vld [vmem:[%s1990_s1 + $0xc0] sm:$0xff] (!%p140_p2)   ;;  %1441 = vmatprep.subr.bf16.mxu0 (!%p140_p2), %v1637_v0  ;;  %v1642_v5 = vld [vmem:[%s1990_s1 + $0xc8] sm:$0xff] (!%p140_p2)   ;;  %v1646_v9 = vld [vmem:[%s1990_s1 + $0xd0] sm:$0xff] (!%p140_p2)  }
   0x7   : > { %v1639_v2 = vld [vmem:[%s1990_s1] sm:$0xff] (!%p140_p2)   ;;  %1535 = vmatprep.subr.bf16.mxu1 (!%p140_p2), %v1638_v1  ;;  %v1643_v6 = vld [vmem:[%s1990_s1 + $0x8] sm:$0xff] (!%p140_p2)   ;;  %v1647_v10 = vld [vmem:[%s1990_s1 + $0x10] sm:$0xff] (!%p140_p2)   ;;  %p165_p3 = scmp.lt.s32.totalorder (!%p140_p2), %s164_s19, 49 }
   0x8   : > { %v1640_v3 = vld [vmem:[%s1990_s1 + $0x80] sm:$0xff] (!%p140_p2)   ;;  %1442 = vmatpush3.bf16.msra.mxu0 (!%p140_p2), %v1639_v2  ;;  %v1644_v7 = vld [vmem:[%s1990_s1 + $0x88] sm:$0xff] (!%p140_p2)   ;;  %v1648_v11 = vld [vmem:[%s1990_s1 + $0x90] sm:$0xff] (!%p140_p2)  }
   0x9   : > { %1536 = vmatpush3.bf16.msra.mxu1 (!%p140_p2), %v1640_v3  ;;  %1443 = vmatprep.subr.bf16.mxu0 (!%p140_p2), %v1641_v4  ;;  %v1649_v12 = vld [vmem:[%s1990_s1 + $0x58] sm:$0xff] (!%p140_p2)   ;;  %v1653_v16 = vld [vmem:[%s1990_s1 + $0x60] sm:$0xff] (!%p140_p2)   ;;  %v1657_v20 = vld [vmem:[%s1990_s1 + $0x68] sm:$0xff] (!%p140_p2)  }
   0xa   : > { %1537 = vmatprep.subr.bf16.mxu1 (!%p140_p2), %v1642_v5  ;;  %v1650_v13 = vld [vmem:[%s1990_s1 + $0xd8] sm:$0xff] (!%p140_p2)   ;;  %v1654_v17 = vld [vmem:[%s1990_s1 + $0xe0] sm:$0xff] (!%p140_p2)   ;;  %v1658_v21 = vld [vmem:[%s1990_s1 + $0xe8] sm:$0xff] (!%p140_p2)  }
   0xb   : > { %v1651_v14 = vld [vmem:[%s1990_s1 + $0x18] sm:$0xff] (!%p140_p2)   ;;  %v1655_v18 = vld [vmem:[%s1990_s1 + $0x20] sm:$0xff] (!%p140_p2)   ;;  %v1659_v22 = vld [vmem:[%s1990_s1 + $0x28] sm:$0xff] (!%p140_p2)  }
   0xc   : > { %1444 = vmatpush3.bf16.msra.mxu0 (!%p140_p2), %v1643_v6  ;;  %v1652_v15 = vld [vmem:[%s1990_s1 + $0x98] sm:$0xff] (!%p140_p2)   ;;  %v1656_v19 = vld [vmem:[%s1990_s1 + $0xa0] sm:$0xff] (!%p140_p2)   ;;  %v1660_v23 = vld [vmem:[%s1990_s1 + $0xa8] sm:$0xff] (!%p140_p2)  }
   0xd   : > { %1538 = vmatpush3.bf16.msra.mxu1 %v1644_v7  ;;  %1445 = vmatprep.subr.bf16.mxu0 %v1645_v8  ;;  %s1994_s19 = smov (!%p165_p3, %s164_s19), 49  ;;  %v1661_v24 = vld [vmem:[%s1990_s1 + $0x70] sm:$0xff]   ;;  %v1665_v28 = vld [vmem:[%s1990_s1 + $0x78] sm:$0xff]  }
   0xe   : > { %1539 = vmatprep.subr.bf16.mxu1 %v1646_v9  ;;  %v1662_v25 = vld [vmem:[%s1990_s1 + $0xf0] sm:$0xff]   ;;  %s1344_s18 = sshll.u32 %s1994_s19, 4  ;;  %v1666_v29 = vld [vmem:[%s1990_s1 + $0xf8] sm:$0xff]   ;;  %s1231_s7 = sshll.u32 %s1994_s19, 2 }
   0xf   : > { %v1663_v26 = vld [vmem:[%s1990_s1 + $0x30] sm:$0xff]   ;;  %s1879_s13 = scalar_lea.vmem %s1989_s0, %s1344_s18  ;;  %v1667_v30 = vld [vmem:[%s1990_s1 + $0x38] sm:$0xff]   ;;  %s1948_s10 = scalar_lea.vmem %s1992_s3, %s1231_s7 }
  0x10   : > { %1446 = vmatpush3.bf16.msra.mxu0 %v1647_v10  ;;  %v1664_v27 = vld [vmem:[%s1990_s1 + $0xb0] sm:$0xff]   ;;  %v1668_v31 = vld [vmem:[%s1990_s1 + $0xb8] sm:$0xff]  }
  0x11   : > { %1540 = vmatpush3.bf16.msra.mxu1 %v1648_v11  ;;  %1447 = vmatprep.subr.bf16.mxu0 %v1649_v12  ;;  %v1669_v32 = vld [vmem:[%s1879_s13] ss:$16 sps:$4 sm:$0xff]   ;;  %v1671_v33 = vld [vmem:[%s1879_s13 + $0x4] ss:$16 sps:$4 sm:$0xff]   ;;  %v1672_v34 = vld [vmem:[%s1879_s13 + $0x8] ss:$16 sps:$4 sm:$0xff]  }
  0x12   : > { %1541 = vmatprep.subr.bf16.mxu1 %v1650_v13  ;;  %v1674_v35 = vld [vmem:[%s1879_s13 + $0xc] ss:$16 sps:$4 sm:$0xff]   ;;  %777 = vmatprep.mubr.bf16.mxu0 %v1671_v33  ;;  %v1675_v36 = vld [vmem:[%s1879_s13 + $0x24] ss:$16 sps:$4 sm:$0xff]   ;;  %v1679_v38 = vld [vmem:[%s1879_s13 + $0x20] ss:$16 sps:$4 sm:$0xff]  }
  0x13   : > { %913 = vmatprep.mubr.bf16.mxu1 %v1674_v35  ;;  %v1677_v37 = vld [vmem:[%s1879_s13 + $0x2c] ss:$16 sps:$4 sm:$0xff]   ;;  %v1680_v39 = vld [vmem:[%s1879_s13 + $0x28] ss:$16 sps:$4 sm:$0xff]   ;;  %v1681_v40 = vld [vmem:[%s1879_s13 + $0x44] ss:$16 sps:$4 sm:$0xff]  }
  0x14   : > { %1448 = vmatpush3.bf16.msra.mxu0 %v1651_v14  ;;  %v1683_v41 = vld [vmem:[%s1879_s13 + $0x4c] ss:$16 sps:$4 sm:$0xff]   ;;  %v1685_v42 = vld [vmem:[%s1879_s13 + $0x40] ss:$16 sps:$4 sm:$0xff]   ;;  %v1686_v43 = vld [vmem:[%s1879_s13 + $0x48] ss:$16 sps:$4 sm:$0xff]  }
  0x15   : > { %1542 = vmatpush3.bf16.msra.mxu1 %v1652_v15  ;;  %1449 = vmatprep.subr.bf16.mxu0 %v1653_v16  ;;  %v1687_v44 = vld [vmem:[%s1879_s13 + $0x64] ss:$16 sps:$4 sm:$0xff]   ;;  %v1689_v45 = vld [vmem:[%s1879_s13 + $0x6c] ss:$16 sps:$4 sm:$0xff]   ;;  %v1691_v46 = vld [vmem:[%s1879_s13 + $0x60] ss:$16 sps:$4 sm:$0xff]  }
  0x16   : > { %1543 = vmatprep.subr.bf16.mxu1 %v1654_v17  ;;  %v1692_v47 = vld [vmem:[%s1879_s13 + $0x68] ss:$16 sps:$4 sm:$0xff]   ;;  %v1693_v48 = vld [vmem:[%s1879_s13 + $0x84] ss:$16 sps:$4 sm:$0xff]   ;;  %v1695_v49 = vld [vmem:[%s1879_s13 + $0x8c] ss:$16 sps:$4 sm:$0xff]  }
  0x17   : > { %v1697_v50 = vld [vmem:[%s1879_s13 + $0x80] ss:$16 sps:$4 sm:$0xff]   ;;  %v1698_v51 = vld [vmem:[%s1879_s13 + $0x88] ss:$16 sps:$4 sm:$0xff]   ;;  %v1699_v52 = vld [vmem:[%s1879_s13 + $0xa4] ss:$16 sps:$4 sm:$0xff]  }
  0x18   : > { %1450 = vmatpush3.bf16.msra.mxu0 %v1655_v18  ;;  %v1701_v53 = vld [vmem:[%s1879_s13 + $0xac] ss:$16 sps:$4 sm:$0xff]   ;;  %v1703_v54 = vld [vmem:[%s1879_s13 + $0xa0] ss:$16 sps:$4 sm:$0xff]   ;;  %v1704_v55 = vld [vmem:[%s1879_s13 + $0xa8] ss:$16 sps:$4 sm:$0xff]  }
  0x19   : > { %1544 = vmatpush3.bf16.msra.mxu1 %v1656_v19  ;;  %1451 = vmatprep.subr.bf16.mxu0 %v1657_v20  ;;  %v1705_v56 = vld [vmem:[%s1879_s13 + $0xc4] ss:$16 sps:$4 sm:$0xff]   ;;  %v1707_v57 = vld [vmem:[%s1879_s13 + $0xcc] ss:$16 sps:$4 sm:$0xff]   ;;  %v1709_v58 = vld [vmem:[%s1879_s13 + $0xc0] ss:$16 sps:$4 sm:$0xff]  }
  0x1a   : > { %1545 = vmatprep.subr.bf16.mxu1 %v1658_v21  ;;  %v1710_v59 = vld [vmem:[%s1879_s13 + $0xc8] ss:$16 sps:$4 sm:$0xff]   ;;  %v1711_v60 = vld [vmem:[%s1879_s13 + $0xe4] ss:$16 sps:$4 sm:$0xff]   ;;  %v1713_v61 = vld [vmem:[%s1879_s13 + $0xec] ss:$16 sps:$4 sm:$0xff]  }
  0x1b   : > { %v1715_v62 = vld [vmem:[%s1879_s13 + $0xe0] ss:$16 sps:$4 sm:$0xff]   ;;  %v1716_v63 = vld [vmem:[%s1879_s13 + $0xe8] ss:$16 sps:$4 sm:$0xff]   ;;  %v1717_v0 = vld [vmem:[%s1879_s13 + $0x104] ss:$16 sps:$4 sm:$0xff]  }
  0x1c   : > { %1452 = vmatpush3.bf16.msra.mxu0 %v1659_v22  ;;  %v1719_v1 = vld [vmem:[%s1879_s13 + $0x10c] ss:$16 sps:$4 sm:$0xff]   ;;  %v1721_v2 = vld [vmem:[%s1879_s13 + $0x100] ss:$16 sps:$4 sm:$0xff]   ;;  %v1722_v3 = vld [vmem:[%s1879_s13 + $0x108] ss:$16 sps:$4 sm:$0xff]  }
  0x1d   : > { %1546 = vmatpush3.bf16.msra.mxu1 %v1660_v23  ;;  %1453 = vmatprep.subr.bf16.mxu0 %v1661_v24  ;;  %v1723_v4 = vld [vmem:[%s1879_s13 + $0x124] ss:$16 sps:$4 sm:$0xff]   ;;  %v1725_v5 = vld [vmem:[%s1879_s13 + $0x12c] ss:$16 sps:$4 sm:$0xff]   ;;  %v1727_v6 = vld [vmem:[%s1879_s13 + $0x120] ss:$16 sps:$4 sm:$0xff]  }
  0x1e   : > { %1547 = vmatprep.subr.bf16.mxu1 %v1662_v25  ;;  %v1728_v7 = vld [vmem:[%s1879_s13 + $0x128] ss:$16 sps:$4 sm:$0xff]   ;;  %v1729_v8 = vld [vmem:[%s1879_s13 + $0x144] ss:$16 sps:$4 sm:$0xff]   ;;  %v1731_v9 = vld [vmem:[%s1879_s13 + $0x14c] ss:$16 sps:$4 sm:$0xff]  }
  0x1f   : > { %v1733_v10 = vld [vmem:[%s1879_s13 + $0x140] ss:$16 sps:$4 sm:$0xff]   ;;  %v1734_v11 = vld [vmem:[%s1879_s13 + $0x148] ss:$16 sps:$4 sm:$0xff]   ;;  %v1735_v12 = vld [vmem:[%s1879_s13 + $0x164] ss:$16 sps:$4 sm:$0xff]  }
  0x20   : > { %1454 = vmatpush3.bf16.msra.mxu0 %v1663_v26  ;;  %v1737_v13 = vld [vmem:[%s1879_s13 + $0x16c] ss:$16 sps:$4 sm:$0xff]   ;;  %v226_v14 = vld [vmem:[%s1879_s13 + $0x180] sm:$0xff]  ;;  %v1740_v17 = vld [vmem:[%s1879_s13 + $0x168] ss:$16 sps:$4 sm:$0xff]  }
  0x21   : > { %1548 = vmatpush3.bf16.msra.mxu1 %v1664_v27  ;;  %1455 = vmatprep.subr.bf16.mxu0 %v1665_v28  ;;  %v227_v15 = vld [vmem:[%s1879_s13 + $0x188] sm:$0xff]  ;;  %v1739_v16 = vld [vmem:[%s1879_s13 + $0x160] ss:$16 sps:$4 sm:$0xff]   ;;  %v1282_v18 = vcombine.high %v226_v14, %v226_v14  ;;  %v1281_v20 = vcombine.low %v226_v14, %v226_v14 }
  0x22   : > { %1549 = vmatprep.subr.bf16.mxu1 %v1666_v29  ;;  %v1284_v19 = vcombine.high %v227_v15, %v227_v15  ;;  %v1283_v21 = vcombine.low %v227_v15, %v227_v15  ;;  %v1940_v24 = vld [vmem:[%s1991_s2] ss:$0 sm:$0xff] }
  0x24   : > { %1456 = vmatpush3.bf16.msra.mxu0 %v1667_v30 }
  0x25   : > { %1550 = vmatpush3.bf16.msra.mxu1 %v1668_v31 }
  0x27   : > { %778 = vmatmul.mubr.bf16.vlgmr.msra.gmra.mrb[0].mxu0 %v1669_v32 }
  0x28   : > { %914 = vmatmul.mubr.bf16.vlgmr.msra.gmra.mrb[0].mxu1 %v1672_v34  ;;  %785 = vmatprep.mubr.bf16.mxu0 %v1675_v36 }
  0x29   : > { %921 = vmatprep.mubr.bf16.mxu1 %v1677_v37 }
  0x2f   : > { %786 = vmatmul.mubr.bf16.gmra.mrb[4].mxu0 %v1679_v38 }
  0x30   : > { %922 = vmatmul.mubr.bf16.gmra.mrb[4].mxu1 %v1680_v39  ;;  %793 = vmatprep.mubr.bf16.mxu0 %v1681_v40 }
  0x31   : > { %929 = vmatprep.mubr.bf16.mxu1 %v1683_v41 }
  0x37   : > { %794 = vmatmul.mubr.bf16.gmra.mrb[8].mxu0 %v1685_v42 }
  0x38   : > { %930 = vmatmul.mubr.bf16.gmra.mrb[8].mxu1 %v1686_v43  ;;  %801 = vmatprep.mubr.bf16.mxu0 %v1687_v44 }
  0x39   : > { %937 = vmatprep.mubr.bf16.mxu1 %v1689_v45 }
  0x3f   : > { %802 = vmatmul.mubr.bf16.gmra.mrb[12].mxu0 %v1691_v46 }
  0x40   : > { %938 = vmatmul.mubr.bf16.gmra.mrb[12].mxu1 %v1692_v47  ;;  %809 = vmatprep.mubr.bf16.mxu0 %v1693_v48 }
  0x41   : > { %945 = vmatprep.mubr.bf16.mxu1 %v1695_v49 }
  0x47   : > { %810 = vmatmul.mubr.bf16.gmra.mrb[16].mxu0 %v1697_v50 }
  0x48   : > { %946 = vmatmul.mubr.bf16.gmra.mrb[16].mxu1 %v1698_v51  ;;  %817 = vmatprep.mubr.bf16.mxu0 %v1699_v52 }
  0x49   : > { %953 = vmatprep.mubr.bf16.mxu1 %v1701_v53 }
  0x4f   : > { %818 = vmatmul.mubr.bf16.gmra.mrb[20].mxu0 %v1703_v54 }
  0x50   : > { %954 = vmatmul.mubr.bf16.gmra.mrb[20].mxu1 %v1704_v55  ;;  %825 = vmatprep.mubr.bf16.mxu0 %v1705_v56 }
  0x51   : > { %961 = vmatprep.mubr.bf16.mxu1 %v1707_v57 }
  0x57   : > { %826 = vmatmul.mubr.bf16.gmra.mrb[24].mxu0 %v1709_v58 }
  0x58   : > { %962 = vmatmul.mubr.bf16.gmra.mrb[24].mxu1 %v1710_v59  ;;  %833 = vmatprep.mubr.bf16.mxu0 %v1711_v60 }
  0x59   : > { %969 = vmatprep.mubr.bf16.mxu1 %v1713_v61 }
  0x5f   : > { %834 = vmatmul.mubr.bf16.gmra.mrb[28].mxu0 %v1715_v62 }
  0x60   : > { %970 = vmatmul.mubr.bf16.gmra.mrb[28].mxu1 %v1716_v63  ;;  %841 = vmatprep.mubr.bf16.mxu0 %v1717_v0 }
  0x61   : > { %977 = vmatprep.mubr.bf16.mxu1 %v1719_v1 }
  0x67   : > { %842 = vmatmul.mubr.bf16.gmra.mrb[32].mxu0 %v1721_v2 }
  0x68   : > { %978 = vmatmul.mubr.bf16.gmra.mrb[32].mxu1 %v1722_v3  ;;  %849 = vmatprep.mubr.bf16.mxu0 %v1723_v4 }
  0x69   : > { %985 = vmatprep.mubr.bf16.mxu1 %v1725_v5 }
  0x6f   : > { %850 = vmatmul.mubr.bf16.gmra.mrb[36].mxu0 %v1727_v6 }
  0x70   : > { %986 = vmatmul.mubr.bf16.gmra.mrb[36].mxu1 %v1728_v7  ;;  %857 = vmatprep.mubr.bf16.mxu0 %v1729_v8 }
  0x71   : > { %993 = vmatprep.mubr.bf16.mxu1 %v1731_v9 }
  0x77   : > { %858 = vmatmul.mubr.bf16.gmra.mrb[40].mxu0 %v1733_v10 }
  0x78   : > { %994 = vmatmul.mubr.bf16.gmra.mrb[40].mxu1 %v1734_v11  ;;  %865 = vmatprep.mubr.bf16.mxu0 %v1735_v12 }
  0x79   : > { %1001 = vmatprep.mubr.bf16.mxu1 %v1737_v13 }
  0x7f   : > { %866 = vmatmul.mubr.bf16.gmra.mrb[44].mxu0 %v1739_v16 }
  0x80   : > { %1002 = vmatmul.mubr.bf16.gmra.mrb[44].mxu1 %v1740_v17  ;;  %873 = vmatprep.mubr.bf16.mxu0 %v1282_v18 }
  0x81   : > { %1009 = vmatprep.mubr.bf16.mxu1 %v1284_v19 }
  0x87   : > { %874 = vmatmul.mubr.bf16.gmra.mrb[48].mxu0 %v1281_v20 }
  0x88   : > { %1010 = vmatmul.mubr.bf16.gmra.mrb[48].mxu1 %v1283_v21 }
  0xfa   : > { %v1457_v22 = vpop.f32.mrb[0].mxu0 }
  0xfb   : > { %v1551_v23 = vpop.f32.mrb[0].mxu1  ;;  %v1458_v25 = vpop.f32.mrb[1].mxu0 }
  0xfc   : > { %v1459_v26 = vadd.f32 %v1458_v25, %v1457_v22  ;;  %v1552_v27 = vpop.f32.mrb[1].mxu1  ;;  %v1460_v28 = vpop.f32.mrb[2].mxu0 }
  0xfd   : > { %v1553_v29 = vadd.f32 %v1552_v27, %v1551_v23  ;;  %v1554_v30 = vpop.f32.mrb[2].mxu1  ;;  %v1461_v31 = vpop.f32.mrb[3].mxu0 }
  0xfe   : > { %v780_v32 = vadd.f32 %v1459_v26, %v1940_v24  ;;  %v1462_v33 = vadd.f32 %v1461_v31, %v1460_v28  ;;  %v1555_v34 = vpop.f32.mrb[3].mxu1 }
  0xff   : > { %v1556_v35 = vadd.f32 %v1555_v34, %v1554_v30 }
 0x100   : > { %v916_v36 = vadd.f32 %v1553_v29, %v780_v32  ;;  %v783_v37 = vadd.f32 %v1462_v33, %v1940_v24 }
 0x102   : > { %v919_v38 = vadd.f32 %v1556_v35, %v783_v37  ;;  %v1463_v39 = vpop.f32.mrb[4].mxu0  ;;  %v1017_v42 = vmax.f32 %v916_v36, 0.0 }
 0x103   : > { %v1557_v40 = vpop.f32.mrb[4].mxu1  ;;  %v1464_v41 = vpop.f32.mrb[5].mxu0 }
 0x104   : > { %v1018_v43 = vmax.f32 %v919_v38, 0.0  ;;  %v1465_v44 = vadd.f32 %v1464_v41, %v1463_v39  ;;  %v1558_v45 = vpop.f32.mrb[5].mxu1  ;;  %v1466_v46 = vpop.f32.mrb[6].mxu0 }
 0x105   : > { %v1559_v47 = vadd.f32 %v1558_v45, %v1557_v40  ;;  %v1560_v48 = vpop.f32.mrb[6].mxu1  ;;  %v1467_v49 = vpop.f32.mrb[7].mxu0 }
 0x106   : > { %v1373_v50 = vpack.c.bf16 %v1018_v43, %v1017_v42  ;;  %v788_v51 = vadd.f32 %v1465_v44, %v1940_v24  ;;  %v1468_v52 = vadd.f32 %v1467_v49, %v1466_v46  ;;  %v1561_v53 = vpop.f32.mrb[7].mxu1 }
 0x107   : > { %v1562_v54 = vadd.f32 %v1561_v53, %v1560_v48 }
 0x108   : > { %1374 = vst [vmem:[%s1948_s10] sm:$0xff] %v1373_v50   ;;  %v924_v55 = vadd.f32 %v1559_v47, %v788_v51  ;;  %v791_v56 = vadd.f32 %v1468_v52, %v1940_v24 }
 0x10a   : > { %v927_v57 = vadd.f32 %v1562_v54, %v791_v56  ;;  %v1469_v58 = vpop.f32.mrb[8].mxu0  ;;  %v1019_v61 = vmax.f32 %v924_v55, 0.0 }
 0x10b   : > { %v1563_v59 = vpop.f32.mrb[8].mxu1  ;;  %v1470_v60 = vpop.f32.mrb[9].mxu0 }
 0x10c   : > { %v1020_v62 = vmax.f32 %v927_v57, 0.0  ;;  %v1471_v63 = vadd.f32 %v1470_v60, %v1469_v58  ;;  %v1564_v0 = vpop.f32.mrb[9].mxu1  ;;  %v1472_v1 = vpop.f32.mrb[10].mxu0 }
 0x10d   : > { %v1565_v2 = vadd.f32 %v1564_v0, %v1563_v59  ;;  %v1566_v3 = vpop.f32.mrb[10].mxu1  ;;  %v1473_v4 = vpop.f32.mrb[11].mxu0 }
 0x10e   : > { %v1378_v5 = vpack.c.bf16 %v1020_v62, %v1019_v61  ;;  %v796_v6 = vadd.f32 %v1471_v63, %v1940_v24  ;;  %v1474_v7 = vadd.f32 %v1473_v4, %v1472_v1  ;;  %v1567_v8 = vpop.f32.mrb[11].mxu1 }
 0x10f   : > { %v1568_v9 = vadd.f32 %v1567_v8, %v1566_v3 }
 0x110   : > { %1430 = vst [vmem:[%s1948_s10 + $0x8] sm:$0xff] %v1378_v5   ;;  %v932_v10 = vadd.f32 %v1565_v2, %v796_v6  ;;  %v799_v11 = vadd.f32 %v1474_v7, %v1940_v24 }
 0x112   : > { %v935_v12 = vadd.f32 %v1568_v9, %v799_v11  ;;  %v1475_v13 = vpop.f32.mrb[12].mxu0  ;;  %v1021_v16 = vmax.f32 %v932_v10, 0.0 }
 0x113   : > { %v1569_v14 = vpop.f32.mrb[12].mxu1  ;;  %v1476_v15 = vpop.f32.mrb[13].mxu0 }
 0x114   : > { %v1022_v17 = vmax.f32 %v935_v12, 0.0  ;;  %v1477_v18 = vadd.f32 %v1476_v15, %v1475_v13  ;;  %v1570_v19 = vpop.f32.mrb[13].mxu1  ;;  %v1478_v20 = vpop.f32.mrb[14].mxu0 }
 0x115   : > { %v1571_v21 = vadd.f32 %v1570_v19, %v1569_v14  ;;  %v1572_v22 = vpop.f32.mrb[14].mxu1  ;;  %v1479_v23 = vpop.f32.mrb[15].mxu0 }
 0x116   : > { %v1383_v25 = vpack.c.bf16 %v1022_v17, %v1021_v16  ;;  %v804_v26 = vadd.f32 %v1477_v18, %v1940_v24  ;;  %v1480_v27 = vadd.f32 %v1479_v23, %v1478_v20  ;;  %v1573_v28 = vpop.f32.mrb[15].mxu1 }
 0x117   : > { %v1574_v29 = vadd.f32 %v1573_v28, %v1572_v22 }
 0x118   : > { %1431 = vst [vmem:[%s1948_s10 + $0x10] sm:$0xff] %v1383_v25   ;;  %v940_v30 = vadd.f32 %v1571_v21, %v804_v26  ;;  %v807_v31 = vadd.f32 %v1480_v27, %v1940_v24 }
 0x11a   : > { %v943_v32 = vadd.f32 %v1574_v29, %v807_v31  ;;  %v1481_v33 = vpop.f32.mrb[16].mxu0  ;;  %v1023_v36 = vmax.f32 %v940_v30, 0.0 }
 0x11b   : > { %v1575_v34 = vpop.f32.mrb[16].mxu1  ;;  %v1482_v35 = vpop.f32.mrb[17].mxu0 }
 0x11c   : > { %v1024_v37 = vmax.f32 %v943_v32, 0.0  ;;  %v1483_v38 = vadd.f32 %v1482_v35, %v1481_v33  ;;  %v1576_v39 = vpop.f32.mrb[17].mxu1  ;;  %v1484_v40 = vpop.f32.mrb[18].mxu0 }
 0x11d   : > { %v1577_v41 = vadd.f32 %v1576_v39, %v1575_v34  ;;  %v1578_v42 = vpop.f32.mrb[18].mxu1  ;;  %v1485_v43 = vpop.f32.mrb[19].mxu0 }
 0x11e   : > { %v1388_v44 = vpack.c.bf16 %v1024_v37, %v1023_v36  ;;  %v812_v45 = vadd.f32 %v1483_v38, %v1940_v24  ;;  %v1486_v46 = vadd.f32 %v1485_v43, %v1484_v40  ;;  %v1579_v47 = vpop.f32.mrb[19].mxu1 }
 0x11f   : > { %v1580_v48 = vadd.f32 %v1579_v47, %v1578_v42 }
 0x120   : > { %1432 = vst [vmem:[%s1948_s10 + $0x18] sm:$0xff] %v1388_v44   ;;  %v948_v49 = vadd.f32 %v1577_v41, %v812_v45  ;;  %v815_v50 = vadd.f32 %v1486_v46, %v1940_v24 }
 0x122   : > { %v951_v51 = vadd.f32 %v1580_v48, %v815_v50  ;;  %v1487_v52 = vpop.f32.mrb[20].mxu0  ;;  %v1025_v55 = vmax.f32 %v948_v49, 0.0 }
 0x123   : > { %v1581_v53 = vpop.f32.mrb[20].mxu1  ;;  %v1488_v54 = vpop.f32.mrb[21].mxu0 }
 0x124   : > { %v1026_v56 = vmax.f32 %v951_v51, 0.0  ;;  %v1489_v57 = vadd.f32 %v1488_v54, %v1487_v52  ;;  %v1582_v58 = vpop.f32.mrb[21].mxu1  ;;  %v1490_v59 = vpop.f32.mrb[22].mxu0 }
 0x125   : > { %v1583_v60 = vadd.f32 %v1582_v58, %v1581_v53  ;;  %v1584_v61 = vpop.f32.mrb[22].mxu1  ;;  %v1491_v62 = vpop.f32.mrb[23].mxu0 }
 0x126   : > { %v1393_v63 = vpack.c.bf16 %v1026_v56, %v1025_v55  ;;  %v820_v0 = vadd.f32 %v1489_v57, %v1940_v24  ;;  %v1492_v1 = vadd.f32 %v1491_v62, %v1490_v59  ;;  %v1585_v2 = vpop.f32.mrb[23].mxu1 }
 0x127   : > { %v1586_v3 = vadd.f32 %v1585_v2, %v1584_v61 }
 0x128   : > { %1433 = vst [vmem:[%s1948_s10 + $0x20] sm:$0xff] %v1393_v63   ;;  %v956_v4 = vadd.f32 %v1583_v60, %v820_v0  ;;  %v823_v5 = vadd.f32 %v1492_v1, %v1940_v24 }
 0x12a   : > { %v959_v6 = vadd.f32 %v1586_v3, %v823_v5  ;;  %v1493_v7 = vpop.f32.mrb[24].mxu0  ;;  %v1027_v10 = vmax.f32 %v956_v4, 0.0 }
 0x12b   : > { %v1587_v8 = vpop.f32.mrb[24].mxu1  ;;  %v1494_v9 = vpop.f32.mrb[25].mxu0 }
 0x12c   : > { %v1028_v11 = vmax.f32 %v959_v6, 0.0  ;;  %v1495_v12 = vadd.f32 %v1494_v9, %v1493_v7  ;;  %v1588_v13 = vpop.f32.mrb[25].mxu1  ;;  %v1496_v14 = vpop.f32.mrb[26].mxu0 }
 0x12d   : > { %v1589_v15 = vadd.f32 %v1588_v13, %v1587_v8  ;;  %v1590_v16 = vpop.f32.mrb[26].mxu1  ;;  %v1497_v17 = vpop.f32.mrb[27].mxu0 }
 0x12e   : > { %v1398_v18 = vpack.c.bf16 %v1028_v11, %v1027_v10  ;;  %v828_v19 = vadd.f32 %v1495_v12, %v1940_v24  ;;  %v1498_v20 = vadd.f32 %v1497_v17, %v1496_v14  ;;  %v1591_v21 = vpop.f32.mrb[27].mxu1 }
 0x12f   : > { %v1592_v22 = vadd.f32 %v1591_v21, %v1590_v16 }
 0x130   : > { %1434 = vst [vmem:[%s1948_s10 + $0x28] sm:$0xff] %v1398_v18   ;;  %v964_v23 = vadd.f32 %v1589_v15, %v828_v19  ;;  %v831_v25 = vadd.f32 %v1498_v20, %v1940_v24 }
 0x132   : > { %v967_v26 = vadd.f32 %v1592_v22, %v831_v25  ;;  %v1499_v27 = vpop.f32.mrb[28].mxu0  ;;  %v1029_v30 = vmax.f32 %v964_v23, 0.0 }
 0x133   : > { %v1593_v28 = vpop.f32.mrb[28].mxu1  ;;  %v1500_v29 = vpop.f32.mrb[29].mxu0 }
 0x134   : > { %v1030_v31 = vmax.f32 %v967_v26, 0.0  ;;  %v1501_v32 = vadd.f32 %v1500_v29, %v1499_v27  ;;  %v1594_v33 = vpop.f32.mrb[29].mxu1  ;;  %v1502_v34 = vpop.f32.mrb[30].mxu0 }
 0x135   : > { %v1595_v35 = vadd.f32 %v1594_v33, %v1593_v28  ;;  %v1596_v36 = vpop.f32.mrb[30].mxu1  ;;  %v1503_v37 = vpop.f32.mrb[31].mxu0 }
 0x136   : > { %v1403_v38 = vpack.c.bf16 %v1030_v31, %v1029_v30  ;;  %v836_v39 = vadd.f32 %v1501_v32, %v1940_v24  ;;  %v1504_v40 = vadd.f32 %v1503_v37, %v1502_v34  ;;  %v1597_v41 = vpop.f32.mrb[31].mxu1 }
 0x137   : > { %v1598_v42 = vadd.f32 %v1597_v41, %v1596_v36 }
 0x138   : > { %1435 = vst [vmem:[%s1948_s10 + $0x30] sm:$0xff] %v1403_v38   ;;  %v972_v43 = vadd.f32 %v1595_v35, %v836_v39  ;;  %v839_v44 = vadd.f32 %v1504_v40, %v1940_v24 }
 0x13a   : > { %v975_v45 = vadd.f32 %v1598_v42, %v839_v44  ;;  %v1505_v46 = vpop.f32.mrb[32].mxu0  ;;  %v1031_v49 = vmax.f32 %v972_v43, 0.0 }
 0x13b   : > { %v1599_v47 = vpop.f32.mrb[32].mxu1  ;;  %v1506_v48 = vpop.f32.mrb[33].mxu0 }
 0x13c   : > { %v1032_v50 = vmax.f32 %v975_v45, 0.0  ;;  %v1507_v51 = vadd.f32 %v1506_v48, %v1505_v46  ;;  %v1600_v52 = vpop.f32.mrb[33].mxu1  ;;  %v1508_v53 = vpop.f32.mrb[34].mxu0 }
 0x13d   : > { %v1601_v54 = vadd.f32 %v1600_v52, %v1599_v47  ;;  %v1602_v55 = vpop.f32.mrb[34].mxu1  ;;  %v1509_v56 = vpop.f32.mrb[35].mxu0 }
 0x13e   : > { %v1408_v57 = vpack.c.bf16 %v1032_v50, %v1031_v49  ;;  %v844_v58 = vadd.f32 %v1507_v51, %v1940_v24  ;;  %v1510_v59 = vadd.f32 %v1509_v56, %v1508_v53  ;;  %v1603_v60 = vpop.f32.mrb[35].mxu1 }
 0x13f   : > { %v1604_v61 = vadd.f32 %v1603_v60, %v1602_v55 }
 0x140   : > { %1436 = vst [vmem:[%s1948_s10 + $0x38] sm:$0xff] %v1408_v57   ;;  %v980_v62 = vadd.f32 %v1601_v54, %v844_v58  ;;  %v847_v63 = vadd.f32 %v1510_v59, %v1940_v24 }
 0x142   : > { %v983_v0 = vadd.f32 %v1604_v61, %v847_v63  ;;  %v1511_v1 = vpop.f32.mrb[36].mxu0  ;;  %v1033_v4 = vmax.f32 %v980_v62, 0.0 }
 0x143   : > { %v1605_v2 = vpop.f32.mrb[36].mxu1  ;;  %v1512_v3 = vpop.f32.mrb[37].mxu0 }
 0x144   : > { %v1034_v5 = vmax.f32 %v983_v0, 0.0  ;;  %v1513_v6 = vadd.f32 %v1512_v3, %v1511_v1  ;;  %v1606_v7 = vpop.f32.mrb[37].mxu1  ;;  %v1514_v8 = vpop.f32.mrb[38].mxu0 }
 0x145   : > { %v1607_v9 = vadd.f32 %v1606_v7, %v1605_v2  ;;  %v1608_v10 = vpop.f32.mrb[38].mxu1  ;;  %v1515_v11 = vpop.f32.mrb[39].mxu0 }
 0x146   : > { %v1413_v12 = vpack.c.bf16 %v1034_v5, %v1033_v4  ;;  %v852_v13 = vadd.f32 %v1513_v6, %v1940_v24  ;;  %v1516_v14 = vadd.f32 %v1515_v11, %v1514_v8  ;;  %v1609_v15 = vpop.f32.mrb[39].mxu1 }
 0x147   : > { %v1610_v16 = vadd.f32 %v1609_v15, %v1608_v10 }
 0x148   : > { %1437 = vst [vmem:[%s1948_s10 + $0x40] sm:$0xff] %v1413_v12   ;;  %v988_v17 = vadd.f32 %v1607_v9, %v852_v13  ;;  %v855_v18 = vadd.f32 %v1516_v14, %v1940_v24 }
 0x14a   : > { %v991_v19 = vadd.f32 %v1610_v16, %v855_v18  ;;  %v1517_v20 = vpop.f32.mrb[40].mxu0  ;;  %v1035_v23 = vmax.f32 %v988_v17, 0.0 }
 0x14b   : > { %v1611_v21 = vpop.f32.mrb[40].mxu1  ;;  %v1518_v22 = vpop.f32.mrb[41].mxu0 }
 0x14c   : > { %v1036_v25 = vmax.f32 %v991_v19, 0.0  ;;  %v1519_v26 = vadd.f32 %v1518_v22, %v1517_v20  ;;  %v1612_v27 = vpop.f32.mrb[41].mxu1  ;;  %v1520_v28 = vpop.f32.mrb[42].mxu0 }
 0x14d   : > { %v1613_v29 = vadd.f32 %v1612_v27, %v1611_v21  ;;  %v1614_v30 = vpop.f32.mrb[42].mxu1  ;;  %v1521_v31 = vpop.f32.mrb[43].mxu0 }
 0x14e   : > { %v1418_v32 = vpack.c.bf16 %v1036_v25, %v1035_v23  ;;  %v860_v33 = vadd.f32 %v1519_v26, %v1940_v24  ;;  %v1522_v34 = vadd.f32 %v1521_v31, %v1520_v28  ;;  %v1615_v35 = vpop.f32.mrb[43].mxu1 }
 0x14f   : > { %v1616_v36 = vadd.f32 %v1615_v35, %v1614_v30 }
 0x150   : > { %1438 = vst [vmem:[%s1948_s10 + $0x48] sm:$0xff] %v1418_v32   ;;  %v996_v37 = vadd.f32 %v1613_v29, %v860_v33  ;;  %v863_v38 = vadd.f32 %v1522_v34, %v1940_v24 }
 0x152   : > { %v999_v39 = vadd.f32 %v1616_v36, %v863_v38  ;;  %v1523_v40 = vpop.f32.mrb[44].mxu0  ;;  %v1037_v43 = vmax.f32 %v996_v37, 0.0 }
 0x153   : > { %v1617_v41 = vpop.f32.mrb[44].mxu1  ;;  %v1524_v42 = vpop.f32.mrb[45].mxu0 }
 0x154   : > { %v1038_v44 = vmax.f32 %v999_v39, 0.0  ;;  %v1525_v45 = vadd.f32 %v1524_v42, %v1523_v40  ;;  %v1618_v46 = vpop.f32.mrb[45].mxu1  ;;  %v1526_v47 = vpop.f32.mrb[46].mxu0 }
 0x155   : > { %v1619_v48 = vadd.f32 %v1618_v46, %v1617_v41  ;;  %v1620_v49 = vpop.f32.mrb[46].mxu1  ;;  %v1527_v50 = vpop.f32.mrb[47].mxu0 }
 0x156   : > { %v1423_v51 = vpack.c.bf16 %v1038_v44, %v1037_v43  ;;  %v868_v52 = vadd.f32 %v1525_v45, %v1940_v24  ;;  %v1528_v53 = vadd.f32 %v1527_v50, %v1526_v47  ;;  %v1621_v54 = vpop.f32.mrb[47].mxu1 }
 0x157   : > { %v1622_v55 = vadd.f32 %v1621_v54, %v1620_v49 }
 0x158   : > { %1439 = vst [vmem:[%s1948_s10 + $0x50] sm:$0xff] %v1423_v51   ;;  %v1004_v56 = vadd.f32 %v1619_v48, %v868_v52  ;;  %v871_v57 = vadd.f32 %v1528_v53, %v1940_v24 }
 0x15a   : > { %v1007_v58 = vadd.f32 %v1622_v55, %v871_v57  ;;  %v1529_v59 = vpop.f32.mrb[48].mxu0  ;;  %v1039_v62 = vmax.f32 %v1004_v56, 0.0 }
 0x15b   : > { %v1623_v60 = vpop.f32.mrb[48].mxu1  ;;  %v1530_v61 = vpop.f32.mrb[49].mxu0 }
 0x15c   : > { %v1040_v63 = vmax.f32 %v1007_v58, 0.0  ;;  %v1531_v0 = vadd.f32 %v1530_v61, %v1529_v59  ;;  %v1624_v1 = vpop.f32.mrb[49].mxu1  ;;  %v1532_v2 = vpop.f32.mrb[50].mxu0 }
 0x15d   : > { %v1625_v3 = vadd.f32 %v1624_v1, %v1623_v60  ;;  %v1626_v4 = vpop.f32.mrb[50].mxu1  ;;  %v1533_v5 = vpop.f32.mrb[51].mxu0 }
 0x15e   : > { %v1428_v6 = vpack.c.bf16 %v1040_v63, %v1039_v62  ;;  %v876_v7 = vadd.f32 %v1531_v0, %v1940_v24  ;;  %v1627_v8 = vpop.f32.mrb[51].mxu1 }
 0x160   : > { %1440 = vst [vmem:[%s1948_s10 + $0x58] sm:$0xff] %v1428_v6   ;;  %v1012_v9 = vadd.f32 %v1625_v3, %v876_v7 }
 0x162   : > { %v1041_v10 = vmax.f32 %v1012_v9, 0.0 }
 0x164   : > { %v1369_v11 = vpack.c.bf16 %v1041_v10, %v1041_v10 }
 0x166   : > { %1167 = vst [vmem:[%s1948_s10 + $0x60] sm:$0xf] %v1369_v11 }
 0x167 PF: > { %s13_s12 = sadd.s32 1, %s1751_s12  }
 0x168   : > { %p10_p4 = scmp.ge.s32.totalorder %s13_s12, 4  }
 0x16a   :  { %12 = sbr.rel (!%p10_p4) target bundleno = 1 (0x1), region = 62 }

// kernel: voxel_backbone_8x.14
= control target key start
LH: loop header
LB: loop body
LE: loop exit
PB: predicated region body
PF: predicated region fallthrough
CT: control target
= control target key end

     0   :  { %s4629_s12 = smov 0   ;;  %s5158_s0 = inlined_call_operand.vmem [shape: bf16[1664,512], index: 0, kind: input, shape index: {}]   ;;  %s5159_s1 = inlined_call_operand.vmem [shape: bf16[512,128], index: 1, kind: input, shape index: {}]   ;;  %s5160_s2 = inlined_call_operand.vmem [shape: f32[1,128], index: 2, kind: input, shape index: {}]   ;;  %s5161_s3 = inlined_call_operand.vmem [shape: bf16[1664,128], index: 3, kind: output, shape index: {}]  }
   0x1 LB: > { %s3267_s13 = sadd.s32 4294967295, %s4606_s12   ;;  %p3271_p0 = scmp.ge.s32.totalorder %s4606_s12, 1  ;;  %s4606_s12 = sphi %s4629_s12, %s13_s12  }
   0x2   : > { %p139_p1 = scmp.lt.s32.totalorder %s4606_s12, 3 }
   0x4   : > { %p140_p2 = pnand %p3271_p0, %p139_p1 }
   0x5   : > { %v4255_v0 = vld [vmem:[%s5159_s1] sm:$0xff] (!%p140_p2)   ;;  %v4608_v1 = vmov (!%p140_p2), 0   ;;  %v4257_v3 = vld [vmem:[%s5159_s1 + $0x8] sm:$0xff] (!%p140_p2)   ;;  %v4259_v5 = vld [vmem:[%s5159_s1 + $0x10] sm:$0xff] (!%p140_p2)   ;;  %s164_s7 = smul.u32 (!%p140_p2), 104, %s3267_s13 }
   0x6   : > { %143 = sbr.rel (%p140_p2) target bundleno = 701 (0x2bd), region = 32  ;;  %1689 = vmatprep.subr.bf16.mxu1 (!%p140_p2), %v4608_v1  ;;  %2138 = vmatprep.subr.bf16.mxu0 (!%p140_p2), %v4608_v1  ;;  %v4256_v2 = vld [vmem:[%s5159_s1 + $0x80] sm:$0xff] (!%p140_p2)   ;;  %v4258_v4 = vld [vmem:[%s5159_s1 + $0x88] sm:$0xff] (!%p140_p2)   ;;  %v4260_v6 = vld [vmem:[%s5159_s1 + $0x90] sm:$0xff] (!%p140_p2)  }
   0x7   : > { %1690 = vmatpush1.bf16.msra.mxu1 (!%p140_p2), %v4255_v0  ;;  %2139 = vmatpush1.bf16.msra.mxu0 (!%p140_p2), %v4256_v2  ;;  %v4261_v7 = vld [vmem:[%s5159_s1 + $0x18] sm:$0xff] (!%p140_p2)   ;;  %v4263_v9 = vld [vmem:[%s5159_s1 + $0x20] sm:$0xff] (!%p140_p2)   ;;  %v4265_v11 = vld [vmem:[%s5159_s1 + $0x28] sm:$0xff] (!%p140_p2)   ;;  %p165_p3 = scmp.lt.s32.totalorder (!%p140_p2), %s164_s7, 207 }
   0x8   : > { %1691 = vmatprep.subr.bf16.mxu1 (!%p140_p2), %v4608_v1  ;;  %2140 = vmatprep.subr.bf16.mxu0 (!%p140_p2), %v4608_v1  ;;  %v4262_v8 = vld [vmem:[%s5159_s1 + $0x98] sm:$0xff] (!%p140_p2)   ;;  %v4264_v10 = vld [vmem:[%s5159_s1 + $0xa0] sm:$0xff] (!%p140_p2)   ;;  %v4266_v12 = vld [vmem:[%s5159_s1 + $0xa8] sm:$0xff] (!%p140_p2)  }
   0x9   : > { %v4267_v13 = vld [vmem:[%s5159_s1 + $0x30] sm:$0xff] (!%p140_p2)   ;;  %v4269_v15 = vld [vmem:[%s5159_s1 + $0x38] sm:$0xff] (!%p140_p2)   ;;  %v4271_v17 = vld [vmem:[%s5159_s1 + $0x40] sm:$0xff] (!%p140_p2)  }
   0xa   : > { %v4268_v14 = vld [vmem:[%s5159_s1 + $0xb0] sm:$0xff] (!%p140_p2)   ;;  %v4270_v16 = vld [vmem:[%s5159_s1 + $0xb8] sm:$0xff] (!%p140_p2)   ;;  %v4272_v18 = vld [vmem:[%s5159_s1 + $0xc0] sm:$0xff] (!%p140_p2)  }
   0xb   : > { %1692 = vmatpush1.bf16.msra.mxu1 (!%p140_p2), %v4257_v3  ;;  %2141 = vmatpush1.bf16.msra.mxu0 (!%p140_p2), %v4258_v4  ;;  %v4273_v20 = vld [vmem:[%s5159_s1 + $0x48] sm:$0xff] (!%p140_p2)   ;;  %v4275_v23 = vld [vmem:[%s5159_s1 + $0x50] sm:$0xff] (!%p140_p2)   ;;  %v4277_v25 = vld [vmem:[%s5159_s1 + $0x58] sm:$0xff] (!%p140_p2)  }
   0xc   : > { %1693 = vmatprep.subr.bf16.mxu1 (!%p140_p2), %v4608_v1  ;;  %2142 = vmatprep.subr.bf16.mxu0 (!%p140_p2), %v4608_v1  ;;  %v4274_v22 = vld [vmem:[%s5159_s1 + $0xc8] sm:$0xff] (!%p140_p2)   ;;  %v4276_v24 = vld [vmem:[%s5159_s1 + $0xd0] sm:$0xff] (!%p140_p2)   ;;  %v4278_v26 = vld [vmem:[%s5159_s1 + $0xd8] sm:$0xff] (!%p140_p2)  }
   0xd   : > { %s5163_s7 = smov (!%p165_p3, %s164_s7), 207  ;;  %v4279_v27 = vld [vmem:[%s5159_s1 + $0x60] sm:$0xff]   ;;  %v4281_v29 = vld [vmem:[%s5159_s1 + $0x68] sm:$0xff]   ;;  %v4283_v31 = vld [vmem:[%s5159_s1 + $0x70] sm:$0xff]  }
   0xe   : > { %s3622_s21 = sshll.u32 %s5163_s7, 4  ;;  %v4280_v28 = vld [vmem:[%s5159_s1 + $0xe0] sm:$0xff]   ;;  %v4282_v30 = vld [vmem:[%s5159_s1 + $0xe8] sm:$0xff]   ;;  %v4284_v32 = vld [vmem:[%s5159_s1 + $0xf0] sm:$0xff]   ;;  %s3274_s9 = sshll.u32 %s5163_s7, 2 }
   0xf   : > { %1694 = vmatpush1.bf16.msra.mxu1 %v4259_v5  ;;  %2143 = vmatpush1.bf16.msra.mxu0 %v4260_v6  ;;  %s4712_s26 = scalar_lea.vmem %s5158_s0, %s3622_s21  ;;  %v4285_v33 = vld [vmem:[%s5159_s1 + $0x78] sm:$0xff]   ;;  %s4900_s14 = scalar_lea.vmem %s5161_s3, %s3274_s9 }
  0x10   : > { %1695 = vmatprep.subr.bf16.mxu1 %v4608_v1  ;;  %2144 = vmatprep.subr.bf16.mxu0 %v4608_v1  ;;  %v4289_v19 = vld [vmem:[%s4712_s26 + $0x4] ss:$16 sps:$4 sm:$0xff]   ;;  %v4292_v21 = vld [vmem:[%s4712_s26 + $0xc] ss:$16 sps:$4 sm:$0xff]   ;;  %v4287_v35 = vld [vmem:[%s4712_s26] ss:$16 sps:$4 sm:$0xff]  }
  0x11   : > { %1721 = vmatprep.mubr.bf16.mxu1 %v4289_v19  ;;  %2170 = vmatprep.mubr.bf16.mxu0 %v4292_v21  ;;  %v4286_v34 = vld [vmem:[%s5159_s1 + $0xf8] sm:$0xff]   ;;  %v4293_v37 = vld [vmem:[%s4712_s26 + $0x24] ss:$16 sps:$4 sm:$0xff]   ;;  %v4297_v39 = vld [vmem:[%s4712_s26 + $0x20] ss:$16 sps:$4 sm:$0xff]  }
  0x12   : > { %v4290_v36 = vld [vmem:[%s4712_s26 + $0x8] ss:$16 sps:$4 sm:$0xff]   ;;  %v4295_v38 = vld [vmem:[%s4712_s26 + $0x2c] ss:$16 sps:$4 sm:$0xff]   ;;  %v4299_v41 = vld [vmem:[%s4712_s26 + $0x44] ss:$16 sps:$4 sm:$0xff]  }
  0x13   : > { %1696 = vmatpush1.bf16.msra.mxu1 %v4261_v7  ;;  %2145 = vmatpush1.bf16.msra.mxu0 %v4262_v8  ;;  %v4298_v40 = vld [vmem:[%s4712_s26 + $0x28] ss:$16 sps:$4 sm:$0xff]   ;;  %v4301_v42 = vld [vmem:[%s4712_s26 + $0x4c] ss:$16 sps:$4 sm:$0xff]   ;;  %v4303_v43 = vld [vmem:[%s4712_s26 + $0x40] ss:$16 sps:$4 sm:$0xff]  }
  0x14   : > { %1697 = vmatprep.subr.bf16.mxu1 %v4608_v1  ;;  %2146 = vmatprep.subr.bf16.mxu0 %v4608_v1  ;;  %v4304_v44 = vld [vmem:[%s4712_s26 + $0x48] ss:$16 sps:$4 sm:$0xff]   ;;  %v4305_v45 = vld [vmem:[%s4712_s26 + $0x64] ss:$16 sps:$4 sm:$0xff]   ;;  %v4307_v46 = vld [vmem:[%s4712_s26 + $0x6c] ss:$16 sps:$4 sm:$0xff]  }
  0x15   : > { %v4309_v47 = vld [vmem:[%s4712_s26 + $0x60] ss:$16 sps:$4 sm:$0xff]   ;;  %v4310_v48 = vld [vmem:[%s4712_s26 + $0x68] ss:$16 sps:$4 sm:$0xff]   ;;  %v4311_v49 = vld [vmem:[%s4712_s26 + $0x84] ss:$16 sps:$4 sm:$0xff]  }
  0x16   : > { %v4313_v50 = vld [vmem:[%s4712_s26 + $0x8c] ss:$16 sps:$4 sm:$0xff]   ;;  %v4315_v51 = vld [vmem:[%s4712_s26 + $0x80] ss:$16 sps:$4 sm:$0xff]   ;;  %v4316_v52 = vld [vmem:[%s4712_s26 + $0x88] ss:$16 sps:$4 sm:$0xff]  }
  0x17   : > { %1698 = vmatpush1.bf16.msra.mxu1 %v4263_v9  ;;  %2147 = vmatpush1.bf16.msra.mxu0 %v4264_v10  ;;  %v4317_v53 = vld [vmem:[%s4712_s26 + $0xa4] ss:$16 sps:$4 sm:$0xff]   ;;  %v4319_v54 = vld [vmem:[%s4712_s26 + $0xac] ss:$16 sps:$4 sm:$0xff]   ;;  %v4321_v55 = vld [vmem:[%s4712_s26 + $0xa0] ss:$16 sps:$4 sm:$0xff]  }
  0x18   : > { %1699 = vmatprep.subr.bf16.mxu1 %v4608_v1  ;;  %2148 = vmatprep.subr.bf16.mxu0 %v4608_v1  ;;  %v4322_v56 = vld [vmem:[%s4712_s26 + $0xa8] ss:$16 sps:$4 sm:$0xff]   ;;  %v4323_v57 = vld [vmem:[%s4712_s26 + $0xc4] ss:$16 sps:$4 sm:$0xff]   ;;  %v4325_v58 = vld [vmem:[%s4712_s26 + $0xcc] ss:$16 sps:$4 sm:$0xff]  }
  0x19   : > { %v4327_v59 = vld [vmem:[%s4712_s26 + $0xc0] ss:$16 sps:$4 sm:$0xff]   ;;  %v4328_v60 = vld [vmem:[%s4712_s26 + $0xc8] ss:$16 sps:$4 sm:$0xff]   ;;  %v4329_v61 = vld [vmem:[%s4712_s26 + $0xe4] ss:$16 sps:$4 sm:$0xff]  }
  0x1a   : > { %v4331_v62 = vld [vmem:[%s4712_s26 + $0xec] ss:$16 sps:$4 sm:$0xff]   ;;  %v4333_v63 = vld [vmem:[%s4712_s26 + $0xe0] ss:$16 sps:$4 sm:$0xff]   ;;  %v4334_v0 = vld [vmem:[%s4712_s26 + $0xe8] ss:$16 sps:$4 sm:$0xff]  }
  0x1b   : > { %1700 = vmatpush1.bf16.msra.mxu1 %v4265_v11  ;;  %2149 = vmatpush1.bf16.msra.mxu0 %v4266_v12  ;;  %v4337_v2 = vld [vmem:[%s4712_s26 + $0x10c] ss:$16 sps:$4 sm:$0xff]   ;;  %v4339_v3 = vld [vmem:[%s4712_s26 + $0x100] ss:$16 sps:$4 sm:$0xff]   ;;  %v4340_v4 = vld [vmem:[%s4712_s26 + $0x108] ss:$16 sps:$4 sm:$0xff]  }
  0x1c   : > { %1701 = vmatprep.subr.bf16.mxu1 %v4608_v1  ;;  %2150 = vmatprep.subr.bf16.mxu0 %v4608_v1  ;;  %v4341_v5 = vld [vmem:[%s4712_s26 + $0x124] ss:$16 sps:$4 sm:$0xff]   ;;  %v4343_v6 = vld [vmem:[%s4712_s26 + $0x12c] ss:$16 sps:$4 sm:$0xff]   ;;  %v4345_v7 = vld [vmem:[%s4712_s26 + $0x120] ss:$16 sps:$4 sm:$0xff]  }
  0x1d   : > { %v4346_v8 = vld [vmem:[%s4712_s26 + $0x128] ss:$16 sps:$4 sm:$0xff]   ;;  %v4347_v9 = vld [vmem:[%s4712_s26 + $0x144] ss:$16 sps:$4 sm:$0xff]   ;;  %v4349_v10 = vld [vmem:[%s4712_s26 + $0x14c] ss:$16 sps:$4 sm:$0xff]  }
  0x1e   : > { %v4351_v11 = vld [vmem:[%s4712_s26 + $0x140] ss:$16 sps:$4 sm:$0xff]   ;;  %v4352_v12 = vld [vmem:[%s4712_s26 + $0x148] ss:$16 sps:$4 sm:$0xff]   ;;  %v4365_v21 = vld [vmem:[%s4712_s26 + $0x1a4] ss:$16 sps:$4 sm:$0xff]  }
  0x1f   : > { %1702 = vmatpush1.bf16.msra.mxu1 %v4267_v13  ;;  %2151 = vmatpush1.bf16.msra.mxu0 %v4268_v14  ;;  %v4353_v13 = vld [vmem:[%s4712_s26 + $0x164] ss:$16 sps:$4 sm:$0xff]   ;;  %v4355_v14 = vld [vmem:[%s4712_s26 + $0x16c] ss:$16 sps:$4 sm:$0xff]   ;;  %v4363_v19 = vld [vmem:[%s4712_s26 + $0x180] ss:$16 sps:$4 sm:$0xff]  }
  0x20   : > { %1703 = vmatprep.subr.bf16.mxu1 %v4608_v1  ;;  %2152 = vmatprep.subr.bf16.mxu0 %v4608_v1 }
  0x23   : > { %1704 = vmatpush1.bf16.msra.mxu1 %v4269_v15  ;;  %2153 = vmatpush1.bf16.msra.mxu0 %v4270_v16  ;;  %v4357_v15 = vld [vmem:[%s4712_s26 + $0x160] ss:$16 sps:$4 sm:$0xff]   ;;  %v4358_v16 = vld [vmem:[%s4712_s26 + $0x168] ss:$16 sps:$4 sm:$0xff]  }
  0x24   : > { %1705 = vmatprep.subr.bf16.mxu1 %v4608_v1  ;;  %2154 = vmatprep.subr.bf16.mxu0 %v4608_v1 }
  0x27   : > { %1706 = vmatpush1.bf16.msra.mxu1 %v4271_v17  ;;  %2155 = vmatpush1.bf16.msra.mxu0 %v4272_v18  ;;  %v4359_v17 = vld [vmem:[%s4712_s26 + $0x184] ss:$16 sps:$4 sm:$0xff]   ;;  %v4361_v18 = vld [vmem:[%s4712_s26 + $0x18c] ss:$16 sps:$4 sm:$0xff]  }
  0x28   : > { %1707 = vmatprep.subr.bf16.mxu1 %v4608_v1  ;;  %2156 = vmatprep.subr.bf16.mxu0 %v4608_v1 }
  0x2b   : > { %1708 = vmatpush1.bf16.msra.mxu1 %v4273_v20  ;;  %2157 = vmatpush1.bf16.msra.mxu0 %v4274_v22  ;;  %v4364_v20 = vld [vmem:[%s4712_s26 + $0x188] ss:$16 sps:$4 sm:$0xff]   ;;  %v4367_v22 = vld [vmem:[%s4712_s26 + $0x1ac] ss:$16 sps:$4 sm:$0xff]  }
  0x2c   : > { %1709 = vmatprep.subr.bf16.mxu1 %v4608_v1  ;;  %2158 = vmatprep.subr.bf16.mxu0 %v4608_v1 }
  0x2f   : > { %1710 = vmatpush1.bf16.msra.mxu1 %v4275_v23  ;;  %2159 = vmatpush1.bf16.msra.mxu0 %v4276_v24  ;;  %v4369_v23 = vld [vmem:[%s4712_s26 + $0x1a0] ss:$16 sps:$4 sm:$0xff]   ;;  %v4370_v24 = vld [vmem:[%s4712_s26 + $0x1a8] ss:$16 sps:$4 sm:$0xff]  }
  0x30   : > { %1711 = vmatprep.subr.bf16.mxu1 %v4608_v1  ;;  %2160 = vmatprep.subr.bf16.mxu0 %v4608_v1 }
  0x33   : > { %1712 = vmatpush1.bf16.msra.mxu1 %v4277_v25  ;;  %2161 = vmatpush1.bf16.msra.mxu0 %v4278_v26  ;;  %v4371_v25 = vld [vmem:[%s4712_s26 + $0x1c4] ss:$16 sps:$4 sm:$0xff]   ;;  %v4373_v26 = vld [vmem:[%s4712_s26 + $0x1cc] ss:$16 sps:$4 sm:$0xff]  }
  0x34   : > { %1713 = vmatprep.subr.bf16.mxu1 %v4608_v1  ;;  %2162 = vmatprep.subr.bf16.mxu0 %v4608_v1 }
  0x37   : > { %1714 = vmatpush1.bf16.msra.mxu1 %v4279_v27  ;;  %2163 = vmatpush1.bf16.msra.mxu0 %v4280_v28  ;;  %v4375_v27 = vld [vmem:[%s4712_s26 + $0x1c0] ss:$16 sps:$4 sm:$0xff]   ;;  %v4376_v28 = vld [vmem:[%s4712_s26 + $0x1c8] ss:$16 sps:$4 sm:$0xff]  }
  0x38   : > { %1715 = vmatprep.subr.bf16.mxu1 %v4608_v1  ;;  %2164 = vmatprep.subr.bf16.mxu0 %v4608_v1 }
  0x3b   : > { %1716 = vmatpush1.bf16.msra.mxu1 %v4281_v29  ;;  %2165 = vmatpush1.bf16.msra.mxu0 %v4282_v30  ;;  %v4377_v29 = vld [vmem:[%s4712_s26 + $0x1e4] ss:$16 sps:$4 sm:$0xff]   ;;  %v4379_v30 = vld [vmem:[%s4712_s26 + $0x1ec] ss:$16 sps:$4 sm:$0xff]  }
  0x3c   : > { %1717 = vmatprep.subr.bf16.mxu1 %v4608_v1  ;;  %2166 = vmatprep.subr.bf16.mxu0 %v4608_v1 }
  0x3f   : > { %1718 = vmatpush1.bf16.msra.mxu1 %v4283_v31  ;;  %2167 = vmatpush1.bf16.msra.mxu0 %v4284_v32  ;;  %v4381_v31 = vld [vmem:[%s4712_s26 + $0x1e0] ss:$16 sps:$4 sm:$0xff]   ;;  %v4382_v32 = vld [vmem:[%s4712_s26 + $0x1e8] ss:$16 sps:$4 sm:$0xff]  }
  0x40   : > { %1719 = vmatprep.subr.bf16.mxu1 %v4608_v1  ;;  %2168 = vmatprep.subr.bf16.mxu0 %v4608_v1  ;;  %v4335_v1 = vld [vmem:[%s4712_s26 + $0x104] ss:$16 sps:$4 sm:$0xff]  }
  0x43   : > { %1720 = vmatpush1.bf16.msra.mxu1 %v4285_v33  ;;  %2169 = vmatpush1.bf16.msra.mxu0 %v4286_v34  ;;  %v4383_v33 = vld [vmem:[%s4712_s26 + $0x204] ss:$16 sps:$4 sm:$0xff]   ;;  %v4385_v34 = vld [vmem:[%s4712_s26 + $0x20c] ss:$16 sps:$4 sm:$0xff]  }
  0x46   : > { %1722 = vmatmul.mubr.bf16.vlgmr.msra.gmra.mrb[0].mxu1 %v4287_v35  ;;  %2171 = vmatmul.mubr.bf16.vlgmr.msra.gmra.mrb[0].mxu0 %v4290_v36  ;;  %v4387_v35 = vld [vmem:[%s4712_s26 + $0x200] ss:$16 sps:$4 sm:$0xff]   ;;  %v4388_v36 = vld [vmem:[%s4712_s26 + $0x208] ss:$16 sps:$4 sm:$0xff]  }
  0x47   : > { %1729 = vmatprep.mubr.bf16.mxu1 %v4293_v37  ;;  %2178 = vmatprep.mubr.bf16.mxu0 %v4295_v38  ;;  %v4389_v37 = vld [vmem:[%s4712_s26 + $0x224] ss:$16 sps:$4 sm:$0xff]   ;;  %v4391_v38 = vld [vmem:[%s4712_s26 + $0x22c] ss:$16 sps:$4 sm:$0xff]  }
  0x4e   : > { %1730 = vmatmul.mubr.bf16.gmra.mrb[4].mxu1 %v4297_v39  ;;  %2179 = vmatmul.mubr.bf16.gmra.mrb[4].mxu0 %v4298_v40  ;;  %v4393_v39 = vld [vmem:[%s4712_s26 + $0x220] ss:$16 sps:$4 sm:$0xff]   ;;  %v4394_v40 = vld [vmem:[%s4712_s26 + $0x228] ss:$16 sps:$4 sm:$0xff]  }
  0x4f   : > { %1737 = vmatprep.mubr.bf16.mxu1 %v4299_v41  ;;  %2186 = vmatprep.mubr.bf16.mxu0 %v4301_v42  ;;  %v4395_v41 = vld [vmem:[%s4712_s26 + $0x244] ss:$16 sps:$4 sm:$0xff]   ;;  %v4397_v42 = vld [vmem:[%s4712_s26 + $0x24c] ss:$16 sps:$4 sm:$0xff]  }
  0x56   : > { %1738 = vmatmul.mubr.bf16.gmra.mrb[8].mxu1 %v4303_v43  ;;  %2187 = vmatmul.mubr.bf16.gmra.mrb[8].mxu0 %v4304_v44  ;;  %v4399_v43 = vld [vmem:[%s4712_s26 + $0x240] ss:$16 sps:$4 sm:$0xff]   ;;  %v4400_v44 = vld [vmem:[%s4712_s26 + $0x248] ss:$16 sps:$4 sm:$0xff]  }
  0x57   : > { %1745 = vmatprep.mubr.bf16.mxu1 %v4305_v45  ;;  %2194 = vmatprep.mubr.bf16.mxu0 %v4307_v46  ;;  %v4401_v45 = vld [vmem:[%s4712_s26 + $0x264] ss:$16 sps:$4 sm:$0xff]   ;;  %v4403_v46 = vld [vmem:[%s4712_s26 + $0x26c] ss:$16 sps:$4 sm:$0xff]  }
  0x5e   : > { %1746 = vmatmul.mubr.bf16.gmra.mrb[12].mxu1 %v4309_v47  ;;  %2195 = vmatmul.mubr.bf16.gmra.mrb[12].mxu0 %v4310_v48  ;;  %v4405_v47 = vld [vmem:[%s4712_s26 + $0x260] ss:$16 sps:$4 sm:$0xff]   ;;  %v4406_v48 = vld [vmem:[%s4712_s26 + $0x268] ss:$16 sps:$4 sm:$0xff]  }
  0x5f   : > { %1753 = vmatprep.mubr.bf16.mxu1 %v4311_v49  ;;  %2202 = vmatprep.mubr.bf16.mxu0 %v4313_v50  ;;  %v4407_v49 = vld [vmem:[%s4712_s26 + $0x284] ss:$16 sps:$4 sm:$0xff]   ;;  %v4409_v50 = vld [vmem:[%s4712_s26 + $0x28c] ss:$16 sps:$4 sm:$0xff]  }
  0x66   : > { %1754 = vmatmul.mubr.bf16.gmra.mrb[16].mxu1 %v4315_v51  ;;  %2203 = vmatmul.mubr.bf16.gmra.mrb[16].mxu0 %v4316_v52  ;;  %v4411_v51 = vld [vmem:[%s4712_s26 + $0x280] ss:$16 sps:$4 sm:$0xff]   ;;  %v4412_v52 = vld [vmem:[%s4712_s26 + $0x288] ss:$16 sps:$4 sm:$0xff]  }
  0x67   : > { %1761 = vmatprep.mubr.bf16.mxu1 %v4317_v53  ;;  %2210 = vmatprep.mubr.bf16.mxu0 %v4319_v54  ;;  %v4413_v53 = vld [vmem:[%s4712_s26 + $0x2a4] ss:$16 sps:$4 sm:$0xff]   ;;  %v4415_v54 = vld [vmem:[%s4712_s26 + $0x2ac] ss:$16 sps:$4 sm:$0xff]  }
  0x6e   : > { %1762 = vmatmul.mubr.bf16.gmra.mrb[20].mxu1 %v4321_v55  ;;  %2211 = vmatmul.mubr.bf16.gmra.mrb[20].mxu0 %v4322_v56  ;;  %v4417_v55 = vld [vmem:[%s4712_s26 + $0x2a0] ss:$16 sps:$4 sm:$0xff]   ;;  %v4418_v56 = vld [vmem:[%s4712_s26 + $0x2a8] ss:$16 sps:$4 sm:$0xff]  }
  0x6f   : > { %1769 = vmatprep.mubr.bf16.mxu1 %v4323_v57  ;;  %2218 = vmatprep.mubr.bf16.mxu0 %v4325_v58  ;;  %v4419_v57 = vld [vmem:[%s4712_s26 + $0x2c4] ss:$16 sps:$4 sm:$0xff]   ;;  %v4421_v58 = vld [vmem:[%s4712_s26 + $0x2cc] ss:$16 sps:$4 sm:$0xff]  }
  0x76   : > { %1770 = vmatmul.mubr.bf16.gmra.mrb[24].mxu1 %v4327_v59  ;;  %2219 = vmatmul.mubr.bf16.gmra.mrb[24].mxu0 %v4328_v60  ;;  %v4423_v59 = vld [vmem:[%s4712_s26 + $0x2c0] ss:$16 sps:$4 sm:$0xff]   ;;  %v4424_v60 = vld [vmem:[%s4712_s26 + $0x2c8] ss:$16 sps:$4 sm:$0xff]  }
  0x77   : > { %1777 = vmatprep.mubr.bf16.mxu1 %v4329_v61  ;;  %2226 = vmatprep.mubr.bf16.mxu0 %v4331_v62  ;;  %v4425_v61 = vld [vmem:[%s4712_s26 + $0x2e4] ss:$16 sps:$4 sm:$0xff]   ;;  %v4427_v62 = vld [vmem:[%s4712_s26 + $0x2ec] ss:$16 sps:$4 sm:$0xff]  }
  0x7e   : > { %1778 = vmatmul.mubr.bf16.gmra.mrb[28].mxu1 %v4333_v63  ;;  %2227 = vmatmul.mubr.bf16.gmra.mrb[28].mxu0 %v4334_v0  ;;  %v4429_v63 = vld [vmem:[%s4712_s26 + $0x2e0] ss:$16 sps:$4 sm:$0xff]   ;;  %v4430_v0 = vld [vmem:[%s4712_s26 + $0x2e8] ss:$16 sps:$4 sm:$0xff]  }
  0x7f   : > { %1785 = vmatprep.mubr.bf16.mxu1 %v4335_v1  ;;  %2234 = vmatprep.mubr.bf16.mxu0 %v4337_v2  ;;  %v4431_v1 = vld [vmem:[%s4712_s26 + $0x304] ss:$16 sps:$4 sm:$0xff]   ;;  %v4433_v2 = vld [vmem:[%s4712_s26 + $0x30c] ss:$16 sps:$4 sm:$0xff]  }
  0x86   : > { %1786 = vmatmul.mubr.bf16.gmra.mrb[32].mxu1 %v4339_v3  ;;  %2235 = vmatmul.mubr.bf16.gmra.mrb[32].mxu0 %v4340_v4  ;;  %v4435_v3 = vld [vmem:[%s4712_s26 + $0x300] ss:$16 sps:$4 sm:$0xff]   ;;  %v4436_v4 = vld [vmem:[%s4712_s26 + $0x308] ss:$16 sps:$4 sm:$0xff]  }
  0x87   : > { %1793 = vmatprep.mubr.bf16.mxu1 %v4341_v5  ;;  %2242 = vmatprep.mubr.bf16.mxu0 %v4343_v6  ;;  %v4437_v5 = vld [vmem:[%s4712_s26 + $0x324] ss:$16 sps:$4 sm:$0xff]   ;;  %v4439_v6 = vld [vmem:[%s4712_s26 + $0x32c] ss:$16 sps:$4 sm:$0xff]  }
  0x8e   : > { %1794 = vmatmul.mubr.bf16.gmra.mrb[36].mxu1 %v4345_v7  ;;  %2243 = vmatmul.mubr.bf16.gmra.mrb[36].mxu0 %v4346_v8  ;;  %v4441_v7 = vld [vmem:[%s4712_s26 + $0x320] ss:$16 sps:$4 sm:$0xff]   ;;  %v4442_v8 = vld [vmem:[%s4712_s26 + $0x328] ss:$16 sps:$4 sm:$0xff]  }
  0x8f   : > { %1801 = vmatprep.mubr.bf16.mxu1 %v4347_v9  ;;  %2250 = vmatprep.mubr.bf16.mxu0 %v4349_v10  ;;  %v4443_v9 = vld [vmem:[%s4712_s26 + $0x344] ss:$16 sps:$4 sm:$0xff]   ;;  %v4445_v10 = vld [vmem:[%s4712_s26 + $0x34c] ss:$16 sps:$4 sm:$0xff]  }
  0x96   : > { %1802 = vmatmul.mubr.bf16.gmra.mrb[40].mxu1 %v4351_v11  ;;  %2251 = vmatmul.mubr.bf16.gmra.mrb[40].mxu0 %v4352_v12  ;;  %v4447_v11 = vld [vmem:[%s4712_s26 + $0x340] ss:$16 sps:$4 sm:$0xff]   ;;  %v4448_v12 = vld [vmem:[%s4712_s26 + $0x348] ss:$16 sps:$4 sm:$0xff]  }
  0x97   : > { %1809 = vmatprep.mubr.bf16.mxu1 %v4353_v13  ;;  %2258 = vmatprep.mubr.bf16.mxu0 %v4355_v14  ;;  %v4449_v13 = vld [vmem:[%s4712_s26 + $0x364] ss:$16 sps:$4 sm:$0xff]   ;;  %v4451_v14 = vld [vmem:[%s4712_s26 + $0x36c] ss:$16 sps:$4 sm:$0xff]  }
  0x9e   : > { %1810 = vmatmul.mubr.bf16.gmra.mrb[44].mxu1 %v4357_v15  ;;  %2259 = vmatmul.mubr.bf16.gmra.mrb[44].mxu0 %v4358_v16  ;;  %v4888_v15 = vld [vmem:[%s5160_s2] ss:$0 sm:$0xff] }
  0x9f   : > { %1817 = vmatprep.mubr.bf16.mxu1 %v4359_v17  ;;  %2266 = vmatprep.mubr.bf16.mxu0 %v4361_v18 }
  0xa6   : > { %1818 = vmatmul.mubr.bf16.gmra.mrb[48].mxu1 %v4363_v19  ;;  %2267 = vmatmul.mubr.bf16.gmra.mrb[48].mxu0 %v4364_v20  ;;  %v4453_v20 = vld [vmem:[%s4712_s26 + $0x360] ss:$16 sps:$4 sm:$0xff]  }
  0xa7   : > { %1825 = vmatprep.mubr.bf16.mxu1 %v4365_v21  ;;  %2274 = vmatprep.mubr.bf16.mxu0 %v4367_v22 }
  0xae   : > { %1826 = vmatmul.mubr.bf16.gmra.mrb[52].mxu1 %v4369_v23  ;;  %2275 = vmatmul.mubr.bf16.gmra.mrb[52].mxu0 %v4370_v24  ;;  %v4454_v23 = vld [vmem:[%s4712_s26 + $0x368] ss:$16 sps:$4 sm:$0xff]   ;;  %v4455_v24 = vld [vmem:[%s4712_s26 + $0x384] ss:$16 sps:$4 sm:$0xff]  }
  0xaf   : > { %1833 = vmatprep.mubr.bf16.mxu1 %v4371_v25  ;;  %2282 = vmatprep.mubr.bf16.mxu0 %v4373_v26 }
  0xb6   : > { %1834 = vmatmul.mubr.bf16.gmra.mrb[56].mxu1 %v4375_v27  ;;  %2283 = vmatmul.mubr.bf16.gmra.mrb[56].mxu0 %v4376_v28 }
  0xb7   : > { %1841 = vmatprep.mubr.bf16.mxu1 %v4377_v29  ;;  %2290 = vmatprep.mubr.bf16.mxu0 %v4379_v30  ;;  %v4457_v29 = vld [vmem:[%s4712_s26 + $0x38c] ss:$16 sps:$4 sm:$0xff]  }
  0xbe   : > { %1842 = vmatmul.mubr.bf16.gmra.mrb[60].mxu1 %v4381_v31  ;;  %2291 = vmatmul.mubr.bf16.gmra.mrb[60].mxu0 %v4382_v32 }
  0xbf   : > { %1849 = vmatprep.mubr.bf16.mxu1 %v4383_v33  ;;  %2298 = vmatprep.mubr.bf16.mxu0 %v4385_v34 }
  0xc6   : > { %1850 = vmatmul.mubr.bf16.gmra.mrb[64].mxu1 %v4387_v35  ;;  %2299 = vmatmul.mubr.bf16.gmra.mrb[64].mxu0 %v4388_v36 }
  0xc7   : > { %1857 = vmatprep.mubr.bf16.mxu1 %v4389_v37  ;;  %2306 = vmatprep.mubr.bf16.mxu0 %v4391_v38 }
  0xce   : > { %1858 = vmatmul.mubr.bf16.gmra.mrb[68].mxu1 %v4393_v39  ;;  %2307 = vmatmul.mubr.bf16.gmra.mrb[68].mxu0 %v4394_v40  ;;  %v4459_v39 = vld [vmem:[%s4712_s26 + $0x380] ss:$16 sps:$4 sm:$0xff]  }
  0xcf   : > { %1865 = vmatprep.mubr.bf16.mxu1 %v4395_v41  ;;  %2314 = vmatprep.mubr.bf16.mxu0 %v4397_v42  ;;  %v4460_v42 = vld [vmem:[%s4712_s26 + $0x388] ss:$16 sps:$4 sm:$0xff]  }
  0xd6   : > { %1866 = vmatmul.mubr.bf16.gmra.mrb[72].mxu1 %v4399_v43  ;;  %2315 = vmatmul.mubr.bf16.gmra.mrb[72].mxu0 %v4400_v44  ;;  %v4461_v43 = vld [vmem:[%s4712_s26 + $0x3a4] ss:$16 sps:$4 sm:$0xff]  }
  0xd7   : > { %1873 = vmatprep.mubr.bf16.mxu1 %v4401_v45  ;;  %2322 = vmatprep.mubr.bf16.mxu0 %v4403_v46 }
  0xde   : > { %1874 = vmatmul.mubr.bf16.gmra.mrb[76].mxu1 %v4405_v47  ;;  %2323 = vmatmul.mubr.bf16.gmra.mrb[76].mxu0 %v4406_v48  ;;  %v4463_v48 = vld [vmem:[%s4712_s26 + $0x3ac] ss:$16 sps:$4 sm:$0xff]  }
  0xdf   : > { %1881 = vmatprep.mubr.bf16.mxu1 %v4407_v49  ;;  %2330 = vmatprep.mubr.bf16.mxu0 %v4409_v50 }
  0xe6   : > { %1882 = vmatmul.mubr.bf16.gmra.mrb[80].mxu1 %v4411_v51  ;;  %2331 = vmatmul.mubr.bf16.gmra.mrb[80].mxu0 %v4412_v52 }
  0xe7   : > { %1889 = vmatprep.mubr.bf16.mxu1 %v4413_v53  ;;  %2338 = vmatprep.mubr.bf16.mxu0 %v4415_v54 }
  0xee   : > { %1890 = vmatmul.mubr.bf16.gmra.mrb[84].mxu1 %v4417_v55  ;;  %2339 = vmatmul.mubr.bf16.gmra.mrb[84].mxu0 %v4418_v56 }
  0xef   : > { %1897 = vmatprep.mubr.bf16.mxu1 %v4419_v57  ;;  %2346 = vmatprep.mubr.bf16.mxu0 %v4421_v58  ;;  %v4465_v58 = vld [vmem:[%s4712_s26 + $0x3a0] ss:$16 sps:$4 sm:$0xff]  }
  0xf6   : > { %1898 = vmatmul.mubr.bf16.gmra.mrb[88].mxu1 %v4423_v59  ;;  %2347 = vmatmul.mubr.bf16.gmra.mrb[88].mxu0 %v4424_v60 }
  0xf7   : > { %1905 = vmatprep.mubr.bf16.mxu1 %v4425_v61  ;;  %2354 = vmatprep.mubr.bf16.mxu0 %v4427_v62  ;;  %v4466_v61 = vld [vmem:[%s4712_s26 + $0x3a8] ss:$16 sps:$4 sm:$0xff]   ;;  %v4467_v62 = vld [vmem:[%s4712_s26 + $0x3c4] ss:$16 sps:$4 sm:$0xff]  }
  0xfe   : > { %1906 = vmatmul.mubr.bf16.gmra.mrb[92].mxu1 %v4429_v63  ;;  %2355 = vmatmul.mubr.bf16.gmra.mrb[92].mxu0 %v4430_v0 }
  0xff   : > { %1913 = vmatprep.mubr.bf16.mxu1 %v4431_v1  ;;  %2362 = vmatprep.mubr.bf16.mxu0 %v4433_v2 }
 0x106   : > { %1914 = vmatmul.mubr.bf16.gmra.mrb[96].mxu1 %v4435_v3  ;;  %2363 = vmatmul.mubr.bf16.gmra.mrb[96].mxu0 %v4436_v4  ;;  %v4469_v3 = vld [vmem:[%s4712_s26 + $0x3cc] ss:$16 sps:$4 sm:$0xff]  }
 0x107   : > { %1921 = vmatprep.mubr.bf16.mxu1 %v4437_v5  ;;  %2370 = vmatprep.mubr.bf16.mxu0 %v4439_v6 }
 0x10e   : > { %1922 = vmatmul.mubr.bf16.gmra.mrb[100].mxu1 %v4441_v7  ;;  %2371 = vmatmul.mubr.bf16.gmra.mrb[100].mxu0 %v4442_v8 }
 0x10f   : > { %1929 = vmatprep.mubr.bf16.mxu1 %v4443_v9  ;;  %2378 = vmatprep.mubr.bf16.mxu0 %v4445_v10 }
 0x116   : > { %1930 = vmatmul.mubr.bf16.gmra.mrb[104].mxu1 %v4447_v11  ;;  %2379 = vmatmul.mubr.bf16.gmra.mrb[104].mxu0 %v4448_v12 }
 0x117   : > { %1937 = vmatprep.mubr.bf16.mxu1 %v4449_v13  ;;  %2386 = vmatprep.mubr.bf16.mxu0 %v4451_v14  ;;  %v4471_v13 = vld [vmem:[%s4712_s26 + $0x3c0] ss:$16 sps:$4 sm:$0xff]  }
 0x119   : > { %v1723_v16 = vpop.f32.mrb[0].mxu1  ;;  %v2172_v18 = vpop.f32.mrb[0].mxu0 }
 0x11a   : > { %v1724_v17 = vadd.f32 %v4888_v15, %v1723_v16  ;;  %v1725_v19 = vpop.f32.mrb[1].mxu1  ;;  %v2174_v21 = vpop.f32.mrb[1].mxu0 }
 0x11b   : > { %v1726_v22 = vpop.f32.mrb[2].mxu1  ;;  %v2175_v27 = vpop.f32.mrb[2].mxu0 }
 0x11c   : > { %v2173_v25 = vadd.f32 %v2172_v18, %v1724_v17  ;;  %v1727_v26 = vadd.f32 %v4888_v15, %v1726_v22  ;;  %v1728_v28 = vpop.f32.mrb[3].mxu1  ;;  %v2177_v30 = vpop.f32.mrb[3].mxu0  ;;  %v4472_v17 = vld [vmem:[%s4712_s26 + $0x3c8] ss:$16 sps:$4 sm:$0xff]   ;;  %v4473_v18 = vld [vmem:[%s4712_s26 + $0x3e4] ss:$16 sps:$4 sm:$0xff]  }
 0x11e   : > { %v2176_v31 = vadd.f32 %v2175_v27, %v1727_v26  ;;  %1938 = vmatmul.mubr.bf16.gmra.mrb[108].mxu1 %v4453_v20  ;;  %2387 = vmatmul.mubr.bf16.gmra.mrb[108].mxu0 %v4454_v23  ;;  %v2587_v32 = vmax.f32 %v2173_v25, 0.0  ;;  %v4475_v23 = vld [vmem:[%s4712_s26 + $0x3ec] ss:$16 sps:$4 sm:$0xff]  }
 0x11f   : > { %1945 = vmatprep.mubr.bf16.mxu1 %v4455_v24  ;;  %2394 = vmatprep.mubr.bf16.mxu0 %v4457_v29 }
 0x120   : > { %v2588_v33 = vmax.f32 %v2176_v31, 0.0 }
 0x121   : > { %v1731_v34 = vpop.f32.mrb[4].mxu1  ;;  %v2180_v37 = vpop.f32.mrb[4].mxu0 }
 0x122   : > { %v3730_v35 = vpack.c.bf16 %v2588_v33, %v2587_v32  ;;  %v1732_v36 = vadd.f32 %v4888_v15, %v1731_v34  ;;  %v1733_v38 = vpop.f32.mrb[5].mxu1  ;;  %v2182_v40 = vpop.f32.mrb[5].mxu0  ;;  %v4477_v33 = vld [vmem:[%s4712_s26 + $0x3e0] ss:$16 sps:$4 sm:$0xff]  }
 0x123   : > { %v1734_v41 = vpop.f32.mrb[6].mxu1  ;;  %v2183_v46 = vpop.f32.mrb[6].mxu0 }
 0x124   : > { %3731 = vst [vmem:[%s4900_s14] sm:$0xff] %v3730_v35   ;;  %v2181_v44 = vadd.f32 %v2180_v37, %v1732_v36  ;;  %v1735_v45 = vadd.f32 %v4888_v15, %v1734_v41  ;;  %v1736_v47 = vpop.f32.mrb[7].mxu1  ;;  %v2185_v49 = vpop.f32.mrb[7].mxu0  ;;  %v4478_v36 = vld [vmem:[%s4712_s26 + $0x3e8] ss:$16 sps:$4 sm:$0xff]   ;;  %v4479_v37 = vld [vmem:[%s4712_s26 + $0x404] ss:$16 sps:$4 sm:$0xff]  }
 0x126   : > { %v2184_v50 = vadd.f32 %v2183_v46, %v1735_v45  ;;  %1946 = vmatmul.mubr.bf16.gmra.mrb[112].mxu1 %v4459_v39  ;;  %2395 = vmatmul.mubr.bf16.gmra.mrb[112].mxu0 %v4460_v42  ;;  %v2589_v51 = vmax.f32 %v2181_v44, 0.0  ;;  %v4481_v42 = vld [vmem:[%s4712_s26 + $0x40c] ss:$16 sps:$4 sm:$0xff]  }
 0x127   : > { %1953 = vmatprep.mubr.bf16.mxu1 %v4461_v43  ;;  %2402 = vmatprep.mubr.bf16.mxu0 %v4463_v48 }
 0x128   : > { %v2590_v52 = vmax.f32 %v2184_v50, 0.0 }
 0x129   : > { %v1739_v53 = vpop.f32.mrb[8].mxu1  ;;  %v2188_v56 = vpop.f32.mrb[8].mxu0 }
 0x12a   : > { %v3735_v54 = vpack.c.bf16 %v2590_v52, %v2589_v51  ;;  %v1740_v55 = vadd.f32 %v4888_v15, %v1739_v53  ;;  %v1741_v57 = vpop.f32.mrb[9].mxu1  ;;  %v2190_v59 = vpop.f32.mrb[9].mxu0  ;;  %v4483_v52 = vld [vmem:[%s4712_s26 + $0x400] ss:$16 sps:$4 sm:$0xff]  }
 0x12b   : > { %v1742_v60 = vpop.f32.mrb[10].mxu1  ;;  %v2191_v1 = vpop.f32.mrb[10].mxu0 }
 0x12c   : > { %3987 = vst [vmem:[%s4900_s14 + $0x8] sm:$0xff] %v3735_v54   ;;  %v2189_v63 = vadd.f32 %v2188_v56, %v1740_v55  ;;  %v1743_v0 = vadd.f32 %v4888_v15, %v1742_v60  ;;  %v1744_v2 = vpop.f32.mrb[11].mxu1  ;;  %v2193_v4 = vpop.f32.mrb[11].mxu0  ;;  %v4484_v55 = vld [vmem:[%s4712_s26 + $0x408] ss:$16 sps:$4 sm:$0xff]  }
 0x12d   : > { %v4485_v56 = vld [vmem:[%s4712_s26 + $0x424] ss:$16 sps:$4 sm:$0xff]  }
 0x12e   : > { %v2192_v5 = vadd.f32 %v2191_v1, %v1743_v0  ;;  %1954 = vmatmul.mubr.bf16.gmra.mrb[116].mxu1 %v4465_v58  ;;  %2403 = vmatmul.mubr.bf16.gmra.mrb[116].mxu0 %v4466_v61  ;;  %v2591_v6 = vmax.f32 %v2189_v63, 0.0  ;;  %v4487_v61 = vld [vmem:[%s4712_s26 + $0x42c] ss:$16 sps:$4 sm:$0xff]  }
 0x12f   : > { %1961 = vmatprep.mubr.bf16.mxu1 %v4467_v62  ;;  %2410 = vmatprep.mubr.bf16.mxu0 %v4469_v3 }
 0x130   : > { %v2592_v7 = vmax.f32 %v2192_v5, 0.0 }
 0x131   : > { %v1747_v8 = vpop.f32.mrb[12].mxu1  ;;  %v2196_v11 = vpop.f32.mrb[12].mxu0 }
 0x132   : > { %v3740_v9 = vpack.c.bf16 %v2592_v7, %v2591_v6  ;;  %v1748_v10 = vadd.f32 %v4888_v15, %v1747_v8  ;;  %v1749_v12 = vpop.f32.mrb[13].mxu1  ;;  %v2198_v14 = vpop.f32.mrb[13].mxu0  ;;  %v4489_v7 = vld [vmem:[%s4712_s26 + $0x420] ss:$16 sps:$4 sm:$0xff]  }
 0x133   : > { %v1750_v16 = vpop.f32.mrb[14].mxu1  ;;  %v2199_v21 = vpop.f32.mrb[14].mxu0 }
 0x134   : > { %3988 = vst [vmem:[%s4900_s14 + $0x10] sm:$0xff] %v3740_v9   ;;  %v2197_v19 = vadd.f32 %v2196_v11, %v1748_v10  ;;  %v1751_v20 = vadd.f32 %v4888_v15, %v1750_v16  ;;  %v1752_v22 = vpop.f32.mrb[15].mxu1  ;;  %v2201_v24 = vpop.f32.mrb[15].mxu0  ;;  %v4490_v10 = vld [vmem:[%s4712_s26 + $0x428] ss:$16 sps:$4 sm:$0xff]  }
 0x135   : > { %v4491_v11 = vld [vmem:[%s4712_s26 + $0x444] ss:$16 sps:$4 sm:$0xff]  }
 0x136   : > { %v2200_v25 = vadd.f32 %v2199_v21, %v1751_v20  ;;  %1962 = vmatmul.mubr.bf16.gmra.mrb[120].mxu1 %v4471_v13  ;;  %2411 = vmatmul.mubr.bf16.gmra.mrb[120].mxu0 %v4472_v17  ;;  %v2593_v26 = vmax.f32 %v2197_v19, 0.0  ;;  %v4493_v17 = vld [vmem:[%s4712_s26 + $0x44c] ss:$16 sps:$4 sm:$0xff]  }
 0x137   : > { %1969 = vmatprep.mubr.bf16.mxu1 %v4473_v18  ;;  %2418 = vmatprep.mubr.bf16.mxu0 %v4475_v23 }
 0x138   : > { %v2594_v27 = vmax.f32 %v2200_v25, 0.0 }
 0x139   : > { %v1755_v28 = vpop.f32.mrb[16].mxu1  ;;  %v2204_v31 = vpop.f32.mrb[16].mxu0 }
 0x13a   : > { %v3745_v29 = vpack.c.bf16 %v2594_v27, %v2593_v26  ;;  %v1756_v30 = vadd.f32 %v4888_v15, %v1755_v28  ;;  %v1757_v32 = vpop.f32.mrb[17].mxu1  ;;  %v2206_v34 = vpop.f32.mrb[17].mxu0  ;;  %v4495_v27 = vld [vmem:[%s4712_s26 + $0x440] ss:$16 sps:$4 sm:$0xff]  }
 0x13b   : > { %v1758_v35 = vpop.f32.mrb[18].mxu1  ;;  %v2207_v40 = vpop.f32.mrb[18].mxu0 }
 0x13c   : > { %3989 = vst [vmem:[%s4900_s14 + $0x18] sm:$0xff] %v3745_v29   ;;  %v2205_v38 = vadd.f32 %v2204_v31, %v1756_v30  ;;  %v1759_v39 = vadd.f32 %v4888_v15, %v1758_v35  ;;  %v1760_v41 = vpop.f32.mrb[19].mxu1  ;;  %v2209_v43 = vpop.f32.mrb[19].mxu0  ;;  %v4496_v30 = vld [vmem:[%s4712_s26 + $0x448] ss:$16 sps:$4 sm:$0xff]  }
 0x13d   : > { %v4497_v31 = vld [vmem:[%s4712_s26 + $0x464] ss:$16 sps:$4 sm:$0xff]  }
 0x13e   : > { %v2208_v44 = vadd.f32 %v2207_v40, %v1759_v39  ;;  %1970 = vmatmul.mubr.bf16.gmra.mrb[124].mxu1 %v4477_v33  ;;  %2419 = vmatmul.mubr.bf16.gmra.mrb[124].mxu0 %v4478_v36  ;;  %v2595_v45 = vmax.f32 %v2205_v38, 0.0  ;;  %v4499_v36 = vld [vmem:[%s4712_s26 + $0x46c] ss:$16 sps:$4 sm:$0xff]  }
 0x13f   : > { %1977 = vmatprep.mubr.bf16.mxu1 %v4479_v37  ;;  %2426 = vmatprep.mubr.bf16.mxu0 %v4481_v42 }
 0x140   : > { %v2596_v46 = vmax.f32 %v2208_v44, 0.0 }
 0x141   : > { %v1763_v47 = vpop.f32.mrb[20].mxu1  ;;  %v2212_v50 = vpop.f32.mrb[20].mxu0 }
 0x142   : > { %v3750_v48 = vpack.c.bf16 %v2596_v46, %v2595_v45  ;;  %v1764_v49 = vadd.f32 %v4888_v15, %v1763_v47  ;;  %v1765_v51 = vpop.f32.mrb[21].mxu1  ;;  %v2214_v53 = vpop.f32.mrb[21].mxu0  ;;  %v4501_v46 = vld [vmem:[%s4712_s26 + $0x460] ss:$16 sps:$4 sm:$0xff]  }
 0x143   : > { %v1766_v54 = vpop.f32.mrb[22].mxu1  ;;  %v2215_v59 = vpop.f32.mrb[22].mxu0 }
 0x144   : > { %3990 = vst [vmem:[%s4900_s14 + $0x20] sm:$0xff] %v3750_v48   ;;  %v2213_v57 = vadd.f32 %v2212_v50, %v1764_v49  ;;  %v1767_v58 = vadd.f32 %v4888_v15, %v1766_v54  ;;  %v1768_v60 = vpop.f32.mrb[23].mxu1  ;;  %v2217_v62 = vpop.f32.mrb[23].mxu0  ;;  %v4502_v49 = vld [vmem:[%s4712_s26 + $0x468] ss:$16 sps:$4 sm:$0xff]  }
 0x145   : > { %v4503_v50 = vld [vmem:[%s4712_s26 + $0x484] ss:$16 sps:$4 sm:$0xff]  }
 0x146   : > { %v2216_v63 = vadd.f32 %v2215_v59, %v1767_v58  ;;  %1978 = vmatmul.mubr.bf16.gmra.mrb[128].mxu1 %v4483_v52  ;;  %2427 = vmatmul.mubr.bf16.gmra.mrb[128].mxu0 %v4484_v55  ;;  %v2597_v0 = vmax.f32 %v2213_v57, 0.0  ;;  %v4505_v55 = vld [vmem:[%s4712_s26 + $0x48c] ss:$16 sps:$4 sm:$0xff]  }
 0x147   : > { %1985 = vmatprep.mubr.bf16.mxu1 %v4485_v56  ;;  %2434 = vmatprep.mubr.bf16.mxu0 %v4487_v61 }
 0x148   : > { %v2598_v1 = vmax.f32 %v2216_v63, 0.0 }
 0x149   : > { %v1771_v2 = vpop.f32.mrb[24].mxu1  ;;  %v2220_v5 = vpop.f32.mrb[24].mxu0 }
 0x14a   : > { %v3755_v3 = vpack.c.bf16 %v2598_v1, %v2597_v0  ;;  %v1772_v4 = vadd.f32 %v4888_v15, %v1771_v2  ;;  %v1773_v6 = vpop.f32.mrb[25].mxu1  ;;  %v2222_v8 = vpop.f32.mrb[25].mxu0  ;;  %v4507_v1 = vld [vmem:[%s4712_s26 + $0x480] ss:$16 sps:$4 sm:$0xff]  }
 0x14b   : > { %v1774_v9 = vpop.f32.mrb[26].mxu1  ;;  %v2223_v14 = vpop.f32.mrb[26].mxu0 }
 0x14c   : > { %3991 = vst [vmem:[%s4900_s14 + $0x28] sm:$0xff] %v3755_v3   ;;  %v2221_v12 = vadd.f32 %v2220_v5, %v1772_v4  ;;  %v1775_v13 = vadd.f32 %v4888_v15, %v1774_v9  ;;  %v1776_v16 = vpop.f32.mrb[27].mxu1  ;;  %v2225_v18 = vpop.f32.mrb[27].mxu0  ;;  %v4508_v4 = vld [vmem:[%s4712_s26 + $0x488] ss:$16 sps:$4 sm:$0xff]  }
 0x14d   : > { %v4509_v5 = vld [vmem:[%s4712_s26 + $0x4a4] ss:$16 sps:$4 sm:$0xff]  }
 0x14e   : > { %v2224_v19 = vadd.f32 %v2223_v14, %v1775_v13  ;;  %1986 = vmatmul.mubr.bf16.gmra.mrb[132].mxu1 %v4489_v7  ;;  %2435 = vmatmul.mubr.bf16.gmra.mrb[132].mxu0 %v4490_v10  ;;  %v2599_v20 = vmax.f32 %v2221_v12, 0.0  ;;  %v4511_v10 = vld [vmem:[%s4712_s26 + $0x4ac] ss:$16 sps:$4 sm:$0xff]  }
 0x14f   : > { %1993 = vmatprep.mubr.bf16.mxu1 %v4491_v11  ;;  %2442 = vmatprep.mubr.bf16.mxu0 %v4493_v17 }
 0x150   : > { %v2600_v21 = vmax.f32 %v2224_v19, 0.0 }
 0x151   : > { %v1779_v22 = vpop.f32.mrb[28].mxu1  ;;  %v2228_v25 = vpop.f32.mrb[28].mxu0 }
 0x152   : > { %v3760_v23 = vpack.c.bf16 %v2600_v21, %v2599_v20  ;;  %v1780_v24 = vadd.f32 %v4888_v15, %v1779_v22  ;;  %v1781_v26 = vpop.f32.mrb[29].mxu1  ;;  %v2230_v28 = vpop.f32.mrb[29].mxu0  ;;  %v4513_v21 = vld [vmem:[%s4712_s26 + $0x4a0] ss:$16 sps:$4 sm:$0xff]  }
 0x153   : > { %v1782_v29 = vpop.f32.mrb[30].mxu1  ;;  %v2231_v34 = vpop.f32.mrb[30].mxu0 }
 0x154   : > { %3992 = vst [vmem:[%s4900_s14 + $0x30] sm:$0xff] %v3760_v23   ;;  %v2229_v32 = vadd.f32 %v2228_v25, %v1780_v24  ;;  %v1783_v33 = vadd.f32 %v4888_v15, %v1782_v29  ;;  %v1784_v35 = vpop.f32.mrb[31].mxu1  ;;  %v2233_v37 = vpop.f32.mrb[31].mxu0  ;;  %v4514_v24 = vld [vmem:[%s4712_s26 + $0x4a8] ss:$16 sps:$4 sm:$0xff]  }
 0x155   : > { %v4515_v25 = vld [vmem:[%s4712_s26 + $0x4c4] ss:$16 sps:$4 sm:$0xff]  }
 0x156   : > { %v2232_v38 = vadd.f32 %v2231_v34, %v1783_v33  ;;  %1994 = vmatmul.mubr.bf16.gmra.mrb[136].mxu1 %v4495_v27  ;;  %2443 = vmatmul.mubr.bf16.gmra.mrb[136].mxu0 %v4496_v30  ;;  %v2601_v39 = vmax.f32 %v2229_v32, 0.0  ;;  %v4517_v30 = vld [vmem:[%s4712_s26 + $0x4cc] ss:$16 sps:$4 sm:$0xff]  }
 0x157   : > { %2001 = vmatprep.mubr.bf16.mxu1 %v4497_v31  ;;  %2450 = vmatprep.mubr.bf16.mxu0 %v4499_v36 }
 0x158   : > { %v2602_v40 = vmax.f32 %v2232_v38, 0.0 }
 0x159   : > { %v1787_v41 = vpop.f32.mrb[32].mxu1  ;;  %v2236_v44 = vpop.f32.mrb[32].mxu0 }
 0x15a   : > { %v3765_v42 = vpack.c.bf16 %v2602_v40, %v2601_v39  ;;  %v1788_v43 = vadd.f32 %v4888_v15, %v1787_v41  ;;  %v1789_v45 = vpop.f32.mrb[33].mxu1  ;;  %v2238_v47 = vpop.f32.mrb[33].mxu0  ;;  %v4519_v40 = vld [vmem:[%s4712_s26 + $0x4c0] ss:$16 sps:$4 sm:$0xff]  }
 0x15b   : > { %v1790_v48 = vpop.f32.mrb[34].mxu1  ;;  %v2239_v53 = vpop.f32.mrb[34].mxu0 }
 0x15c   : > { %3993 = vst [vmem:[%s4900_s14 + $0x38] sm:$0xff] %v3765_v42   ;;  %v2237_v51 = vadd.f32 %v2236_v44, %v1788_v43  ;;  %v1791_v52 = vadd.f32 %v4888_v15, %v1790_v48  ;;  %v1792_v54 = vpop.f32.mrb[35].mxu1  ;;  %v2241_v56 = vpop.f32.mrb[35].mxu0  ;;  %v4520_v43 = vld [vmem:[%s4712_s26 + $0x4c8] ss:$16 sps:$4 sm:$0xff]  }
 0x15d   : > { %v4521_v44 = vld [vmem:[%s4712_s26 + $0x4e4] ss:$16 sps:$4 sm:$0xff]  }
 0x15e   : > { %v2240_v57 = vadd.f32 %v2239_v53, %v1791_v52  ;;  %2002 = vmatmul.mubr.bf16.gmra.mrb[140].mxu1 %v4501_v46  ;;  %2451 = vmatmul.mubr.bf16.gmra.mrb[140].mxu0 %v4502_v49  ;;  %v2603_v58 = vmax.f32 %v2237_v51, 0.0  ;;  %v4523_v49 = vld [vmem:[%s4712_s26 + $0x4ec] ss:$16 sps:$4 sm:$0xff]  }
 0x15f   : > { %2009 = vmatprep.mubr.bf16.mxu1 %v4503_v50  ;;  %2458 = vmatprep.mubr.bf16.mxu0 %v4505_v55 }
 0x160   : > { %v2604_v59 = vmax.f32 %v2240_v57, 0.0 }
 0x161   : > { %v1795_v60 = vpop.f32.mrb[36].mxu1  ;;  %v2244_v63 = vpop.f32.mrb[36].mxu0 }
 0x162   : > { %v3770_v61 = vpack.c.bf16 %v2604_v59, %v2603_v58  ;;  %v1796_v62 = vadd.f32 %v4888_v15, %v1795_v60  ;;  %v1797_v0 = vpop.f32.mrb[37].mxu1  ;;  %v2246_v2 = vpop.f32.mrb[37].mxu0  ;;  %v4525_v59 = vld [vmem:[%s4712_s26 + $0x4e0] ss:$16 sps:$4 sm:$0xff]  }
 0x163   : > { %v1798_v3 = vpop.f32.mrb[38].mxu1  ;;  %v2247_v8 = vpop.f32.mrb[38].mxu0 }
 0x164   : > { %3994 = vst [vmem:[%s4900_s14 + $0x40] sm:$0xff] %v3770_v61   ;;  %v2245_v6 = vadd.f32 %v2244_v63, %v1796_v62  ;;  %v1799_v7 = vadd.f32 %v4888_v15, %v1798_v3  ;;  %v1800_v9 = vpop.f32.mrb[39].mxu1  ;;  %v2249_v11 = vpop.f32.mrb[39].mxu0  ;;  %v4526_v62 = vld [vmem:[%s4712_s26 + $0x4e8] ss:$16 sps:$4 sm:$0xff]  }
 0x165   : > { %v4527_v63 = vld [vmem:[%s4712_s26 + $0x504] ss:$16 sps:$4 sm:$0xff]  }
 0x166   : > { %v2248_v12 = vadd.f32 %v2247_v8, %v1799_v7  ;;  %2010 = vmatmul.mubr.bf16.gmra.mrb[144].mxu1 %v4507_v1  ;;  %2459 = vmatmul.mubr.bf16.gmra.mrb[144].mxu0 %v4508_v4  ;;  %v2605_v13 = vmax.f32 %v2245_v6, 0.0  ;;  %v4529_v4 = vld [vmem:[%s4712_s26 + $0x50c] ss:$16 sps:$4 sm:$0xff]  }
 0x167   : > { %2017 = vmatprep.mubr.bf16.mxu1 %v4509_v5  ;;  %2466 = vmatprep.mubr.bf16.mxu0 %v4511_v10 }
 0x168   : > { %v2606_v14 = vmax.f32 %v2248_v12, 0.0 }
 0x169   : > { %v1803_v16 = vpop.f32.mrb[40].mxu1  ;;  %v2252_v19 = vpop.f32.mrb[40].mxu0 }
 0x16a   : > { %v3775_v17 = vpack.c.bf16 %v2606_v14, %v2605_v13  ;;  %v1804_v18 = vadd.f32 %v4888_v15, %v1803_v16  ;;  %v1805_v20 = vpop.f32.mrb[41].mxu1  ;;  %v2254_v22 = vpop.f32.mrb[41].mxu0  ;;  %v4531_v14 = vld [vmem:[%s4712_s26 + $0x500] ss:$16 sps:$4 sm:$0xff]  }
 0x16b   : > { %v1806_v23 = vpop.f32.mrb[42].mxu1  ;;  %v2255_v28 = vpop.f32.mrb[42].mxu0 }
 0x16c   : > { %3995 = vst [vmem:[%s4900_s14 + $0x48] sm:$0xff] %v3775_v17   ;;  %v2253_v26 = vadd.f32 %v2252_v19, %v1804_v18  ;;  %v1807_v27 = vadd.f32 %v4888_v15, %v1806_v23  ;;  %v1808_v29 = vpop.f32.mrb[43].mxu1  ;;  %v2257_v31 = vpop.f32.mrb[43].mxu0  ;;  %v4532_v18 = vld [vmem:[%s4712_s26 + $0x508] ss:$16 sps:$4 sm:$0xff]  }
 0x16d   : > { %v4533_v19 = vld [vmem:[%s4712_s26 + $0x524] ss:$16 sps:$4 sm:$0xff]  }
 0x16e   : > { %v2256_v32 = vadd.f32 %v2255_v28, %v1807_v27  ;;  %2018 = vmatmul.mubr.bf16.gmra.mrb[148].mxu1 %v4513_v21  ;;  %2467 = vmatmul.mubr.bf16.gmra.mrb[148].mxu0 %v4514_v24  ;;  %v2607_v33 = vmax.f32 %v2253_v26, 0.0  ;;  %v4535_v24 = vld [vmem:[%s4712_s26 + $0x52c] ss:$16 sps:$4 sm:$0xff]  }
 0x16f   : > { %2025 = vmatprep.mubr.bf16.mxu1 %v4515_v25  ;;  %2474 = vmatprep.mubr.bf16.mxu0 %v4517_v30 }
 0x170   : > { %v2608_v34 = vmax.f32 %v2256_v32, 0.0 }
 0x171   : > { %v1811_v35 = vpop.f32.mrb[44].mxu1  ;;  %v2260_v38 = vpop.f32.mrb[44].mxu0 }
 0x172   : > { %v3780_v36 = vpack.c.bf16 %v2608_v34, %v2607_v33  ;;  %v1812_v37 = vadd.f32 %v4888_v15, %v1811_v35  ;;  %v1813_v39 = vpop.f32.mrb[45].mxu1  ;;  %v2262_v41 = vpop.f32.mrb[45].mxu0  ;;  %v4537_v34 = vld [vmem:[%s4712_s26 + $0x520] ss:$16 sps:$4 sm:$0xff]  }
 0x173   : > { %v1814_v42 = vpop.f32.mrb[46].mxu1  ;;  %v2263_v47 = vpop.f32.mrb[46].mxu0 }
 0x174   : > { %3996 = vst [vmem:[%s4900_s14 + $0x50] sm:$0xff] %v3780_v36   ;;  %v2261_v45 = vadd.f32 %v2260_v38, %v1812_v37  ;;  %v1815_v46 = vadd.f32 %v4888_v15, %v1814_v42  ;;  %v1816_v48 = vpop.f32.mrb[47].mxu1  ;;  %v2265_v50 = vpop.f32.mrb[47].mxu0  ;;  %v4538_v37 = vld [vmem:[%s4712_s26 + $0x528] ss:$16 sps:$4 sm:$0xff]  }
 0x175   : > { %v4539_v38 = vld [vmem:[%s4712_s26 + $0x544] ss:$16 sps:$4 sm:$0xff]  }
 0x176   : > { %v2264_v51 = vadd.f32 %v2263_v47, %v1815_v46  ;;  %2026 = vmatmul.mubr.bf16.gmra.mrb[152].mxu1 %v4519_v40  ;;  %2475 = vmatmul.mubr.bf16.gmra.mrb[152].mxu0 %v4520_v43  ;;  %v2609_v52 = vmax.f32 %v2261_v45, 0.0  ;;  %v4541_v43 = vld [vmem:[%s4712_s26 + $0x54c] ss:$16 sps:$4 sm:$0xff]  }
 0x177   : > { %2033 = vmatprep.mubr.bf16.mxu1 %v4521_v44  ;;  %2482 = vmatprep.mubr.bf16.mxu0 %v4523_v49 }
 0x178   : > { %v2610_v53 = vmax.f32 %v2264_v51, 0.0 }
 0x179   : > { %v1819_v54 = vpop.f32.mrb[48].mxu1  ;;  %v2268_v57 = vpop.f32.mrb[48].mxu0 }
 0x17a   : > { %v3785_v55 = vpack.c.bf16 %v2610_v53, %v2609_v52  ;;  %v1820_v56 = vadd.f32 %v4888_v15, %v1819_v54  ;;  %v1821_v58 = vpop.f32.mrb[49].mxu1  ;;  %v2270_v60 = vpop.f32.mrb[49].mxu0  ;;  %v4543_v53 = vld [vmem:[%s4712_s26 + $0x540] ss:$16 sps:$4 sm:$0xff]  }
 0x17b   : > { %v1822_v61 = vpop.f32.mrb[50].mxu1  ;;  %v2271_v2 = vpop.f32.mrb[50].mxu0 }
 0x17c   : > { %3997 = vst [vmem:[%s4900_s14 + $0x58] sm:$0xff] %v3785_v55   ;;  %v2269_v0 = vadd.f32 %v2268_v57, %v1820_v56  ;;  %v1823_v1 = vadd.f32 %v4888_v15, %v1822_v61  ;;  %v1824_v3 = vpop.f32.mrb[51].mxu1  ;;  %v2273_v5 = vpop.f32.mrb[51].mxu0  ;;  %v4544_v56 = vld [vmem:[%s4712_s26 + $0x548] ss:$16 sps:$4 sm:$0xff]  }
 0x17d   : > { %v4545_v57 = vld [vmem:[%s4712_s26 + $0x564] ss:$16 sps:$4 sm:$0xff]  }
 0x17e   : > { %v2272_v6 = vadd.f32 %v2271_v2, %v1823_v1  ;;  %2034 = vmatmul.mubr.bf16.gmra.mrb[156].mxu1 %v4525_v59  ;;  %2483 = vmatmul.mubr.bf16.gmra.mrb[156].mxu0 %v4526_v62  ;;  %v2611_v7 = vmax.f32 %v2269_v0, 0.0  ;;  %v4547_v62 = vld [vmem:[%s4712_s26 + $0x56c] ss:$16 sps:$4 sm:$0xff]  }
 0x17f   : > { %2041 = vmatprep.mubr.bf16.mxu1 %v4527_v63  ;;  %2490 = vmatprep.mubr.bf16.mxu0 %v4529_v4 }
 0x180   : > { %v2612_v8 = vmax.f32 %v2272_v6, 0.0 }
 0x181   : > { %v1827_v9 = vpop.f32.mrb[52].mxu1  ;;  %v2276_v12 = vpop.f32.mrb[52].mxu0 }
 0x182   : > { %v3790_v10 = vpack.c.bf16 %v2612_v8, %v2611_v7  ;;  %v1828_v11 = vadd.f32 %v4888_v15, %v1827_v9  ;;  %v1829_v13 = vpop.f32.mrb[53].mxu1  ;;  %v2278_v16 = vpop.f32.mrb[53].mxu0  ;;  %v4549_v8 = vld [vmem:[%s4712_s26 + $0x560] ss:$16 sps:$4 sm:$0xff]  }
 0x183   : > { %v1830_v17 = vpop.f32.mrb[54].mxu1  ;;  %v2279_v22 = vpop.f32.mrb[54].mxu0 }
 0x184   : > { %3998 = vst [vmem:[%s4900_s14 + $0x60] sm:$0xff] %v3790_v10   ;;  %v2277_v20 = vadd.f32 %v2276_v12, %v1828_v11  ;;  %v1831_v21 = vadd.f32 %v4888_v15, %v1830_v17  ;;  %v1832_v23 = vpop.f32.mrb[55].mxu1  ;;  %v2281_v25 = vpop.f32.mrb[55].mxu0  ;;  %v4550_v11 = vld [vmem:[%s4712_s26 + $0x568] ss:$16 sps:$4 sm:$0xff]  }
 0x185   : > { %v4551_v12 = vld [vmem:[%s4712_s26 + $0x584] ss:$16 sps:$4 sm:$0xff]  }
 0x186   : > { %v2280_v26 = vadd.f32 %v2279_v22, %v1831_v21  ;;  %2042 = vmatmul.mubr.bf16.gmra.mrb[160].mxu1 %v4531_v14  ;;  %2491 = vmatmul.mubr.bf16.gmra.mrb[160].mxu0 %v4532_v18  ;;  %v2613_v27 = vmax.f32 %v2277_v20, 0.0  ;;  %v4553_v18 = vld [vmem:[%s4712_s26 + $0x58c] ss:$16 sps:$4 sm:$0xff]  }
 0x187   : > { %2049 = vmatprep.mubr.bf16.mxu1 %v4533_v19  ;;  %2498 = vmatprep.mubr.bf16.mxu0 %v4535_v24 }
 0x188   : > { %v2614_v28 = vmax.f32 %v2280_v26, 0.0 }
 0x189   : > { %v1835_v29 = vpop.f32.mrb[56].mxu1  ;;  %v2284_v32 = vpop.f32.mrb[56].mxu0 }
 0x18a   : > { %v3795_v30 = vpack.c.bf16 %v2614_v28, %v2613_v27  ;;  %v1836_v31 = vadd.f32 %v4888_v15, %v1835_v29  ;;  %v1837_v33 = vpop.f32.mrb[57].mxu1  ;;  %v2286_v35 = vpop.f32.mrb[57].mxu0  ;;  %v4555_v28 = vld [vmem:[%s4712_s26 + $0x580] ss:$16 sps:$4 sm:$0xff]  }
 0x18b   : > { %v1838_v36 = vpop.f32.mrb[58].mxu1  ;;  %v2287_v41 = vpop.f32.mrb[58].mxu0 }
 0x18c   : > { %3999 = vst [vmem:[%s4900_s14 + $0x68] sm:$0xff] %v3795_v30   ;;  %v2285_v39 = vadd.f32 %v2284_v32, %v1836_v31  ;;  %v1839_v40 = vadd.f32 %v4888_v15, %v1838_v36  ;;  %v1840_v42 = vpop.f32.mrb[59].mxu1  ;;  %v2289_v44 = vpop.f32.mrb[59].mxu0  ;;  %v4556_v31 = vld [vmem:[%s4712_s26 + $0x588] ss:$16 sps:$4 sm:$0xff]  }
 0x18d   : > { %v4557_v32 = vld [vmem:[%s4712_s26 + $0x5a4] ss:$16 sps:$4 sm:$0xff]  }
 0x18e   : > { %v2288_v45 = vadd.f32 %v2287_v41, %v1839_v40  ;;  %2050 = vmatmul.mubr.bf16.gmra.mrb[164].mxu1 %v4537_v34  ;;  %2499 = vmatmul.mubr.bf16.gmra.mrb[164].mxu0 %v4538_v37  ;;  %v2615_v46 = vmax.f32 %v2285_v39, 0.0  ;;  %v4559_v37 = vld [vmem:[%s4712_s26 + $0x5ac] ss:$16 sps:$4 sm:$0xff]  }
 0x18f   : > { %2057 = vmatprep.mubr.bf16.mxu1 %v4539_v38  ;;  %2506 = vmatprep.mubr.bf16.mxu0 %v4541_v43 }
 0x190   : > { %v2616_v47 = vmax.f32 %v2288_v45, 0.0 }
 0x191   : > { %v1843_v48 = vpop.f32.mrb[60].mxu1  ;;  %v2292_v51 = vpop.f32.mrb[60].mxu0 }
 0x192   : > { %v3800_v49 = vpack.c.bf16 %v2616_v47, %v2615_v46  ;;  %v1844_v50 = vadd.f32 %v4888_v15, %v1843_v48  ;;  %v1845_v52 = vpop.f32.mrb[61].mxu1  ;;  %v2294_v54 = vpop.f32.mrb[61].mxu0  ;;  %v4561_v47 = vld [vmem:[%s4712_s26 + $0x5a0] ss:$16 sps:$4 sm:$0xff]  }
 0x193   : > { %v1846_v55 = vpop.f32.mrb[62].mxu1  ;;  %v2295_v60 = vpop.f32.mrb[62].mxu0 }
 0x194   : > { %4000 = vst [vmem:[%s4900_s14 + $0x70] sm:$0xff] %v3800_v49   ;;  %v2293_v58 = vadd.f32 %v2292_v51, %v1844_v50  ;;  %v1847_v59 = vadd.f32 %v4888_v15, %v1846_v55  ;;  %v1848_v61 = vpop.f32.mrb[63].mxu1  ;;  %v2297_v63 = vpop.f32.mrb[63].mxu0  ;;  %v4562_v50 = vld [vmem:[%s4712_s26 + $0x5a8] ss:$16 sps:$4 sm:$0xff]  }
 0x195   : > { %v4563_v51 = vld [vmem:[%s4712_s26 + $0x5c4] ss:$16 sps:$4 sm:$0xff]  }
 0x196   : > { %v2296_v0 = vadd.f32 %v2295_v60, %v1847_v59  ;;  %2058 = vmatmul.mubr.bf16.gmra.mrb[168].mxu1 %v4543_v53  ;;  %2507 = vmatmul.mubr.bf16.gmra.mrb[168].mxu0 %v4544_v56  ;;  %v2617_v1 = vmax.f32 %v2293_v58, 0.0  ;;  %v4565_v56 = vld [vmem:[%s4712_s26 + $0x5cc] ss:$16 sps:$4 sm:$0xff]  }
 0x197   : > { %2065 = vmatprep.mubr.bf16.mxu1 %v4545_v57  ;;  %2514 = vmatprep.mubr.bf16.mxu0 %v4547_v62 }
 0x198   : > { %v2618_v2 = vmax.f32 %v2296_v0, 0.0 }
 0x199   : > { %v1851_v3 = vpop.f32.mrb[64].mxu1  ;;  %v2300_v6 = vpop.f32.mrb[64].mxu0 }
 0x19a   : > { %v3805_v4 = vpack.c.bf16 %v2618_v2, %v2617_v1  ;;  %v1852_v5 = vadd.f32 %v4888_v15, %v1851_v3  ;;  %v1853_v7 = vpop.f32.mrb[65].mxu1  ;;  %v2302_v9 = vpop.f32.mrb[65].mxu0  ;;  %v4567_v2 = vld [vmem:[%s4712_s26 + $0x5c0] ss:$16 sps:$4 sm:$0xff]  }
 0x19b   : > { %v1854_v10 = vpop.f32.mrb[66].mxu1  ;;  %v2303_v16 = vpop.f32.mrb[66].mxu0 }
 0x19c   : > { %4001 = vst [vmem:[%s4900_s14 + $0x78] sm:$0xff] %v3805_v4   ;;  %v2301_v13 = vadd.f32 %v2300_v6, %v1852_v5  ;;  %v1855_v14 = vadd.f32 %v4888_v15, %v1854_v10  ;;  %v1856_v17 = vpop.f32.mrb[67].mxu1  ;;  %v2305_v19 = vpop.f32.mrb[67].mxu0  ;;  %v4568_v5 = vld [vmem:[%s4712_s26 + $0x5c8] ss:$16 sps:$4 sm:$0xff]  }
 0x19d   : > { %v4569_v6 = vld [vmem:[%s4712_s26 + $0x5e4] ss:$16 sps:$4 sm:$0xff]  }
 0x19e   : > { %v2304_v20 = vadd.f32 %v2303_v16, %v1855_v14  ;;  %2066 = vmatmul.mubr.bf16.gmra.mrb[172].mxu1 %v4549_v8  ;;  %2515 = vmatmul.mubr.bf16.gmra.mrb[172].mxu0 %v4550_v11  ;;  %v2619_v21 = vmax.f32 %v2301_v13, 0.0  ;;  %v4571_v11 = vld [vmem:[%s4712_s26 + $0x5ec] ss:$16 sps:$4 sm:$0xff]  }
 0x19f   : > { %2073 = vmatprep.mubr.bf16.mxu1 %v4551_v12  ;;  %2522 = vmatprep.mubr.bf16.mxu0 %v4553_v18 }
 0x1a0   : > { %v2620_v22 = vmax.f32 %v2304_v20, 0.0 }
 0x1a1   : > { %v1859_v23 = vpop.f32.mrb[68].mxu1  ;;  %v2308_v26 = vpop.f32.mrb[68].mxu0 }
 0x1a2   : > { %v3810_v24 = vpack.c.bf16 %v2620_v22, %v2619_v21  ;;  %v1860_v25 = vadd.f32 %v4888_v15, %v1859_v23  ;;  %v1861_v27 = vpop.f32.mrb[69].mxu1  ;;  %v2310_v29 = vpop.f32.mrb[69].mxu0  ;;  %v4573_v22 = vld [vmem:[%s4712_s26 + $0x5e0] ss:$16 sps:$4 sm:$0xff]  }
 0x1a3   : > { %v1862_v30 = vpop.f32.mrb[70].mxu1  ;;  %v2311_v35 = vpop.f32.mrb[70].mxu0 }
 0x1a4   : > { %4002 = vst [vmem:[%s4900_s14 + $0x80] sm:$0xff] %v3810_v24   ;;  %v2309_v33 = vadd.f32 %v2308_v26, %v1860_v25  ;;  %v1863_v34 = vadd.f32 %v4888_v15, %v1862_v30  ;;  %v1864_v36 = vpop.f32.mrb[71].mxu1  ;;  %v2313_v38 = vpop.f32.mrb[71].mxu0  ;;  %v4574_v25 = vld [vmem:[%s4712_s26 + $0x5e8] ss:$16 sps:$4 sm:$0xff]  }
 0x1a5   : > { %v4575_v26 = vld [vmem:[%s4712_s26 + $0x604] ss:$16 sps:$4 sm:$0xff]  }
 0x1a6   : > { %v2312_v39 = vadd.f32 %v2311_v35, %v1863_v34  ;;  %2074 = vmatmul.mubr.bf16.gmra.mrb[176].mxu1 %v4555_v28  ;;  %2523 = vmatmul.mubr.bf16.gmra.mrb[176].mxu0 %v4556_v31  ;;  %v2621_v40 = vmax.f32 %v2309_v33, 0.0  ;;  %v4577_v31 = vld [vmem:[%s4712_s26 + $0x60c] ss:$16 sps:$4 sm:$0xff]  }
 0x1a7   : > { %2081 = vmatprep.mubr.bf16.mxu1 %v4557_v32  ;;  %2530 = vmatprep.mubr.bf16.mxu0 %v4559_v37 }
 0x1a8   : > { %v2622_v41 = vmax.f32 %v2312_v39, 0.0 }
 0x1a9   : > { %v1867_v42 = vpop.f32.mrb[72].mxu1  ;;  %v2316_v45 = vpop.f32.mrb[72].mxu0 }
 0x1aa   : > { %v3815_v43 = vpack.c.bf16 %v2622_v41, %v2621_v40  ;;  %v1868_v44 = vadd.f32 %v4888_v15, %v1867_v42  ;;  %v1869_v46 = vpop.f32.mrb[73].mxu1  ;;  %v2318_v48 = vpop.f32.mrb[73].mxu0  ;;  %v4579_v41 = vld [vmem:[%s4712_s26 + $0x600] ss:$16 sps:$4 sm:$0xff]  }
 0x1ab   : > { %v1870_v49 = vpop.f32.mrb[74].mxu1  ;;  %v2319_v54 = vpop.f32.mrb[74].mxu0 }
 0x1ac   : > { %4003 = vst [vmem:[%s4900_s14 + $0x88] sm:$0xff] %v3815_v43   ;;  %v2317_v52 = vadd.f32 %v2316_v45, %v1868_v44  ;;  %v1871_v53 = vadd.f32 %v4888_v15, %v1870_v49  ;;  %v1872_v55 = vpop.f32.mrb[75].mxu1  ;;  %v2321_v57 = vpop.f32.mrb[75].mxu0  ;;  %v4580_v44 = vld [vmem:[%s4712_s26 + $0x608] ss:$16 sps:$4 sm:$0xff]  }
 0x1ad   : > { %v4581_v45 = vld [vmem:[%s4712_s26 + $0x624] ss:$16 sps:$4 sm:$0xff]  }
 0x1ae   : > { %v2320_v58 = vadd.f32 %v2319_v54, %v1871_v53  ;;  %2082 = vmatmul.mubr.bf16.gmra.mrb[180].mxu1 %v4561_v47  ;;  %2531 = vmatmul.mubr.bf16.gmra.mrb[180].mxu0 %v4562_v50  ;;  %v2623_v59 = vmax.f32 %v2317_v52, 0.0  ;;  %v5050_v47 = vld [vmem:[%s5160_s2] ss:$0 sm:$0xff] }
 0x1af   : > { %2089 = vmatprep.mubr.bf16.mxu1 %v4563_v51  ;;  %2538 = vmatprep.mubr.bf16.mxu0 %v4565_v56 }
 0x1b0   : > { %v2624_v60 = vmax.f32 %v2320_v58, 0.0 }
 0x1b1   : > { %v1875_v61 = vpop.f32.mrb[76].mxu1  ;;  %v2324_v0 = vpop.f32.mrb[76].mxu0 }
 0x1b2   : > { %v3820_v62 = vpack.c.bf16 %v2624_v60, %v2623_v59  ;;  %v1876_v63 = vadd.f32 %v4888_v15, %v1875_v61  ;;  %v1877_v1 = vpop.f32.mrb[77].mxu1  ;;  %v2326_v3 = vpop.f32.mrb[77].mxu0  ;;  %v4585_v60 = vld [vmem:[%s4712_s26 + $0x620] ss:$16 sps:$4 sm:$0xff]  }
 0x1b3   : > { %v1878_v4 = vpop.f32.mrb[78].mxu1  ;;  %v2327_v9 = vpop.f32.mrb[78].mxu0 }
 0x1b4   : > { %4004 = vst [vmem:[%s4900_s14 + $0x90] sm:$0xff] %v3820_v62   ;;  %v2325_v7 = vadd.f32 %v2324_v0, %v1876_v63  ;;  %v1879_v8 = vadd.f32 %v4888_v15, %v1878_v4  ;;  %v1880_v10 = vpop.f32.mrb[79].mxu1  ;;  %v2329_v12 = vpop.f32.mrb[79].mxu0  ;;  %v4586_v63 = vld [vmem:[%s4712_s26 + $0x628] ss:$16 sps:$4 sm:$0xff]  }
 0x1b5   : > { %v4587_v0 = vld [vmem:[%s4712_s26 + $0x644] ss:$16 sps:$4 sm:$0xff]  }
 0x1b6   : > { %v2328_v13 = vadd.f32 %v2327_v9, %v1879_v8  ;;  %2090 = vmatmul.mubr.bf16.gmra.mrb[184].mxu1 %v4567_v2  ;;  %2539 = vmatmul.mubr.bf16.gmra.mrb[184].mxu0 %v4568_v5  ;;  %v2625_v14 = vmax.f32 %v2325_v7, 0.0  ;;  %v4589_v5 = vld [vmem:[%s4712_s26 + $0x64c] ss:$16 sps:$4 sm:$0xff]  }
 0x1b7   : > { %2097 = vmatprep.mubr.bf16.mxu1 %v4569_v6  ;;  %2546 = vmatprep.mubr.bf16.mxu0 %v4571_v11 }
 0x1b8   : > { %v2626_v16 = vmax.f32 %v2328_v13, 0.0 }
 0x1b9   : > { %v1883_v17 = vpop.f32.mrb[80].mxu1  ;;  %v2332_v20 = vpop.f32.mrb[80].mxu0 }
 0x1ba   : > { %v3825_v18 = vpack.c.bf16 %v2626_v16, %v2625_v14  ;;  %v1884_v19 = vadd.f32 %v4888_v15, %v1883_v17  ;;  %v1885_v21 = vpop.f32.mrb[81].mxu1  ;;  %v2334_v23 = vpop.f32.mrb[81].mxu0  ;;  %v4591_v16 = vld [vmem:[%s4712_s26 + $0x640] ss:$16 sps:$4 sm:$0xff]  }
 0x1bb   : > { %v1886_v24 = vpop.f32.mrb[82].mxu1  ;;  %v2335_v29 = vpop.f32.mrb[82].mxu0 }
 0x1bc   : > { %4005 = vst [vmem:[%s4900_s14 + $0x98] sm:$0xff] %v3825_v18   ;;  %v2333_v27 = vadd.f32 %v2332_v20, %v1884_v19  ;;  %v1887_v28 = vadd.f32 %v4888_v15, %v1886_v24  ;;  %v1888_v30 = vpop.f32.mrb[83].mxu1  ;;  %v2337_v32 = vpop.f32.mrb[83].mxu0  ;;  %v4592_v19 = vld [vmem:[%s4712_s26 + $0x648] ss:$16 sps:$4 sm:$0xff]  }
 0x1bd   : > { %v4593_v20 = vld [vmem:[%s4712_s26 + $0x664] ss:$16 sps:$4 sm:$0xff]  }
 0x1be   : > { %v2336_v33 = vadd.f32 %v2335_v29, %v1887_v28  ;;  %2098 = vmatmul.mubr.bf16.gmra.mrb[188].mxu1 %v4573_v22  ;;  %2547 = vmatmul.mubr.bf16.gmra.mrb[188].mxu0 %v4574_v25  ;;  %v2627_v34 = vmax.f32 %v2333_v27, 0.0  ;;  %v4595_v25 = vld [vmem:[%s4712_s26 + $0x66c] ss:$16 sps:$4 sm:$0xff]  }
 0x1bf   : > { %2105 = vmatprep.mubr.bf16.mxu1 %v4575_v26  ;;  %2554 = vmatprep.mubr.bf16.mxu0 %v4577_v31 }
 0x1c0   : > { %v2628_v35 = vmax.f32 %v2336_v33, 0.0 }
 0x1c1   : > { %v1891_v36 = vpop.f32.mrb[84].mxu1  ;;  %v2340_v39 = vpop.f32.mrb[84].mxu0 }
 0x1c2   : > { %v3830_v37 = vpack.c.bf16 %v2628_v35, %v2627_v34  ;;  %v1892_v38 = vadd.f32 %v4888_v15, %v1891_v36  ;;  %v1893_v40 = vpop.f32.mrb[85].mxu1  ;;  %v2342_v42 = vpop.f32.mrb[85].mxu0  ;;  %v4583_v15 = vld [vmem:[%s4712_s26 + $0x62c] ss:$16 sps:$4 sm:$0xff]   ;;  %v4597_v35 = vld [vmem:[%s4712_s26 + $0x660] ss:$16 sps:$4 sm:$0xff]  }
 0x1c3   : > { %v1894_v43 = vpop.f32.mrb[86].mxu1  ;;  %v2343_v49 = vpop.f32.mrb[86].mxu0 }
 0x1c4   : > { %4006 = vst [vmem:[%s4900_s14 + $0xa0] sm:$0xff] %v3830_v37   ;;  %v2341_v46 = vadd.f32 %v2340_v39, %v1892_v38  ;;  %v1895_v48 = vadd.f32 %v5050_v47, %v1894_v43  ;;  %v1896_v50 = vpop.f32.mrb[87].mxu1  ;;  %v2345_v51 = vpop.f32.mrb[87].mxu0  ;;  %v4598_v38 = vld [vmem:[%s4712_s26 + $0x668] ss:$16 sps:$4 sm:$0xff]  }
 0x1c6   : > { %v2344_v52 = vadd.f32 %v2343_v49, %v1895_v48  ;;  %2106 = vmatmul.mubr.bf16.gmra.mrb[192].mxu1 %v4579_v41  ;;  %2555 = vmatmul.mubr.bf16.gmra.mrb[192].mxu0 %v4580_v44  ;;  %v2629_v53 = vmax.f32 %v2341_v46, 0.0 }
 0x1c7   : > { %2113 = vmatprep.mubr.bf16.mxu1 %v4581_v45  ;;  %2562 = vmatprep.mubr.bf16.mxu0 %v4583_v15 }
 0x1c8   : > { %v2630_v54 = vmax.f32 %v2344_v52, 0.0 }
 0x1c9   : > { %v1899_v55 = vpop.f32.mrb[88].mxu1  ;;  %v2348_v58 = vpop.f32.mrb[88].mxu0 }
 0x1ca   : > { %v3835_v56 = vpack.c.bf16 %v2630_v54, %v2629_v53  ;;  %v1900_v57 = vadd.f32 %v5050_v47, %v1899_v55  ;;  %v1901_v59 = vpop.f32.mrb[89].mxu1  ;;  %v2350_v61 = vpop.f32.mrb[89].mxu0 }
 0x1cb   : > { %v1902_v62 = vpop.f32.mrb[90].mxu1  ;;  %v2351_v3 = vpop.f32.mrb[90].mxu0 }
 0x1cc   : > { %4007 = vst [vmem:[%s4900_s14 + $0xa8] sm:$0xff] %v3835_v56   ;;  %v2349_v1 = vadd.f32 %v2348_v58, %v1900_v57  ;;  %v1903_v2 = vadd.f32 %v5050_v47, %v1902_v62  ;;  %v1904_v4 = vpop.f32.mrb[91].mxu1  ;;  %v2353_v6 = vpop.f32.mrb[91].mxu0 }
 0x1ce   : > { %v2352_v7 = vadd.f32 %v2351_v3, %v1903_v2  ;;  %2114 = vmatmul.mubr.bf16.gmra.mrb[196].mxu1 %v4585_v60  ;;  %2563 = vmatmul.mubr.bf16.gmra.mrb[196].mxu0 %v4586_v63  ;;  %v2631_v8 = vmax.f32 %v2349_v1, 0.0 }
 0x1cf   : > { %2121 = vmatprep.mubr.bf16.mxu1 %v4587_v0  ;;  %2570 = vmatprep.mubr.bf16.mxu0 %v4589_v5 }
 0x1d0   : > { %v2632_v9 = vmax.f32 %v2352_v7, 0.0 }
 0x1d1   : > { %v1907_v10 = vpop.f32.mrb[92].mxu1  ;;  %v2356_v13 = vpop.f32.mrb[92].mxu0 }
 0x1d2   : > { %v3840_v11 = vpack.c.bf16 %v2632_v9, %v2631_v8  ;;  %v1908_v12 = vadd.f32 %v5050_v47, %v1907_v10  ;;  %v1909_v14 = vpop.f32.mrb[93].mxu1  ;;  %v2358_v17 = vpop.f32.mrb[93].mxu0 }
 0x1d3   : > { %v1910_v18 = vpop.f32.mrb[94].mxu1  ;;  %v2359_v23 = vpop.f32.mrb[94].mxu0 }
 0x1d4   : > { %4008 = vst [vmem:[%s4900_s14 + $0xb0] sm:$0xff] %v3840_v11   ;;  %v2357_v21 = vadd.f32 %v2356_v13, %v1908_v12  ;;  %v1911_v22 = vadd.f32 %v5050_v47, %v1910_v18  ;;  %v1912_v24 = vpop.f32.mrb[95].mxu1  ;;  %v2361_v26 = vpop.f32.mrb[95].mxu0 }
 0x1d6   : > { %v2360_v27 = vadd.f32 %v2359_v23, %v1911_v22  ;;  %2122 = vmatmul.mubr.bf16.gmra.mrb[200].mxu1 %v4591_v16  ;;  %2571 = vmatmul.mubr.bf16.gmra.mrb[200].mxu0 %v4592_v19  ;;  %v2633_v28 = vmax.f32 %v2357_v21, 0.0 }
 0x1d7   : > { %2129 = vmatprep.mubr.bf16.mxu1 %v4593_v20  ;;  %2578 = vmatprep.mubr.bf16.mxu0 %v4595_v25 }
 0x1d8   : > { %v2634_v29 = vmax.f32 %v2360_v27, 0.0 }
 0x1d9   : > { %v1915_v30 = vpop.f32.mrb[96].mxu1  ;;  %v2364_v33 = vpop.f32.mrb[96].mxu0 }
 0x1da   : > { %v3845_v31 = vpack.c.bf16 %v2634_v29, %v2633_v28  ;;  %v1916_v32 = vadd.f32 %v5050_v47, %v1915_v30  ;;  %v1917_v34 = vpop.f32.mrb[97].mxu1  ;;  %v2366_v36 = vpop.f32.mrb[97].mxu0 }
 0x1db   : > { %v1918_v37 = vpop.f32.mrb[98].mxu1  ;;  %v2367_v41 = vpop.f32.mrb[98].mxu0 }
 0x1dc   : > { %4009 = vst [vmem:[%s4900_s14 + $0xb8] sm:$0xff] %v3845_v31   ;;  %v2365_v39 = vadd.f32 %v2364_v33, %v1916_v32  ;;  %v1919_v40 = vadd.f32 %v5050_v47, %v1918_v37  ;;  %v1920_v42 = vpop.f32.mrb[99].mxu1  ;;  %v2369_v43 = vpop.f32.mrb[99].mxu0 }
 0x1de   : > { %v2368_v44 = vadd.f32 %v2367_v41, %v1919_v40  ;;  %2130 = vmatmul.mubr.bf16.gmra.mrb[204].mxu1 %v4597_v35  ;;  %2579 = vmatmul.mubr.bf16.gmra.mrb[204].mxu0 %v4598_v38  ;;  %v2635_v45 = vmax.f32 %v2365_v39, 0.0 }
 0x1e0   : > { %v2636_v46 = vmax.f32 %v2368_v44, 0.0 }
 0x1e1   : > { %v1923_v48 = vpop.f32.mrb[100].mxu1  ;;  %v2372_v15 = vpop.f32.mrb[100].mxu0 }
 0x1e2   : > { %v3850_v49 = vpack.c.bf16 %v2636_v46, %v2635_v45  ;;  %v1924_v50 = vadd.f32 %v5050_v47, %v1923_v48  ;;  %v1925_v51 = vpop.f32.mrb[101].mxu1  ;;  %v2374_v52 = vpop.f32.mrb[101].mxu0 }
 0x1e3   : > { %v1926_v53 = vpop.f32.mrb[102].mxu1  ;;  %v2375_v56 = vpop.f32.mrb[102].mxu0 }
 0x1e4   : > { %4010 = vst [vmem:[%s4900_s14 + $0xc0] sm:$0xff] %v3850_v49   ;;  %v2373_v54 = vadd.f32 %v2372_v15, %v1924_v50  ;;  %v1927_v55 = vadd.f32 %v5050_v47, %v1926_v53  ;;  %v1928_v57 = vpop.f32.mrb[103].mxu1  ;;  %v2377_v58 = vpop.f32.mrb[103].mxu0 }
 0x1e6   : > { %v2376_v59 = vadd.f32 %v2375_v56, %v1927_v55  ;;  %v2637_v60 = vmax.f32 %v2373_v54, 0.0 }
 0x1e8   : > { %v2638_v61 = vmax.f32 %v2376_v59, 0.0 }
 0x1e9   : > { %v1931_v62 = vpop.f32.mrb[104].mxu1  ;;  %v2380_v1 = vpop.f32.mrb[104].mxu0 }
 0x1ea   : > { %v3855_v63 = vpack.c.bf16 %v2638_v61, %v2637_v60  ;;  %v1932_v0 = vadd.f32 %v5050_v47, %v1931_v62  ;;  %v1933_v2 = vpop.f32.mrb[105].mxu1  ;;  %v2382_v3 = vpop.f32.mrb[105].mxu0 }
 0x1eb   : > { %v1934_v4 = vpop.f32.mrb[106].mxu1  ;;  %v2383_v7 = vpop.f32.mrb[106].mxu0 }
 0x1ec   : > { %4011 = vst [vmem:[%s4900_s14 + $0xc8] sm:$0xff] %v3855_v63   ;;  %v2381_v5 = vadd.f32 %v2380_v1, %v1932_v0  ;;  %v1935_v6 = vadd.f32 %v5050_v47, %v1934_v4  ;;  %v1936_v8 = vpop.f32.mrb[107].mxu1  ;;  %v2385_v9 = vpop.f32.mrb[107].mxu0 }
 0x1ee   : > { %v2384_v10 = vadd.f32 %v2383_v7, %v1935_v6  ;;  %v2639_v11 = vmax.f32 %v2381_v5, 0.0 }
 0x1f0   : > { %v2640_v12 = vmax.f32 %v2384_v10, 0.0 }
 0x1f1   : > { %v1939_v13 = vpop.f32.mrb[108].mxu1  ;;  %v2388_v17 = vpop.f32.mrb[108].mxu0 }
 0x1f2   : > { %v3860_v14 = vpack.c.bf16 %v2640_v12, %v2639_v11  ;;  %v1940_v16 = vadd.f32 %v5050_v47, %v1939_v13  ;;  %v1941_v18 = vpop.f32.mrb[109].mxu1  ;;  %v2390_v19 = vpop.f32.mrb[109].mxu0 }
 0x1f3   : > { %v1942_v20 = vpop.f32.mrb[110].mxu1  ;;  %v2391_v23 = vpop.f32.mrb[110].mxu0 }
 0x1f4   : > { %4012 = vst [vmem:[%s4900_s14 + $0xd0] sm:$0xff] %v3860_v14   ;;  %v2389_v21 = vadd.f32 %v2388_v17, %v1940_v16  ;;  %v1943_v22 = vadd.f32 %v5050_v47, %v1942_v20  ;;  %v1944_v24 = vpop.f32.mrb[111].mxu1  ;;  %v2393_v25 = vpop.f32.mrb[111].mxu0 }
 0x1f6   : > { %v2392_v26 = vadd.f32 %v2391_v23, %v1943_v22  ;;  %v2641_v27 = vmax.f32 %v2389_v21, 0.0 }
 0x1f8   : > { %v2642_v28 = vmax.f32 %v2392_v26, 0.0 }
 0x1f9   : > { %v1947_v29 = vpop.f32.mrb[112].mxu1  ;;  %v2396_v32 = vpop.f32.mrb[112].mxu0 }
 0x1fa   : > { %v3865_v30 = vpack.c.bf16 %v2642_v28, %v2641_v27  ;;  %v1948_v31 = vadd.f32 %v5050_v47, %v1947_v29  ;;  %v1949_v33 = vpop.f32.mrb[113].mxu1  ;;  %v2398_v34 = vpop.f32.mrb[113].mxu0 }
 0x1fb   : > { %v1950_v35 = vpop.f32.mrb[114].mxu1  ;;  %v2399_v38 = vpop.f32.mrb[114].mxu0 }
 0x1fc   : > { %4013 = vst [vmem:[%s4900_s14 + $0xd8] sm:$0xff] %v3865_v30   ;;  %v2397_v36 = vadd.f32 %v2396_v32, %v1948_v31  ;;  %v1951_v37 = vadd.f32 %v5050_v47, %v1950_v35  ;;  %v1952_v39 = vpop.f32.mrb[115].mxu1  ;;  %v2401_v40 = vpop.f32.mrb[115].mxu0 }
 0x1fe   : > { %v2400_v41 = vadd.f32 %v2399_v38, %v1951_v37  ;;  %v2643_v42 = vmax.f32 %v2397_v36, 0.0 }
 0x200   : > { %v2644_v43 = vmax.f32 %v2400_v41, 0.0 }
 0x201   : > { %v1955_v44 = vpop.f32.mrb[116].mxu1  ;;  %v2404_v48 = vpop.f32.mrb[116].mxu0 }
 0x202   : > { %v3870_v45 = vpack.c.bf16 %v2644_v43, %v2643_v42  ;;  %v1956_v46 = vadd.f32 %v5050_v47, %v1955_v44  ;;  %v1957_v49 = vpop.f32.mrb[117].mxu1  ;;  %v2406_v50 = vpop.f32.mrb[117].mxu0 }
 0x203   : > { %v1958_v15 = vpop.f32.mrb[118].mxu1  ;;  %v2407_v53 = vpop.f32.mrb[118].mxu0 }
 0x204   : > { %4014 = vst [vmem:[%s4900_s14 + $0xe0] sm:$0xff] %v3870_v45   ;;  %v2405_v51 = vadd.f32 %v2404_v48, %v1956_v46  ;;  %v1959_v52 = vadd.f32 %v5050_v47, %v1958_v15  ;;  %v1960_v54 = vpop.f32.mrb[119].mxu1  ;;  %v2409_v55 = vpop.f32.mrb[119].mxu0 }
 0x206   : > { %v2408_v56 = vadd.f32 %v2407_v53, %v1959_v52  ;;  %v2645_v57 = vmax.f32 %v2405_v51, 0.0 }
 0x208   : > { %v2646_v58 = vmax.f32 %v2408_v56, 0.0 }
 0x209   : > { %v1963_v59 = vpop.f32.mrb[120].mxu1  ;;  %v2412_v62 = vpop.f32.mrb[120].mxu0 }
 0x20a   : > { %v3875_v60 = vpack.c.bf16 %v2646_v58, %v2645_v57  ;;  %v1964_v61 = vadd.f32 %v5050_v47, %v1963_v59  ;;  %v1965_v63 = vpop.f32.mrb[121].mxu1  ;;  %v2414_v0 = vpop.f32.mrb[121].mxu0 }
 0x20b   : > { %v1966_v1 = vpop.f32.mrb[122].mxu1  ;;  %v2415_v4 = vpop.f32.mrb[122].mxu0 }
 0x20c   : > { %4015 = vst [vmem:[%s4900_s14 + $0xe8] sm:$0xff] %v3875_v60   ;;  %v2413_v2 = vadd.f32 %v2412_v62, %v1964_v61  ;;  %v1967_v3 = vadd.f32 %v5050_v47, %v1966_v1  ;;  %v1968_v5 = vpop.f32.mrb[123].mxu1  ;;  %v2417_v6 = vpop.f32.mrb[123].mxu0 }
 0x20e   : > { %v2416_v7 = vadd.f32 %v2415_v4, %v1967_v3  ;;  %v2647_v8 = vmax.f32 %v2413_v2, 0.0 }
 0x210   : > { %v2648_v9 = vmax.f32 %v2416_v7, 0.0 }
 0x211   : > { %v1971_v10 = vpop.f32.mrb[124].mxu1  ;;  %v2420_v13 = vpop.f32.mrb[124].mxu0 }
 0x212   : > { %v3880_v11 = vpack.c.bf16 %v2648_v9, %v2647_v8  ;;  %v1972_v12 = vadd.f32 %v5050_v47, %v1971_v10  ;;  %v1973_v14 = vpop.f32.mrb[125].mxu1  ;;  %v2422_v16 = vpop.f32.mrb[125].mxu0 }
 0x213   : > { %v1974_v17 = vpop.f32.mrb[126].mxu1  ;;  %v2423_v20 = vpop.f32.mrb[126].mxu0 }
 0x214   : > { %4016 = vst [vmem:[%s4900_s14 + $0xf0] sm:$0xff] %v3880_v11   ;;  %v2421_v18 = vadd.f32 %v2420_v13, %v1972_v12  ;;  %v1975_v19 = vadd.f32 %v5050_v47, %v1974_v17  ;;  %v1976_v21 = vpop.f32.mrb[127].mxu1  ;;  %v2425_v22 = vpop.f32.mrb[127].mxu0 }
 0x216   : > { %v2424_v23 = vadd.f32 %v2423_v20, %v1975_v19  ;;  %v2649_v24 = vmax.f32 %v2421_v18, 0.0 }
 0x218   : > { %v2650_v25 = vmax.f32 %v2424_v23, 0.0 }
 0x219   : > { %v1979_v26 = vpop.f32.mrb[128].mxu1  ;;  %v2428_v29 = vpop.f32.mrb[128].mxu0 }
 0x21a   : > { %v3885_v27 = vpack.c.bf16 %v2650_v25, %v2649_v24  ;;  %v1980_v28 = vadd.f32 %v5050_v47, %v1979_v26  ;;  %v1981_v30 = vpop.f32.mrb[129].mxu1  ;;  %v2430_v31 = vpop.f32.mrb[129].mxu0 }
 0x21b   : > { %v1982_v32 = vpop.f32.mrb[130].mxu1  ;;  %v2431_v35 = vpop.f32.mrb[130].mxu0 }
 0x21c   : > { %4017 = vst [vmem:[%s4900_s14 + $0xf8] sm:$0xff] %v3885_v27   ;;  %v2429_v33 = vadd.f32 %v2428_v29, %v1980_v28  ;;  %v1983_v34 = vadd.f32 %v5050_v47, %v1982_v32  ;;  %v1984_v36 = vpop.f32.mrb[131].mxu1  ;;  %v2433_v37 = vpop.f32.mrb[131].mxu0 }
 0x21e   : > { %v2432_v38 = vadd.f32 %v2431_v35, %v1983_v34  ;;  %v2651_v39 = vmax.f32 %v2429_v33, 0.0 }
 0x220   : > { %v2652_v40 = vmax.f32 %v2432_v38, 0.0 }
 0x221   : > { %v1987_v41 = vpop.f32.mrb[132].mxu1  ;;  %v2436_v44 = vpop.f32.mrb[132].mxu0 }
 0x222   : > { %v3890_v42 = vpack.c.bf16 %v2652_v40, %v2651_v39  ;;  %v1988_v43 = vadd.f32 %v5050_v47, %v1987_v41  ;;  %v1989_v45 = vpop.f32.mrb[133].mxu1  ;;  %v2438_v46 = vpop.f32.mrb[133].mxu0 }
 0x223   : > { %v1990_v48 = vpop.f32.mrb[134].mxu1  ;;  %v2439_v15 = vpop.f32.mrb[134].mxu0 }
 0x224   : > { %4018 = vst [vmem:[%s4900_s14 + $0x100] sm:$0xff] %v3890_v42   ;;  %v2437_v49 = vadd.f32 %v2436_v44, %v1988_v43  ;;  %v1991_v50 = vadd.f32 %v5050_v47, %v1990_v48  ;;  %v1992_v51 = vpop.f32.mrb[135].mxu1  ;;  %v2441_v52 = vpop.f32.mrb[135].mxu0 }
 0x226   : > { %v2440_v53 = vadd.f32 %v2439_v15, %v1991_v50  ;;  %v2653_v54 = vmax.f32 %v2437_v49, 0.0 }
 0x228   : > { %v2654_v55 = vmax.f32 %v2440_v53, 0.0 }
 0x229   : > { %v1995_v56 = vpop.f32.mrb[136].mxu1  ;;  %v2444_v59 = vpop.f32.mrb[136].mxu0 }
 0x22a   : > { %v3895_v57 = vpack.c.bf16 %v2654_v55, %v2653_v54  ;;  %v1996_v58 = vadd.f32 %v5050_v47, %v1995_v56  ;;  %v1997_v60 = vpop.f32.mrb[137].mxu1  ;;  %v2446_v61 = vpop.f32.mrb[137].mxu0 }
 0x22b   : > { %v1998_v62 = vpop.f32.mrb[138].mxu1  ;;  %v2447_v1 = vpop.f32.mrb[138].mxu0 }
 0x22c   : > { %4019 = vst [vmem:[%s4900_s14 + $0x108] sm:$0xff] %v3895_v57   ;;  %v2445_v63 = vadd.f32 %v2444_v59, %v1996_v58  ;;  %v1999_v0 = vadd.f32 %v5050_v47, %v1998_v62  ;;  %v2000_v2 = vpop.f32.mrb[139].mxu1  ;;  %v2449_v3 = vpop.f32.mrb[139].mxu0 }
 0x22e   : > { %v2448_v4 = vadd.f32 %v2447_v1, %v1999_v0  ;;  %v2655_v5 = vmax.f32 %v2445_v63, 0.0 }
 0x230   : > { %v2656_v6 = vmax.f32 %v2448_v4, 0.0 }
 0x231   : > { %v2003_v7 = vpop.f32.mrb[140].mxu1  ;;  %v2452_v10 = vpop.f32.mrb[140].mxu0 }
 0x232   : > { %v3900_v8 = vpack.c.bf16 %v2656_v6, %v2655_v5  ;;  %v2004_v9 = vadd.f32 %v5050_v47, %v2003_v7  ;;  %v2005_v11 = vpop.f32.mrb[141].mxu1  ;;  %v2454_v12 = vpop.f32.mrb[141].mxu0 }
 0x233   : > { %v2006_v13 = vpop.f32.mrb[142].mxu1  ;;  %v2455_v17 = vpop.f32.mrb[142].mxu0 }
 0x234   : > { %4020 = vst [vmem:[%s4900_s14 + $0x110] sm:$0xff] %v3900_v8   ;;  %v2453_v14 = vadd.f32 %v2452_v10, %v2004_v9  ;;  %v2007_v16 = vadd.f32 %v5050_v47, %v2006_v13  ;;  %v2008_v18 = vpop.f32.mrb[143].mxu1  ;;  %v2457_v19 = vpop.f32.mrb[143].mxu0 }
 0x236   : > { %v2456_v20 = vadd.f32 %v2455_v17, %v2007_v16  ;;  %v2657_v21 = vmax.f32 %v2453_v14, 0.0 }
 0x238   : > { %v2658_v22 = vmax.f32 %v2456_v20, 0.0 }
 0x239   : > { %v2011_v23 = vpop.f32.mrb[144].mxu1  ;;  %v2460_v26 = vpop.f32.mrb[144].mxu0 }
 0x23a   : > { %v3905_v24 = vpack.c.bf16 %v2658_v22, %v2657_v21  ;;  %v2012_v25 = vadd.f32 %v5050_v47, %v2011_v23  ;;  %v2013_v27 = vpop.f32.mrb[145].mxu1  ;;  %v2462_v28 = vpop.f32.mrb[145].mxu0 }
 0x23b   : > { %v2014_v29 = vpop.f32.mrb[146].mxu1  ;;  %v2463_v32 = vpop.f32.mrb[146].mxu0 }
 0x23c   : > { %4021 = vst [vmem:[%s4900_s14 + $0x118] sm:$0xff] %v3905_v24   ;;  %v2461_v30 = vadd.f32 %v2460_v26, %v2012_v25  ;;  %v2015_v31 = vadd.f32 %v5050_v47, %v2014_v29  ;;  %v2016_v33 = vpop.f32.mrb[147].mxu1  ;;  %v2465_v34 = vpop.f32.mrb[147].mxu0 }
 0x23e   : > { %v2464_v35 = vadd.f32 %v2463_v32, %v2015_v31  ;;  %v2659_v36 = vmax.f32 %v2461_v30, 0.0 }
 0x240   : > { %v2660_v37 = vmax.f32 %v2464_v35, 0.0 }
 0x241   : > { %v2019_v38 = vpop.f32.mrb[148].mxu1  ;;  %v2468_v41 = vpop.f32.mrb[148].mxu0 }
 0x242   : > { %v3910_v39 = vpack.c.bf16 %v2660_v37, %v2659_v36  ;;  %v2020_v40 = vadd.f32 %v5050_v47, %v2019_v38  ;;  %v2021_v42 = vpop.f32.mrb[149].mxu1  ;;  %v2470_v43 = vpop.f32.mrb[149].mxu0 }
 0x243   : > { %v2022_v44 = vpop.f32.mrb[150].mxu1  ;;  %v2471_v48 = vpop.f32.mrb[150].mxu0 }
 0x244   : > { %4022 = vst [vmem:[%s4900_s14 + $0x120] sm:$0xff] %v3910_v39   ;;  %v2469_v45 = vadd.f32 %v2468_v41, %v2020_v40  ;;  %v2023_v46 = vadd.f32 %v5050_v47, %v2022_v44  ;;  %v2024_v49 = vpop.f32.mrb[151].mxu1  ;;  %v2473_v50 = vpop.f32.mrb[151].mxu0 }
 0x246   : > { %v2472_v15 = vadd.f32 %v2471_v48, %v2023_v46  ;;  %v2661_v51 = vmax.f32 %v2469_v45, 0.0 }
 0x248   : > { %v2662_v52 = vmax.f32 %v2472_v15, 0.0 }
 0x249   : > { %v2027_v53 = vpop.f32.mrb[152].mxu1  ;;  %v2476_v56 = vpop.f32.mrb[152].mxu0 }
 0x24a   : > { %v3915_v54 = vpack.c.bf16 %v2662_v52, %v2661_v51  ;;  %v2028_v55 = vadd.f32 %v5050_v47, %v2027_v53  ;;  %v2029_v57 = vpop.f32.mrb[153].mxu1  ;;  %v2478_v58 = vpop.f32.mrb[153].mxu0 }
 0x24b   : > { %v2030_v59 = vpop.f32.mrb[154].mxu1  ;;  %v2479_v62 = vpop.f32.mrb[154].mxu0 }
 0x24c   : > { %4023 = vst [vmem:[%s4900_s14 + $0x128] sm:$0xff] %v3915_v54   ;;  %v2477_v60 = vadd.f32 %v2476_v56, %v2028_v55  ;;  %v2031_v61 = vadd.f32 %v5050_v47, %v2030_v59  ;;  %v2032_v63 = vpop.f32.mrb[155].mxu1  ;;  %v2481_v0 = vpop.f32.mrb[155].mxu0 }
 0x24e   : > { %v2480_v1 = vadd.f32 %v2479_v62, %v2031_v61  ;;  %v2663_v2 = vmax.f32 %v2477_v60, 0.0 }
 0x250   : > { %v2664_v3 = vmax.f32 %v2480_v1, 0.0 }
 0x251   : > { %v2035_v4 = vpop.f32.mrb[156].mxu1  ;;  %v2484_v7 = vpop.f32.mrb[156].mxu0 }
 0x252   : > { %v3920_v5 = vpack.c.bf16 %v2664_v3, %v2663_v2  ;;  %v2036_v6 = vadd.f32 %v5050_v47, %v2035_v4  ;;  %v2037_v8 = vpop.f32.mrb[157].mxu1  ;;  %v2486_v9 = vpop.f32.mrb[157].mxu0 }
 0x253   : > { %v2038_v10 = vpop.f32.mrb[158].mxu1  ;;  %v2487_v13 = vpop.f32.mrb[158].mxu0 }
 0x254   : > { %4024 = vst [vmem:[%s4900_s14 + $0x130] sm:$0xff] %v3920_v5   ;;  %v2485_v11 = vadd.f32 %v2484_v7, %v2036_v6  ;;  %v2039_v12 = vadd.f32 %v5050_v47, %v2038_v10  ;;  %v2040_v14 = vpop.f32.mrb[159].mxu1  ;;  %v2489_v16 = vpop.f32.mrb[159].mxu0 }
 0x256   : > { %v2488_v17 = vadd.f32 %v2487_v13, %v2039_v12  ;;  %v2665_v18 = vmax.f32 %v2485_v11, 0.0 }
 0x258   : > { %v2666_v19 = vmax.f32 %v2488_v17, 0.0 }
 0x259   : > { %v2043_v20 = vpop.f32.mrb[160].mxu1  ;;  %v2492_v23 = vpop.f32.mrb[160].mxu0 }
 0x25a   : > { %v3925_v21 = vpack.c.bf16 %v2666_v19, %v2665_v18  ;;  %v2044_v22 = vadd.f32 %v5050_v47, %v2043_v20  ;;  %v2045_v24 = vpop.f32.mrb[161].mxu1  ;;  %v2494_v25 = vpop.f32.mrb[161].mxu0 }
 0x25b   : > { %v2046_v26 = vpop.f32.mrb[162].mxu1  ;;  %v2495_v29 = vpop.f32.mrb[162].mxu0 }
 0x25c   : > { %4025 = vst [vmem:[%s4900_s14 + $0x138] sm:$0xff] %v3925_v21   ;;  %v2493_v27 = vadd.f32 %v2492_v23, %v2044_v22  ;;  %v2047_v28 = vadd.f32 %v5050_v47, %v2046_v26  ;;  %v2048_v30 = vpop.f32.mrb[163].mxu1  ;;  %v2497_v31 = vpop.f32.mrb[163].mxu0 }
 0x25e   : > { %v2496_v32 = vadd.f32 %v2495_v29, %v2047_v28  ;;  %v2667_v33 = vmax.f32 %v2493_v27, 0.0 }
 0x260   : > { %v2668_v34 = vmax.f32 %v2496_v32, 0.0 }
 0x261   : > { %v2051_v35 = vpop.f32.mrb[164].mxu1  ;;  %v2500_v38 = vpop.f32.mrb[164].mxu0 }
 0x262   : > { %v3930_v36 = vpack.c.bf16 %v2668_v34, %v2667_v33  ;;  %v2052_v37 = vadd.f32 %v5050_v47, %v2051_v35  ;;  %v2053_v39 = vpop.f32.mrb[165].mxu1  ;;  %v2502_v40 = vpop.f32.mrb[165].mxu0 }
 0x263   : > { %v2054_v41 = vpop.f32.mrb[166].mxu1  ;;  %v2503_v44 = vpop.f32.mrb[166].mxu0 }
 0x264   : > { %4026 = vst [vmem:[%s4900_s14 + $0x140] sm:$0xff] %v3930_v36   ;;  %v2501_v42 = vadd.f32 %v2500_v38, %v2052_v37  ;;  %v2055_v43 = vadd.f32 %v5050_v47, %v2054_v41  ;;  %v2056_v45 = vpop.f32.mrb[167].mxu1  ;;  %v2505_v46 = vpop.f32.mrb[167].mxu0 }
 0x266   : > { %v2504_v48 = vadd.f32 %v2503_v44, %v2055_v43  ;;  %v2669_v49 = vmax.f32 %v2501_v42, 0.0 }
 0x268   : > { %v2670_v50 = vmax.f32 %v2504_v48, 0.0 }
 0x269   : > { %v2059_v15 = vpop.f32.mrb[168].mxu1  ;;  %v2508_v53 = vpop.f32.mrb[168].mxu0 }
 0x26a   : > { %v3935_v51 = vpack.c.bf16 %v2670_v50, %v2669_v49  ;;  %v2060_v52 = vadd.f32 %v5050_v47, %v2059_v15  ;;  %v2061_v54 = vpop.f32.mrb[169].mxu1  ;;  %v2510_v55 = vpop.f32.mrb[169].mxu0 }
 0x26b   : > { %v2062_v56 = vpop.f32.mrb[170].mxu1  ;;  %v2511_v59 = vpop.f32.mrb[170].mxu0 }
 0x26c   : > { %4027 = vst [vmem:[%s4900_s14 + $0x148] sm:$0xff] %v3935_v51   ;;  %v2509_v57 = vadd.f32 %v2508_v53, %v2060_v52  ;;  %v2063_v58 = vadd.f32 %v5050_v47, %v2062_v56  ;;  %v2064_v60 = vpop.f32.mrb[171].mxu1  ;;  %v2513_v61 = vpop.f32.mrb[171].mxu0 }
 0x26e   : > { %v2512_v62 = vadd.f32 %v2511_v59, %v2063_v58  ;;  %v2671_v63 = vmax.f32 %v2509_v57, 0.0 }
 0x270   : > { %v2672_v0 = vmax.f32 %v2512_v62, 0.0 }
 0x271   : > { %v2067_v1 = vpop.f32.mrb[172].mxu1  ;;  %v2516_v4 = vpop.f32.mrb[172].mxu0 }
 0x272   : > { %v3940_v2 = vpack.c.bf16 %v2672_v0, %v2671_v63  ;;  %v2068_v3 = vadd.f32 %v5050_v47, %v2067_v1  ;;  %v2069_v5 = vpop.f32.mrb[173].mxu1  ;;  %v2518_v6 = vpop.f32.mrb[173].mxu0 }
 0x273   : > { %v2070_v7 = vpop.f32.mrb[174].mxu1  ;;  %v2519_v10 = vpop.f32.mrb[174].mxu0 }
 0x274   : > { %4028 = vst [vmem:[%s4900_s14 + $0x150] sm:$0xff] %v3940_v2   ;;  %v2517_v8 = vadd.f32 %v2516_v4, %v2068_v3  ;;  %v2071_v9 = vadd.f32 %v5050_v47, %v2070_v7  ;;  %v2072_v11 = vpop.f32.mrb[175].mxu1  ;;  %v2521_v12 = vpop.f32.mrb[175].mxu0 }
 0x276   : > { %v2520_v13 = vadd.f32 %v2519_v10, %v2071_v9  ;;  %v2673_v14 = vmax.f32 %v2517_v8, 0.0 }
 0x278   : > { %v2674_v16 = vmax.f32 %v2520_v13, 0.0 }
 0x279   : > { %v2075_v17 = vpop.f32.mrb[176].mxu1  ;;  %v2524_v20 = vpop.f32.mrb[176].mxu0 }
 0x27a   : > { %v3945_v18 = vpack.c.bf16 %v2674_v16, %v2673_v14  ;;  %v2076_v19 = vadd.f32 %v5050_v47, %v2075_v17  ;;  %v2077_v21 = vpop.f32.mrb[177].mxu1  ;;  %v2526_v22 = vpop.f32.mrb[177].mxu0 }
 0x27b   : > { %v2078_v23 = vpop.f32.mrb[178].mxu1  ;;  %v2527_v26 = vpop.f32.mrb[178].mxu0 }
 0x27c   : > { %4029 = vst [vmem:[%s4900_s14 + $0x158] sm:$0xff] %v3945_v18   ;;  %v2525_v24 = vadd.f32 %v2524_v20, %v2076_v19  ;;  %v2079_v25 = vadd.f32 %v5050_v47, %v2078_v23  ;;  %v2080_v27 = vpop.f32.mrb[179].mxu1  ;;  %v2529_v28 = vpop.f32.mrb[179].mxu0 }
 0x27e   : > { %v2528_v29 = vadd.f32 %v2527_v26, %v2079_v25  ;;  %v2675_v30 = vmax.f32 %v2525_v24, 0.0 }
 0x280   : > { %v2676_v31 = vmax.f32 %v2528_v29, 0.0 }
 0x281   : > { %v2083_v32 = vpop.f32.mrb[180].mxu1  ;;  %v2532_v35 = vpop.f32.mrb[180].mxu0 }
 0x282   : > { %v3950_v33 = vpack.c.bf16 %v2676_v31, %v2675_v30  ;;  %v2084_v34 = vadd.f32 %v5050_v47, %v2083_v32  ;;  %v2085_v36 = vpop.f32.mrb[181].mxu1  ;;  %v2534_v37 = vpop.f32.mrb[181].mxu0 }
 0x283   : > { %v2086_v38 = vpop.f32.mrb[182].mxu1  ;;  %v2535_v41 = vpop.f32.mrb[182].mxu0 }
 0x284   : > { %4030 = vst [vmem:[%s4900_s14 + $0x160] sm:$0xff] %v3950_v33   ;;  %v2533_v39 = vadd.f32 %v2532_v35, %v2084_v34  ;;  %v2087_v40 = vadd.f32 %v5050_v47, %v2086_v38  ;;  %v2088_v42 = vpop.f32.mrb[183].mxu1  ;;  %v2537_v43 = vpop.f32.mrb[183].mxu0 }
 0x286   : > { %v2536_v44 = vadd.f32 %v2535_v41, %v2087_v40  ;;  %v2677_v45 = vmax.f32 %v2533_v39, 0.0 }
 0x288   : > { %v2678_v46 = vmax.f32 %v2536_v44, 0.0 }
 0x289   : > { %v2091_v48 = vpop.f32.mrb[184].mxu1  ;;  %v2540_v15 = vpop.f32.mrb[184].mxu0 }
 0x28a   : > { %v3955_v49 = vpack.c.bf16 %v2678_v46, %v2677_v45  ;;  %v2092_v50 = vadd.f32 %v5050_v47, %v2091_v48  ;;  %v2093_v51 = vpop.f32.mrb[185].mxu1  ;;  %v2542_v52 = vpop.f32.mrb[185].mxu0 }
 0x28b   : > { %v2094_v53 = vpop.f32.mrb[186].mxu1  ;;  %v2543_v56 = vpop.f32.mrb[186].mxu0 }
 0x28c   : > { %4031 = vst [vmem:[%s4900_s14 + $0x168] sm:$0xff] %v3955_v49   ;;  %v2541_v54 = vadd.f32 %v2540_v15, %v2092_v50  ;;  %v2095_v55 = vadd.f32 %v5050_v47, %v2094_v53  ;;  %v2096_v57 = vpop.f32.mrb[187].mxu1  ;;  %v2545_v58 = vpop.f32.mrb[187].mxu0 }
 0x28e   : > { %v2544_v59 = vadd.f32 %v2543_v56, %v2095_v55  ;;  %v2679_v60 = vmax.f32 %v2541_v54, 0.0 }
 0x290   : > { %v2680_v61 = vmax.f32 %v2544_v59, 0.0 }
 0x291   : > { %v2099_v62 = vpop.f32.mrb[188].mxu1  ;;  %v2548_v1 = vpop.f32.mrb[188].mxu0 }
 0x292   : > { %v3960_v63 = vpack.c.bf16 %v2680_v61, %v2679_v60  ;;  %v2100_v0 = vadd.f32 %v5050_v47, %v2099_v62  ;;  %v2101_v2 = vpop.f32.mrb[189].mxu1  ;;  %v2550_v3 = vpop.f32.mrb[189].mxu0 }
 0x293   : > { %v2102_v4 = vpop.f32.mrb[190].mxu1  ;;  %v2551_v7 = vpop.f32.mrb[190].mxu0 }
 0x294   : > { %4032 = vst [vmem:[%s4900_s14 + $0x170] sm:$0xff] %v3960_v63   ;;  %v2549_v5 = vadd.f32 %v2548_v1, %v2100_v0  ;;  %v2103_v6 = vadd.f32 %v5050_v47, %v2102_v4  ;;  %v2104_v8 = vpop.f32.mrb[191].mxu1  ;;  %v2553_v9 = vpop.f32.mrb[191].mxu0 }
 0x296   : > { %v2552_v10 = vadd.f32 %v2551_v7, %v2103_v6  ;;  %v2681_v11 = vmax.f32 %v2549_v5, 0.0 }
 0x298   : > { %v2682_v12 = vmax.f32 %v2552_v10, 0.0 }
 0x299   : > { %v2107_v13 = vpop.f32.mrb[192].mxu1  ;;  %v2556_v17 = vpop.f32.mrb[192].mxu0 }
 0x29a   : > { %v3965_v14 = vpack.c.bf16 %v2682_v12, %v2681_v11  ;;  %v2108_v16 = vadd.f32 %v5050_v47, %v2107_v13  ;;  %v2109_v18 = vpop.f32.mrb[193].mxu1  ;;  %v2558_v19 = vpop.f32.mrb[193].mxu0 }
 0x29b   : > { %v2110_v20 = vpop.f32.mrb[194].mxu1  ;;  %v2559_v23 = vpop.f32.mrb[194].mxu0 }
 0x29c   : > { %4033 = vst [vmem:[%s4900_s14 + $0x178] sm:$0xff] %v3965_v14   ;;  %v2557_v21 = vadd.f32 %v2556_v17, %v2108_v16  ;;  %v2111_v22 = vadd.f32 %v5050_v47, %v2110_v20  ;;  %v2112_v24 = vpop.f32.mrb[195].mxu1  ;;  %v2561_v25 = vpop.f32.mrb[195].mxu0 }
 0x29e   : > { %v2560_v26 = vadd.f32 %v2559_v23, %v2111_v22  ;;  %v2683_v27 = vmax.f32 %v2557_v21, 0.0 }
 0x2a0   : > { %v2684_v28 = vmax.f32 %v2560_v26, 0.0 }
 0x2a1   : > { %v2115_v29 = vpop.f32.mrb[196].mxu1  ;;  %v2564_v32 = vpop.f32.mrb[196].mxu0 }
 0x2a2   : > { %v3970_v30 = vpack.c.bf16 %v2684_v28, %v2683_v27  ;;  %v2116_v31 = vadd.f32 %v5050_v47, %v2115_v29  ;;  %v2117_v33 = vpop.f32.mrb[197].mxu1  ;;  %v2566_v34 = vpop.f32.mrb[197].mxu0 }
 0x2a3   : > { %v2118_v35 = vpop.f32.mrb[198].mxu1  ;;  %v2567_v38 = vpop.f32.mrb[198].mxu0 }
 0x2a4   : > { %4034 = vst [vmem:[%s4900_s14 + $0x180] sm:$0xff] %v3970_v30   ;;  %v2565_v36 = vadd.f32 %v2564_v32, %v2116_v31  ;;  %v2119_v37 = vadd.f32 %v5050_v47, %v2118_v35  ;;  %v2120_v39 = vpop.f32.mrb[199].mxu1  ;;  %v2569_v40 = vpop.f32.mrb[199].mxu0 }
 0x2a6   : > { %v2568_v41 = vadd.f32 %v2567_v38, %v2119_v37  ;;  %v2685_v42 = vmax.f32 %v2565_v36, 0.0 }
 0x2a8   : > { %v2686_v43 = vmax.f32 %v2568_v41, 0.0 }
 0x2a9   : > { %v2123_v44 = vpop.f32.mrb[200].mxu1  ;;  %v2572_v48 = vpop.f32.mrb[200].mxu0 }
 0x2aa   : > { %v3975_v45 = vpack.c.bf16 %v2686_v43, %v2685_v42  ;;  %v2124_v46 = vadd.f32 %v5050_v47, %v2123_v44  ;;  %v2125_v49 = vpop.f32.mrb[201].mxu1  ;;  %v2574_v50 = vpop.f32.mrb[201].mxu0 }
 0x2ab   : > { %v2126_v15 = vpop.f32.mrb[202].mxu1  ;;  %v2575_v53 = vpop.f32.mrb[202].mxu0 }
 0x2ac   : > { %4035 = vst [vmem:[%s4900_s14 + $0x188] sm:$0xff] %v3975_v45   ;;  %v2573_v51 = vadd.f32 %v2572_v48, %v2124_v46  ;;  %v2127_v52 = vadd.f32 %v5050_v47, %v2126_v15  ;;  %v2128_v54 = vpop.f32.mrb[203].mxu1  ;;  %v2577_v55 = vpop.f32.mrb[203].mxu0 }
 0x2ae   : > { %v2576_v56 = vadd.f32 %v2575_v53, %v2127_v52  ;;  %v2687_v57 = vmax.f32 %v2573_v51, 0.0 }
 0x2b0   : > { %v2688_v58 = vmax.f32 %v2576_v56, 0.0 }
 0x2b1   : > { %v2131_v59 = vpop.f32.mrb[204].mxu1  ;;  %v2580_v62 = vpop.f32.mrb[204].mxu0 }
 0x2b2   : > { %v3980_v60 = vpack.c.bf16 %v2688_v58, %v2687_v57  ;;  %v2132_v61 = vadd.f32 %v5050_v47, %v2131_v59  ;;  %v2133_v63 = vpop.f32.mrb[205].mxu1  ;;  %v2582_v0 = vpop.f32.mrb[205].mxu0 }
 0x2b3   : > { %v2134_v1 = vpop.f32.mrb[206].mxu1  ;;  %v2583_v4 = vpop.f32.mrb[206].mxu0 }
 0x2b4   : > { %4036 = vst [vmem:[%s4900_s14 + $0x190] sm:$0xff] %v3980_v60   ;;  %v2581_v2 = vadd.f32 %v2580_v62, %v2132_v61  ;;  %v2135_v3 = vadd.f32 %v5050_v47, %v2134_v1  ;;  %v2136_v5 = vpop.f32.mrb[207].mxu1  ;;  %v2585_v6 = vpop.f32.mrb[207].mxu0 }
 0x2b6   : > { %v2584_v7 = vadd.f32 %v2583_v4, %v2135_v3  ;;  %v2689_v8 = vmax.f32 %v2581_v2, 0.0 }
 0x2b8   : > { %v2690_v9 = vmax.f32 %v2584_v7, 0.0 }
 0x2ba   : > { %v3985_v10 = vpack.c.bf16 %v2690_v9, %v2689_v8 }
 0x2bc   : > { %4037 = vst [vmem:[%s4900_s14 + $0x198] sm:$0xff] %v3985_v10  }
 0x2bd PF: > { %s13_s12 = sadd.s32 1, %s4606_s12  }
 0x2be   : > { %p10_p4 = scmp.ge.s32.totalorder %s13_s12, 4  }
 0x2c0   :  { %12 = sbr.rel (!%p10_p4) target bundleno = 1 (0x1), region = 62 }

// kernel: voxel_backbone_8x.15
= control target key start
LH: loop header
LB: loop body
LE: loop exit
PB: predicated region body
PF: predicated region fallthrough
CT: control target
= control target key end

     0   :  { %s7591_s12 = smov 0   ;;  %s9041_s0 = inlined_call_operand.vmem [shape: bf16[1664,896], index: 0, kind: input, shape index: {}]   ;;  %s9042_s1 = inlined_call_operand.vmem [shape: bf16[896,128], index: 1, kind: input, shape index: {}]   ;;  %s9043_s2 = inlined_call_operand.vmem [shape: f32[1,128], index: 2, kind: input, shape index: {}]   ;;  %s9044_s3 = inlined_call_operand.vmem [shape: bf16[1664,128], index: 3, kind: output, shape index: {}]  }
   0x1 LB: > { %s5397_s13 = sadd.s32 4294967295, %s7568_s12   ;;  %p5401_p0 = scmp.ge.s32.totalorder %s7568_s12, 1  ;;  %s7568_s12 = sphi %s7591_s12, %s13_s12  }
   0x2   : > { %p139_p1 = scmp.lt.s32.totalorder %s7568_s12, 3 }
   0x4   : > { %p140_p2 = pnand %p5401_p0, %p139_p1 }
   0x6   : > { %143 = sbr.rel (%p140_p2) target bundleno = 1021 (0x3fd), region = 32 }
   0xd   : > { %v6984_v0 = vld [vmem:[%s9042_s1] sm:$0xff]   ;;  %v7570_v1 = vmov 0   ;;  %v6986_v3 = vld [vmem:[%s9042_s1 + $0x8] sm:$0xff]   ;;  %v6988_v5 = vld [vmem:[%s9042_s1 + $0x10] sm:$0xff]   ;;  %s164_s5 = smul.u32 104, %s5397_s13 }
   0xe   : > { %2921 = vmatprep.subr.bf16.mxu1 %v7570_v1  ;;  %3370 = vmatprep.subr.bf16.mxu0 %v7570_v1  ;;  %v7607_v2 = vld [vmem:[%s9042_s1 + $0x80] sm:$0xff]   ;;  %v7617_v4 = vld [vmem:[%s9042_s1 + $0x88] sm:$0xff]   ;;  %v7628_v6 = vld [vmem:[%s9042_s1 + $0x90] sm:$0xff]  }
   0xf   : > { %2922 = vmatpush1.bf16.msra.mxu1 %v6984_v0  ;;  %3371 = vmatpush1.bf16.msra.mxu0 %v7607_v2  ;;  %v6990_v7 = vld [vmem:[%s9042_s1 + $0x18] sm:$0xff]   ;;  %v6992_v9 = vld [vmem:[%s9042_s1 + $0x20] sm:$0xff]   ;;  %v6994_v11 = vld [vmem:[%s9042_s1 + $0x28] sm:$0xff]   ;;  %p165_p3 = scmp.lt.s32.totalorder %s164_s5, 207 }
  0x10   : > { %2923 = vmatprep.subr.bf16.mxu1 %v7570_v1  ;;  %3372 = vmatprep.subr.bf16.mxu0 %v7570_v1  ;;  %v7639_v8 = vld [vmem:[%s9042_s1 + $0x98] sm:$0xff]   ;;  %v7652_v10 = vld [vmem:[%s9042_s1 + $0xa0] sm:$0xff]   ;;  %v7663_v12 = vld [vmem:[%s9042_s1 + $0xa8] sm:$0xff]  }
  0x11   : > { %v6996_v13 = vld [vmem:[%s9042_s1 + $0x30] sm:$0xff]   ;;  %s9170_s5 = smov (!%p165_p3, %s164_s5), 207  ;;  %v6998_v15 = vld [vmem:[%s9042_s1 + $0x38] sm:$0xff]   ;;  %v7000_v17 = vld [vmem:[%s9042_s1 + $0x40] sm:$0xff]  }
  0x12   : > { %v7676_v14 = vld [vmem:[%s9042_s1 + $0xb0] sm:$0xff]   ;;  %s6974_s19 = smul.u32 28, %s9170_s5  ;;  %v7688_v16 = vld [vmem:[%s9042_s1 + $0xb8] sm:$0xff]   ;;  %v7704_v18 = vld [vmem:[%s9042_s1 + $0xc0] sm:$0xff]  }
  0x13   : > { %2924 = vmatpush1.bf16.msra.mxu1 %v6986_v3  ;;  %3373 = vmatpush1.bf16.msra.mxu0 %v7617_v4  ;;  %v7002_v20 = vld [vmem:[%s9042_s1 + $0x48] sm:$0xff]   ;;  %v7004_v23 = vld [vmem:[%s9042_s1 + $0x50] sm:$0xff]   ;;  %v7006_v25 = vld [vmem:[%s9042_s1 + $0x58] sm:$0xff]  }
  0x14   : > { %2925 = vmatprep.subr.bf16.mxu1 %v7570_v1  ;;  %3374 = vmatprep.subr.bf16.mxu0 %v7570_v1  ;;  %s7697_s26 = scalar_lea.vmem %s9041_s0, %s6974_s19  ;;  %v7717_v22 = vld [vmem:[%s9042_s1 + $0xc8] sm:$0xff]   ;;  %v7728_v24 = vld [vmem:[%s9042_s1 + $0xd0] sm:$0xff]   ;;  %v7739_v26 = vld [vmem:[%s9042_s1 + $0xd8] sm:$0xff]  }
  0x15   : > { %v7018_v19 = vld [vmem:[%s7697_s26 + $0x4] ss:$28 sps:$4 sm:$0xff]   ;;  %v7021_v21 = vld [vmem:[%s7697_s26 + $0xc] ss:$28 sps:$4 sm:$0xff]   ;;  %v7012_v31 = vld [vmem:[%s9042_s1 + $0x70] sm:$0xff]  }
  0x16   : > { %2953 = vmatprep.mubr.bf16.mxu1 %v7018_v19  ;;  %3402 = vmatprep.mubr.bf16.mxu0 %v7021_v21  ;;  %v7008_v27 = vld [vmem:[%s9042_s1 + $0x60] sm:$0xff]   ;;  %v7010_v29 = vld [vmem:[%s9042_s1 + $0x68] sm:$0xff]   ;;  %v7772_v32 = vld [vmem:[%s9042_s1 + $0xf0] sm:$0xff]  }
  0x17   : > { %2926 = vmatpush1.bf16.msra.mxu1 %v6988_v5  ;;  %3375 = vmatpush1.bf16.msra.mxu0 %v7628_v6  ;;  %v7750_v28 = vld [vmem:[%s9042_s1 + $0xe0] sm:$0xff]   ;;  %v7761_v30 = vld [vmem:[%s9042_s1 + $0xe8] sm:$0xff]   ;;  %v7014_v33 = vld [vmem:[%s9042_s1 + $0x78] sm:$0xff]  }
  0x18   : > { %2927 = vmatprep.subr.bf16.mxu1 %v7570_v1  ;;  %3376 = vmatprep.subr.bf16.mxu0 %v7570_v1  ;;  %v7783_v34 = vld [vmem:[%s9042_s1 + $0xf8] sm:$0xff]   ;;  %v7019_v36 = vld [vmem:[%s7697_s26 + $0x8] ss:$28 sps:$4 sm:$0xff]   ;;  %v7029_v43 = vld [vmem:[%s7697_s26 + $0x74] ss:$28 sps:$4 sm:$0xff]  }
  0x19   : > { %v7016_v35 = vld [vmem:[%s7697_s26] ss:$28 sps:$4 sm:$0xff]   ;;  %v7035_v40 = vld [vmem:[%s9042_s1 + $0x108] sm:$0xff]   ;;  %v7027_v41 = vld [vmem:[%s7697_s26 + $0x38] ss:$28 sps:$4 sm:$0xff]  }
  0x1a   : > { %v7022_v37 = vld [vmem:[%s9042_s1 + $0x100] sm:$0xff]   ;;  %v7023_v38 = vld [vmem:[%s7697_s26 + $0x3c] ss:$28 sps:$4 sm:$0xff]   ;;  %v7054_v45 = vld [vmem:[%s9042_s1 + $0x110] sm:$0xff]  }
  0x1b   : > { %2928 = vmatpush1.bf16.msra.mxu1 %v6990_v7  ;;  %3377 = vmatpush1.bf16.msra.mxu0 %v7639_v8  ;;  %v7025_v39 = vld [vmem:[%s7697_s26 + $0x44] ss:$28 sps:$4 sm:$0xff]   ;;  %v7031_v44 = vld [vmem:[%s7697_s26 + $0x7c] ss:$28 sps:$4 sm:$0xff]   ;;  %v7033_v47 = vld [vmem:[%s7697_s26 + $0x70] ss:$28 sps:$4 sm:$0xff]  }
  0x1c   : > { %2929 = vmatprep.subr.bf16.mxu1 %v7570_v1  ;;  %3378 = vmatprep.subr.bf16.mxu0 %v7570_v1  ;;  %v7028_v42 = vld [vmem:[%s7697_s26 + $0x40] ss:$28 sps:$4 sm:$0xff]   ;;  %v7034_v48 = vld [vmem:[%s7697_s26 + $0x78] ss:$28 sps:$4 sm:$0xff]   ;;  %v7036_v49 = vld [vmem:[%s7697_s26 + $0xac] ss:$28 sps:$4 sm:$0xff]  }
  0x1d   : > { %v7067_v46 = vld [vmem:[%s9042_s1 + $0x118] sm:$0xff]   ;;  %v7038_v50 = vld [vmem:[%s7697_s26 + $0xb4] ss:$28 sps:$4 sm:$0xff]   ;;  %v7084_v51 = vld [vmem:[%s9042_s1 + $0x120] sm:$0xff]  }
  0x1e   : > { %v7099_v52 = vld [vmem:[%s9042_s1 + $0x128] sm:$0xff]   ;;  %v7042_v55 = vld [vmem:[%s7697_s26 + $0xe4] ss:$28 sps:$4 sm:$0xff]   ;;  %v7112_v57 = vld [vmem:[%s9042_s1 + $0x130] sm:$0xff]  }
  0x1f   : > { %2930 = vmatpush1.bf16.msra.mxu1 %v6992_v9  ;;  %3379 = vmatpush1.bf16.msra.mxu0 %v7652_v10  ;;  %v7040_v53 = vld [vmem:[%s7697_s26 + $0xa8] ss:$28 sps:$4 sm:$0xff]   ;;  %v7041_v54 = vld [vmem:[%s7697_s26 + $0xb0] ss:$28 sps:$4 sm:$0xff]   ;;  %v7131_v58 = vld [vmem:[%s9042_s1 + $0x138] sm:$0xff]  }
  0x20   : > { %2931 = vmatprep.subr.bf16.mxu1 %v7570_v1  ;;  %3380 = vmatprep.subr.bf16.mxu0 %v7570_v1  ;;  %v7044_v56 = vld [vmem:[%s7697_s26 + $0xec] ss:$28 sps:$4 sm:$0xff]   ;;  %v7046_v59 = vld [vmem:[%s7697_s26 + $0xe0] ss:$28 sps:$4 sm:$0xff]   ;;  %v7052_v0 = vld [vmem:[%s7697_s26 + $0x118] ss:$28 sps:$4 sm:$0xff]  }
  0x21   : > { %v7047_v60 = vld [vmem:[%s7697_s26 + $0xe8] ss:$28 sps:$4 sm:$0xff]   ;;  %v7048_v61 = vld [vmem:[%s7697_s26 + $0x11c] ss:$28 sps:$4 sm:$0xff]   ;;  %v7055_v3 = vld [vmem:[%s7697_s26 + $0x154] ss:$28 sps:$4 sm:$0xff]  }
  0x22   : > { %v7050_v62 = vld [vmem:[%s7697_s26 + $0x124] ss:$28 sps:$4 sm:$0xff]   ;;  %v7059_v5 = vld [vmem:[%s7697_s26 + $0x150] ss:$28 sps:$4 sm:$0xff]   ;;  %v7078_v19 = vld [vmem:[%s7697_s26 + $0x1f8] ss:$28 sps:$4 sm:$0xff]  }
  0x23   : > { %2932 = vmatpush1.bf16.msra.mxu1 %v6994_v11  ;;  %3381 = vmatpush1.bf16.msra.mxu0 %v7663_v12  ;;  %v7144_v63 = vld [vmem:[%s9042_s1 + $0x140] sm:$0xff]   ;;  %v7061_v7 = vld [vmem:[%s7697_s26 + $0x18c] ss:$28 sps:$4 sm:$0xff]   ;;  %v7080_v21 = vld [vmem:[%s7697_s26 + $0x234] ss:$28 sps:$4 sm:$0xff]  }
  0x24   : > { %2933 = vmatprep.subr.bf16.mxu1 %v7570_v1  ;;  %3382 = vmatprep.subr.bf16.mxu0 %v7570_v1  ;;  %v7163_v9 = vld [vmem:[%s9042_s1 + $0x148] sm:$0xff]  }
  0x25   : > { %v7066_v11 = vld [vmem:[%s7697_s26 + $0x190] ss:$28 sps:$4 sm:$0xff]  }
  0x27   : > { %2934 = vmatpush1.bf16.msra.mxu1 %v6996_v13  ;;  %3383 = vmatpush1.bf16.msra.mxu0 %v7676_v14  ;;  %v7070_v13 = vld [vmem:[%s7697_s26 + $0x1cc] ss:$28 sps:$4 sm:$0xff]  }
  0x28   : > { %2935 = vmatprep.subr.bf16.mxu1 %v7570_v1  ;;  %3384 = vmatprep.subr.bf16.mxu0 %v7570_v1 }
  0x2b   : > { %2936 = vmatpush1.bf16.msra.mxu1 %v6998_v15  ;;  %3385 = vmatpush1.bf16.msra.mxu0 %v7688_v16  ;;  %v7073_v15 = vld [vmem:[%s7697_s26 + $0x1c8] ss:$28 sps:$4 sm:$0xff]  }
  0x2c   : > { %2937 = vmatprep.subr.bf16.mxu1 %v7570_v1  ;;  %3386 = vmatprep.subr.bf16.mxu0 %v7570_v1 }
  0x2f   : > { %2938 = vmatpush1.bf16.msra.mxu1 %v7000_v17  ;;  %3387 = vmatpush1.bf16.msra.mxu0 %v7704_v18  ;;  %v7076_v17 = vld [vmem:[%s7697_s26 + $0x204] ss:$28 sps:$4 sm:$0xff]  }
  0x30   : > { %2939 = vmatprep.subr.bf16.mxu1 %v7570_v1  ;;  %3388 = vmatprep.subr.bf16.mxu0 %v7570_v1 }
  0x33   : > { %2940 = vmatpush1.bf16.msra.mxu1 %v7002_v20  ;;  %3389 = vmatpush1.bf16.msra.mxu0 %v7717_v22  ;;  %v7079_v20 = vld [vmem:[%s7697_s26 + $0x200] ss:$28 sps:$4 sm:$0xff]  }
  0x34   : > { %2941 = vmatprep.subr.bf16.mxu1 %v7570_v1  ;;  %3390 = vmatprep.subr.bf16.mxu0 %v7570_v1 }
  0x37   : > { %2942 = vmatpush1.bf16.msra.mxu1 %v7004_v23  ;;  %3391 = vmatpush1.bf16.msra.mxu0 %v7728_v24  ;;  %v7085_v23 = vld [vmem:[%s7697_s26 + $0x230] ss:$28 sps:$4 sm:$0xff]  }
  0x38   : > { %2943 = vmatprep.subr.bf16.mxu1 %v7570_v1  ;;  %3392 = vmatprep.subr.bf16.mxu0 %v7570_v1 }
  0x3b   : > { %2944 = vmatpush1.bf16.msra.mxu1 %v7006_v25  ;;  %3393 = vmatpush1.bf16.msra.mxu0 %v7739_v26  ;;  %v7087_v25 = vld [vmem:[%s7697_s26 + $0x26c] ss:$28 sps:$4 sm:$0xff]  }
  0x3c   : > { %2945 = vmatprep.subr.bf16.mxu1 %v7570_v1  ;;  %3394 = vmatprep.subr.bf16.mxu0 %v7570_v1 }
  0x3f   : > { %2946 = vmatpush1.bf16.msra.mxu1 %v7008_v27  ;;  %3395 = vmatpush1.bf16.msra.mxu0 %v7750_v28  ;;  %v7091_v27 = vld [vmem:[%s7697_s26 + $0x268] ss:$28 sps:$4 sm:$0xff]  }
  0x40   : > { %2947 = vmatprep.subr.bf16.mxu1 %v7570_v1  ;;  %3396 = vmatprep.subr.bf16.mxu0 %v7570_v1 }
  0x43   : > { %2948 = vmatpush1.bf16.msra.mxu1 %v7010_v29  ;;  %3397 = vmatpush1.bf16.msra.mxu0 %v7761_v30  ;;  %v7093_v29 = vld [vmem:[%s7697_s26 + $0x2a4] ss:$28 sps:$4 sm:$0xff]  }
  0x44   : > { %2949 = vmatprep.subr.bf16.mxu1 %v7570_v1  ;;  %3398 = vmatprep.subr.bf16.mxu0 %v7570_v1 }
  0x47   : > { %2950 = vmatpush1.bf16.msra.mxu1 %v7012_v31  ;;  %3399 = vmatpush1.bf16.msra.mxu0 %v7772_v32  ;;  %v7195_v31 = vld [vmem:[%s9042_s1 + $0x158] sm:$0xff]  }
  0x48   : > { %2951 = vmatprep.subr.bf16.mxu1 %v7570_v1  ;;  %3400 = vmatprep.subr.bf16.mxu0 %v7570_v1 }
  0x4b   : > { %2952 = vmatpush1.bf16.msra.mxu1 %v7014_v33  ;;  %3401 = vmatpush1.bf16.msra.mxu0 %v7783_v34  ;;  %v7098_v33 = vld [vmem:[%s7697_s26 + $0x2a8] ss:$28 sps:$4 sm:$0xff]  }
  0x4c   : > { %6526 = vmatprep.subr.bf16.mxu1 %v7570_v1  ;;  %3819 = vmatprep.subr.bf16.mxu0 %v7570_v1 }
  0x4e   : > { %2954 = vmatmul.mubr.bf16.vlgmr.msra.gmra.mrb[0].mxu1 %v7016_v35  ;;  %3403 = vmatmul.mubr.bf16.vlgmr.msra.gmra.mrb[0].mxu0 %v7019_v36  ;;  %v7102_v35 = vld [vmem:[%s7697_s26 + $0x2e4] ss:$28 sps:$4 sm:$0xff]   ;;  %v7104_v36 = vld [vmem:[%s7697_s26 + $0x2d8] ss:$28 sps:$4 sm:$0xff]  }
  0x4f   : > { %6542 = vmatpush1.bf16.msra.mxu1 %v7607_v2  ;;  %3820 = vmatpush1.bf16.msra.mxu0 %v7022_v37  ;;  %v7053_v2 = vld [vmem:[%s7697_s26 + $0x120] ss:$28 sps:$4 sm:$0xff]  }
  0x50   : > { %2961 = vmatprep.mubr.bf16.mxu1 %v7023_v38  ;;  %3410 = vmatprep.mubr.bf16.mxu0 %v7025_v39  ;;  %v7105_v37 = vld [vmem:[%s7697_s26 + $0x2e0] ss:$28 sps:$4 sm:$0xff]   ;;  %v7106_v38 = vld [vmem:[%s7697_s26 + $0x314] ss:$28 sps:$4 sm:$0xff]  }
  0x51   : > { %3821 = vmatprep.subr.bf16.mxu0 %v7570_v1  ;;  %6527 = vmatprep.subr.bf16.mxu1 %v7570_v1  ;;  %v7108_v39 = vld [vmem:[%s7697_s26 + $0x31c] ss:$28 sps:$4 sm:$0xff]  }
  0x53   : > { %6543 = vmatpush1.bf16.msra.mxu1 %v7617_v4  ;;  %3822 = vmatpush1.bf16.msra.mxu0 %v7035_v40  ;;  %v7057_v4 = vld [vmem:[%s7697_s26 + $0x15c] ss:$28 sps:$4 sm:$0xff]   ;;  %v7110_v40 = vld [vmem:[%s7697_s26 + $0x310] ss:$28 sps:$4 sm:$0xff]  }
  0x54   : > { %6528 = vmatprep.subr.bf16.mxu1 %v7570_v1  ;;  %3823 = vmatprep.subr.bf16.mxu0 %v7570_v1 }
  0x56   : > { %2962 = vmatmul.mubr.bf16.gmra.mrb[4].mxu1 %v7027_v41  ;;  %3411 = vmatmul.mubr.bf16.gmra.mrb[4].mxu0 %v7028_v42  ;;  %v7111_v41 = vld [vmem:[%s7697_s26 + $0x318] ss:$28 sps:$4 sm:$0xff]   ;;  %v7113_v42 = vld [vmem:[%s7697_s26 + $0x34c] ss:$28 sps:$4 sm:$0xff]  }
  0x57   : > { %2969 = vmatprep.mubr.bf16.mxu1 %v7029_v43  ;;  %3418 = vmatprep.mubr.bf16.mxu0 %v7031_v44  ;;  %v7208_v43 = vld [vmem:[%s9042_s1 + $0x160] sm:$0xff]   ;;  %v7115_v44 = vld [vmem:[%s7697_s26 + $0x354] ss:$28 sps:$4 sm:$0xff]  }
  0x58   : > { %3824 = vmatpush1.bf16.msra.mxu0 %v7054_v45  ;;  %6544 = vmatpush1.bf16.msra.mxu1 %v7628_v6  ;;  %v7060_v6 = vld [vmem:[%s7697_s26 + $0x158] ss:$28 sps:$4 sm:$0xff]   ;;  %v7117_v45 = vld [vmem:[%s7697_s26 + $0x348] ss:$28 sps:$4 sm:$0xff]  }
  0x59   : > { %3825 = vmatprep.subr.bf16.mxu0 %v7570_v1  ;;  %6529 = vmatprep.subr.bf16.mxu1 %v7570_v1 }
  0x5c   : > { %3826 = vmatpush1.bf16.msra.mxu0 %v7067_v46  ;;  %6545 = vmatpush1.bf16.msra.mxu1 %v7639_v8  ;;  %v7063_v8 = vld [vmem:[%s7697_s26 + $0x194] ss:$28 sps:$4 sm:$0xff]  }
  0x5d   : > { %3827 = vmatprep.subr.bf16.mxu0 %v7570_v1  ;;  %6530 = vmatprep.subr.bf16.mxu1 %v7570_v1  ;;  %v7118_v46 = vld [vmem:[%s7697_s26 + $0x350] ss:$28 sps:$4 sm:$0xff]  }
  0x5e   : > { %2970 = vmatmul.mubr.bf16.gmra.mrb[8].mxu1 %v7033_v47  ;;  %3419 = vmatmul.mubr.bf16.gmra.mrb[8].mxu0 %v7034_v48  ;;  %v7119_v47 = vld [vmem:[%s7697_s26 + $0x384] ss:$28 sps:$4 sm:$0xff]   ;;  %v7121_v48 = vld [vmem:[%s7697_s26 + $0x38c] ss:$28 sps:$4 sm:$0xff]  }
  0x5f   : > { %2977 = vmatprep.mubr.bf16.mxu1 %v7036_v49  ;;  %3426 = vmatprep.mubr.bf16.mxu0 %v7038_v50  ;;  %v7123_v49 = vld [vmem:[%s7697_s26 + $0x380] ss:$28 sps:$4 sm:$0xff]   ;;  %v7124_v50 = vld [vmem:[%s7697_s26 + $0x388] ss:$28 sps:$4 sm:$0xff]  }
  0x60   : > { %3828 = vmatpush1.bf16.msra.mxu0 %v7084_v51  ;;  %6546 = vmatpush1.bf16.msra.mxu1 %v7652_v10  ;;  %v7065_v10 = vld [vmem:[%s7697_s26 + $0x188] ss:$28 sps:$4 sm:$0xff]   ;;  %v7125_v51 = vld [vmem:[%s7697_s26 + $0x3bc] ss:$28 sps:$4 sm:$0xff]  }
  0x61   : > { %3829 = vmatprep.subr.bf16.mxu0 %v7570_v1  ;;  %6531 = vmatprep.subr.bf16.mxu1 %v7570_v1 }
  0x64   : > { %3830 = vmatpush1.bf16.msra.mxu0 %v7099_v52  ;;  %6547 = vmatpush1.bf16.msra.mxu1 %v7663_v12  ;;  %v7068_v12 = vld [vmem:[%s7697_s26 + $0x1c4] ss:$28 sps:$4 sm:$0xff]  }
  0x65   : > { %3831 = vmatprep.subr.bf16.mxu0 %v7570_v1  ;;  %6532 = vmatprep.subr.bf16.mxu1 %v7570_v1  ;;  %v7127_v52 = vld [vmem:[%s7697_s26 + $0x3c4] ss:$28 sps:$4 sm:$0xff]  }
  0x66   : > { %2978 = vmatmul.mubr.bf16.gmra.mrb[12].mxu1 %v7040_v53  ;;  %3427 = vmatmul.mubr.bf16.gmra.mrb[12].mxu0 %v7041_v54  ;;  %v7225_v53 = vld [vmem:[%s9042_s1 + $0x168] sm:$0xff]   ;;  %v7129_v54 = vld [vmem:[%s7697_s26 + $0x3b8] ss:$28 sps:$4 sm:$0xff]  }
  0x67   : > { %2985 = vmatprep.mubr.bf16.mxu1 %v7042_v55  ;;  %3434 = vmatprep.mubr.bf16.mxu0 %v7044_v56  ;;  %v7130_v55 = vld [vmem:[%s7697_s26 + $0x3c0] ss:$28 sps:$4 sm:$0xff]   ;;  %v7132_v56 = vld [vmem:[%s7697_s26 + $0x3f4] ss:$28 sps:$4 sm:$0xff]  }
  0x68   : > { %3832 = vmatpush1.bf16.msra.mxu0 %v7112_v57  ;;  %6548 = vmatpush1.bf16.msra.mxu1 %v7676_v14  ;;  %v7072_v14 = vld [vmem:[%s7697_s26 + $0x1c0] ss:$28 sps:$4 sm:$0xff]  }
  0x69   : > { %3833 = vmatprep.subr.bf16.mxu0 %v7570_v1  ;;  %6533 = vmatprep.subr.bf16.mxu1 %v7570_v1  ;;  %v7134_v57 = vld [vmem:[%s7697_s26 + $0x3fc] ss:$28 sps:$4 sm:$0xff]  }
  0x6c   : > { %3834 = vmatpush1.bf16.msra.mxu0 %v7131_v58  ;;  %6549 = vmatpush1.bf16.msra.mxu1 %v7688_v16  ;;  %v7074_v16 = vld [vmem:[%s7697_s26 + $0x1fc] ss:$28 sps:$4 sm:$0xff]   ;;  %v7136_v58 = vld [vmem:[%s7697_s26 + $0x3f0] ss:$28 sps:$4 sm:$0xff]  }
  0x6d   : > { %3835 = vmatprep.subr.bf16.mxu0 %v7570_v1  ;;  %6534 = vmatprep.subr.bf16.mxu1 %v7570_v1 }
  0x6e   : > { %2986 = vmatmul.mubr.bf16.gmra.mrb[16].mxu1 %v7046_v59  ;;  %3435 = vmatmul.mubr.bf16.gmra.mrb[16].mxu0 %v7047_v60  ;;  %v7137_v59 = vld [vmem:[%s7697_s26 + $0x3f8] ss:$28 sps:$4 sm:$0xff]   ;;  %v7138_v60 = vld [vmem:[%s7697_s26 + $0x42c] ss:$28 sps:$4 sm:$0xff]  }
  0x6f   : > { %2993 = vmatprep.mubr.bf16.mxu1 %v7048_v61  ;;  %3442 = vmatprep.mubr.bf16.mxu0 %v7050_v62  ;;  %v7140_v61 = vld [vmem:[%s7697_s26 + $0x434] ss:$28 sps:$4 sm:$0xff]  }
  0x70   : > { %3836 = vmatpush1.bf16.msra.mxu0 %v7144_v63  ;;  %6550 = vmatpush1.bf16.msra.mxu1 %v7704_v18  ;;  %v7176_v18 = vld [vmem:[%s9042_s1 + $0x150] sm:$0xff]   ;;  %v7142_v63 = vld [vmem:[%s7697_s26 + $0x428] ss:$28 sps:$4 sm:$0xff]  }
  0x71   : > { %3837 = vmatprep.subr.bf16.mxu0 %v7570_v1  ;;  %6535 = vmatprep.subr.bf16.mxu1 %v7570_v1  ;;  %v7240_v62 = vld [vmem:[%s9042_s1 + $0x170] sm:$0xff]  }
  0x74   : > { %6551 = vmatpush1.bf16.msra.mxu1 %v7717_v22  ;;  %3838 = vmatpush1.bf16.msra.mxu0 %v7163_v9  ;;  %v7082_v22 = vld [vmem:[%s7697_s26 + $0x23c] ss:$28 sps:$4 sm:$0xff]   ;;  %v7157_v9 = vld [vmem:[%s7697_s26 + $0x4d4] ss:$28 sps:$4 sm:$0xff]  }
  0x75   : > { %6536 = vmatprep.subr.bf16.mxu1 %v7570_v1  ;;  %3839 = vmatprep.subr.bf16.mxu0 %v7570_v1 }
  0x76   : > { %2994 = vmatmul.mubr.bf16.gmra.mrb[20].mxu1 %v7052_v0  ;;  %3443 = vmatmul.mubr.bf16.gmra.mrb[20].mxu0 %v7053_v2  ;;  %v7143_v0 = vld [vmem:[%s7697_s26 + $0x430] ss:$28 sps:$4 sm:$0xff]   ;;  %v7145_v2 = vld [vmem:[%s7697_s26 + $0x464] ss:$28 sps:$4 sm:$0xff]  }
  0x77   : > { %3001 = vmatprep.mubr.bf16.mxu1 %v7055_v3  ;;  %3450 = vmatprep.mubr.bf16.mxu0 %v7057_v4  ;;  %v7147_v3 = vld [vmem:[%s7697_s26 + $0x46c] ss:$28 sps:$4 sm:$0xff]   ;;  %v7149_v4 = vld [vmem:[%s7697_s26 + $0x460] ss:$28 sps:$4 sm:$0xff]  }
  0x78   : > { %6552 = vmatpush1.bf16.msra.mxu1 %v7728_v24  ;;  %3840 = vmatpush1.bf16.msra.mxu0 %v7176_v18  ;;  %v7086_v24 = vld [vmem:[%s7697_s26 + $0x238] ss:$28 sps:$4 sm:$0xff]   ;;  %v7170_v18 = vld [vmem:[%s7697_s26 + $0x544] ss:$28 sps:$4 sm:$0xff]  }
  0x79   : > { %6537 = vmatprep.subr.bf16.mxu1 %v7570_v1  ;;  %3841 = vmatprep.subr.bf16.mxu0 %v7570_v1 }
  0x7c   : > { %6553 = vmatpush1.bf16.msra.mxu1 %v7739_v26  ;;  %v7089_v26 = vld [vmem:[%s7697_s26 + $0x274] ss:$28 sps:$4 sm:$0xff]   ;;  %3842 = vmatpush1.bf16.msra.mxu0 %v7195_v31 }
  0x7d   : > { %6538 = vmatprep.subr.bf16.mxu1 %v7570_v1  ;;  %3843 = vmatprep.subr.bf16.mxu0 %v7570_v1  ;;  %v7191_v31 = vld [vmem:[%s7697_s26 + $0x5f4] ss:$28 sps:$4 sm:$0xff]  }
  0x7e   : > { %3002 = vmatmul.mubr.bf16.gmra.mrb[24].mxu1 %v7059_v5  ;;  %3451 = vmatmul.mubr.bf16.gmra.mrb[24].mxu0 %v7060_v6  ;;  %v7150_v5 = vld [vmem:[%s7697_s26 + $0x468] ss:$28 sps:$4 sm:$0xff]   ;;  %v7151_v6 = vld [vmem:[%s7697_s26 + $0x49c] ss:$28 sps:$4 sm:$0xff]  }
  0x7f   : > { %3009 = vmatprep.mubr.bf16.mxu1 %v7061_v7  ;;  %3458 = vmatprep.mubr.bf16.mxu0 %v7063_v8  ;;  %v7153_v7 = vld [vmem:[%s7697_s26 + $0x4a4] ss:$28 sps:$4 sm:$0xff]  }
  0x80   : > { %6554 = vmatpush1.bf16.msra.mxu1 %v7750_v28  ;;  %v7092_v28 = vld [vmem:[%s7697_s26 + $0x270] ss:$28 sps:$4 sm:$0xff]   ;;  %3844 = vmatpush1.bf16.msra.mxu0 %v7208_v43  ;;  %v7156_v8 = vld [vmem:[%s7697_s26 + $0x4a0] ss:$28 sps:$4 sm:$0xff]  }
  0x81   : > { %6539 = vmatprep.subr.bf16.mxu1 %v7570_v1  ;;  %3845 = vmatprep.subr.bf16.mxu0 %v7570_v1 }
  0x84   : > { %6555 = vmatpush1.bf16.msra.mxu1 %v7761_v30  ;;  %v7095_v30 = vld [vmem:[%s7697_s26 + $0x2ac] ss:$28 sps:$4 sm:$0xff]   ;;  %3846 = vmatpush1.bf16.msra.mxu0 %v7225_v53  ;;  %v7209_v53 = vld [vmem:[%s7697_s26 + $0x694] ss:$28 sps:$4 sm:$0xff]  }
  0x85   : > { %6540 = vmatprep.subr.bf16.mxu1 %v7570_v1  ;;  %3847 = vmatprep.subr.bf16.mxu0 %v7570_v1 }
  0x86   : > { %3010 = vmatmul.mubr.bf16.gmra.mrb[28].mxu1 %v7065_v10  ;;  %3459 = vmatmul.mubr.bf16.gmra.mrb[28].mxu0 %v7066_v11  ;;  %v7159_v10 = vld [vmem:[%s7697_s26 + $0x4dc] ss:$28 sps:$4 sm:$0xff]  }
  0x87   : > { %3017 = vmatprep.mubr.bf16.mxu1 %v7068_v12  ;;  %3466 = vmatprep.mubr.bf16.mxu0 %v7070_v13  ;;  %v7253_v11 = vld [vmem:[%s9042_s1 + $0x178] sm:$0xff]   ;;  %v7161_v12 = vld [vmem:[%s7697_s26 + $0x4d0] ss:$28 sps:$4 sm:$0xff]  }
  0x88   : > { %6556 = vmatpush1.bf16.msra.mxu1 %v7772_v32  ;;  %v7097_v32 = vld [vmem:[%s7697_s26 + $0x2a0] ss:$28 sps:$4 sm:$0xff]   ;;  %3848 = vmatpush1.bf16.msra.mxu0 %v7240_v62  ;;  %v7162_v13 = vld [vmem:[%s7697_s26 + $0x4d8] ss:$28 sps:$4 sm:$0xff]  }
  0x89   : > { %6541 = vmatprep.subr.bf16.mxu1 %v7570_v1  ;;  %3849 = vmatprep.subr.bf16.mxu0 %v7570_v1  ;;  %v7155_v1 = vld [vmem:[%s7697_s26 + $0x498] ss:$28 sps:$4 sm:$0xff]  }
  0x8c   : > { %6557 = vmatpush1.bf16.msra.mxu1 %v7783_v34  ;;  %v7100_v34 = vld [vmem:[%s7697_s26 + $0x2dc] ss:$28 sps:$4 sm:$0xff]   ;;  %3850 = vmatpush1.bf16.msra.mxu0 %v7253_v11 }
  0x8e   : > { %3018 = vmatmul.mubr.bf16.gmra.mrb[32].mxu1 %v7072_v14  ;;  %3467 = vmatmul.mubr.bf16.gmra.mrb[32].mxu0 %v7073_v15  ;;  %v7164_v14 = vld [vmem:[%s7697_s26 + $0x50c] ss:$28 sps:$4 sm:$0xff]   ;;  %v7166_v15 = vld [vmem:[%s7697_s26 + $0x514] ss:$28 sps:$4 sm:$0xff]  }
  0x8f   : > { %3025 = vmatprep.mubr.bf16.mxu1 %v7074_v16  ;;  %3474 = vmatprep.mubr.bf16.mxu0 %v7076_v17  ;;  %v7168_v16 = vld [vmem:[%s7697_s26 + $0x508] ss:$28 sps:$4 sm:$0xff]   ;;  %v7169_v17 = vld [vmem:[%s7697_s26 + $0x510] ss:$28 sps:$4 sm:$0xff]  }
  0x96   : > { %3026 = vmatmul.mubr.bf16.gmra.mrb[36].mxu1 %v7078_v19  ;;  %3475 = vmatmul.mubr.bf16.gmra.mrb[36].mxu0 %v7079_v20  ;;  %v7172_v19 = vld [vmem:[%s7697_s26 + $0x54c] ss:$28 sps:$4 sm:$0xff]   ;;  %v7174_v20 = vld [vmem:[%s7697_s26 + $0x540] ss:$28 sps:$4 sm:$0xff]  }
  0x97   : > { %3033 = vmatprep.mubr.bf16.mxu1 %v7080_v21  ;;  %3482 = vmatprep.mubr.bf16.mxu0 %v7082_v22  ;;  %v7175_v21 = vld [vmem:[%s7697_s26 + $0x548] ss:$28 sps:$4 sm:$0xff]   ;;  %v7177_v22 = vld [vmem:[%s7697_s26 + $0x57c] ss:$28 sps:$4 sm:$0xff]  }
  0x9e   : > { %3034 = vmatmul.mubr.bf16.gmra.mrb[40].mxu1 %v7085_v23  ;;  %3483 = vmatmul.mubr.bf16.gmra.mrb[40].mxu0 %v7086_v24  ;;  %v7179_v23 = vld [vmem:[%s7697_s26 + $0x584] ss:$28 sps:$4 sm:$0xff]   ;;  %v7181_v24 = vld [vmem:[%s7697_s26 + $0x578] ss:$28 sps:$4 sm:$0xff]  }
  0x9f   : > { %3041 = vmatprep.mubr.bf16.mxu1 %v7087_v25  ;;  %3490 = vmatprep.mubr.bf16.mxu0 %v7089_v26  ;;  %v7182_v25 = vld [vmem:[%s7697_s26 + $0x580] ss:$28 sps:$4 sm:$0xff]   ;;  %v7183_v26 = vld [vmem:[%s7697_s26 + $0x5b4] ss:$28 sps:$4 sm:$0xff]  }
  0xa6   : > { %3042 = vmatmul.mubr.bf16.gmra.mrb[44].mxu1 %v7091_v27  ;;  %3491 = vmatmul.mubr.bf16.gmra.mrb[44].mxu0 %v7092_v28  ;;  %v7185_v27 = vld [vmem:[%s7697_s26 + $0x5bc] ss:$28 sps:$4 sm:$0xff]   ;;  %v7187_v28 = vld [vmem:[%s7697_s26 + $0x5b0] ss:$28 sps:$4 sm:$0xff]  }
  0xa7   : > { %3049 = vmatprep.mubr.bf16.mxu1 %v7093_v29  ;;  %3498 = vmatprep.mubr.bf16.mxu0 %v7095_v30  ;;  %v7188_v29 = vld [vmem:[%s7697_s26 + $0x5b8] ss:$28 sps:$4 sm:$0xff]   ;;  %v7189_v30 = vld [vmem:[%s7697_s26 + $0x5ec] ss:$28 sps:$4 sm:$0xff]  }
  0xae   : > { %3050 = vmatmul.mubr.bf16.gmra.mrb[48].mxu1 %v7097_v32  ;;  %3499 = vmatmul.mubr.bf16.gmra.mrb[48].mxu0 %v7098_v33 }
  0xaf   : > { %3057 = vmatprep.mubr.bf16.mxu1 %v7100_v34  ;;  %3506 = vmatprep.mubr.bf16.mxu0 %v7102_v35  ;;  %v7193_v34 = vld [vmem:[%s7697_s26 + $0x5e8] ss:$28 sps:$4 sm:$0xff]  }
  0xb6   : > { %3058 = vmatmul.mubr.bf16.gmra.mrb[52].mxu1 %v7104_v36  ;;  %3507 = vmatmul.mubr.bf16.gmra.mrb[52].mxu0 %v7105_v37  ;;  %v7194_v36 = vld [vmem:[%s7697_s26 + $0x5f0] ss:$28 sps:$4 sm:$0xff]   ;;  %v7196_v37 = vld [vmem:[%s7697_s26 + $0x624] ss:$28 sps:$4 sm:$0xff]  }
  0xb7   : > { %3065 = vmatprep.mubr.bf16.mxu1 %v7106_v38  ;;  %3514 = vmatprep.mubr.bf16.mxu0 %v7108_v39  ;;  %v7198_v39 = vld [vmem:[%s7697_s26 + $0x62c] ss:$28 sps:$4 sm:$0xff]  }
  0xbe   : > { %3066 = vmatmul.mubr.bf16.gmra.mrb[56].mxu1 %v7110_v40  ;;  %3515 = vmatmul.mubr.bf16.gmra.mrb[56].mxu0 %v7111_v41 }
  0xbf   : > { %3073 = vmatprep.mubr.bf16.mxu1 %v7113_v42  ;;  %3522 = vmatprep.mubr.bf16.mxu0 %v7115_v44  ;;  %v7200_v42 = vld [vmem:[%s7697_s26 + $0x620] ss:$28 sps:$4 sm:$0xff]   ;;  %v7201_v44 = vld [vmem:[%s7697_s26 + $0x628] ss:$28 sps:$4 sm:$0xff]  }
  0xc6   : > { %3074 = vmatmul.mubr.bf16.gmra.mrb[60].mxu1 %v7117_v45  ;;  %3523 = vmatmul.mubr.bf16.gmra.mrb[60].mxu0 %v7118_v46  ;;  %v7202_v45 = vld [vmem:[%s7697_s26 + $0x65c] ss:$28 sps:$4 sm:$0xff]  }
  0xc7   : > { %3081 = vmatprep.mubr.bf16.mxu1 %v7119_v47  ;;  %3530 = vmatprep.mubr.bf16.mxu0 %v7121_v48  ;;  %v7204_v47 = vld [vmem:[%s7697_s26 + $0x664] ss:$28 sps:$4 sm:$0xff]  }
  0xce   : > { %3082 = vmatmul.mubr.bf16.gmra.mrb[64].mxu1 %v7123_v49  ;;  %3531 = vmatmul.mubr.bf16.gmra.mrb[64].mxu0 %v7124_v50  ;;  %v7206_v50 = vld [vmem:[%s7697_s26 + $0x658] ss:$28 sps:$4 sm:$0xff]  }
  0xcf   : > { %3089 = vmatprep.mubr.bf16.mxu1 %v7125_v51  ;;  %3538 = vmatprep.mubr.bf16.mxu0 %v7127_v52  ;;  %v7207_v52 = vld [vmem:[%s7697_s26 + $0x660] ss:$28 sps:$4 sm:$0xff]  }
  0xd6   : > { %3090 = vmatmul.mubr.bf16.gmra.mrb[68].mxu1 %v7129_v54  ;;  %3539 = vmatmul.mubr.bf16.gmra.mrb[68].mxu0 %v7130_v55  ;;  %v7211_v55 = vld [vmem:[%s7697_s26 + $0x69c] ss:$28 sps:$4 sm:$0xff]  }
  0xd7   : > { %3097 = vmatprep.mubr.bf16.mxu1 %v7132_v56  ;;  %3546 = vmatprep.mubr.bf16.mxu0 %v7134_v57 }
  0xde   : > { %3098 = vmatmul.mubr.bf16.gmra.mrb[72].mxu1 %v7136_v58  ;;  %3547 = vmatmul.mubr.bf16.gmra.mrb[72].mxu0 %v7137_v59  ;;  %v7213_v58 = vld [vmem:[%s7697_s26 + $0x690] ss:$28 sps:$4 sm:$0xff]  }
  0xdf   : > { %3105 = vmatprep.mubr.bf16.mxu1 %v7138_v60  ;;  %3554 = vmatprep.mubr.bf16.mxu0 %v7140_v61  ;;  %v7214_v60 = vld [vmem:[%s7697_s26 + $0x698] ss:$28 sps:$4 sm:$0xff]   ;;  %v7215_v61 = vld [vmem:[%s7697_s26 + $0x6cc] ss:$28 sps:$4 sm:$0xff]  }
  0xe6   : > { %3106 = vmatmul.mubr.bf16.gmra.mrb[76].mxu1 %v7142_v63  ;;  %3555 = vmatmul.mubr.bf16.gmra.mrb[76].mxu0 %v7143_v0  ;;  %v7217_v63 = vld [vmem:[%s7697_s26 + $0x6d4] ss:$28 sps:$4 sm:$0xff]  }
  0xe7   : > { %3113 = vmatprep.mubr.bf16.mxu1 %v7145_v2  ;;  %3562 = vmatprep.mubr.bf16.mxu0 %v7147_v3  ;;  %v7219_v3 = vld [vmem:[%s7697_s26 + $0x6c8] ss:$28 sps:$4 sm:$0xff]  }
  0xee   : > { %3114 = vmatmul.mubr.bf16.gmra.mrb[80].mxu1 %v7149_v4  ;;  %3563 = vmatmul.mubr.bf16.gmra.mrb[80].mxu0 %v7150_v5  ;;  %v7220_v5 = vld [vmem:[%s7697_s26 + $0x6d0] ss:$28 sps:$4 sm:$0xff]  }
  0xef   : > { %3121 = vmatprep.mubr.bf16.mxu1 %v7151_v6  ;;  %3570 = vmatprep.mubr.bf16.mxu0 %v7153_v7  ;;  %v7221_v6 = vld [vmem:[%s7697_s26 + $0x704] ss:$28 sps:$4 sm:$0xff]  }
  0xf6   : > { %3122 = vmatmul.mubr.bf16.gmra.mrb[84].mxu1 %v7155_v1  ;;  %3571 = vmatmul.mubr.bf16.gmra.mrb[84].mxu0 %v7156_v8  ;;  %v7223_v1 = vld [vmem:[%s7697_s26 + $0x70c] ss:$28 sps:$4 sm:$0xff]  }
  0xf7   : > { %3129 = vmatprep.mubr.bf16.mxu1 %v7157_v9  ;;  %3578 = vmatprep.mubr.bf16.mxu0 %v7159_v10  ;;  %v7226_v10 = vld [vmem:[%s7697_s26 + $0x700] ss:$28 sps:$4 sm:$0xff]  }
  0xfe   : > { %3130 = vmatmul.mubr.bf16.gmra.mrb[88].mxu1 %v7161_v12  ;;  %3579 = vmatmul.mubr.bf16.gmra.mrb[88].mxu0 %v7162_v13  ;;  %v7227_v12 = vld [vmem:[%s7697_s26 + $0x708] ss:$28 sps:$4 sm:$0xff]   ;;  %v7228_v13 = vld [vmem:[%s7697_s26 + $0x73c] ss:$28 sps:$4 sm:$0xff]  }
  0xff   : > { %3137 = vmatprep.mubr.bf16.mxu1 %v7164_v14  ;;  %3586 = vmatprep.mubr.bf16.mxu0 %v7166_v15  ;;  %v7230_v15 = vld [vmem:[%s7697_s26 + $0x744] ss:$28 sps:$4 sm:$0xff]  }
 0x106   : > { %3138 = vmatmul.mubr.bf16.gmra.mrb[92].mxu1 %v7168_v16  ;;  %3587 = vmatmul.mubr.bf16.gmra.mrb[92].mxu0 %v7169_v17 }
 0x107   : > { %3145 = vmatprep.mubr.bf16.mxu1 %v7170_v18  ;;  %3594 = vmatprep.mubr.bf16.mxu0 %v7172_v19  ;;  %v7232_v18 = vld [vmem:[%s7697_s26 + $0x738] ss:$28 sps:$4 sm:$0xff]  }
 0x10e   : > { %3146 = vmatmul.mubr.bf16.gmra.mrb[96].mxu1 %v7174_v20  ;;  %3595 = vmatmul.mubr.bf16.gmra.mrb[96].mxu0 %v7175_v21  ;;  %v7233_v20 = vld [vmem:[%s7697_s26 + $0x740] ss:$28 sps:$4 sm:$0xff]   ;;  %v7234_v21 = vld [vmem:[%s7697_s26 + $0x774] ss:$28 sps:$4 sm:$0xff]  }
 0x10f   : > { %3153 = vmatprep.mubr.bf16.mxu1 %v7177_v22  ;;  %3602 = vmatprep.mubr.bf16.mxu0 %v7179_v23  ;;  %v7236_v23 = vld [vmem:[%s7697_s26 + $0x77c] ss:$28 sps:$4 sm:$0xff]  }
 0x116   : > { %3154 = vmatmul.mubr.bf16.gmra.mrb[100].mxu1 %v7181_v24  ;;  %3603 = vmatmul.mubr.bf16.gmra.mrb[100].mxu0 %v7182_v25 }
 0x117   : > { %3161 = vmatprep.mubr.bf16.mxu1 %v7183_v26  ;;  %3610 = vmatprep.mubr.bf16.mxu0 %v7185_v27  ;;  %v7238_v26 = vld [vmem:[%s7697_s26 + $0x770] ss:$28 sps:$4 sm:$0xff]  }
 0x11e   : > { %3162 = vmatmul.mubr.bf16.gmra.mrb[104].mxu1 %v7187_v28  ;;  %3611 = vmatmul.mubr.bf16.gmra.mrb[104].mxu0 %v7188_v29  ;;  %v7239_v28 = vld [vmem:[%s7697_s26 + $0x778] ss:$28 sps:$4 sm:$0xff]   ;;  %v7241_v29 = vld [vmem:[%s7697_s26 + $0x7ac] ss:$28 sps:$4 sm:$0xff]  }
 0x11f   : > { %3169 = vmatprep.mubr.bf16.mxu1 %v7189_v30  ;;  %3618 = vmatprep.mubr.bf16.mxu0 %v7191_v31  ;;  %v7243_v31 = vld [vmem:[%s7697_s26 + $0x7b4] ss:$28 sps:$4 sm:$0xff]  }
 0x121   : > { %v7991_v32 = vpop.f32.mrb[0].mxu1 }
 0x122   : > { %v2957_v33 = vpop.f32.mrb[1].mxu1 }
 0x123   : > { %v7994_v35 = vpop.f32.mrb[2].mxu1 }
 0x124   : > { %v2960_v38 = vpop.f32.mrb[3].mxu1 }
 0x125   : > { %v7246_v38 = vld [vmem:[%s7697_s26 + $0x7b0] ss:$28 sps:$4 sm:$0xff]  }
 0x126   : > { %3170 = vmatmul.mubr.bf16.gmra.mrb[108].mxu1 %v7193_v34  ;;  %3619 = vmatmul.mubr.bf16.gmra.mrb[108].mxu0 %v7194_v36  ;;  %v7245_v36 = vld [vmem:[%s7697_s26 + $0x7a8] ss:$28 sps:$4 sm:$0xff]  }
 0x127   : > { %3177 = vmatprep.mubr.bf16.mxu1 %v7196_v37  ;;  %3626 = vmatprep.mubr.bf16.mxu0 %v7198_v39  ;;  %v7247_v39 = vld [vmem:[%s7697_s26 + $0x7e4] ss:$28 sps:$4 sm:$0xff]  }
 0x129   : > { %v7999_v40 = vpop.f32.mrb[4].mxu1 }
 0x12a   : > { %v2965_v41 = vpop.f32.mrb[5].mxu1 }
 0x12b   : > { %v8002_v43 = vpop.f32.mrb[6].mxu1 }
 0x12c   : > { %v2968_v46 = vpop.f32.mrb[7].mxu1 }
 0x12d   : > { %v7251_v46 = vld [vmem:[%s7697_s26 + $0x7e0] ss:$28 sps:$4 sm:$0xff]  }
 0x12e   : > { %3178 = vmatmul.mubr.bf16.gmra.mrb[112].mxu1 %v7200_v42  ;;  %3627 = vmatmul.mubr.bf16.gmra.mrb[112].mxu0 %v7201_v44  ;;  %v7249_v42 = vld [vmem:[%s7697_s26 + $0x7ec] ss:$28 sps:$4 sm:$0xff]  }
 0x12f   : > { %3185 = vmatprep.mubr.bf16.mxu1 %v7202_v45  ;;  %3634 = vmatprep.mubr.bf16.mxu0 %v7204_v47 }
 0x131   : > { %v8007_v48 = vpop.f32.mrb[8].mxu1 }
 0x132   : > { %v2973_v49 = vpop.f32.mrb[9].mxu1 }
 0x133   : > { %v8010_v51 = vpop.f32.mrb[10].mxu1  ;;  %v7252_v49 = vld [vmem:[%s7697_s26 + $0x7e8] ss:$28 sps:$4 sm:$0xff]  }
 0x134   : > { %v2976_v54 = vpop.f32.mrb[11].mxu1 }
 0x135   : > { %v8074_v54 = vld [vmem:[%s9042_s1 + $0x180] sm:$0xff]  }
 0x136   : > { %3186 = vmatmul.mubr.bf16.gmra.mrb[116].mxu1 %v7206_v50  ;;  %3635 = vmatmul.mubr.bf16.gmra.mrb[116].mxu0 %v7207_v52  ;;  %v7254_v50 = vld [vmem:[%s7697_s26 + $0x81c] ss:$28 sps:$4 sm:$0xff]  }
 0x137   : > { %3193 = vmatprep.mubr.bf16.mxu1 %v7209_v53  ;;  %3642 = vmatprep.mubr.bf16.mxu0 %v7211_v55  ;;  %v7256_v53 = vld [vmem:[%s7697_s26 + $0x824] ss:$28 sps:$4 sm:$0xff]  }
 0x138   : > { %6406 = vmatprep.subr.bf16.mxu1 %v8074_v54 }
 0x139   : > { %v8015_v56 = vpop.f32.mrb[12].mxu1 }
 0x13a   : > { %v2981_v57 = vpop.f32.mrb[13].mxu1 }
 0x13b   : > { %v8018_v59 = vpop.f32.mrb[14].mxu1 }
 0x13c   : > { %v2984_v62 = vpop.f32.mrb[15].mxu1 }
 0x13d   : > { %v7260_v62 = vld [vmem:[%s7697_s26 + $0x854] ss:$28 sps:$4 sm:$0xff]  }
 0x13e   : > { %3194 = vmatmul.mubr.bf16.gmra.mrb[120].mxu1 %v7213_v58  ;;  %3643 = vmatmul.mubr.bf16.gmra.mrb[120].mxu0 %v7214_v60  ;;  %v7258_v58 = vld [vmem:[%s7697_s26 + $0x818] ss:$28 sps:$4 sm:$0xff]  }
 0x13f   : > { %3201 = vmatprep.mubr.bf16.mxu1 %v7215_v61  ;;  %3650 = vmatprep.mubr.bf16.mxu0 %v7217_v63  ;;  %v7259_v61 = vld [vmem:[%s7697_s26 + $0x820] ss:$28 sps:$4 sm:$0xff]  }
 0x141   : > { %v8023_v0 = vpop.f32.mrb[16].mxu1 }
 0x142   : > { %v2989_v2 = vpop.f32.mrb[17].mxu1 }
 0x143   : > { %v8026_v4 = vpop.f32.mrb[18].mxu1  ;;  %v7262_v2 = vld [vmem:[%s7697_s26 + $0x85c] ss:$28 sps:$4 sm:$0xff]  }
 0x144   : > { %v2992_v7 = vpop.f32.mrb[19].mxu1 }
 0x146   : > { %3202 = vmatmul.mubr.bf16.gmra.mrb[124].mxu1 %v7219_v3  ;;  %3651 = vmatmul.mubr.bf16.gmra.mrb[124].mxu0 %v7220_v5 }
 0x147   : > { %3209 = vmatprep.mubr.bf16.mxu1 %v7221_v6  ;;  %3658 = vmatprep.mubr.bf16.mxu0 %v7223_v1  ;;  %v7264_v6 = vld [vmem:[%s7697_s26 + $0x850] ss:$28 sps:$4 sm:$0xff]   ;;  %v7265_v1 = vld [vmem:[%s7697_s26 + $0x858] ss:$28 sps:$4 sm:$0xff]  }
 0x149   : > { %v8031_v8 = vpop.f32.mrb[20].mxu1 }
 0x14a   : > { %v2997_v9 = vpop.f32.mrb[21].mxu1 }
 0x14b   : > { %v8034_v11 = vpop.f32.mrb[22].mxu1  ;;  %v7266_v9 = vld [vmem:[%s7697_s26 + $0x88c] ss:$28 sps:$4 sm:$0xff]  }
 0x14c   : > { %v3000_v14 = vpop.f32.mrb[23].mxu1 }
 0x14e   : > { %3210 = vmatmul.mubr.bf16.gmra.mrb[128].mxu1 %v7226_v10  ;;  %3659 = vmatmul.mubr.bf16.gmra.mrb[128].mxu0 %v7227_v12  ;;  %v7270_v12 = vld [vmem:[%s7697_s26 + $0x14] ss:$28 sps:$4 sm:$0xff]  }
 0x14f   : > { %3217 = vmatprep.mubr.bf16.mxu1 %v7228_v13  ;;  %3666 = vmatprep.mubr.bf16.mxu0 %v7230_v15  ;;  %v7271_v15 = vld [vmem:[%s7697_s26 + $0x888] ss:$28 sps:$4 sm:$0xff]  }
 0x151   : > { %v8039_v16 = vpop.f32.mrb[24].mxu1 }
 0x152   : > { %v3005_v17 = vpop.f32.mrb[25].mxu1 }
 0x153   : > { %v8042_v19 = vpop.f32.mrb[26].mxu1 }
 0x154   : > { %v3008_v22 = vpop.f32.mrb[27].mxu1 }
 0x155   : > { %v7274_v22 = vld [vmem:[%s7697_s26 + $0x4c] ss:$28 sps:$4 sm:$0xff]  }
 0x156   : > { %3218 = vmatmul.mubr.bf16.gmra.mrb[132].mxu1 %v7232_v18  ;;  %3667 = vmatmul.mubr.bf16.gmra.mrb[132].mxu0 %v7233_v20  ;;  %v7268_v18 = vld [vmem:[%s7697_s26 + $0x10] ss:$28 sps:$4 sm:$0xff]   ;;  %v7272_v20 = vld [vmem:[%s7697_s26 + $0x8c4] ss:$28 sps:$4 sm:$0xff]  }
 0x157   : > { %3225 = vmatprep.mubr.bf16.mxu1 %v7234_v21  ;;  %3674 = vmatprep.mubr.bf16.mxu0 %v7236_v23 }
 0x159   : > { %v8047_v24 = vpop.f32.mrb[28].mxu1 }
 0x15a   : > { %v3013_v25 = vpop.f32.mrb[29].mxu1 }
 0x15b   : > { %v8050_v27 = vpop.f32.mrb[30].mxu1 }
 0x15c   : > { %v3016_v30 = vpop.f32.mrb[31].mxu1 }
 0x15d   : > { %v7278_v30 = vld [vmem:[%s7697_s26 + $0x8fc] ss:$28 sps:$4 sm:$0xff]  }
 0x15e   : > { %3226 = vmatmul.mubr.bf16.gmra.mrb[136].mxu1 %v7238_v26  ;;  %3675 = vmatmul.mubr.bf16.gmra.mrb[136].mxu0 %v7239_v28  ;;  %v7276_v26 = vld [vmem:[%s7697_s26 + $0x8c0] ss:$28 sps:$4 sm:$0xff]  }
 0x15f   : > { %3233 = vmatprep.mubr.bf16.mxu1 %v7241_v29  ;;  %3682 = vmatprep.mubr.bf16.mxu0 %v7243_v31  ;;  %v7277_v29 = vld [vmem:[%s7697_s26 + $0x48] ss:$28 sps:$4 sm:$0xff]  }
 0x161   : > { %v8055_v33 = vpop.f32.mrb[32].mxu1 }
 0x162   : > { %v3021_v34 = vpop.f32.mrb[33].mxu1 }
 0x163   : > { %v8058_v37 = vpop.f32.mrb[34].mxu1  ;;  %v7280_v34 = vld [vmem:[%s7697_s26 + $0x84] ss:$28 sps:$4 sm:$0xff]  }
 0x164   : > { %v3024_v41 = vpop.f32.mrb[35].mxu1 }
 0x166   : > { %3234 = vmatmul.mubr.bf16.gmra.mrb[140].mxu1 %v7245_v36  ;;  %3683 = vmatmul.mubr.bf16.gmra.mrb[140].mxu0 %v7246_v38 }
 0x167   : > { %3241 = vmatprep.mubr.bf16.mxu1 %v7247_v39  ;;  %3690 = vmatprep.mubr.bf16.mxu0 %v7249_v42  ;;  %v7282_v39 = vld [vmem:[%s7697_s26 + $0x8f8] ss:$28 sps:$4 sm:$0xff]   ;;  %v7283_v42 = vld [vmem:[%s7697_s26 + $0x80] ss:$28 sps:$4 sm:$0xff]  }
 0x169   : > { %v8063_v44 = vpop.f32.mrb[36].mxu1 }
 0x16a   : > { %v3029_v45 = vpop.f32.mrb[37].mxu1 }
 0x16b   : > { %v8066_v47 = vpop.f32.mrb[38].mxu1  ;;  %v7284_v45 = vld [vmem:[%s7697_s26 + $0x934] ss:$28 sps:$4 sm:$0xff]  }
 0x16c   : > { %v3032_v52 = vpop.f32.mrb[39].mxu1 }
 0x16e   : > { %3242 = vmatmul.mubr.bf16.gmra.mrb[144].mxu1 %v7251_v46  ;;  %3691 = vmatmul.mubr.bf16.gmra.mrb[144].mxu0 %v7252_v49  ;;  %v7286_v49 = vld [vmem:[%s7697_s26 + $0xbc] ss:$28 sps:$4 sm:$0xff]  }
 0x16f   : > { %3249 = vmatprep.mubr.bf16.mxu1 %v7254_v50  ;;  %3698 = vmatprep.mubr.bf16.mxu0 %v7256_v53  ;;  %v7288_v53 = vld [vmem:[%s7697_s26 + $0x930] ss:$28 sps:$4 sm:$0xff]  }
 0x171   : > { %v8076_v55 = vpop.f32.mrb[40].mxu1 }
 0x172   : > { %v3037_v57 = vpop.f32.mrb[41].mxu1 }
 0x173   : > { %v8080_v60 = vpop.f32.mrb[42].mxu1 }
 0x174   : > { %v3040_v63 = vpop.f32.mrb[43].mxu1 }
 0x175   : > { %v7292_v63 = vld [vmem:[%s7697_s26 + $0xf4] ss:$28 sps:$4 sm:$0xff]  }
 0x176   : > { %3250 = vmatmul.mubr.bf16.gmra.mrb[148].mxu1 %v7258_v58  ;;  %3699 = vmatmul.mubr.bf16.gmra.mrb[148].mxu0 %v7259_v61  ;;  %v7289_v58 = vld [vmem:[%s7697_s26 + $0xb8] ss:$28 sps:$4 sm:$0xff]   ;;  %v7290_v61 = vld [vmem:[%s7697_s26 + $0x96c] ss:$28 sps:$4 sm:$0xff]  }
 0x177   : > { %3257 = vmatprep.mubr.bf16.mxu1 %v7260_v62  ;;  %3706 = vmatprep.mubr.bf16.mxu0 %v7262_v2 }
 0x179   : > { %v8085_v3 = vpop.f32.mrb[44].mxu1 }
 0x17a   : > { %v3045_v5 = vpop.f32.mrb[45].mxu1 }
 0x17b   : > { %v8088_v7 = vpop.f32.mrb[46].mxu1 }
 0x17c   : > { %v3048_v10 = vpop.f32.mrb[47].mxu1 }
 0x17d   : > { %v7296_v10 = vld [vmem:[%s7697_s26 + $0x9a4] ss:$28 sps:$4 sm:$0xff]  }
 0x17e   : > { %3258 = vmatmul.mubr.bf16.gmra.mrb[152].mxu1 %v7264_v6  ;;  %3707 = vmatmul.mubr.bf16.gmra.mrb[152].mxu0 %v7265_v1  ;;  %v7294_v6 = vld [vmem:[%s7697_s26 + $0x968] ss:$28 sps:$4 sm:$0xff]  }
 0x17f   : > { %3265 = vmatprep.mubr.bf16.mxu1 %v7266_v9  ;;  %3851 = vmatprep.mubr.bf16.mxu0 %v7270_v12  ;;  %v7295_v9 = vld [vmem:[%s7697_s26 + $0xf0] ss:$28 sps:$4 sm:$0xff]  }
 0x181   : > { %v8093_v13 = vpop.f32.mrb[48].mxu1 }
 0x182   : > { %v3053_v14 = vpop.f32.mrb[49].mxu1 }
 0x183   : > { %v8096_v17 = vpop.f32.mrb[50].mxu1  ;;  %v7298_v14 = vld [vmem:[%s7697_s26 + $0x12c] ss:$28 sps:$4 sm:$0xff]  }
 0x184   : > { %v3056_v21 = vpop.f32.mrb[51].mxu1 }
 0x186   : > { %3266 = vmatmul.mubr.bf16.gmra.mrb[156].mxu1 %v7271_v15  ;;  %3852 = vmatmul.mubr.bf16.vlgmr.msra.gmra.mrb[0].mxu0 %v7268_v18 }
 0x187   : > { %3273 = vmatprep.mubr.bf16.mxu1 %v7272_v20  ;;  %3859 = vmatprep.mubr.bf16.mxu0 %v7274_v22  ;;  %v7300_v20 = vld [vmem:[%s7697_s26 + $0x9a0] ss:$28 sps:$4 sm:$0xff]   ;;  %v7301_v22 = vld [vmem:[%s7697_s26 + $0x128] ss:$28 sps:$4 sm:$0xff]  }
 0x189   : > { %v8101_v23 = vpop.f32.mrb[52].mxu1 }
 0x18a   : > { %v3061_v25 = vpop.f32.mrb[53].mxu1 }
 0x18b   : > { %v8104_v28 = vpop.f32.mrb[54].mxu1  ;;  %v7302_v25 = vld [vmem:[%s7697_s26 + $0x9dc] ss:$28 sps:$4 sm:$0xff]  }
 0x18c   : > { %v3064_v31 = vpop.f32.mrb[55].mxu1 }
 0x18e   : > { %3274 = vmatmul.mubr.bf16.gmra.mrb[160].mxu1 %v7276_v26  ;;  %3860 = vmatmul.mubr.bf16.gmra.mrb[4].mxu0 %v7277_v29  ;;  %v7304_v29 = vld [vmem:[%s7697_s26 + $0x164] ss:$28 sps:$4 sm:$0xff]  }
 0x18f   : > { %3281 = vmatprep.mubr.bf16.mxu1 %v7278_v30  ;;  %3867 = vmatprep.mubr.bf16.mxu0 %v7280_v34  ;;  %v7306_v34 = vld [vmem:[%s7697_s26 + $0x9d8] ss:$28 sps:$4 sm:$0xff]  }
 0x191   : > { %v8109_v36 = vpop.f32.mrb[56].mxu1 }
 0x192   : > { %v3069_v38 = vpop.f32.mrb[57].mxu1 }
 0x193   : > { %v8112_v41 = vpop.f32.mrb[58].mxu1 }
 0x194   : > { %v3072_v46 = vpop.f32.mrb[59].mxu1 }
 0x195   : > { %v7310_v46 = vld [vmem:[%s7697_s26 + $0x19c] ss:$28 sps:$4 sm:$0xff]  }
 0x196   : > { %3282 = vmatmul.mubr.bf16.gmra.mrb[164].mxu1 %v7282_v39  ;;  %3868 = vmatmul.mubr.bf16.gmra.mrb[8].mxu0 %v7283_v42  ;;  %v7307_v39 = vld [vmem:[%s7697_s26 + $0x160] ss:$28 sps:$4 sm:$0xff]   ;;  %v7308_v42 = vld [vmem:[%s7697_s26 + $0xa14] ss:$28 sps:$4 sm:$0xff]  }
 0x197   : > { %3289 = vmatprep.mubr.bf16.mxu1 %v7284_v45  ;;  %3875 = vmatprep.mubr.bf16.mxu0 %v7286_v49 }
 0x199   : > { %v8117_v50 = vpop.f32.mrb[60].mxu1 }
 0x19a   : > { %v3077_v52 = vpop.f32.mrb[61].mxu1 }
 0x19b   : > { %v8120_v57 = vpop.f32.mrb[62].mxu1 }
 0x19c   : > { %v3080_v62 = vpop.f32.mrb[63].mxu1 }
 0x19d   : > { %v7314_v62 = vld [vmem:[%s7697_s26 + $0xa4c] ss:$28 sps:$4 sm:$0xff]  }
 0x19e   : > { %3290 = vmatmul.mubr.bf16.gmra.mrb[168].mxu1 %v7288_v53  ;;  %3876 = vmatmul.mubr.bf16.gmra.mrb[12].mxu0 %v7289_v58  ;;  %v7312_v53 = vld [vmem:[%s7697_s26 + $0xa10] ss:$28 sps:$4 sm:$0xff]  }
 0x19f   : > { %3297 = vmatprep.mubr.bf16.mxu1 %v7290_v61  ;;  %3883 = vmatprep.mubr.bf16.mxu0 %v7292_v63  ;;  %v7313_v61 = vld [vmem:[%s7697_s26 + $0x198] ss:$28 sps:$4 sm:$0xff]  }
 0x1a1   : > { %v8125_v2 = vpop.f32.mrb[64].mxu1 }
 0x1a2   : > { %v3085_v5 = vpop.f32.mrb[65].mxu1 }
 0x1a3   : > { %v8128_v1 = vpop.f32.mrb[66].mxu1  ;;  %v7316_v5 = vld [vmem:[%s7697_s26 + $0x1d4] ss:$28 sps:$4 sm:$0xff]  }
 0x1a4   : > { %v3088_v12 = vpop.f32.mrb[67].mxu1 }
 0x1a6   : > { %3298 = vmatmul.mubr.bf16.gmra.mrb[172].mxu1 %v7294_v6  ;;  %3884 = vmatmul.mubr.bf16.gmra.mrb[16].mxu0 %v7295_v9 }
 0x1a7   : > { %3305 = vmatprep.mubr.bf16.mxu1 %v7296_v10  ;;  %3891 = vmatprep.mubr.bf16.mxu0 %v7298_v14  ;;  %v7318_v10 = vld [vmem:[%s7697_s26 + $0xa48] ss:$28 sps:$4 sm:$0xff]   ;;  %v7319_v14 = vld [vmem:[%s7697_s26 + $0x1d0] ss:$28 sps:$4 sm:$0xff]  }
 0x1a9   : > { %v8133_v15 = vpop.f32.mrb[68].mxu1 }
 0x1aa   : > { %v3093_v18 = vpop.f32.mrb[69].mxu1 }
 0x1ab   : > { %v8136_v21 = vpop.f32.mrb[70].mxu1  ;;  %v7320_v18 = vld [vmem:[%s7697_s26 + $0xa84] ss:$28 sps:$4 sm:$0xff]  }
 0x1ac   : > { %v3096_v26 = vpop.f32.mrb[71].mxu1 }
 0x1ae   : > { %3306 = vmatmul.mubr.bf16.gmra.mrb[176].mxu1 %v7300_v20  ;;  %3892 = vmatmul.mubr.bf16.gmra.mrb[20].mxu0 %v7301_v22  ;;  %v7322_v22 = vld [vmem:[%s7697_s26 + $0x20c] ss:$28 sps:$4 sm:$0xff]  }
 0x1af   : > { %3313 = vmatprep.mubr.bf16.mxu1 %v7302_v25  ;;  %3899 = vmatprep.mubr.bf16.mxu0 %v7304_v29  ;;  %v7324_v29 = vld [vmem:[%s7697_s26 + $0xa80] ss:$28 sps:$4 sm:$0xff]  }
 0x1b1   : > { %v8141_v30 = vpop.f32.mrb[72].mxu1 }
 0x1b2   : > { %v3101_v31 = vpop.f32.mrb[73].mxu1 }
 0x1b3   : > { %v8144_v38 = vpop.f32.mrb[74].mxu1 }
 0x1b4   : > { %v3104_v45 = vpop.f32.mrb[75].mxu1 }
 0x1b5   : > { %v7328_v45 = vld [vmem:[%s7697_s26 + $0x244] ss:$28 sps:$4 sm:$0xff]  }
 0x1b6   : > { %3314 = vmatmul.mubr.bf16.gmra.mrb[180].mxu1 %v7306_v34  ;;  %3900 = vmatmul.mubr.bf16.gmra.mrb[24].mxu0 %v7307_v39  ;;  %v7325_v34 = vld [vmem:[%s7697_s26 + $0x208] ss:$28 sps:$4 sm:$0xff]   ;;  %v7326_v39 = vld [vmem:[%s7697_s26 + $0xabc] ss:$28 sps:$4 sm:$0xff]  }
 0x1b7   : > { %3321 = vmatprep.mubr.bf16.mxu1 %v7308_v42  ;;  %3907 = vmatprep.mubr.bf16.mxu0 %v7310_v46 }
 0x1b9   : > { %v8149_v49 = vpop.f32.mrb[76].mxu1 }
 0x1ba   : > { %v3109_v52 = vpop.f32.mrb[77].mxu1 }
 0x1bb   : > { %v8152_v58 = vpop.f32.mrb[78].mxu1 }
 0x1bc   : > { %v3112_v63 = vpop.f32.mrb[79].mxu1 }
 0x1bd   : > { %v7332_v63 = vld [vmem:[%s7697_s26 + $0xaf4] ss:$28 sps:$4 sm:$0xff]  }
 0x1be   : > { %3322 = vmatmul.mubr.bf16.gmra.mrb[184].mxu1 %v7312_v53  ;;  %3908 = vmatmul.mubr.bf16.gmra.mrb[28].mxu0 %v7313_v61  ;;  %v7330_v53 = vld [vmem:[%s7697_s26 + $0xab8] ss:$28 sps:$4 sm:$0xff]  }
 0x1bf   : > { %3329 = vmatprep.mubr.bf16.mxu1 %v7314_v62  ;;  %3915 = vmatprep.mubr.bf16.mxu0 %v7316_v5  ;;  %v7331_v62 = vld [vmem:[%s7697_s26 + $0x240] ss:$28 sps:$4 sm:$0xff]  }
 0x1c1   : > { %v8157_v6 = vpop.f32.mrb[80].mxu1 }
 0x1c2   : > { %v3117_v9 = vpop.f32.mrb[81].mxu1 }
 0x1c3   : > { %v8160_v12 = vpop.f32.mrb[82].mxu1  ;;  %v7334_v9 = vld [vmem:[%s7697_s26 + $0x27c] ss:$28 sps:$4 sm:$0xff]  }
 0x1c4   : > { %v3120_v20 = vpop.f32.mrb[83].mxu1 }
 0x1c6   : > { %3330 = vmatmul.mubr.bf16.gmra.mrb[188].mxu1 %v7318_v10  ;;  %3916 = vmatmul.mubr.bf16.gmra.mrb[32].mxu0 %v7319_v14 }
 0x1c7   : > { %3337 = vmatprep.mubr.bf16.mxu1 %v7320_v18  ;;  %3923 = vmatprep.mubr.bf16.mxu0 %v7322_v22  ;;  %v7336_v18 = vld [vmem:[%s7697_s26 + $0xaf0] ss:$28 sps:$4 sm:$0xff]   ;;  %v7337_v22 = vld [vmem:[%s7697_s26 + $0x278] ss:$28 sps:$4 sm:$0xff]  }
 0x1c9   : > { %v8165_v25 = vpop.f32.mrb[84].mxu1 }
 0x1ca   : > { %v3125_v26 = vpop.f32.mrb[85].mxu1 }
 0x1cb   : > { %v8168_v31 = vpop.f32.mrb[86].mxu1  ;;  %v7338_v26 = vld [vmem:[%s7697_s26 + $0xb2c] ss:$28 sps:$4 sm:$0xff]  }
 0x1cc   : > { %v3128_v42 = vpop.f32.mrb[87].mxu1 }
 0x1ce   : > { %3338 = vmatmul.mubr.bf16.gmra.mrb[192].mxu1 %v7324_v29  ;;  %3924 = vmatmul.mubr.bf16.gmra.mrb[36].mxu0 %v7325_v34  ;;  %v7340_v34 = vld [vmem:[%s7697_s26 + $0x2b4] ss:$28 sps:$4 sm:$0xff]  }
 0x1cf   : > { %3345 = vmatprep.mubr.bf16.mxu1 %v7326_v39  ;;  %3931 = vmatprep.mubr.bf16.mxu0 %v7328_v45  ;;  %v7342_v45 = vld [vmem:[%s7697_s26 + $0xb28] ss:$28 sps:$4 sm:$0xff]  }
 0x1d1   : > { %v8173_v46 = vpop.f32.mrb[88].mxu1 }
 0x1d2   : > { %v3133_v52 = vpop.f32.mrb[89].mxu1 }
 0x1d3   : > { %v8176_v61 = vpop.f32.mrb[90].mxu1 }
 0x1d4   : > { %v3136_v5 = vpop.f32.mrb[91].mxu1 }
 0x1d5   : > { %v7347_v5 = vld [vmem:[%s7697_s26 + $0x2ec] ss:$28 sps:$4 sm:$0xff]  }
 0x1d6   : > { %3346 = vmatmul.mubr.bf16.gmra.mrb[196].mxu1 %v7330_v53  ;;  %3932 = vmatmul.mubr.bf16.gmra.mrb[40].mxu0 %v7331_v62  ;;  %v7343_v53 = vld [vmem:[%s7697_s26 + $0x2b0] ss:$28 sps:$4 sm:$0xff]  }
 0x1d7   : > { %3353 = vmatprep.mubr.bf16.mxu1 %v7332_v63  ;;  %3939 = vmatprep.mubr.bf16.mxu0 %v7334_v9  ;;  %v7346_v62 = vld [vmem:[%s7697_s26 + $0x894] ss:$28 sps:$4 sm:$0xff]  }
 0x1d9   : > { %v8181_v10 = vpop.f32.mrb[92].mxu1 }
 0x1da   : > { %v3141_v14 = vpop.f32.mrb[93].mxu1 }
 0x1db   : > { %v8184_v20 = vpop.f32.mrb[94].mxu1 }
 0x1dc   : > { %v3144_v29 = vpop.f32.mrb[95].mxu1 }
 0x1de   : > { %3354 = vmatmul.mubr.bf16.gmra.mrb[200].mxu1 %v7336_v18  ;;  %3940 = vmatmul.mubr.bf16.gmra.mrb[44].mxu0 %v7337_v22  ;;  %v7344_v18 = vld [vmem:[%s7697_s26 + $0x890] ss:$28 sps:$4 sm:$0xff]  }
 0x1df   : > { %3361 = vmatprep.mubr.bf16.mxu1 %v7338_v26  ;;  %3947 = vmatprep.mubr.bf16.mxu0 %v7340_v34  ;;  %v7349_v26 = vld [vmem:[%s7697_s26 + $0x2e8] ss:$28 sps:$4 sm:$0xff]  }
 0x1e0   : > { %v7351_v34 = vld [vmem:[%s7697_s26 + $0x8cc] ss:$28 sps:$4 sm:$0xff]  }
 0x1e1   : > { %v8189_v39 = vpop.f32.mrb[96].mxu1 }
 0x1e2   : > { %v3149_v42 = vpop.f32.mrb[97].mxu1 }
 0x1e3   : > { %v8192_v52 = vpop.f32.mrb[98].mxu1  ;;  %v7353_v42 = vld [vmem:[%s7697_s26 + $0x324] ss:$28 sps:$4 sm:$0xff]  }
 0x1e4   : > { %v3152_v63 = vpop.f32.mrb[99].mxu1 }
 0x1e6   : > { %3362 = vmatmul.mubr.bf16.gmra.mrb[204].mxu1 %v7342_v45  ;;  %3948 = vmatmul.mubr.bf16.gmra.mrb[48].mxu0 %v7343_v53  ;;  %v7357_v45 = vld [vmem:[%s9042_s1 + $0x188] sm:$0xff]   ;;  %v7370_v53 = vld [vmem:[%s9042_s1 + $0x190] sm:$0xff]  }
 0x1e7   : > { %3714 = vmatprep.mubr.bf16.mxu1 %v7346_v62  ;;  %3955 = vmatprep.mubr.bf16.mxu0 %v7347_v5  ;;  %v7355_v5 = vld [vmem:[%s7697_s26 + $0x8c8] ss:$28 sps:$4 sm:$0xff]  }
 0x1e9   : > { %v8197_v9 = vpop.f32.mrb[100].mxu1 }
 0x1ea   : > { %9045 = vst [vmem:[#allocation2_spill] sm:$0xff] %v8197_v9  ;;  %v3157_v14 = vpop.f32.mrb[101].mxu1 }
 0x1eb   : > { %v8200_v22 = vpop.f32.mrb[102].mxu1 }
 0x1ec   : > { %9046 = vst [vmem:[#allocation3_spill] sm:$0xff] %v8200_v22  ;;  %v3160_v29 = vpop.f32.mrb[103].mxu1  ;;  %v7358_v22 = vld [vmem:[%s7697_s26 + $0x904] ss:$28 sps:$4 sm:$0xff]  }
 0x1ed   : > { %v7356_v29 = vld [vmem:[%s7697_s26 + $0x320] ss:$28 sps:$4 sm:$0xff]  }
 0x1ee   : > { %3715 = vmatmul.mubr.bf16.vlgmr.msra.gmra.mrb[156].mxu1 %v7344_v18  ;;  %3956 = vmatmul.mubr.bf16.gmra.mrb[52].mxu0 %v7349_v26  ;;  %v7383_v26 = vld [vmem:[%s9042_s1 + $0x198] sm:$0xff]  }
 0x1ef   : > { %6407 = vmatpush3.bf16.msra.mxu1 %v8074_v54  ;;  %3722 = vmatprep.mubr.bf16.mxu1 %v7351_v34  ;;  %v7360_v54 = vld [vmem:[%s7697_s26 + $0x35c] ss:$28 sps:$4 sm:$0xff]  }
 0x1f0   : > { %3963 = vmatprep.mubr.bf16.mxu0 %v7353_v42  ;;  %6408 = vmatprep.subr.bf16.mxu1 %v7357_v45  ;;  %v7390_v42 = vld [vmem:[%s9042_s1 + $0x1a0] sm:$0xff]  }
 0x1f1   : > { %v8212_v62 = vpop.f32.mrb[104].mxu1 }
 0x1f2   : > { %9047 = vst [vmem:[#allocation4_spill] sm:$0xff] %v8212_v62  ;;  %v3165_v63 = vpop.f32.mrb[105].mxu1  ;;  %v7364_v62 = vld [vmem:[%s7697_s26 + $0x93c] ss:$28 sps:$4 sm:$0xff]  }
 0x1f3   : > { %v8215_v14 = vpop.f32.mrb[106].mxu1  ;;  %6409 = vmatpush3.bf16.msra.mxu1 %v7357_v45  ;;  %v7362_v63 = vld [vmem:[%s7697_s26 + $0x900] ss:$28 sps:$4 sm:$0xff]  }
 0x1f4   : > { %9048 = vst [vmem:[#allocation5_spill] sm:$0xff] %v8215_v14  ;;  %v3168_v18 = vpop.f32.mrb[107].mxu1  ;;  %6410 = vmatprep.subr.bf16.mxu1 %v7370_v53  ;;  %v7363_v14 = vld [vmem:[%s7697_s26 + $0x358] ss:$28 sps:$4 sm:$0xff]  }
 0x1f6   : > { %3723 = vmatmul.mubr.bf16.gmra.mrb[160].mxu1 %v7355_v5  ;;  %3964 = vmatmul.mubr.bf16.gmra.mrb[56].mxu0 %v7356_v29  ;;  %v7366_v5 = vld [vmem:[%s7697_s26 + $0x394] ss:$28 sps:$4 sm:$0xff]  }
 0x1f7   : > { %3730 = vmatprep.mubr.bf16.mxu1 %v7358_v22  ;;  %3971 = vmatprep.mubr.bf16.mxu0 %v7360_v54  ;;  %v7403_v22 = vld [vmem:[%s9042_s1 + $0x1a8] sm:$0xff]   ;;  %v7368_v54 = vld [vmem:[%s7697_s26 + $0x938] ss:$28 sps:$4 sm:$0xff]  }
 0x1f8   : > { %6411 = vmatpush3.bf16.msra.mxu1 %v7370_v53 }
 0x1f9   : > { %v8223_v34 = vpop.f32.mrb[108].mxu1  ;;  %6412 = vmatprep.subr.bf16.mxu1 %v7383_v26 }
 0x1fa   : > { %9049 = vst [vmem:[#allocation6_spill] sm:$0xff] %v8223_v34  ;;  %v3173_v45 = vpop.f32.mrb[109].mxu1  ;;  %v7379_v34 = vld [vmem:[%s7697_s26 + $0x404] ss:$28 sps:$4 sm:$0xff]  }
 0x1fb   : > { %v8229_v18 = vpop.f32.mrb[110].mxu1  ;;  %v7369_v45 = vld [vmem:[%s7697_s26 + $0x390] ss:$28 sps:$4 sm:$0xff]  }
 0x1fc   : > { %9050 = vst [vmem:[#allocation7_spill] sm:$0xff] %v8229_v18  ;;  %v3176_v9 = vpop.f32.mrb[111].mxu1  ;;  %6413 = vmatpush3.bf16.msra.mxu1 %v7383_v26  ;;  %v7371_v18 = vld [vmem:[%s7697_s26 + $0x974] ss:$28 sps:$4 sm:$0xff]  }
 0x1fd   : > { %6414 = vmatprep.subr.bf16.mxu1 %v7390_v42  ;;  %v7414_v9 = vld [vmem:[%s9042_s1 + $0x1b0] sm:$0xff]  }
 0x1fe   : > { %3731 = vmatmul.mubr.bf16.gmra.mrb[164].mxu1 %v7362_v63  ;;  %3972 = vmatmul.mubr.bf16.gmra.mrb[60].mxu0 %v7363_v14  ;;  %v7423_v14 = vld [vmem:[%s9042_s1 + $0x1b8] sm:$0xff]  }
 0x1ff   : > { %3738 = vmatprep.mubr.bf16.mxu1 %v7364_v62  ;;  %3979 = vmatprep.mubr.bf16.mxu0 %v7366_v5  ;;  %v7373_v62 = vld [vmem:[%s7697_s26 + $0x3cc] ss:$28 sps:$4 sm:$0xff]  }
 0x200   : > { %6415 = vmatpush3.bf16.msra.mxu1 %v7390_v42 }
 0x201   : > { %v8237_v53 = vpop.f32.mrb[112].mxu1  ;;  %6416 = vmatprep.subr.bf16.mxu1 %v7403_v22 }
 0x202   : > { %9051 = vst [vmem:[#allocation8_spill] sm:$0xff] %v8237_v53  ;;  %v3181_v29 = vpop.f32.mrb[113].mxu1 }
 0x203   : > { %v8243_v26 = vpop.f32.mrb[114].mxu1  ;;  %v7375_v29 = vld [vmem:[%s7697_s26 + $0x970] ss:$28 sps:$4 sm:$0xff]  }
 0x204   : > { %9052 = vst [vmem:[#allocation9_spill] sm:$0xff] %v8243_v26  ;;  %v3184_v63 = vpop.f32.mrb[115].mxu1  ;;  %6417 = vmatpush3.bf16.msra.mxu1 %v7403_v22  ;;  %v7377_v26 = vld [vmem:[%s7697_s26 + $0x9ac] ss:$28 sps:$4 sm:$0xff]  }
 0x205   : > { %6418 = vmatprep.subr.bf16.mxu1 %v7414_v9  ;;  %v7376_v63 = vld [vmem:[%s7697_s26 + $0x3c8] ss:$28 sps:$4 sm:$0xff]  }
 0x206   : > { %3739 = vmatmul.mubr.bf16.gmra.mrb[168].mxu1 %v7368_v54  ;;  %3980 = vmatmul.mubr.bf16.gmra.mrb[64].mxu0 %v7369_v45  ;;  %v7381_v54 = vld [vmem:[%s7697_s26 + $0x9a8] ss:$28 sps:$4 sm:$0xff]  }
 0x207   : > { %3746 = vmatprep.mubr.bf16.mxu1 %v7371_v18  ;;  %3987 = vmatprep.mubr.bf16.mxu0 %v7373_v62  ;;  %v7382_v62 = vld [vmem:[%s7697_s26 + $0x400] ss:$28 sps:$4 sm:$0xff]  }
 0x208   : > { %6419 = vmatpush3.bf16.msra.mxu1 %v7414_v9 }
 0x209   : > { %v8251_v42 = vpop.f32.mrb[116].mxu1  ;;  %6420 = vmatprep.subr.bf16.mxu1 %v7423_v14 }
 0x20a   : > { %9053 = vst [vmem:[#allocation10_spill] sm:$0xff] %v8251_v42  ;;  %v3189_v5 = vpop.f32.mrb[117].mxu1 }
 0x20b   : > { %v8254_v22 = vpop.f32.mrb[118].mxu1  ;;  %v7384_v5 = vld [vmem:[%s7697_s26 + $0x9e4] ss:$28 sps:$4 sm:$0xff]  }
 0x20c   : > { %9054 = vst [vmem:[#allocation11_spill] sm:$0xff] %v8254_v22  ;;  %v3192_v53 = vpop.f32.mrb[119].mxu1  ;;  %6421 = vmatpush3.bf16.msra.mxu1 %v7423_v14  ;;  %v7388_v14 = vld [vmem:[%s7697_s26 + $0x9e0] ss:$28 sps:$4 sm:$0xff]  }
 0x20d   : > { %v7386_v53 = vld [vmem:[%s7697_s26 + $0x43c] ss:$28 sps:$4 sm:$0xff]  }
 0x20e   : > { %3747 = vmatmul.mubr.bf16.gmra.mrb[172].mxu1 %v7375_v29  ;;  %3988 = vmatmul.mubr.bf16.gmra.mrb[68].mxu0 %v7376_v63  ;;  %v7389_v63 = vld [vmem:[%s7697_s26 + $0x438] ss:$28 sps:$4 sm:$0xff]  }
 0x20f   : > { %3754 = vmatprep.mubr.bf16.mxu1 %v7377_v26  ;;  %3995 = vmatprep.mubr.bf16.mxu0 %v7379_v34 }
 0x211   : > { %v8259_v18 = vpop.f32.mrb[120].mxu1 }
 0x212   : > { %9055 = vst [vmem:[#allocation12_spill] sm:$0xff] %v8259_v18  ;;  %v3197_v9 = vpop.f32.mrb[121].mxu1  ;;  %v7393_v18 = vld [vmem:[%s7697_s26 + $0x474] ss:$28 sps:$4 sm:$0xff]  }
 0x213   : > { %v8262_v45 = vpop.f32.mrb[122].mxu1  ;;  %v7391_v9 = vld [vmem:[%s7697_s26 + $0xa1c] ss:$28 sps:$4 sm:$0xff]  }
 0x214   : > { %9056 = vst [vmem:[#allocation13_spill] sm:$0xff] %v8262_v45  ;;  %v3200_v22 = vpop.f32.mrb[123].mxu1 }
 0x216   : > { %3755 = vmatmul.mubr.bf16.gmra.mrb[176].mxu1 %v7381_v54  ;;  %3996 = vmatmul.mubr.bf16.gmra.mrb[72].mxu0 %v7382_v62  ;;  %v7395_v62 = vld [vmem:[%s7697_s26 + $0xa18] ss:$28 sps:$4 sm:$0xff]  }
 0x217   : > { %3762 = vmatprep.mubr.bf16.mxu1 %v7384_v5  ;;  %4003 = vmatprep.mubr.bf16.mxu0 %v7386_v53  ;;  %v7396_v53 = vld [vmem:[%s7697_s26 + $0x470] ss:$28 sps:$4 sm:$0xff]  }
 0x219   : > { %v8267_v26 = vpop.f32.mrb[124].mxu1 }
 0x21a   : > { %9057 = vst [vmem:[#allocation14_spill] sm:$0xff] %v8267_v26  ;;  %v3205_v34 = vpop.f32.mrb[125].mxu1  ;;  %v7399_v26 = vld [vmem:[%s7697_s26 + $0x4ac] ss:$28 sps:$4 sm:$0xff]  }
 0x21b   : > { %v8270_v29 = vpop.f32.mrb[126].mxu1  ;;  %v7397_v34 = vld [vmem:[%s7697_s26 + $0xa54] ss:$28 sps:$4 sm:$0xff]  }
 0x21c   : > { %9058 = vst [vmem:[#allocation15_spill] sm:$0xff] %v8270_v29  ;;  %v3208_v45 = vpop.f32.mrb[127].mxu1 }
 0x21e   : > { %3763 = vmatmul.mubr.bf16.gmra.mrb[180].mxu1 %v7388_v14  ;;  %4004 = vmatmul.mubr.bf16.gmra.mrb[76].mxu0 %v7389_v63  ;;  %v7401_v14 = vld [vmem:[%s7697_s26 + $0xa50] ss:$28 sps:$4 sm:$0xff]  }
 0x21f   : > { %3770 = vmatprep.mubr.bf16.mxu1 %v7391_v9  ;;  %4011 = vmatprep.mubr.bf16.mxu0 %v7393_v18  ;;  %v7402_v9 = vld [vmem:[%s7697_s26 + $0x4a8] ss:$28 sps:$4 sm:$0xff]  }
 0x221   : > { %v8275_v22 = vpop.f32.mrb[128].mxu1 }
 0x222   : > { %9059 = vst [vmem:[#allocation16_spill] sm:$0xff] %v8275_v22  ;;  %v3213_v54 = vpop.f32.mrb[129].mxu1  ;;  %v7406_v22 = vld [vmem:[%s7697_s26 + $0x4e4] ss:$28 sps:$4 sm:$0xff]  }
 0x223   : > { %v8278_v5 = vpop.f32.mrb[130].mxu1  ;;  %v7404_v54 = vld [vmem:[%s7697_s26 + $0xa8c] ss:$28 sps:$4 sm:$0xff]  }
 0x224   : > { %9060 = vst [vmem:[#allocation17_spill] sm:$0xff] %v8278_v5  ;;  %v3216_v29 = vpop.f32.mrb[131].mxu1 }
 0x226   : > { %3771 = vmatmul.mubr.bf16.gmra.mrb[184].mxu1 %v7395_v62  ;;  %4012 = vmatmul.mubr.bf16.gmra.mrb[80].mxu0 %v7396_v53  ;;  %v7408_v62 = vld [vmem:[%s7697_s26 + $0xa88] ss:$28 sps:$4 sm:$0xff]  }
 0x227   : > { %3778 = vmatprep.mubr.bf16.mxu1 %v7397_v34  ;;  %4019 = vmatprep.mubr.bf16.mxu0 %v7399_v26  ;;  %v7409_v34 = vld [vmem:[%s7697_s26 + $0x4e0] ss:$28 sps:$4 sm:$0xff]  }
 0x229   : > { %v8283_v45 = vpop.f32.mrb[132].mxu1 }
 0x22a   : > { %9061 = vst [vmem:[#allocation18_spill] sm:$0xff] %v8283_v45  ;;  %v3221_v18 = vpop.f32.mrb[133].mxu1  ;;  %v7412_v45 = vld [vmem:[%s7697_s26 + $0x51c] ss:$28 sps:$4 sm:$0xff]  }
 0x22b   : > { %v8286_v63 = vpop.f32.mrb[134].mxu1  ;;  %v7410_v18 = vld [vmem:[%s7697_s26 + $0xac4] ss:$28 sps:$4 sm:$0xff]  }
 0x22c   : > { %9062 = vst [vmem:[#allocation19_spill] sm:$0xff] %v8286_v63  ;;  %v3224_v5 = vpop.f32.mrb[135].mxu1 }
 0x22e   : > { %3779 = vmatmul.mubr.bf16.gmra.mrb[188].mxu1 %v7401_v14  ;;  %4020 = vmatmul.mubr.bf16.gmra.mrb[84].mxu0 %v7402_v9  ;;  %v7415_v14 = vld [vmem:[%s7697_s26 + $0xac0] ss:$28 sps:$4 sm:$0xff]  }
 0x22f   : > { %3786 = vmatprep.mubr.bf16.mxu1 %v7404_v54  ;;  %4027 = vmatprep.mubr.bf16.mxu0 %v7406_v22  ;;  %v7416_v54 = vld [vmem:[%s7697_s26 + $0x518] ss:$28 sps:$4 sm:$0xff]  }
 0x231   : > { %v8291_v29 = vpop.f32.mrb[136].mxu1 }
 0x232   : > { %9063 = vst [vmem:[#allocation20_spill] sm:$0xff] %v8291_v29  ;;  %v3229_v26 = vpop.f32.mrb[137].mxu1  ;;  %v7419_v29 = vld [vmem:[%s7697_s26 + $0x554] ss:$28 sps:$4 sm:$0xff]  }
 0x233   : > { %v8294_v53 = vpop.f32.mrb[138].mxu1  ;;  %v7417_v26 = vld [vmem:[%s7697_s26 + $0xafc] ss:$28 sps:$4 sm:$0xff]  }
 0x234   : > { %9064 = vst [vmem:[#allocation21_spill] sm:$0xff] %v8294_v53  ;;  %v3232_v63 = vpop.f32.mrb[139].mxu1 }
 0x236   : > { %3787 = vmatmul.mubr.bf16.gmra.mrb[192].mxu1 %v7408_v62  ;;  %4028 = vmatmul.mubr.bf16.gmra.mrb[88].mxu0 %v7409_v34  ;;  %v7421_v62 = vld [vmem:[%s7697_s26 + $0xaf8] ss:$28 sps:$4 sm:$0xff]  }
 0x237   : > { %3794 = vmatprep.mubr.bf16.mxu1 %v7410_v18  ;;  %4035 = vmatprep.mubr.bf16.mxu0 %v7412_v45  ;;  %v7422_v18 = vld [vmem:[%s7697_s26 + $0x550] ss:$28 sps:$4 sm:$0xff]  }
 0x239   : > { %v8299_v5 = vpop.f32.mrb[140].mxu1 }
 0x23a   : > { %9065 = vst [vmem:[#allocation22_spill] sm:$0xff] %v8299_v5  ;;  %v3237_v22 = vpop.f32.mrb[141].mxu1  ;;  %v7426_v5 = vld [vmem:[%s7697_s26 + $0x58c] ss:$28 sps:$4 sm:$0xff]  }
 0x23b   : > { %v8302_v9 = vpop.f32.mrb[142].mxu1  ;;  %v7424_v22 = vld [vmem:[%s7697_s26 + $0xb34] ss:$28 sps:$4 sm:$0xff]  }
 0x23c   : > { %9066 = vst [vmem:[#allocation23_spill] sm:$0xff] %v8302_v9  ;;  %v3240_v53 = vpop.f32.mrb[143].mxu1 }
 0x23e   : > { %3795 = vmatmul.mubr.bf16.gmra.mrb[196].mxu1 %v7415_v14  ;;  %4036 = vmatmul.mubr.bf16.gmra.mrb[92].mxu0 %v7416_v54  ;;  %v7428_v14 = vld [vmem:[%s7697_s26 + $0xb30] ss:$28 sps:$4 sm:$0xff]  }
 0x23f   : > { %3802 = vmatprep.mubr.bf16.mxu1 %v7417_v26  ;;  %4043 = vmatprep.mubr.bf16.mxu0 %v7419_v29  ;;  %v7429_v26 = vld [vmem:[%s7697_s26 + $0x588] ss:$28 sps:$4 sm:$0xff]  }
 0x241   : > { %v8307_v63 = vpop.f32.mrb[144].mxu1 }
 0x242   : > { %9067 = vst [vmem:[#allocation24_spill] sm:$0xff] %v8307_v63  ;;  %v3245_v45 = vpop.f32.mrb[145].mxu1  ;;  %v7430_v63 = vld [vmem:[%s7697_s26 + $0x5c4] ss:$28 sps:$4 sm:$0xff]  }
 0x243   : > { %v8310_v34 = vpop.f32.mrb[146].mxu1  ;;  %v7432_v45 = vld [vmem:[%s7697_s26 + $0x18] ss:$28 sps:$4 sm:$0xff]  }
 0x244   : > { %9068 = vst [vmem:[#allocation25_spill] sm:$0xff] %v8310_v34  ;;  %v3248_v9 = vpop.f32.mrb[147].mxu1 }
 0x246   : > { %3803 = vmatmul.mubr.bf16.gmra.mrb[200].mxu1 %v7421_v62  ;;  %4044 = vmatmul.mubr.bf16.gmra.mrb[96].mxu0 %v7422_v18  ;;  %v7434_v62 = vld [vmem:[%s7697_s26 + $0x50] ss:$28 sps:$4 sm:$0xff]  }
 0x247   : > { %3810 = vmatprep.mubr.bf16.mxu1 %v7424_v22  ;;  %4051 = vmatprep.mubr.bf16.mxu0 %v7426_v5  ;;  %v7433_v22 = vld [vmem:[%s7697_s26 + $0x5c0] ss:$28 sps:$4 sm:$0xff]  }
 0x249   : > { %v8315_v53 = vpop.f32.mrb[148].mxu1 }
 0x24a   : > { %9069 = vst [vmem:[#allocation26_spill] sm:$0xff] %v8315_v53  ;;  %v3253_v29 = vpop.f32.mrb[149].mxu1  ;;  %v7435_v53 = vld [vmem:[%s7697_s26 + $0x5fc] ss:$28 sps:$4 sm:$0xff]  }
 0x24b   : > { %v8318_v54 = vpop.f32.mrb[150].mxu1  ;;  %v7437_v29 = vld [vmem:[%s7697_s26 + $0x88] ss:$28 sps:$4 sm:$0xff]  }
 0x24c   : > { %9070 = vst [vmem:[#allocation27_spill] sm:$0xff] %v8318_v54  ;;  %v3256_v34 = vpop.f32.mrb[151].mxu1 }
 0x24d   : > { %v8334_v34 = vld [vmem:[%s9043_s2] ss:$0 sm:$0xff] }
 0x24e   : > { %3811 = vmatmul.mubr.bf16.gmra.mrb[204].mxu1 %v7428_v14  ;;  %4052 = vmatmul.mubr.bf16.gmra.mrb[100].mxu0 %v7429_v26  ;;  %v7439_v26 = vld [vmem:[%s7697_s26 + $0xc0] ss:$28 sps:$4 sm:$0xff]   ;;  %v2967_v42 = vadd.f32 %v8334_v34, %v8002_v43 }
 0x24f   : > { %6422 = vmatprep.mubr.bf16.mxu1 %v7432_v45  ;;  %4059 = vmatprep.mubr.bf16.mxu0 %v7430_v63  ;;  %v2956_v63 = vadd.f32 %v8334_v34, %v7991_v32  ;;  %v2964_v32 = vadd.f32 %v8334_v34, %v7999_v40  ;;  %v2972_v40 = vadd.f32 %v8334_v34, %v8007_v48 }
 0x250   : > { %v2980_v48 = vadd.f32 %v8334_v34, %v8015_v56  ;;  %v2988_v56 = vadd.f32 %v8334_v34, %v8023_v0  ;;  %v2996_v0 = vadd.f32 %v8334_v34, %v8031_v8  ;;  %v3004_v8 = vadd.f32 %v8334_v34, %v8039_v16 }
 0x251   : > { %v8323_v9 = vpop.f32.mrb[152].mxu1  ;;  %v3012_v16 = vadd.f32 %v8334_v34, %v8047_v24  ;;  %v3020_v24 = vadd.f32 %v8334_v34, %v8055_v33  ;;  %v3028_v33 = vadd.f32 %v8334_v34, %v8063_v44  ;;  %v3036_v44 = vadd.f32 %v8334_v34, %v8076_v55 }
 0x252   : > { %9071 = vst [vmem:[#allocation28_spill] sm:$0xff] %v8323_v9  ;;  %v3261_v5 = vpop.f32.mrb[153].mxu1  ;;  %v7442_v9 = vld [vmem:[%s7697_s26 + $0xf8] ss:$28 sps:$4 sm:$0xff]   ;;  %v3044_v55 = vadd.f32 %v8334_v34, %v8085_v3  ;;  %v3052_v3 = vadd.f32 %v8334_v34, %v8093_v13 }
 0x253   : > { %v8326_v18 = vpop.f32.mrb[154].mxu1  ;;  %v2959_v5 = vadd.f32 %v8334_v34, %v7994_v35 }
 0x254   : > { %9072 = vst [vmem:[#allocation29_spill] sm:$0xff] %v8326_v18  ;;  %v3264_v54 = vpop.f32.mrb[155].mxu1  ;;  %v7438_v18 = vld [vmem:[%s7697_s26 + $0x5f8] ss:$28 sps:$4 sm:$0xff]  }
 0x256   : > { %6423 = vmatmul.mubr.bf16.vlgmr.msra.gmra.mrb[208].mxu1 %v7434_v62  ;;  %4060 = vmatmul.mubr.bf16.gmra.mrb[104].mxu0 %v7433_v22  ;;  %v7440_v22 = vld [vmem:[%s7697_s26 + $0x634] ss:$28 sps:$4 sm:$0xff]  }
 0x257   : > { %6426 = vmatprep.mubr.bf16.mxu1 %v7437_v29  ;;  %4067 = vmatprep.mubr.bf16.mxu0 %v7435_v53 }
 0x259   : > { %v3853_v14 = vpop.f32.mrb[0].mxu0 }
 0x25a   : > { %v8339_v45 = vadd.f32 %v3853_v14, %v2956_v63  ;;  %v3855_v54 = vpop.f32.mrb[1].mxu0  ;;  %v7444_v14 = vld [vmem:[%s7697_s26 + $0x130] ss:$28 sps:$4 sm:$0xff]  }
 0x25b   : > { %v3856_v62 = vpop.f32.mrb[2].mxu0 }
 0x25c   : > { %9073 = vst [vmem:[#allocation30_spill] sm:$0xff] %v8339_v45  ;;  %v8346_v53 = vadd.f32 %v3856_v62, %v2959_v5  ;;  %v3858_v29 = vpop.f32.mrb[3].mxu0  ;;  %v7443_v45 = vld [vmem:[%s7697_s26 + $0x630] ss:$28 sps:$4 sm:$0xff]   ;;  %v7447_v5 = vld [vmem:[%s7697_s26 + $0x168] ss:$28 sps:$4 sm:$0xff]  }
 0x25d   : > { %v7449_v29 = vld [vmem:[%s7697_s26 + $0x1a0] ss:$28 sps:$4 sm:$0xff]  }
 0x25e   : > { %6427 = vmatmul.mubr.bf16.gmra.mrb[212].mxu1 %v7439_v26  ;;  %4068 = vmatmul.mubr.bf16.gmra.mrb[108].mxu0 %v7438_v18  ;;  %v7445_v18 = vld [vmem:[%s7697_s26 + $0x66c] ss:$28 sps:$4 sm:$0xff]  }
 0x25f   : > { %6430 = vmatprep.mubr.bf16.mxu1 %v7442_v9  ;;  %4075 = vmatprep.mubr.bf16.mxu0 %v7440_v22 }
 0x261   : > { %v3861_v63 = vpop.f32.mrb[4].mxu0 }
 0x262   : > { %v8351_v35 = vadd.f32 %v3861_v63, %v2964_v32  ;;  %v3863_v54 = vpop.f32.mrb[5].mxu0  ;;  %v2975_v63 = vadd.f32 %v8334_v34, %v8010_v51 }
 0x263   : > { %v3864_v26 = vpop.f32.mrb[6].mxu0  ;;  %v7448_v54 = vld [vmem:[%s7697_s26 + $0x668] ss:$28 sps:$4 sm:$0xff]  }
 0x264   : > { %v8358_v9 = vadd.f32 %v3864_v26, %v2967_v42  ;;  %v3866_v62 = vpop.f32.mrb[7].mxu0  ;;  %v7452_v42 = vld [vmem:[%s7697_s26 + $0x1d8] ss:$28 sps:$4 sm:$0xff]  }
 0x265   : > { %v7454_v62 = vld [vmem:[%s7697_s26 + $0x210] ss:$28 sps:$4 sm:$0xff]  }
 0x266   : > { %6431 = vmatmul.mubr.bf16.gmra.mrb[216].mxu1 %v7444_v14  ;;  %4076 = vmatmul.mubr.bf16.gmra.mrb[112].mxu0 %v7443_v45  ;;  %v7450_v45 = vld [vmem:[%s7697_s26 + $0x6a4] ss:$28 sps:$4 sm:$0xff]  }
 0x267   : > { %6434 = vmatprep.mubr.bf16.mxu1 %v7447_v5  ;;  %4083 = vmatprep.mubr.bf16.mxu0 %v7445_v18 }
 0x269   : > { %v3869_v22 = vpop.f32.mrb[8].mxu0 }
 0x26a   : > { %v8363_v43 = vadd.f32 %v3869_v22, %v2972_v40  ;;  %v3871_v32 = vpop.f32.mrb[9].mxu0  ;;  %v2983_v22 = vadd.f32 %v8334_v34, %v8018_v59 }
 0x26b   : > { %v3872_v14 = vpop.f32.mrb[10].mxu0  ;;  %v7453_v32 = vld [vmem:[%s7697_s26 + $0x6a0] ss:$28 sps:$4 sm:$0xff]  }
 0x26c   : > { %v8370_v5 = vadd.f32 %v3872_v14, %v2975_v63  ;;  %v3874_v26 = vpop.f32.mrb[11].mxu0  ;;  %v7457_v63 = vld [vmem:[%s7697_s26 + $0x248] ss:$28 sps:$4 sm:$0xff]  }
 0x26d   : > { %v7459_v26 = vld [vmem:[%s7697_s26 + $0x280] ss:$28 sps:$4 sm:$0xff]  }
 0x26e   : > { %6435 = vmatmul.mubr.bf16.gmra.mrb[220].mxu1 %v7449_v29  ;;  %4084 = vmatmul.mubr.bf16.gmra.mrb[116].mxu0 %v7448_v54  ;;  %v7455_v54 = vld [vmem:[%s7697_s26 + $0x6dc] ss:$28 sps:$4 sm:$0xff]  }
 0x26f   : > { %6438 = vmatprep.mubr.bf16.mxu1 %v7452_v42  ;;  %4091 = vmatprep.mubr.bf16.mxu0 %v7450_v45 }
 0x271   : > { %v3877_v18 = vpop.f32.mrb[12].mxu0 }
 0x272   : > { %v8375_v51 = vadd.f32 %v3877_v18, %v2980_v48  ;;  %v3879_v40 = vpop.f32.mrb[13].mxu0  ;;  %v2991_v18 = vadd.f32 %v8334_v34, %v8026_v4 }
 0x273   : > { %v3880_v29 = vpop.f32.mrb[14].mxu0  ;;  %v7458_v40 = vld [vmem:[%s7697_s26 + $0x6d8] ss:$28 sps:$4 sm:$0xff]  }
 0x274   : > { %v8382_v42 = vadd.f32 %v3880_v29, %v2983_v22  ;;  %v3882_v14 = vpop.f32.mrb[15].mxu0  ;;  %v7462_v22 = vld [vmem:[%s7697_s26 + $0x2b8] ss:$28 sps:$4 sm:$0xff]  }
 0x275   : > { %v7464_v14 = vld [vmem:[%s7697_s26 + $0x2f0] ss:$28 sps:$4 sm:$0xff]  }
 0x276   : > { %6439 = vmatmul.mubr.bf16.gmra.mrb[224].mxu1 %v7454_v62  ;;  %4092 = vmatmul.mubr.bf16.gmra.mrb[120].mxu0 %v7453_v32  ;;  %v7460_v32 = vld [vmem:[%s7697_s26 + $0x714] ss:$28 sps:$4 sm:$0xff]  }
 0x277   : > { %6442 = vmatprep.mubr.bf16.mxu1 %v7457_v63  ;;  %4099 = vmatprep.mubr.bf16.mxu0 %v7455_v54 }
 0x279   : > { %v3885_v45 = vpop.f32.mrb[16].mxu0 }
 0x27a   : > { %v8387_v59 = vadd.f32 %v3885_v45, %v2988_v56  ;;  %v3887_v48 = vpop.f32.mrb[17].mxu0  ;;  %v2999_v45 = vadd.f32 %v8334_v34, %v8034_v11 }
 0x27b   : > { %v3888_v62 = vpop.f32.mrb[18].mxu0  ;;  %v7463_v48 = vld [vmem:[%s7697_s26 + $0x710] ss:$28 sps:$4 sm:$0xff]  }
 0x27c   : > { %v8394_v63 = vadd.f32 %v3888_v62, %v2991_v18  ;;  %v3890_v29 = vpop.f32.mrb[19].mxu0  ;;  %v7467_v18 = vld [vmem:[%s7697_s26 + $0x328] ss:$28 sps:$4 sm:$0xff]  }
 0x27d   : > { %v7469_v29 = vld [vmem:[%s7697_s26 + $0x360] ss:$28 sps:$4 sm:$0xff]  }
 0x27e   : > { %6443 = vmatmul.mubr.bf16.gmra.mrb[228].mxu1 %v7459_v26  ;;  %4100 = vmatmul.mubr.bf16.gmra.mrb[124].mxu0 %v7458_v40  ;;  %v7465_v40 = vld [vmem:[%s7697_s26 + $0x74c] ss:$28 sps:$4 sm:$0xff]  }
 0x27f   : > { %6446 = vmatprep.mubr.bf16.mxu1 %v7462_v22  ;;  %4107 = vmatprep.mubr.bf16.mxu0 %v7460_v32 }
 0x281   : > { %v3893_v54 = vpop.f32.mrb[20].mxu0 }
 0x282   : > { %v8399_v4 = vadd.f32 %v3893_v54, %v2996_v0  ;;  %v3895_v56 = vpop.f32.mrb[21].mxu0  ;;  %v3007_v54 = vadd.f32 %v8334_v34, %v8042_v19 }
 0x283   : > { %v3896_v26 = vpop.f32.mrb[22].mxu0  ;;  %v7468_v56 = vld [vmem:[%s7697_s26 + $0x748] ss:$28 sps:$4 sm:$0xff]  }
 0x284   : > { %v8406_v22 = vadd.f32 %v3896_v26, %v2999_v45  ;;  %v3898_v62 = vpop.f32.mrb[23].mxu0  ;;  %v7472_v45 = vld [vmem:[%s7697_s26 + $0x398] ss:$28 sps:$4 sm:$0xff]  }
 0x285   : > { %v7474_v62 = vld [vmem:[%s7697_s26 + $0x3d0] ss:$28 sps:$4 sm:$0xff]  }
 0x286   : > { %6447 = vmatmul.mubr.bf16.gmra.mrb[232].mxu1 %v7464_v14  ;;  %4108 = vmatmul.mubr.bf16.gmra.mrb[128].mxu0 %v7463_v48  ;;  %v7470_v48 = vld [vmem:[%s7697_s26 + $0x784] ss:$28 sps:$4 sm:$0xff]  }
 0x287   : > { %6450 = vmatprep.mubr.bf16.mxu1 %v7467_v18  ;;  %4115 = vmatprep.mubr.bf16.mxu0 %v7465_v40 }
 0x289   : > { %v3901_v32 = vpop.f32.mrb[24].mxu0 }
 0x28a   : > { %v8411_v11 = vadd.f32 %v3901_v32, %v3004_v8  ;;  %v3903_v0 = vpop.f32.mrb[25].mxu0  ;;  %v3015_v32 = vadd.f32 %v8334_v34, %v8050_v27 }
 0x28b   : > { %v3904_v14 = vpop.f32.mrb[26].mxu0  ;;  %v7473_v0 = vld [vmem:[%s7697_s26 + $0x780] ss:$28 sps:$4 sm:$0xff]  }
 0x28c   : > { %v8418_v18 = vadd.f32 %v3904_v14, %v3007_v54  ;;  %v3906_v26 = vpop.f32.mrb[27].mxu0  ;;  %v7477_v54 = vld [vmem:[%s7697_s26 + $0x408] ss:$28 sps:$4 sm:$0xff]  }
 0x28d   : > { %v7479_v26 = vld [vmem:[%s7697_s26 + $0x440] ss:$28 sps:$4 sm:$0xff]  }
 0x28e   : > { %6451 = vmatmul.mubr.bf16.gmra.mrb[236].mxu1 %v7469_v29  ;;  %4116 = vmatmul.mubr.bf16.gmra.mrb[132].mxu0 %v7468_v56  ;;  %v7475_v56 = vld [vmem:[%s7697_s26 + $0x7bc] ss:$28 sps:$4 sm:$0xff]  }
 0x28f   : > { %6454 = vmatprep.mubr.bf16.mxu1 %v7472_v45  ;;  %4123 = vmatprep.mubr.bf16.mxu0 %v7470_v48 }
 0x291   : > { %v3909_v40 = vpop.f32.mrb[28].mxu0 }
 0x292   : > { %v8423_v19 = vadd.f32 %v3909_v40, %v3012_v16  ;;  %v3911_v8 = vpop.f32.mrb[29].mxu0  ;;  %v3023_v40 = vadd.f32 %v8334_v34, %v8058_v37 }
 0x293   : > { %v3912_v29 = vpop.f32.mrb[30].mxu0  ;;  %v7478_v8 = vld [vmem:[%s7697_s26 + $0x7b8] ss:$28 sps:$4 sm:$0xff]  }
 0x294   : > { %v8430_v45 = vadd.f32 %v3912_v29, %v3015_v32  ;;  %v3914_v14 = vpop.f32.mrb[31].mxu0  ;;  %v7482_v32 = vld [vmem:[%s7697_s26 + $0x478] ss:$28 sps:$4 sm:$0xff]  }
 0x295   : > { %v7484_v14 = vld [vmem:[%s7697_s26 + $0x4b0] ss:$28 sps:$4 sm:$0xff]  }
 0x296   : > { %6455 = vmatmul.mubr.bf16.gmra.mrb[240].mxu1 %v7474_v62  ;;  %4124 = vmatmul.mubr.bf16.gmra.mrb[136].mxu0 %v7473_v0  ;;  %v7480_v0 = vld [vmem:[%s7697_s26 + $0x7f4] ss:$28 sps:$4 sm:$0xff]  }
 0x297   : > { %6458 = vmatprep.mubr.bf16.mxu1 %v7477_v54  ;;  %4131 = vmatprep.mubr.bf16.mxu0 %v7475_v56 }
 0x299   : > { %v3917_v48 = vpop.f32.mrb[32].mxu0 }
 0x29a   : > { %v8435_v27 = vadd.f32 %v3917_v48, %v3020_v24  ;;  %v3919_v16 = vpop.f32.mrb[33].mxu0  ;;  %v3031_v48 = vadd.f32 %v8334_v34, %v8066_v47 }
 0x29b   : > { %v3920_v62 = vpop.f32.mrb[34].mxu0  ;;  %v7483_v16 = vld [vmem:[%s7697_s26 + $0x7f0] ss:$28 sps:$4 sm:$0xff]  }
 0x29c   : > { %v8442_v54 = vadd.f32 %v3920_v62, %v3023_v40  ;;  %v3922_v29 = vpop.f32.mrb[35].mxu0  ;;  %v7487_v40 = vld [vmem:[%s7697_s26 + $0x4e8] ss:$28 sps:$4 sm:$0xff]  }
 0x29d   : > { %v7489_v29 = vld [vmem:[%s7697_s26 + $0x520] ss:$28 sps:$4 sm:$0xff]  }
 0x29e   : > { %6459 = vmatmul.mubr.bf16.gmra.mrb[244].mxu1 %v7479_v26  ;;  %4132 = vmatmul.mubr.bf16.gmra.mrb[140].mxu0 %v7478_v8  ;;  %v7485_v8 = vld [vmem:[%s7697_s26 + $0x82c] ss:$28 sps:$4 sm:$0xff]  }
 0x29f   : > { %6462 = vmatprep.mubr.bf16.mxu1 %v7482_v32  ;;  %4139 = vmatprep.mubr.bf16.mxu0 %v7480_v0 }
 0x2a1   : > { %v3925_v56 = vpop.f32.mrb[36].mxu0 }
 0x2a2   : > { %v8447_v37 = vadd.f32 %v3925_v56, %v3028_v33  ;;  %v3927_v24 = vpop.f32.mrb[37].mxu0  ;;  %v3039_v56 = vadd.f32 %v8334_v34, %v8080_v60 }
 0x2a3   : > { %v3928_v26 = vpop.f32.mrb[38].mxu0  ;;  %v7488_v24 = vld [vmem:[%s7697_s26 + $0x828] ss:$28 sps:$4 sm:$0xff]  }
 0x2a4   : > { %v8454_v32 = vadd.f32 %v3928_v26, %v3031_v48  ;;  %v3930_v62 = vpop.f32.mrb[39].mxu0  ;;  %v7492_v48 = vld [vmem:[%s7697_s26 + $0x558] ss:$28 sps:$4 sm:$0xff]  }
 0x2a5   : > { %v7494_v62 = vld [vmem:[%s7697_s26 + $0x590] ss:$28 sps:$4 sm:$0xff]  }
 0x2a6   : > { %6463 = vmatmul.mubr.bf16.gmra.mrb[248].mxu1 %v7484_v14  ;;  %4140 = vmatmul.mubr.bf16.gmra.mrb[144].mxu0 %v7483_v16  ;;  %v7490_v16 = vld [vmem:[%s7697_s26 + $0x864] ss:$28 sps:$4 sm:$0xff]  }
 0x2a7   : > { %6466 = vmatprep.mubr.bf16.mxu1 %v7487_v40  ;;  %4147 = vmatprep.mubr.bf16.mxu0 %v7485_v8 }
 0x2a9   : > { %v3933_v0 = vpop.f32.mrb[40].mxu0 }
 0x2aa   : > { %v8459_v47 = vadd.f32 %v3933_v0, %v3036_v44  ;;  %v3935_v33 = vpop.f32.mrb[41].mxu0  ;;  %v3047_v0 = vadd.f32 %v8334_v34, %v8088_v7 }
 0x2ab   : > { %v3936_v14 = vpop.f32.mrb[42].mxu0  ;;  %v7493_v33 = vld [vmem:[%s7697_s26 + $0x860] ss:$28 sps:$4 sm:$0xff]  }
 0x2ac   : > { %v8466_v40 = vadd.f32 %v3936_v14, %v3039_v56  ;;  %v3938_v26 = vpop.f32.mrb[43].mxu0  ;;  %v7497_v56 = vld [vmem:[%s7697_s26 + $0x5c8] ss:$28 sps:$4 sm:$0xff]  }
 0x2ad   : > { %v7499_v26 = vld [vmem:[%s7697_s26 + $0x600] ss:$28 sps:$4 sm:$0xff]  }
 0x2ae   : > { %6467 = vmatmul.mubr.bf16.gmra.mrb[252].mxu1 %v7489_v29  ;;  %4148 = vmatmul.mubr.bf16.gmra.mrb[148].mxu0 %v7488_v24  ;;  %v7495_v24 = vld [vmem:[%s7697_s26 + $0x89c] ss:$28 sps:$4 sm:$0xff]  }
 0x2af   : > { %6470 = vmatprep.mubr.bf16.mxu1 %v7492_v48  ;;  %4155 = vmatprep.mubr.bf16.mxu0 %v7490_v16 }
 0x2b1   : > { %v3941_v8 = vpop.f32.mrb[44].mxu0 }
 0x2b2   : > { %v8471_v60 = vadd.f32 %v3941_v8, %v3044_v55  ;;  %v3943_v44 = vpop.f32.mrb[45].mxu0  ;;  %v3055_v8 = vadd.f32 %v8334_v34, %v8096_v17 }
 0x2b3   : > { %v3944_v29 = vpop.f32.mrb[46].mxu0  ;;  %v7498_v44 = vld [vmem:[%s7697_s26 + $0x898] ss:$28 sps:$4 sm:$0xff]  }
 0x2b4   : > { %v8478_v48 = vadd.f32 %v3944_v29, %v3047_v0  ;;  %v3946_v14 = vpop.f32.mrb[47].mxu0  ;;  %v7502_v0 = vld [vmem:[%s7697_s26 + $0x638] ss:$28 sps:$4 sm:$0xff]  }
 0x2b5   : > { %v7500_v14 = vld [vmem:[%s7697_s26 + $0x8d4] ss:$28 sps:$4 sm:$0xff]  }
 0x2b6   : > { %6471 = vmatmul.mubr.bf16.gmra.mrb[0].mxu1 %v7494_v62  ;;  %4156 = vmatmul.mubr.bf16.gmra.mrb[152].mxu0 %v7493_v33 }
 0x2b7   : > { %6474 = vmatprep.mubr.bf16.mxu1 %v7497_v56  ;;  %4163 = vmatprep.mubr.bf16.mxu0 %v7495_v24  ;;  %v3060_v56 = vadd.f32 %v8334_v34, %v8101_v23 }
 0x2b9   : > { %v3949_v16 = vpop.f32.mrb[48].mxu0 }
 0x2ba   : > { %v8483_v7 = vadd.f32 %v3949_v16, %v3052_v3  ;;  %v3951_v55 = vpop.f32.mrb[49].mxu0  ;;  %v7504_v3 = vld [vmem:[%s7697_s26 + $0x670] ss:$28 sps:$4 sm:$0xff]  }
 0x2bb   : > { %v3952_v29 = vpop.f32.mrb[50].mxu0 }
 0x2bc   : > { %v8490_v62 = vadd.f32 %v3952_v29, %v3055_v8  ;;  %v3954_v33 = vpop.f32.mrb[51].mxu0 }
 0x2bd   : > { %v7505_v33 = vld [vmem:[%s7697_s26 + $0x90c] ss:$28 sps:$4 sm:$0xff]  }
 0x2be   : > { %6475 = vmatmul.mubr.bf16.gmra.mrb[4].mxu1 %v7499_v26  ;;  %4164 = vmatmul.mubr.bf16.gmra.mrb[156].mxu0 %v7498_v44  ;;  %v3063_v26 = vadd.f32 %v8334_v34, %v8104_v28  ;;  %v7503_v44 = vld [vmem:[%s7697_s26 + $0x8d0] ss:$28 sps:$4 sm:$0xff]  }
 0x2bf   : > { %6478 = vmatprep.mubr.bf16.mxu1 %v7502_v0  ;;  %4171 = vmatprep.mubr.bf16.mxu0 %v7500_v14  ;;  %v7507_v0 = vld [vmem:[%s7697_s26 + $0x6a8] ss:$28 sps:$4 sm:$0xff]  }
 0x2c1   : > { %v8492_v13 = vpop.f32.mrb[156].mxu1  ;;  %v3957_v17 = vpop.f32.mrb[52].mxu0 }
 0x2c2   : > { %9074 = vst [vmem:[#allocation31_spill] sm:$0xff] %v8492_v13  ;;  %v3718_v24 = vpop.f32.mrb[157].mxu1  ;;  %v8497_v16 = vadd.f32 %v3957_v17, %v3060_v56  ;;  %v3959_v55 = vpop.f32.mrb[53].mxu0  ;;  %v3068_v56 = vadd.f32 %v8334_v34, %v8109_v36 }
 0x2c3   : > { %v8499_v8 = vpop.f32.mrb[158].mxu1  ;;  %v3960_v29 = vpop.f32.mrb[54].mxu0  ;;  %v7509_v55 = vld [vmem:[%s7697_s26 + $0x6e0] ss:$28 sps:$4 sm:$0xff]  }
 0x2c4   : > { %9075 = vst [vmem:[#allocation32_spill] sm:$0xff] %v8499_v8  ;;  %v3721_v14 = vpop.f32.mrb[159].mxu1  ;;  %v8506_v13 = vadd.f32 %v3960_v29, %v3063_v26  ;;  %v3962_v23 = vpop.f32.mrb[55].mxu0  ;;  %v7510_v8 = vld [vmem:[%s7697_s26 + $0x944] ss:$28 sps:$4 sm:$0xff]  }
 0x2c5   : > { %v3071_v14 = vadd.f32 %v8334_v34, %v8112_v41  ;;  %v3076_v41 = vadd.f32 %v8334_v34, %v8117_v50 }
 0x2c6   : > { %6479 = vmatmul.mubr.bf16.gmra.mrb[8].mxu1 %v7504_v3  ;;  %4172 = vmatmul.mubr.bf16.gmra.mrb[160].mxu0 %v7503_v44  ;;  %v7508_v3 = vld [vmem:[%s7697_s26 + $0x908] ss:$28 sps:$4 sm:$0xff]   ;;  %v7512_v44 = vld [vmem:[%s7697_s26 + $0x718] ss:$28 sps:$4 sm:$0xff]  }
 0x2c7   : > { %6482 = vmatprep.mubr.bf16.mxu1 %v7507_v0  ;;  %4179 = vmatprep.mubr.bf16.mxu0 %v7505_v33 }
 0x2c9   : > { %v8510_v28 = vpop.f32.mrb[160].mxu1  ;;  %v3965_v17 = vpop.f32.mrb[56].mxu0 }
 0x2ca   : > { %9076 = vst [vmem:[#allocation33_spill] sm:$0xff] %v8510_v28  ;;  %v3726_v24 = vpop.f32.mrb[161].mxu1  ;;  %v8515_v26 = vadd.f32 %v3965_v17, %v3068_v56  ;;  %v3967_v29 = vpop.f32.mrb[57].mxu0  ;;  %v7515_v28 = vld [vmem:[%s7697_s26 + $0x97c] ss:$28 sps:$4 sm:$0xff]  }
 0x2cb   : > { %v8517_v23 = vpop.f32.mrb[162].mxu1  ;;  %v3968_v0 = vpop.f32.mrb[58].mxu0 }
 0x2cc   : > { %9077 = vst [vmem:[#allocation34_spill] sm:$0xff] %v8517_v23  ;;  %v3729_v33 = vpop.f32.mrb[163].mxu1  ;;  %v8522_v36 = vadd.f32 %v3968_v0, %v3071_v14  ;;  %v3970_v24 = vpop.f32.mrb[59].mxu0  ;;  %v7514_v23 = vld [vmem:[%s7697_s26 + $0x750] ss:$28 sps:$4 sm:$0xff]  }
 0x2cd   : > { %v3079_v33 = vadd.f32 %v8334_v34, %v8120_v57  ;;  %v3084_v57 = vadd.f32 %v8334_v34, %v8125_v2 }
 0x2ce   : > { %6483 = vmatmul.mubr.bf16.gmra.mrb[12].mxu1 %v7509_v55  ;;  %4180 = vmatmul.mubr.bf16.gmra.mrb[164].mxu0 %v7508_v3  ;;  %v7513_v55 = vld [vmem:[%s7697_s26 + $0x940] ss:$28 sps:$4 sm:$0xff]   ;;  %v7517_v3 = vld [vmem:[%s7697_s26 + $0x788] ss:$28 sps:$4 sm:$0xff]  }
 0x2cf   : > { %6486 = vmatprep.mubr.bf16.mxu1 %v7512_v44  ;;  %4187 = vmatprep.mubr.bf16.mxu0 %v7510_v8 }
 0x2d1   : > { %v8526_v56 = vpop.f32.mrb[164].mxu1  ;;  %v3973_v17 = vpop.f32.mrb[60].mxu0 }
 0x2d2   : > { %9078 = vst [vmem:[#allocation35_spill] sm:$0xff] %v8526_v56  ;;  %v3734_v29 = vpop.f32.mrb[165].mxu1  ;;  %v8531_v14 = vadd.f32 %v3973_v17, %v3076_v41  ;;  %v3975_v0 = vpop.f32.mrb[61].mxu0  ;;  %v7520_v56 = vld [vmem:[%s7697_s26 + $0x9b4] ss:$28 sps:$4 sm:$0xff]  }
 0x2d3   : > { %v8533_v24 = vpop.f32.mrb[166].mxu1  ;;  %v3976_v8 = vpop.f32.mrb[62].mxu0 }
 0x2d4   : > { %9079 = vst [vmem:[#allocation36_spill] sm:$0xff] %v8533_v24  ;;  %v3737_v44 = vpop.f32.mrb[167].mxu1  ;;  %v8538_v50 = vadd.f32 %v3976_v8, %v3079_v33  ;;  %v3978_v29 = vpop.f32.mrb[63].mxu0  ;;  %v7519_v24 = vld [vmem:[%s7697_s26 + $0x7c0] ss:$28 sps:$4 sm:$0xff]  }
 0x2d5   : > { %v3087_v44 = vadd.f32 %v8334_v34, %v8128_v1  ;;  %v3092_v1 = vadd.f32 %v8334_v34, %v8133_v15 }
 0x2d6   : > { %6487 = vmatmul.mubr.bf16.gmra.mrb[16].mxu1 %v7514_v23  ;;  %4188 = vmatmul.mubr.bf16.gmra.mrb[168].mxu0 %v7513_v55  ;;  %v7518_v23 = vld [vmem:[%s7697_s26 + $0x978] ss:$28 sps:$4 sm:$0xff]  }
 0x2d7   : > { %6490 = vmatprep.mubr.bf16.mxu1 %v7517_v3  ;;  %4195 = vmatprep.mubr.bf16.mxu0 %v7515_v28  ;;  %v7522_v55 = vld [vmem:[%s7697_s26 + $0x7f8] ss:$28 sps:$4 sm:$0xff]  }
 0x2d9   : > { %v8542_v41 = vpop.f32.mrb[168].mxu1  ;;  %v3981_v17 = vpop.f32.mrb[64].mxu0 }
 0x2da   : > { %9080 = vst [vmem:[#allocation37_spill] sm:$0xff] %v8542_v41  ;;  %v3742_v0 = vpop.f32.mrb[169].mxu1  ;;  %v8547_v33 = vadd.f32 %v3981_v17, %v3084_v57  ;;  %v3983_v8 = vpop.f32.mrb[65].mxu0  ;;  %v7525_v41 = vld [vmem:[%s7697_s26 + $0x9ec] ss:$28 sps:$4 sm:$0xff]  }
 0x2db   : > { %v8549_v29 = vpop.f32.mrb[170].mxu1  ;;  %v3984_v28 = vpop.f32.mrb[66].mxu0 }
 0x2dc   : > { %9081 = vst [vmem:[#allocation38_spill] sm:$0xff] %v8549_v29  ;;  %v3745_v3 = vpop.f32.mrb[171].mxu1  ;;  %v8554_v2 = vadd.f32 %v3984_v28, %v3087_v44  ;;  %v3986_v0 = vpop.f32.mrb[67].mxu0  ;;  %v7524_v29 = vld [vmem:[%s7697_s26 + $0x830] ss:$28 sps:$4 sm:$0xff]  }
 0x2dd   : > { %v3095_v3 = vadd.f32 %v8334_v34, %v8136_v21  ;;  %v3100_v21 = vadd.f32 %v8334_v34, %v8141_v30 }
 0x2de   : > { %6491 = vmatmul.mubr.bf16.gmra.mrb[20].mxu1 %v7519_v24  ;;  %4196 = vmatmul.mubr.bf16.gmra.mrb[172].mxu0 %v7518_v23  ;;  %v7523_v24 = vld [vmem:[%s7697_s26 + $0x9b0] ss:$28 sps:$4 sm:$0xff]   ;;  %v7527_v23 = vld [vmem:[%s7697_s26 + $0x868] ss:$28 sps:$4 sm:$0xff]  }
 0x2df   : > { %6494 = vmatprep.mubr.bf16.mxu1 %v7522_v55  ;;  %4203 = vmatprep.mubr.bf16.mxu0 %v7520_v56 }
 0x2e1   : > { %v8558_v57 = vpop.f32.mrb[172].mxu1  ;;  %v3989_v17 = vpop.f32.mrb[68].mxu0 }
 0x2e2   : > { %9082 = vst [vmem:[#allocation39_spill] sm:$0xff] %v8558_v57  ;;  %v3750_v8 = vpop.f32.mrb[173].mxu1  ;;  %v8563_v44 = vadd.f32 %v3989_v17, %v3092_v1  ;;  %v3991_v28 = vpop.f32.mrb[69].mxu0  ;;  %v7530_v57 = vld [vmem:[%s7697_s26 + $0xa24] ss:$28 sps:$4 sm:$0xff]  }
 0x2e3   : > { %v8565_v0 = vpop.f32.mrb[174].mxu1  ;;  %v3992_v56 = vpop.f32.mrb[70].mxu0 }
 0x2e4   : > { %9083 = vst [vmem:[#allocation40_spill] sm:$0xff] %v8565_v0  ;;  %v3753_v55 = vpop.f32.mrb[175].mxu1  ;;  %v8570_v15 = vadd.f32 %v3992_v56, %v3095_v3  ;;  %v3994_v8 = vpop.f32.mrb[71].mxu0  ;;  %v7529_v0 = vld [vmem:[%s7697_s26 + $0x8a0] ss:$28 sps:$4 sm:$0xff]  }
 0x2e5   : > { %v3103_v55 = vadd.f32 %v8334_v34, %v8144_v38  ;;  %v3108_v38 = vadd.f32 %v8334_v34, %v8149_v49 }
 0x2e6   : > { %6495 = vmatmul.mubr.bf16.gmra.mrb[24].mxu1 %v7524_v29  ;;  %4204 = vmatmul.mubr.bf16.gmra.mrb[176].mxu0 %v7523_v24  ;;  %v7528_v29 = vld [vmem:[%s7697_s26 + $0x9e8] ss:$28 sps:$4 sm:$0xff]   ;;  %v7532_v24 = vld [vmem:[%s7697_s26 + $0x8d8] ss:$28 sps:$4 sm:$0xff]  }
 0x2e7   : > { %6498 = vmatprep.mubr.bf16.mxu1 %v7527_v23  ;;  %4211 = vmatprep.mubr.bf16.mxu0 %v7525_v41 }
 0x2e9   : > { %v8574_v1 = vpop.f32.mrb[176].mxu1  ;;  %v3997_v17 = vpop.f32.mrb[72].mxu0 }
 0x2ea   : > { %9084 = vst [vmem:[#allocation41_spill] sm:$0xff] %v8574_v1  ;;  %v3758_v28 = vpop.f32.mrb[177].mxu1  ;;  %v8579_v3 = vadd.f32 %v3997_v17, %v3100_v21  ;;  %v3999_v56 = vpop.f32.mrb[73].mxu0  ;;  %v7535_v1 = vld [vmem:[%s7697_s26 + $0xa5c] ss:$28 sps:$4 sm:$0xff]  }
 0x2eb   : > { %v8581_v8 = vpop.f32.mrb[178].mxu1  ;;  %v4000_v41 = vpop.f32.mrb[74].mxu0 }
 0x2ec   : > { %9085 = vst [vmem:[#allocation42_spill] sm:$0xff] %v8581_v8  ;;  %v3761_v23 = vpop.f32.mrb[179].mxu1  ;;  %v8586_v30 = vadd.f32 %v4000_v41, %v3103_v55  ;;  %v4002_v28 = vpop.f32.mrb[75].mxu0  ;;  %v7534_v8 = vld [vmem:[%s7697_s26 + $0x910] ss:$28 sps:$4 sm:$0xff]  }
 0x2ed   : > { %v3111_v23 = vadd.f32 %v8334_v34, %v8152_v58  ;;  %v3116_v58 = vadd.f32 %v8334_v34, %v8157_v6 }
 0x2ee   : > { %6499 = vmatmul.mubr.bf16.gmra.mrb[28].mxu1 %v7529_v0  ;;  %4212 = vmatmul.mubr.bf16.gmra.mrb[180].mxu0 %v7528_v29  ;;  %v7533_v0 = vld [vmem:[%s7697_s26 + $0xa20] ss:$28 sps:$4 sm:$0xff]   ;;  %v7537_v29 = vld [vmem:[%s7697_s26 + $0x948] ss:$28 sps:$4 sm:$0xff]  }
 0x2ef   : > { %6502 = vmatprep.mubr.bf16.mxu1 %v7532_v24  ;;  %4219 = vmatprep.mubr.bf16.mxu0 %v7530_v57 }
 0x2f1   : > { %v8590_v21 = vpop.f32.mrb[180].mxu1  ;;  %v4005_v17 = vpop.f32.mrb[76].mxu0 }
 0x2f2   : > { %9086 = vst [vmem:[#allocation43_spill] sm:$0xff] %v8590_v21  ;;  %v3766_v56 = vpop.f32.mrb[181].mxu1  ;;  %v8595_v55 = vadd.f32 %v4005_v17, %v3108_v38  ;;  %v4007_v41 = vpop.f32.mrb[77].mxu0  ;;  %v7540_v21 = vld [vmem:[%s7697_s26 + $0xa94] ss:$28 sps:$4 sm:$0xff]  }
 0x2f3   : > { %v8597_v28 = vpop.f32.mrb[182].mxu1  ;;  %v4008_v57 = vpop.f32.mrb[78].mxu0 }
 0x2f4   : > { %9087 = vst [vmem:[#allocation44_spill] sm:$0xff] %v8597_v28  ;;  %v3769_v24 = vpop.f32.mrb[183].mxu1  ;;  %v8602_v49 = vadd.f32 %v4008_v57, %v3111_v23  ;;  %v4010_v56 = vpop.f32.mrb[79].mxu0  ;;  %v7539_v28 = vld [vmem:[%s7697_s26 + $0x980] ss:$28 sps:$4 sm:$0xff]  }
 0x2f5   : > { %v3119_v24 = vadd.f32 %v8334_v34, %v8160_v12  ;;  %v3124_v12 = vadd.f32 %v8334_v34, %v8165_v25 }
 0x2f6   : > { %6503 = vmatmul.mubr.bf16.gmra.mrb[32].mxu1 %v7534_v8  ;;  %4220 = vmatmul.mubr.bf16.gmra.mrb[184].mxu0 %v7533_v0  ;;  %v7538_v8 = vld [vmem:[%s7697_s26 + $0xa58] ss:$28 sps:$4 sm:$0xff]  }
 0x2f7   : > { %6506 = vmatprep.mubr.bf16.mxu1 %v7537_v29  ;;  %4227 = vmatprep.mubr.bf16.mxu0 %v7535_v1  ;;  %v7542_v0 = vld [vmem:[%s7697_s26 + $0x9b8] ss:$28 sps:$4 sm:$0xff]  }
 0x2f9   : > { %v8606_v38 = vpop.f32.mrb[184].mxu1  ;;  %v4013_v17 = vpop.f32.mrb[80].mxu0 }
 0x2fa   : > { %9088 = vst [vmem:[#allocation45_spill] sm:$0xff] %v8606_v38  ;;  %v3774_v41 = vpop.f32.mrb[185].mxu1  ;;  %v8611_v23 = vadd.f32 %v4013_v17, %v3116_v58  ;;  %v4015_v57 = vpop.f32.mrb[81].mxu0  ;;  %v7545_v38 = vld [vmem:[%s7697_s26 + $0xacc] ss:$28 sps:$4 sm:$0xff]  }
 0x2fb   : > { %v8613_v56 = vpop.f32.mrb[186].mxu1  ;;  %v4016_v1 = vpop.f32.mrb[82].mxu0 }
 0x2fc   : > { %9089 = vst [vmem:[#allocation46_spill] sm:$0xff] %v8613_v56  ;;  %v3777_v29 = vpop.f32.mrb[187].mxu1  ;;  %v8618_v6 = vadd.f32 %v4016_v1, %v3119_v24  ;;  %v4018_v41 = vpop.f32.mrb[83].mxu0  ;;  %v7544_v56 = vld [vmem:[%s7697_s26 + $0x9f0] ss:$28 sps:$4 sm:$0xff]  }
 0x2fd   : > { %v3127_v29 = vadd.f32 %v8334_v34, %v8168_v31  ;;  %v3132_v31 = vadd.f32 %v8334_v34, %v8173_v46 }
 0x2fe   : > { %6507 = vmatmul.mubr.bf16.gmra.mrb[36].mxu1 %v7539_v28  ;;  %4228 = vmatmul.mubr.bf16.gmra.mrb[188].mxu0 %v7538_v8  ;;  %v7543_v28 = vld [vmem:[%s7697_s26 + $0xa90] ss:$28 sps:$4 sm:$0xff]   ;;  %v7547_v8 = vld [vmem:[%s7697_s26 + $0xa28] ss:$28 sps:$4 sm:$0xff]  }
 0x2ff   : > { %6510 = vmatprep.mubr.bf16.mxu1 %v7542_v0  ;;  %4235 = vmatprep.mubr.bf16.mxu0 %v7540_v21 }
 0x301   : > { %v8622_v58 = vpop.f32.mrb[188].mxu1  ;;  %v4021_v17 = vpop.f32.mrb[84].mxu0 }
 0x302   : > { %9090 = vst [vmem:[#allocation47_spill] sm:$0xff] %v8622_v58  ;;  %v3782_v57 = vpop.f32.mrb[189].mxu1  ;;  %v8627_v24 = vadd.f32 %v4021_v17, %v3124_v12  ;;  %v4023_v1 = vpop.f32.mrb[85].mxu0  ;;  %v7550_v58 = vld [vmem:[%s7697_s26 + $0xb04] ss:$28 sps:$4 sm:$0xff]  }
 0x303   : > { %v8629_v41 = vpop.f32.mrb[190].mxu1  ;;  %v4024_v21 = vpop.f32.mrb[86].mxu0 }
 0x304   : > { %9091 = vst [vmem:[#allocation48_spill] sm:$0xff] %v8629_v41  ;;  %v3785_v0 = vpop.f32.mrb[191].mxu1  ;;  %v8634_v25 = vadd.f32 %v4024_v21, %v3127_v29  ;;  %v4026_v57 = vpop.f32.mrb[87].mxu0  ;;  %v7549_v41 = vld [vmem:[%s7697_s26 + $0xa60] ss:$28 sps:$4 sm:$0xff]  }
 0x305   : > { %v3135_v0 = vadd.f32 %v8334_v34, %v8176_v61  ;;  %v3140_v61 = vadd.f32 %v8334_v34, %v8181_v10 }
 0x306   : > { %6511 = vmatmul.mubr.bf16.gmra.mrb[40].mxu1 %v7544_v56  ;;  %4236 = vmatmul.mubr.bf16.gmra.mrb[192].mxu0 %v7543_v28  ;;  %v7548_v56 = vld [vmem:[%s7697_s26 + $0xac8] ss:$28 sps:$4 sm:$0xff]   ;;  %v7552_v28 = vld [vmem:[%s7697_s26 + $0xa98] ss:$28 sps:$4 sm:$0xff]  }
 0x307   : > { %6514 = vmatprep.mubr.bf16.mxu1 %v7547_v8  ;;  %4243 = vmatprep.mubr.bf16.mxu0 %v7545_v38 }
 0x309   : > { %v8638_v12 = vpop.f32.mrb[192].mxu1  ;;  %v4029_v17 = vpop.f32.mrb[88].mxu0 }
 0x30a   : > { %9092 = vst [vmem:[#allocation49_spill] sm:$0xff] %v8638_v12  ;;  %v3790_v1 = vpop.f32.mrb[193].mxu1  ;;  %v8643_v29 = vadd.f32 %v4029_v17, %v3132_v31  ;;  %v4031_v21 = vpop.f32.mrb[89].mxu0  ;;  %v7555_v12 = vld [vmem:[%s7697_s26 + $0xb3c] ss:$28 sps:$4 sm:$0xff]  }
 0x30b   : > { %v8645_v57 = vpop.f32.mrb[194].mxu1  ;;  %v4032_v38 = vpop.f32.mrb[90].mxu0 }
 0x30c   : > { %9093 = vst [vmem:[#allocation50_spill] sm:$0xff] %v8643_v29  ;;  %9094 = vst [vmem:[#allocation51_spill] sm:$0xff] %v8645_v57  ;;  %v3793_v8 = vpop.f32.mrb[195].mxu1  ;;  %v8650_v46 = vadd.f32 %v4032_v38, %v3135_v0  ;;  %v4034_v1 = vpop.f32.mrb[91].mxu0  ;;  %v7554_v57 = vld [vmem:[%s7697_s26 + $0xad0] ss:$28 sps:$4 sm:$0xff]  }
 0x30d   : > { %v3143_v8 = vadd.f32 %v8334_v34, %v8184_v20  ;;  %v3148_v20 = vadd.f32 %v8334_v34, %v8189_v39  ;;  %v9103_v39 = vld [vmem:[#allocation2_spill] sm:$0xff] }
 0x30e   : > { %9095 = vst [vmem:[#allocation52_spill] sm:$0xff] %v8650_v46  ;;  %6515 = vmatmul.mubr.bf16.gmra.mrb[44].mxu1 %v7549_v41  ;;  %4244 = vmatmul.mubr.bf16.gmra.mrb[196].mxu0 %v7548_v56  ;;  %v7553_v41 = vld [vmem:[%s7697_s26 + $0xb00] ss:$28 sps:$4 sm:$0xff]   ;;  %v7557_v56 = vld [vmem:[%s7697_s26 + $0xb08] ss:$28 sps:$4 sm:$0xff]  }
 0x30f   : > { %6518 = vmatprep.mubr.bf16.mxu1 %v7552_v28  ;;  %4251 = vmatprep.mubr.bf16.mxu0 %v7550_v58 }
 0x311   : > { %v8654_v31 = vpop.f32.mrb[196].mxu1  ;;  %v4037_v17 = vpop.f32.mrb[92].mxu0 }
 0x312   : > { %9096 = vst [vmem:[#allocation53_spill] sm:$0xff] %v8654_v31  ;;  %v3798_v21 = vpop.f32.mrb[197].mxu1  ;;  %v8659_v0 = vadd.f32 %v4037_v17, %v3140_v61  ;;  %v4039_v38 = vpop.f32.mrb[93].mxu0 }
 0x313   : > { %v8661_v1 = vpop.f32.mrb[198].mxu1  ;;  %v4040_v58 = vpop.f32.mrb[94].mxu0  ;;  %v7559_v38 = vld [vmem:[%s7697_s26 + $0xb40] ss:$28 sps:$4 sm:$0xff]  }
 0x314   : > { %9097 = vst [vmem:[#allocation54_spill] sm:$0xff] %v8661_v1  ;;  %v3801_v28 = vpop.f32.mrb[199].mxu1  ;;  %v8666_v10 = vadd.f32 %v4040_v58, %v3143_v8  ;;  %v4042_v31 = vpop.f32.mrb[95].mxu0 }
 0x315   : > { %v3151_v28 = vadd.f32 %v8334_v34, %v8192_v52 }
 0x316   : > { %9098 = vst [vmem:[#allocation55_spill] sm:$0xff] %v8666_v10  ;;  %6519 = vmatmul.mubr.bf16.gmra.mrb[48].mxu1 %v7554_v57  ;;  %4252 = vmatmul.mubr.bf16.gmra.mrb[200].mxu0 %v7553_v41  ;;  %v7558_v57 = vld [vmem:[%s7697_s26 + $0xb38] ss:$28 sps:$4 sm:$0xff]   ;;  %s5403_s26 = sshll.u32 %s9170_s5, 2 }
 0x317   : > { %6522 = vmatprep.mubr.bf16.mxu1 %v7557_v56  ;;  %4259 = vmatprep.mubr.bf16.mxu0 %v7555_v12  ;;  %s8710_s11 = scalar_lea.vmem %s9044_s3, %s5403_s26 }
 0x319   : > { %v8670_v61 = vpop.f32.mrb[200].mxu1  ;;  %v4045_v17 = vpop.f32.mrb[96].mxu0 }
 0x31a   : > { %9099 = vst [vmem:[#allocation56_spill] sm:$0xff] %v8670_v61  ;;  %v3806_v21 = vpop.f32.mrb[201].mxu1  ;;  %v8675_v1 = vadd.f32 %v4045_v17, %v3148_v20  ;;  %v4047_v8 = vpop.f32.mrb[97].mxu0  ;;  %v9105_v20 = vld [vmem:[#allocation3_spill] sm:$0xff] }
 0x31b   : > { %v8677_v58 = vpop.f32.mrb[202].mxu1  ;;  %v4048_v31 = vpop.f32.mrb[98].mxu0  ;;  %v3156_v21 = vadd.f32 %v8334_v34, %v9103_v39  ;;  %v3159_v17 = vadd.f32 %v8334_v34, %v9105_v20  ;;  %v9110_v20 = vld [vmem:[#allocation5_spill] sm:$0xff] }
 0x31c   : > { %9100 = vst [vmem:[#allocation57_spill] sm:$0xff] %v8675_v1  ;;  %9101 = vst [vmem:[#allocation58_spill] sm:$0xff] %v8677_v58  ;;  %v3809_v41 = vpop.f32.mrb[203].mxu1  ;;  %v8680_v12 = vadd.f32 %v4048_v31, %v3151_v28  ;;  %v4050_v56 = vpop.f32.mrb[99].mxu0 }
 0x31d   : > { %v9109_v41 = vld [vmem:[#allocation4_spill] sm:$0xff] }
 0x31e   : > { %9102 = vst [vmem:[#allocation59_spill] sm:$0xff] %v8680_v12  ;;  %6523 = vmatmul.mubr.bf16.gmra.mrb[52].mxu1 %v7559_v38  ;;  %4260 = vmatmul.mubr.bf16.gmra.mrb[204].mxu0 %v7558_v57  ;;  %v3164_v56 = vadd.f32 %v8334_v34, %v9109_v41 }
 0x321   : > { %v8684_v61 = vpop.f32.mrb[204].mxu1  ;;  %v4053_v46 = vpop.f32.mrb[100].mxu0 }
 0x322   : > { %9104 = vst [vmem:[#allocation2_spill] sm:$0xff] %v8684_v61  ;;  %v3814_v52 = vpop.f32.mrb[205].mxu1  ;;  %v8688_v8 = vadd.f32 %v4053_v46, %v3156_v21  ;;  %v4055_v58 = vpop.f32.mrb[101].mxu0  ;;  %v3167_v46 = vadd.f32 %v8334_v34, %v9110_v20 }
 0x323   : > { %v8690_v1 = vpop.f32.mrb[206].mxu1  ;;  %v4056_v28 = vpop.f32.mrb[102].mxu0 }
 0x324   : > { %9106 = vst [vmem:[#allocation3_spill] sm:$0xff] %v8688_v8  ;;  %9107 = vst [vmem:[#allocation60_spill] sm:$0xff] %v8690_v1  ;;  %v3817_v31 = vpop.f32.mrb[207].mxu1  ;;  %v8692_v38 = vadd.f32 %v4056_v28, %v3159_v17  ;;  %v4058_v57 = vpop.f32.mrb[103].mxu0  ;;  %v9111_v1 = vld [vmem:[#allocation30_spill] sm:$0xff] }
 0x326   : > { %9108 = vst [vmem:[#allocation61_spill] sm:$0xff] %v8692_v38 }
 0x329   : > { %v6424_v39 = vpop.f32.mrb[208].mxu1  ;;  %v4061_v61 = vpop.f32.mrb[104].mxu0 }
 0x32a   : > { %v4311_v52 = vadd.f32 %v8351_v35, %v6424_v39  ;;  %v4302_v12 = vpop.f32.mrb[209].mxu1  ;;  %v8699_v58 = vadd.f32 %v4061_v61, %v3164_v56  ;;  %v4063_v21 = vpop.f32.mrb[105].mxu0 }
 0x32b   : > { %v4303_v8 = vadd.f32 %v9111_v1, %v4302_v12  ;;  %v6425_v31 = vpop.f32.mrb[210].mxu1  ;;  %v4064_v17 = vpop.f32.mrb[106].mxu0  ;;  %v9112_v12 = vld [vmem:[#allocation6_spill] sm:$0xff] }
 0x32c   : > { %v4314_v28 = vadd.f32 %v8358_v9, %v6425_v31  ;;  %v4305_v57 = vpop.f32.mrb[211].mxu1  ;;  %v8704_v41 = vadd.f32 %v4064_v17, %v3167_v46  ;;  %v4066_v38 = vpop.f32.mrb[107].mxu0  ;;  %v4719_v39 = vmax.f32 %v4311_v52, 0.0  ;;  %v3172_v9 = vadd.f32 %v8334_v34, %v9112_v12 }
 0x32d   : > { %v4306_v35 = vadd.f32 %v8346_v53, %v4305_v57  ;;  %v4717_v29 = vmax.f32 %v4303_v8, 0.0  ;;  %v9113_v8 = vld [vmem:[#allocation7_spill] sm:$0xff] }
 0x32e   : > { %v4720_v10 = vmax.f32 %v4314_v28, 0.0  ;;  %v3175_v46 = vadd.f32 %v8334_v34, %v9113_v8 }
 0x32f   : > { %v4718_v1 = vmax.f32 %v4306_v35, 0.0 }
 0x330   : > { %v6043_v61 = vpack.c.bf16 %v4720_v10, %v4719_v39 }
 0x331   : > { %v6038_v56 = vpack.c.bf16 %v4718_v1, %v4717_v29  ;;  %v6428_v20 = vpop.f32.mrb[212].mxu1  ;;  %v4069_v38 = vpop.f32.mrb[108].mxu0 }
 0x332   : > { %6295 = vst [vmem:[%s8710_s11 + $0x8] sm:$0xff] %v6043_v61   ;;  %v4327_v53 = vadd.f32 %v8375_v51, %v6428_v20  ;;  %v4318_v52 = vpop.f32.mrb[213].mxu1  ;;  %v8719_v21 = vadd.f32 %v4069_v38, %v3172_v9  ;;  %v4071_v31 = vpop.f32.mrb[109].mxu0  ;;  %v9114_v20 = vld [vmem:[#allocation8_spill] sm:$0xff] }
 0x333   : > { %6039 = vst [vmem:[%s8710_s11] sm:$0xff] %v6038_v56   ;;  %v4319_v17 = vadd.f32 %v8363_v43, %v4318_v52  ;;  %v6429_v10 = vpop.f32.mrb[214].mxu1  ;;  %v4072_v28 = vpop.f32.mrb[110].mxu0  ;;  %v3180_v43 = vadd.f32 %v8334_v34, %v9114_v20  ;;  %v8733_v31 = vld [vmem:[%s9043_s2] ss:$0 sm:$0xff] }
 0x334   : > { %v4330_v29 = vadd.f32 %v8382_v42, %v6429_v10  ;;  %v4321_v57 = vpop.f32.mrb[215].mxu1  ;;  %v8723_v35 = vadd.f32 %v4072_v28, %v3175_v46  ;;  %v4074_v39 = vpop.f32.mrb[111].mxu0  ;;  %v4723_v1 = vmax.f32 %v4327_v53, 0.0 }
 0x335   : > { %v4322_v51 = vadd.f32 %v8370_v5, %v4321_v57  ;;  %v4721_v12 = vmax.f32 %v4319_v17, 0.0  ;;  %v9115_v5 = vld [vmem:[#allocation9_spill] sm:$0xff] }
 0x336   : > { %v4724_v61 = vmax.f32 %v4330_v29, 0.0  ;;  %v3183_v53 = vadd.f32 %v8733_v31, %v9115_v5  ;;  %v9117_v5 = vld [vmem:[#allocation11_spill] sm:$0xff] }
 0x337   : > { %v4722_v9 = vmax.f32 %v4322_v51, 0.0 }
 0x338   : > { %v6053_v56 = vpack.c.bf16 %v4724_v61, %v4723_v1 }
 0x339   : > { %v6048_v38 = vpack.c.bf16 %v4722_v9, %v4721_v12  ;;  %v6432_v52 = vpop.f32.mrb[216].mxu1  ;;  %v4077_v8 = vpop.f32.mrb[112].mxu0 }
 0x33a   : > { %6297 = vst [vmem:[%s8710_s11 + $0x18] sm:$0xff] %v6053_v56   ;;  %v4343_v42 = vadd.f32 %v8399_v4, %v6432_v52  ;;  %v4334_v46 = vpop.f32.mrb[217].mxu1  ;;  %v8738_v17 = vadd.f32 %v4077_v8, %v3180_v43  ;;  %v4079_v10 = vpop.f32.mrb[113].mxu0  ;;  %v9116_v43 = vld [vmem:[#allocation10_spill] sm:$0xff] }
 0x33b   : > { %6296 = vst [vmem:[%s8710_s11 + $0x10] sm:$0xff] %v6048_v38   ;;  %v4335_v34 = vadd.f32 %v8387_v59, %v4334_v46  ;;  %v6433_v28 = vpop.f32.mrb[218].mxu1  ;;  %v4080_v29 = vpop.f32.mrb[114].mxu0  ;;  %v3188_v59 = vadd.f32 %v8733_v31, %v9116_v43 }
 0x33c   : > { %v4346_v4 = vadd.f32 %v8406_v22, %v6433_v28  ;;  %v4337_v57 = vpop.f32.mrb[219].mxu1  ;;  %v8742_v39 = vadd.f32 %v4080_v29, %v3183_v53  ;;  %v4082_v51 = vpop.f32.mrb[115].mxu0  ;;  %v4727_v61 = vmax.f32 %v4343_v42, 0.0  ;;  %v3191_v53 = vadd.f32 %v8733_v31, %v9117_v5 }
 0x33d   : > { %v4338_v1 = vadd.f32 %v8394_v63, %v4337_v57  ;;  %v4725_v9 = vmax.f32 %v4335_v34, 0.0 }
 0x33e   : > { %v4728_v12 = vmax.f32 %v4346_v4, 0.0 }
 0x33f   : > { %v4726_v56 = vmax.f32 %v4338_v1, 0.0 }
 0x340   : > { %v6063_v20 = vpack.c.bf16 %v4728_v12, %v4727_v61 }
 0x341   : > { %v6058_v38 = vpack.c.bf16 %v4726_v56, %v4725_v9  ;;  %v6436_v52 = vpop.f32.mrb[220].mxu1  ;;  %v4085_v8 = vpop.f32.mrb[116].mxu0 }
 0x342   : > { %6299 = vst [vmem:[%s8710_s11 + $0x28] sm:$0xff] %v6063_v20   ;;  %v4359_v22 = vadd.f32 %v8423_v19, %v6436_v52  ;;  %v4350_v46 = vpop.f32.mrb[221].mxu1  ;;  %v8752_v63 = vadd.f32 %v4085_v8, %v3188_v59  ;;  %v4087_v42 = vpop.f32.mrb[117].mxu0  ;;  %v9118_v20 = vld [vmem:[#allocation12_spill] sm:$0xff]  ;;  %v9119_v8 = vld [vmem:[#allocation13_spill] sm:$0xff] }
 0x343   : > { %6298 = vst [vmem:[%s8710_s11 + $0x20] sm:$0xff] %v6058_v38   ;;  %v4351_v10 = vadd.f32 %v8411_v11, %v4350_v46  ;;  %v6437_v34 = vpop.f32.mrb[222].mxu1  ;;  %v4088_v28 = vpop.f32.mrb[118].mxu0  ;;  %v3196_v11 = vadd.f32 %v8733_v31, %v9118_v20  ;;  %v3199_v46 = vadd.f32 %v8733_v31, %v9119_v8 }
 0x344   : > { %v4362_v29 = vadd.f32 %v8430_v45, %v6437_v34  ;;  %v4353_v4 = vpop.f32.mrb[223].mxu1  ;;  %v8756_v57 = vadd.f32 %v4088_v28, %v3191_v53  ;;  %v4090_v19 = vpop.f32.mrb[119].mxu0  ;;  %v4731_v1 = vmax.f32 %v4359_v22, 0.0 }
 0x345   : > { %v4354_v51 = vadd.f32 %v8418_v18, %v4353_v4  ;;  %v4729_v12 = vmax.f32 %v4351_v10, 0.0 }
 0x346   : > { %v4732_v61 = vmax.f32 %v4362_v29, 0.0 }
 0x347   : > { %v4730_v9 = vmax.f32 %v4354_v51, 0.0 }
 0x348   : > { %v6073_v56 = vpack.c.bf16 %v4732_v61, %v4731_v1 }
 0x349   : > { %v6068_v43 = vpack.c.bf16 %v4730_v9, %v4729_v12  ;;  %v6440_v59 = vpop.f32.mrb[224].mxu1  ;;  %v4093_v38 = vpop.f32.mrb[120].mxu0  ;;  %v9120_v12 = vld [vmem:[#allocation14_spill] sm:$0xff] }
 0x34a   : > { %6301 = vst [vmem:[%s8710_s11 + $0x38] sm:$0xff] %v6073_v56   ;;  %v4375_v45 = vadd.f32 %v8447_v37, %v6440_v59  ;;  %v4366_v52 = vpop.f32.mrb[225].mxu1  ;;  %v8766_v18 = vadd.f32 %v4093_v38, %v3196_v11  ;;  %v4095_v22 = vpop.f32.mrb[121].mxu0 }
 0x34b   : > { %6300 = vst [vmem:[%s8710_s11 + $0x30] sm:$0xff] %v6068_v43   ;;  %v4367_v5 = vadd.f32 %v8435_v27, %v4366_v52  ;;  %v6441_v53 = vpop.f32.mrb[226].mxu1  ;;  %v4096_v42 = vpop.f32.mrb[122].mxu0  ;;  %v3204_v27 = vadd.f32 %v8733_v31, %v9120_v12  ;;  %v9121_v43 = vld [vmem:[#allocation15_spill] sm:$0xff]  ;;  %v9123_v12 = vld [vmem:[#allocation17_spill] sm:$0xff] }
 0x34c   : > { %v4378_v10 = vadd.f32 %v8454_v32, %v6441_v53  ;;  %v4369_v34 = vpop.f32.mrb[227].mxu1  ;;  %v8770_v28 = vadd.f32 %v4096_v42, %v3199_v46  ;;  %v4098_v37 = vpop.f32.mrb[123].mxu0  ;;  %v4735_v4 = vmax.f32 %v4375_v45, 0.0  ;;  %v3207_v59 = vadd.f32 %v8733_v31, %v9121_v43 }
 0x34d   : > { %v4370_v29 = vadd.f32 %v8442_v54, %v4369_v34  ;;  %v4733_v51 = vmax.f32 %v4367_v5, 0.0 }
 0x34e   : > { %v4736_v19 = vmax.f32 %v4378_v10, 0.0 }
 0x34f   : > { %v4734_v1 = vmax.f32 %v4370_v29, 0.0 }
 0x350   : > { %v6083_v61 = vpack.c.bf16 %v4736_v19, %v4735_v4  ;;  %v9122_v4 = vld [vmem:[#allocation16_spill] sm:$0xff] }
 0x351   : > { %v6078_v9 = vpack.c.bf16 %v4734_v1, %v4733_v51  ;;  %v6444_v56 = vpop.f32.mrb[228].mxu1  ;;  %v4101_v20 = vpop.f32.mrb[124].mxu0 }
 0x352   : > { %6303 = vst [vmem:[%s8710_s11 + $0x48] sm:$0xff] %v6083_v61   ;;  %v4391_v32 = vadd.f32 %v8471_v60, %v6444_v56  ;;  %v4382_v11 = vpop.f32.mrb[229].mxu1  ;;  %v8780_v54 = vadd.f32 %v4101_v20, %v3204_v27  ;;  %v4103_v38 = vpop.f32.mrb[125].mxu0  ;;  %v3215_v27 = vadd.f32 %v8733_v31, %v9123_v12 }
 0x353   : > { %6302 = vst [vmem:[%s8710_s11 + $0x40] sm:$0xff] %v6078_v9   ;;  %v4383_v45 = vadd.f32 %v8459_v47, %v4382_v11  ;;  %v6445_v52 = vpop.f32.mrb[230].mxu1  ;;  %v4104_v8 = vpop.f32.mrb[126].mxu0  ;;  %v3212_v47 = vadd.f32 %v8733_v31, %v9122_v4 }
 0x354   : > { %v4394_v46 = vadd.f32 %v8478_v48, %v6445_v52  ;;  %v4385_v22 = vpop.f32.mrb[231].mxu1  ;;  %v8784_v5 = vadd.f32 %v4104_v8, %v3207_v59  ;;  %v4106_v60 = vpop.f32.mrb[127].mxu0  ;;  %v4739_v42 = vmax.f32 %v4391_v32, 0.0 }
 0x355   : > { %v4386_v53 = vadd.f32 %v8466_v40, %v4385_v22  ;;  %v4737_v34 = vmax.f32 %v4383_v45, 0.0  ;;  %v9124_v60 = vld [vmem:[#allocation18_spill] sm:$0xff] }
 0x356   : > { %v4740_v10 = vmax.f32 %v4394_v46, 0.0 }
 0x357   : > { %v4738_v37 = vmax.f32 %v4386_v53, 0.0 }
 0x358   : > { %v6093_v29 = vpack.c.bf16 %v4740_v10, %v4739_v42 }
 0x359   : > { %v6088_v19 = vpack.c.bf16 %v4738_v37, %v4737_v34  ;;  %v6448_v51 = vpop.f32.mrb[232].mxu1  ;;  %v4109_v1 = vpop.f32.mrb[128].mxu0  ;;  %v9125_v37 = vld [vmem:[#allocation19_spill] sm:$0xff] }
 0x35a   : > { %6305 = vst [vmem:[%s8710_s11 + $0x58] sm:$0xff] %v6093_v29   ;;  %v4407_v48 = vadd.f32 %v8497_v16, %v6448_v51  ;;  %v4398_v61 = vpop.f32.mrb[233].mxu1  ;;  %v8794_v40 = vadd.f32 %v4109_v1, %v3212_v47  ;;  %v4111_v9 = vpop.f32.mrb[129].mxu0  ;;  %v3223_v29 = vadd.f32 %v8733_v31, %v9125_v37 }
 0x35b   : > { %6304 = vst [vmem:[%s8710_s11 + $0x50] sm:$0xff] %v6088_v19   ;;  %v4399_v56 = vadd.f32 %v8483_v7, %v4398_v61  ;;  %v6449_v20 = vpop.f32.mrb[234].mxu1  ;;  %v4112_v32 = vpop.f32.mrb[130].mxu0  ;;  %v3220_v7 = vadd.f32 %v8733_v31, %v9124_v60 }
 0x35c   : > { %v4410_v11 = vadd.f32 %v8506_v13, %v6449_v20  ;;  %v4401_v43 = vpop.f32.mrb[235].mxu1  ;;  %v8798_v59 = vadd.f32 %v4112_v32, %v3215_v27  ;;  %v4114_v16 = vpop.f32.mrb[131].mxu0  ;;  %v4743_v45 = vmax.f32 %v4407_v48, 0.0 }
 0x35d   : > { %v4402_v38 = vadd.f32 %v8490_v62, %v4401_v43  ;;  %v4741_v8 = vmax.f32 %v4399_v56, 0.0 }
 0x35e   : > { %v4744_v52 = vmax.f32 %v4410_v11, 0.0  ;;  %v9126_v11 = vld [vmem:[#allocation20_spill] sm:$0xff] }
 0x35f   : > { %v4742_v46 = vmax.f32 %v4402_v38, 0.0 }
 0x360   : > { %v6103_v22 = vpack.c.bf16 %v4744_v52, %v4743_v45  ;;  %v9127_v52 = vld [vmem:[#allocation21_spill] sm:$0xff] }
 0x361   : > { %v6098_v53 = vpack.c.bf16 %v4742_v46, %v4741_v8  ;;  %v6452_v42 = vpop.f32.mrb[236].mxu1  ;;  %v4117_v10 = vpop.f32.mrb[132].mxu0  ;;  %v3231_v8 = vadd.f32 %v8733_v31, %v9127_v52 }
 0x362   : > { %6307 = vst [vmem:[%s8710_s11 + $0x68] sm:$0xff] %v6103_v22   ;;  %v4423_v13 = vadd.f32 %v8531_v14, %v6452_v42  ;;  %v4414_v34 = vpop.f32.mrb[237].mxu1  ;;  %v8808_v62 = vadd.f32 %v4117_v10, %v3220_v7  ;;  %v4119_v4 = vpop.f32.mrb[133].mxu0 }
 0x363   : > { %6306 = vst [vmem:[%s8710_s11 + $0x60] sm:$0xff] %v6098_v53   ;;  %v4415_v47 = vadd.f32 %v8515_v26, %v4414_v34  ;;  %v6453_v19 = vpop.f32.mrb[238].mxu1  ;;  %v4120_v51 = vpop.f32.mrb[134].mxu0  ;;  %v3228_v26 = vadd.f32 %v8733_v31, %v9126_v11 }
 0x364   : > { %v4426_v1 = vadd.f32 %v8538_v50, %v6453_v19  ;;  %v4417_v48 = vpop.f32.mrb[239].mxu1  ;;  %v8812_v61 = vadd.f32 %v4120_v51, %v3223_v29  ;;  %v4122_v14 = vpop.f32.mrb[135].mxu0  ;;  %v4747_v27 = vmax.f32 %v4423_v13, 0.0  ;;  %v9128_v19 = vld [vmem:[#allocation22_spill] sm:$0xff] }
 0x365   : > { %v4418_v12 = vadd.f32 %v8522_v36, %v4417_v48  ;;  %v4745_v56 = vmax.f32 %v4415_v47, 0.0 }
 0x366   : > { %v4748_v9 = vmax.f32 %v4426_v1, 0.0 }
 0x367   : > { %v4746_v20 = vmax.f32 %v4418_v12, 0.0  ;;  %v9129_v12 = vld [vmem:[#allocation23_spill] sm:$0xff] }
 0x368   : > { %v6113_v32 = vpack.c.bf16 %v4748_v9, %v4747_v27  ;;  %v3239_v27 = vadd.f32 %v8733_v31, %v9129_v12  ;;  %v9132_v12 = vld [vmem:[#allocation26_spill] sm:$0xff] }
 0x369   : > { %v6108_v43 = vpack.c.bf16 %v4746_v20, %v4745_v56  ;;  %v6456_v16 = vpop.f32.mrb[240].mxu1  ;;  %v4125_v38 = vpop.f32.mrb[136].mxu0 }
 0x36a   : > { %6309 = vst [vmem:[%s8710_s11 + $0x78] sm:$0xff] %v6113_v32   ;;  %v4439_v50 = vadd.f32 %v8563_v44, %v6456_v16  ;;  %v4430_v45 = vpop.f32.mrb[241].mxu1  ;;  %v8822_v36 = vadd.f32 %v4125_v38, %v3228_v26  ;;  %v4127_v46 = vpop.f32.mrb[137].mxu0 }
 0x36b   : > { %6308 = vst [vmem:[%s8710_s11 + $0x70] sm:$0xff] %v6108_v43   ;;  %v4431_v22 = vadd.f32 %v8547_v33, %v4430_v45  ;;  %v6457_v60 = vpop.f32.mrb[242].mxu1  ;;  %v4128_v7 = vpop.f32.mrb[138].mxu0  ;;  %v3236_v33 = vadd.f32 %v8733_v31, %v9128_v19  ;;  %v9130_v46 = vld [vmem:[#allocation24_spill] sm:$0xff] }
 0x36c   : > { %v4442_v53 = vadd.f32 %v8570_v15, %v6457_v60  ;;  %v4433_v42 = vpop.f32.mrb[243].mxu1  ;;  %v8826_v10 = vadd.f32 %v4128_v7, %v3231_v8  ;;  %v4130_v44 = vpop.f32.mrb[139].mxu0  ;;  %v4751_v34 = vmax.f32 %v4439_v50, 0.0 }
 0x36d   : > { %v4434_v13 = vadd.f32 %v8554_v2, %v4433_v42  ;;  %v4749_v29 = vmax.f32 %v4431_v22, 0.0  ;;  %v9131_v42 = vld [vmem:[#allocation25_spill] sm:$0xff] }
 0x36e   : > { %v4752_v37 = vmax.f32 %v4442_v53, 0.0  ;;  %v3247_v44 = vadd.f32 %v8733_v31, %v9131_v42 }
 0x36f   : > { %v4750_v4 = vmax.f32 %v4434_v13, 0.0 }
 0x370   : > { %v6123_v47 = vpack.c.bf16 %v4752_v37, %v4751_v34 }
 0x371   : > { %v6118_v51 = vpack.c.bf16 %v4750_v4, %v4749_v29  ;;  %v6460_v1 = vpop.f32.mrb[244].mxu1  ;;  %v4133_v48 = vpop.f32.mrb[140].mxu0 }
 0x372   : > { %6311 = vst [vmem:[%s8710_s11 + $0x88] sm:$0xff] %v6123_v47   ;;  %v4455_v15 = vadd.f32 %v8595_v55, %v6460_v1  ;;  %v4446_v14 = vpop.f32.mrb[245].mxu1  ;;  %v8836_v2 = vadd.f32 %v4133_v48, %v3236_v33  ;;  %v4135_v9 = vpop.f32.mrb[141].mxu0 }
 0x373   : > { %6310 = vst [vmem:[%s8710_s11 + $0x80] sm:$0xff] %v6118_v51   ;;  %v4447_v56 = vadd.f32 %v8579_v3, %v4446_v14  ;;  %v6461_v20 = vpop.f32.mrb[246].mxu1  ;;  %v4136_v32 = vpop.f32.mrb[142].mxu0  ;;  %v3244_v3 = vadd.f32 %v8733_v31, %v9130_v46 }
 0x374   : > { %v4458_v11 = vadd.f32 %v8602_v49, %v6461_v20  ;;  %v4449_v26 = vpop.f32.mrb[247].mxu1  ;;  %v8840_v43 = vadd.f32 %v4136_v32, %v3239_v27  ;;  %v4138_v55 = vpop.f32.mrb[143].mxu0  ;;  %v4755_v38 = vmax.f32 %v4455_v15, 0.0  ;;  %v9133_v32 = vld [vmem:[#allocation27_spill] sm:$0xff] }
 0x375   : > { %v4450_v16 = vadd.f32 %v8586_v30, %v4449_v26  ;;  %v4753_v45 = vmax.f32 %v4447_v56, 0.0  ;;  %v9134_v55 = vld [vmem:[#allocation50_spill] sm:$0xff] }
 0x376   : > { %v4756_v50 = vmax.f32 %v4458_v11, 0.0  ;;  %v3255_v11 = vadd.f32 %v8733_v31, %v9133_v32  ;;  %v9142_v32 = vld [vmem:[#allocation59_spill] sm:$0xff] }
 0x377   : > { %v4754_v52 = vmax.f32 %v4450_v16, 0.0 }
 0x378   : > { %v6133_v8 = vpack.c.bf16 %v4756_v50, %v4755_v38 }
 0x379   : > { %v6128_v22 = vpack.c.bf16 %v4754_v52, %v4753_v45  ;;  %v6464_v60 = vpop.f32.mrb[248].mxu1  ;;  %v4141_v7 = vpop.f32.mrb[144].mxu0  ;;  %v9135_v45 = vld [vmem:[#allocation55_spill] sm:$0xff] }
 0x37a   : > { %6313 = vst [vmem:[%s8710_s11 + $0x98] sm:$0xff] %v6133_v8   ;;  %v4471_v49 = vadd.f32 %v8627_v24, %v6464_v60  ;;  %v4462_v53 = vpop.f32.mrb[249].mxu1  ;;  %v8850_v30 = vadd.f32 %v4141_v7, %v3244_v3  ;;  %v4143_v13 = vpop.f32.mrb[145].mxu0  ;;  %v9136_v3 = vld [vmem:[#allocation52_spill] sm:$0xff] }
 0x37b   : > { %6312 = vst [vmem:[%s8710_s11 + $0x90] sm:$0xff] %v6128_v22   ;;  %v4463_v34 = vadd.f32 %v8611_v23, %v4462_v53  ;;  %v6465_v37 = vpop.f32.mrb[250].mxu1  ;;  %v4144_v29 = vpop.f32.mrb[146].mxu0  ;;  %v3252_v23 = vadd.f32 %v8733_v31, %v9132_v12 }
 0x37c   : > { %v4474_v4 = vadd.f32 %v8634_v25, %v6465_v37  ;;  %v4465_v47 = vpop.f32.mrb[251].mxu1  ;;  %v8854_v19 = vadd.f32 %v4144_v29, %v3247_v44  ;;  %v4146_v24 = vpop.f32.mrb[147].mxu0  ;;  %v4759_v51 = vmax.f32 %v4471_v49, 0.0  ;;  %v9137_v44 = vld [vmem:[#allocation28_spill] sm:$0xff] }
 0x37d   : > { %v4466_v33 = vadd.f32 %v8618_v6, %v4465_v47  ;;  %v4757_v48 = vmax.f32 %v4463_v34, 0.0  ;;  %v3260_v13 = vadd.f32 %v8733_v31, %v9137_v44 }
 0x37e   : > { %v4760_v1 = vmax.f32 %v4474_v4, 0.0  ;;  %v9138_v4 = vld [vmem:[#allocation3_spill] sm:$0xff] }
 0x37f   : > { %v4758_v15 = vmax.f32 %v4466_v33, 0.0  ;;  %v9139_v33 = vld [vmem:[#allocation29_spill] sm:$0xff] }
 0x380   : > { %v6143_v14 = vpack.c.bf16 %v4760_v1, %v4759_v51  ;;  %v3263_v51 = vadd.f32 %v8733_v31, %v9139_v33 }
 0x381   : > { %v6138_v27 = vpack.c.bf16 %v4758_v15, %v4757_v48  ;;  %v6468_v9 = vpop.f32.mrb[252].mxu1  ;;  %v4149_v56 = vpop.f32.mrb[148].mxu0  ;;  %v9140_v15 = vld [vmem:[#allocation57_spill] sm:$0xff] }
 0x382   : > { %6315 = vst [vmem:[%s8710_s11 + $0xa8] sm:$0xff] %v6143_v14   ;;  %v4487_v25 = vadd.f32 %v8659_v0, %v6468_v9  ;;  %v4478_v20 = vpop.f32.mrb[253].mxu1  ;;  %v8864_v6 = vadd.f32 %v4149_v56, %v3252_v23  ;;  %v4151_v26 = vpop.f32.mrb[149].mxu0 }
 0x383   : > { %6314 = vst [vmem:[%s8710_s11 + $0xa0] sm:$0xff] %v6138_v27   ;;  %v4479_v16 = vadd.f32 %v9134_v55, %v4478_v20  ;;  %v6469_v38 = vpop.f32.mrb[254].mxu1  ;;  %v4152_v50 = vpop.f32.mrb[150].mxu0  ;;  %v9141_v27 = vld [vmem:[#allocation61_spill] sm:$0xff] }
 0x384   : > { %v4490_v52 = vadd.f32 %v9135_v45, %v6469_v38  ;;  %v4481_v8 = vpop.f32.mrb[255].mxu1  ;;  %v8868_v46 = vadd.f32 %v4152_v50, %v3255_v11  ;;  %v4154_v0 = vpop.f32.mrb[151].mxu0  ;;  %v4763_v60 = vmax.f32 %v4487_v25, 0.0  ;;  %v9143_v45 = vld [vmem:[#allocation31_spill] sm:$0xff] }
 0x385   : > { %v4482_v22 = vadd.f32 %v9136_v3, %v4481_v8  ;;  %v4761_v49 = vmax.f32 %v4479_v16, 0.0 }
 0x386   : > { %v4764_v7 = vmax.f32 %v4490_v52, 0.0  ;;  %v6714_v52 = vadd.f32 %v8733_v31, %v9143_v45 }
 0x387   : > { %v4762_v53 = vmax.f32 %v4482_v22, 0.0 }
 0x388   : > { %v6153_v42 = vpack.c.bf16 %v4764_v7, %v4763_v60  ;;  %v9144_v7 = vld [vmem:[#allocation32_spill] sm:$0xff] }
 0x389   : > { %v6148_v34 = vpack.c.bf16 %v4762_v53, %v4761_v49  ;;  %v6472_v37 = vpop.f32.mrb[0].mxu1  ;;  %v4157_v29 = vpop.f32.mrb[152].mxu0  ;;  %v6716_v49 = vadd.f32 %v8733_v31, %v9144_v7 }
 0x38a   : > { %6317 = vst [vmem:[%s8710_s11 + $0xb8] sm:$0xff] %v6153_v42   ;;  %v4503_v47 = vadd.f32 %v9138_v4, %v6472_v37  ;;  %v4494_v24 = vpop.f32.mrb[1].mxu1  ;;  %v8878_v1 = vadd.f32 %v4157_v29, %v3260_v13  ;;  %v4159_v48 = vpop.f32.mrb[153].mxu0 }
 0x38b   : > { %6316 = vst [vmem:[%s8710_s11 + $0xb0] sm:$0xff] %v6148_v34   ;;  %v4495_v14 = vadd.f32 %v9140_v15, %v4494_v24  ;;  %v6473_v12 = vpop.f32.mrb[2].mxu1  ;;  %v4160_v23 = vpop.f32.mrb[154].mxu0 }
 0x38c   : > { %v4506_v9 = vadd.f32 %v9141_v27, %v6473_v12  ;;  %v4497_v56 = vpop.f32.mrb[3].mxu1  ;;  %v8882_v25 = vadd.f32 %v4160_v23, %v3263_v51  ;;  %v4162_v20 = vpop.f32.mrb[155].mxu0  ;;  %v4767_v26 = vmax.f32 %v4503_v47, 0.0 }
 0x38d   : > { %v4498_v11 = vadd.f32 %v9142_v32, %v4497_v56  ;;  %v4765_v16 = vmax.f32 %v4495_v14, 0.0  ;;  %v9145_v14 = vld [vmem:[#allocation33_spill] sm:$0xff]  ;;  %v9146_v56 = vld [vmem:[#allocation34_spill] sm:$0xff] }
 0x38e   : > { %v4768_v55 = vmax.f32 %v4506_v9, 0.0  ;;  %v6720_v20 = vadd.f32 %v8733_v31, %v9146_v56 }
 0x38f   : > { %v4766_v38 = vmax.f32 %v4498_v11, 0.0 }
 0x390   : > { %v6163_v50 = vpack.c.bf16 %v4768_v55, %v4767_v26 }
 0x391   : > { %v6158_v8 = vpack.c.bf16 %v4766_v38, %v4765_v16  ;;  %v6476_v0 = vpop.f32.mrb[4].mxu1  ;;  %v4165_v3 = vpop.f32.mrb[156].mxu0 }
 0x392   : > { %6319 = vst [vmem:[%s8710_s11 + $0xc8] sm:$0xff] %v6163_v50   ;;  %v4519_v22 = vadd.f32 %v8719_v21, %v6476_v0  ;;  %v4510_v60 = vpop.f32.mrb[5].mxu1  ;;  %v8892_v53 = vadd.f32 %v6714_v52, %v4165_v3  ;;  %v4167_v42 = vpop.f32.mrb[157].mxu0 }
 0x393   : > { %6318 = vst [vmem:[%s8710_s11 + $0xc0] sm:$0xff] %v6158_v8   ;;  %v4511_v44 = vadd.f32 %v8699_v58, %v4510_v60  ;;  %v6477_v13 = vpop.f32.mrb[6].mxu1  ;;  %v4168_v34 = vpop.f32.mrb[158].mxu0  ;;  %v6718_v58 = vadd.f32 %v8733_v31, %v9145_v14  ;;  %v9147_v60 = vld [vmem:[#allocation35_spill] sm:$0xff] }
 0x394   : > { %v4522_v37 = vadd.f32 %v8723_v35, %v6477_v13  ;;  %v4513_v29 = vpop.f32.mrb[7].mxu1  ;;  %v8896_v4 = vadd.f32 %v6716_v49, %v4168_v34  ;;  %v4170_v21 = vpop.f32.mrb[159].mxu0  ;;  %v4771_v24 = vmax.f32 %v4519_v22, 0.0  ;;  %v9148_v13 = vld [vmem:[#allocation36_spill] sm:$0xff] }
 0x395   : > { %v4514_v47 = vadd.f32 %v8704_v41, %v4513_v29  ;;  %v4769_v51 = vmax.f32 %v4511_v44, 0.0  ;;  %v6724_v34 = vadd.f32 %v8733_v31, %v9148_v13  ;;  %v9152_v13 = vld [vmem:[#allocation40_spill] sm:$0xff] }
 0x396   : > { %v4772_v33 = vmax.f32 %v4522_v37, 0.0 }
 0x397   : > { %v4770_v48 = vmax.f32 %v4514_v47, 0.0 }
 0x398   : > { %v6173_v15 = vpack.c.bf16 %v4772_v33, %v4771_v24 }
 0x399   : > { %v6168_v12 = vpack.c.bf16 %v4770_v48, %v4769_v51  ;;  %v6480_v23 = vpop.f32.mrb[8].mxu1  ;;  %v4173_v27 = vpop.f32.mrb[160].mxu0 }
 0x39a   : > { %6321 = vst [vmem:[%s8710_s11 + $0xd8] sm:$0xff] %v6173_v15   ;;  %v4535_v35 = vadd.f32 %v8752_v63, %v6480_v23  ;;  %v4526_v9 = vpop.f32.mrb[9].mxu1  ;;  %v8906_v41 = vadd.f32 %v6718_v58, %v4173_v27  ;;  %v4175_v32 = vpop.f32.mrb[161].mxu0  ;;  %v9149_v27 = vld [vmem:[#allocation37_spill] sm:$0xff] }
 0x39b   : > { %6320 = vst [vmem:[%s8710_s11 + $0xd0] sm:$0xff] %v6168_v12   ;;  %v4527_v11 = vadd.f32 %v8738_v17, %v4526_v9  ;;  %v6481_v26 = vpop.f32.mrb[10].mxu1  ;;  %v4176_v55 = vpop.f32.mrb[162].mxu0  ;;  %v6722_v17 = vadd.f32 %v8733_v31, %v9147_v60  ;;  %v9150_v32 = vld [vmem:[#allocation38_spill] sm:$0xff] }
 0x39c   : > { %v4538_v16 = vadd.f32 %v8756_v57, %v6481_v26  ;;  %v4529_v38 = vpop.f32.mrb[11].mxu1  ;;  %v8910_v50 = vadd.f32 %v6720_v20, %v4176_v55  ;;  %v4178_v63 = vpop.f32.mrb[163].mxu0  ;;  %v4775_v52 = vmax.f32 %v4535_v35, 0.0 }
 0x39d   : > { %v4530_v45 = vadd.f32 %v8742_v39, %v4529_v38  ;;  %v4773_v0 = vmax.f32 %v4527_v11, 0.0  ;;  %v6728_v11 = vadd.f32 %v8733_v31, %v9150_v32 }
 0x39e   : > { %v4776_v8 = vmax.f32 %v4538_v16, 0.0 }
 0x39f   : > { %v4774_v3 = vmax.f32 %v4530_v45, 0.0 }
 0x3a0   : > { %v6183_v22 = vpack.c.bf16 %v4776_v8, %v4775_v52 }
 0x3a1   : > { %v6178_v7 = vpack.c.bf16 %v4774_v3, %v4773_v0  ;;  %v6484_v49 = vpop.f32.mrb[12].mxu1  ;;  %v4181_v42 = vpop.f32.mrb[164].mxu0 }
 0x3a2   : > { %6323 = vst [vmem:[%s8710_s11 + $0xe8] sm:$0xff] %v6183_v22   ;;  %v4551_v57 = vadd.f32 %v8780_v54, %v6484_v49  ;;  %v4542_v44 = vpop.f32.mrb[13].mxu1  ;;  %v8920_v39 = vadd.f32 %v6722_v17, %v4181_v42  ;;  %v4183_v37 = vpop.f32.mrb[165].mxu0 }
 0x3a3   : > { %6322 = vst [vmem:[%s8710_s11 + $0xe0] sm:$0xff] %v6178_v7   ;;  %v4543_v29 = vadd.f32 %v8766_v18, %v4542_v44  ;;  %v6485_v21 = vpop.f32.mrb[14].mxu1  ;;  %v4184_v47 = vpop.f32.mrb[166].mxu0  ;;  %v6726_v18 = vadd.f32 %v8733_v31, %v9149_v27  ;;  %v9151_v7 = vld [vmem:[#allocation39_spill] sm:$0xff]  ;;  %v9153_v27 = vld [vmem:[#allocation41_spill] sm:$0xff] }
 0x3a4   : > { %v4554_v24 = vadd.f32 %v8784_v5, %v6485_v21  ;;  %v4545_v33 = vpop.f32.mrb[15].mxu1  ;;  %v8924_v51 = vadd.f32 %v6724_v34, %v4184_v47  ;;  %v4186_v54 = vpop.f32.mrb[167].mxu0  ;;  %v4779_v15 = vmax.f32 %v4551_v57, 0.0  ;;  %v6732_v34 = vadd.f32 %v8733_v31, %v9152_v13 }
 0x3a5   : > { %v4546_v48 = vadd.f32 %v8770_v28, %v4545_v33  ;;  %v4777_v58 = vmax.f32 %v4543_v29, 0.0 }
 0x3a6   : > { %v4780_v14 = vmax.f32 %v4554_v24, 0.0 }
 0x3a7   : > { %v4778_v12 = vmax.f32 %v4546_v48, 0.0 }
 0x3a8   : > { %v6193_v23 = vpack.c.bf16 %v4780_v14, %v4779_v15 }
 0x3a9   : > { %v6188_v35 = vpack.c.bf16 %v4778_v12, %v4777_v58  ;;  %v6488_v9 = vpop.f32.mrb[16].mxu1  ;;  %v4189_v56 = vpop.f32.mrb[168].mxu0 }
 0x3aa   : > { %6325 = vst [vmem:[%s8710_s11 + $0xf8] sm:$0xff] %v6193_v23   ;;  %v4567_v5 = vadd.f32 %v8808_v62, %v6488_v9  ;;  %v4558_v20 = vpop.f32.mrb[17].mxu1  ;;  %v8934_v28 = vadd.f32 %v6726_v18, %v4189_v56  ;;  %v4191_v26 = vpop.f32.mrb[169].mxu0 }
 0x3ab   : > { %6324 = vst [vmem:[%s8710_s11 + $0xf0] sm:$0xff] %v6188_v35   ;;  %v4559_v55 = vadd.f32 %v8794_v40, %v4558_v20  ;;  %v6489_v16 = vpop.f32.mrb[18].mxu1  ;;  %v4192_v38 = vpop.f32.mrb[170].mxu0  ;;  %v6730_v40 = vadd.f32 %v8733_v31, %v9151_v7 }
 0x3ac   : > { %v4570_v63 = vadd.f32 %v8812_v61, %v6489_v16  ;;  %v4561_v45 = vpop.f32.mrb[19].mxu1  ;;  %v8938_v52 = vadd.f32 %v6728_v11, %v4192_v38  ;;  %v4194_v62 = vpop.f32.mrb[171].mxu0  ;;  %v4783_v0 = vmax.f32 %v4567_v5, 0.0  ;;  %v9154_v5 = vld [vmem:[#allocation42_spill] sm:$0xff] }
 0x3ad   : > { %v4562_v8 = vadd.f32 %v8798_v59, %v4561_v45  ;;  %v4781_v22 = vmax.f32 %v4559_v55, 0.0  ;;  %v6736_v20 = vadd.f32 %v8733_v31, %v9154_v5 }
 0x3ae   : > { %v4784_v3 = vmax.f32 %v4570_v63, 0.0 }
 0x3af   : > { %v4782_v60 = vmax.f32 %v4562_v8, 0.0 }
 0x3b0   : > { %v6203_v17 = vpack.c.bf16 %v4784_v3, %v4783_v0 }
 0x3b1   : > { %v6198_v49 = vpack.c.bf16 %v4782_v60, %v4781_v22  ;;  %v6492_v42 = vpop.f32.mrb[20].mxu1  ;;  %v4197_v57 = vpop.f32.mrb[172].mxu0  ;;  %v9155_v60 = vld [vmem:[#allocation43_spill] sm:$0xff] }
 0x3b2   : > { %6327 = vst [vmem:[%s8710_s11 + $0x108] sm:$0xff] %v6203_v17   ;;  %v4583_v61 = vadd.f32 %v8836_v2, %v6492_v42  ;;  %v4574_v44 = vpop.f32.mrb[21].mxu1  ;;  %v8948_v59 = vadd.f32 %v6730_v40, %v4197_v57  ;;  %v4199_v37 = vpop.f32.mrb[173].mxu0  ;;  %v9156_v42 = vld [vmem:[#allocation44_spill] sm:$0xff] }
 0x3b3   : > { %6326 = vst [vmem:[%s8710_s11 + $0x100] sm:$0xff] %v6198_v49   ;;  %v4575_v29 = vadd.f32 %v8822_v36, %v4574_v44  ;;  %v6493_v21 = vpop.f32.mrb[22].mxu1  ;;  %v4200_v47 = vpop.f32.mrb[174].mxu0  ;;  %v6734_v36 = vadd.f32 %v8733_v31, %v9153_v27  ;;  %v6740_v57 = vadd.f32 %v8733_v31, %v9156_v42 }
 0x3b4   : > { %v4586_v24 = vadd.f32 %v8840_v43, %v6493_v21  ;;  %v4577_v33 = vpop.f32.mrb[23].mxu1  ;;  %v8952_v54 = vadd.f32 %v6732_v34, %v4200_v47  ;;  %v4202_v2 = vpop.f32.mrb[175].mxu0  ;;  %v4787_v15 = vmax.f32 %v4583_v61, 0.0 }
 0x3b5   : > { %v4578_v48 = vadd.f32 %v8826_v10, %v4577_v33  ;;  %v4785_v58 = vmax.f32 %v4575_v29, 0.0 }
 0x3b6   : > { %v4788_v14 = vmax.f32 %v4586_v24, 0.0 }
 0x3b7   : > { %v4786_v12 = vmax.f32 %v4578_v48, 0.0 }
 0x3b8   : > { %v6213_v23 = vpack.c.bf16 %v4788_v14, %v4787_v15  ;;  %v9157_v14 = vld [vmem:[#allocation45_spill] sm:$0xff] }
 0x3b9   : > { %v6208_v18 = vpack.c.bf16 %v4786_v12, %v4785_v58  ;;  %v6496_v35 = vpop.f32.mrb[24].mxu1  ;;  %v4205_v9 = vpop.f32.mrb[176].mxu0 }
 0x3ba   : > { %6329 = vst [vmem:[%s8710_s11 + $0x118] sm:$0xff] %v6213_v23   ;;  %v4599_v43 = vadd.f32 %v8864_v6, %v6496_v35  ;;  %v4590_v56 = vpop.f32.mrb[25].mxu1  ;;  %v8962_v10 = vadd.f32 %v6734_v36, %v4205_v9  ;;  %v4207_v32 = vpop.f32.mrb[177].mxu0  ;;  %v9158_v36 = vld [vmem:[#allocation46_spill] sm:$0xff] }
 0x3bb   : > { %6328 = vst [vmem:[%s8710_s11 + $0x110] sm:$0xff] %v6208_v18   ;;  %v4591_v11 = vadd.f32 %v8850_v30, %v4590_v56  ;;  %v6497_v26 = vpop.f32.mrb[26].mxu1  ;;  %v4208_v55 = vpop.f32.mrb[178].mxu0  ;;  %v6738_v30 = vadd.f32 %v8733_v31, %v9155_v60  ;;  %v6744_v18 = vadd.f32 %v8733_v31, %v9158_v36 }
 0x3bc   : > { %v4602_v16 = vadd.f32 %v8868_v46, %v6497_v26  ;;  %v4593_v38 = vpop.f32.mrb[27].mxu1  ;;  %v8966_v63 = vadd.f32 %v6736_v20, %v4208_v55  ;;  %v4210_v6 = vpop.f32.mrb[179].mxu0  ;;  %v4791_v62 = vmax.f32 %v4599_v43, 0.0 }
 0x3bd   : > { %v4594_v45 = vadd.f32 %v8854_v19, %v4593_v38  ;;  %v4789_v0 = vmax.f32 %v4591_v11, 0.0 }
 0x3be   : > { %v4792_v8 = vmax.f32 %v4602_v16, 0.0 }
 0x3bf   : > { %v4790_v3 = vmax.f32 %v4594_v45, 0.0  ;;  %v9159_v45 = vld [vmem:[#allocation47_spill] sm:$0xff] }
 0x3c0   : > { %v6223_v22 = vpack.c.bf16 %v4792_v8, %v4791_v62 }
 0x3c1   : > { %v6218_v17 = vpack.c.bf16 %v4790_v3, %v4789_v0  ;;  %v6500_v7 = vpop.f32.mrb[28].mxu1  ;;  %v4213_v40 = vpop.f32.mrb[180].mxu0 }
 0x3c2   : > { %6331 = vst [vmem:[%s8710_s11 + $0x128] sm:$0xff] %v6223_v22   ;;  %v4615_v46 = vadd.f32 %v8892_v53, %v6500_v7  ;;  %v4606_v49 = vpop.f32.mrb[29].mxu1  ;;  %v8976_v19 = vadd.f32 %v6738_v30, %v4213_v40  ;;  %v4215_v61 = vpop.f32.mrb[181].mxu0  ;;  %v9160_v22 = vld [vmem:[#allocation48_spill] sm:$0xff] }
 0x3c3   : > { %6330 = vst [vmem:[%s8710_s11 + $0x120] sm:$0xff] %v6218_v17   ;;  %v4607_v44 = vadd.f32 %v8878_v1, %v4606_v49  ;;  %v6501_v13 = vpop.f32.mrb[30].mxu1  ;;  %v4216_v34 = vpop.f32.mrb[182].mxu0  ;;  %v6742_v1 = vadd.f32 %v8733_v31, %v9157_v14  ;;  %v6748_v60 = vadd.f32 %v8733_v31, %v9160_v22 }
 0x3c4   : > { %v4618_v37 = vadd.f32 %v8896_v4, %v6501_v13  ;;  %v4609_v29 = vpop.f32.mrb[31].mxu1  ;;  %v8980_v21 = vadd.f32 %v6740_v57, %v4216_v34  ;;  %v4218_v53 = vpop.f32.mrb[183].mxu0  ;;  %v4795_v24 = vmax.f32 %v4615_v46, 0.0 }
 0x3c5   : > { %v4610_v47 = vadd.f32 %v8882_v25, %v4609_v29  ;;  %v4793_v2 = vmax.f32 %v4607_v44, 0.0  ;;  %v9161_v29 = vld [vmem:[#allocation49_spill] sm:$0xff] }
 0x3c6   : > { %v4796_v33 = vmax.f32 %v4618_v37, 0.0  ;;  %v6750_v53 = vadd.f32 %v8733_v31, %v9161_v29 }
 0x3c7   : > { %v4794_v48 = vmax.f32 %v4610_v47, 0.0 }
 0x3c8   : > { %v6233_v15 = vpack.c.bf16 %v4796_v33, %v4795_v24 }
 0x3c9   : > { %v6228_v58 = vpack.c.bf16 %v4794_v48, %v4793_v2  ;;  %v6504_v12 = vpop.f32.mrb[32].mxu1  ;;  %v4221_v23 = vpop.f32.mrb[184].mxu0  ;;  %v9162_v2 = vld [vmem:[#allocation51_spill] sm:$0xff] }
 0x3ca   : > { %6333 = vst [vmem:[%s8710_s11 + $0x138] sm:$0xff] %v6233_v15   ;;  %v4631_v4 = vadd.f32 %v8920_v39, %v6504_v12  ;;  %v4622_v27 = vpop.f32.mrb[33].mxu1  ;;  %v8990_v25 = vadd.f32 %v6742_v1, %v4221_v23  ;;  %v4223_v35 = vpop.f32.mrb[185].mxu0  ;;  %v6752_v48 = vadd.f32 %v8733_v31, %v9162_v2 }
 0x3cb   : > { %6332 = vst [vmem:[%s8710_s11 + $0x130] sm:$0xff] %v6228_v58   ;;  %v4623_v9 = vadd.f32 %v8906_v41, %v4622_v27  ;;  %v6505_v43 = vpop.f32.mrb[34].mxu1  ;;  %v4224_v56 = vpop.f32.mrb[186].mxu0  ;;  %v6746_v41 = vadd.f32 %v8733_v31, %v9159_v45 }
 0x3cc   : > { %v4634_v5 = vadd.f32 %v8924_v51, %v6505_v43  ;;  %v4625_v20 = vpop.f32.mrb[35].mxu1  ;;  %v8994_v32 = vadd.f32 %v6744_v18, %v4224_v56  ;;  %v4226_v39 = vpop.f32.mrb[187].mxu0  ;;  %v4799_v26 = vmax.f32 %v4631_v4, 0.0  ;;  %v9163_v56 = vld [vmem:[#allocation53_spill] sm:$0xff] }
 0x3cd   : > { %v4626_v11 = vadd.f32 %v8910_v50, %v4625_v20  ;;  %v4797_v16 = vmax.f32 %v4623_v9, 0.0 }
 0x3ce   : > { %v4800_v55 = vmax.f32 %v4634_v5, 0.0  ;;  %v6754_v5 = vadd.f32 %v8733_v31, %v9163_v56 }
 0x3cf   : > { %v4798_v38 = vmax.f32 %v4626_v11, 0.0 }
 0x3d0   : > { %v6243_v6 = vpack.c.bf16 %v4800_v55, %v4799_v26  ;;  %v9164_v26 = vld [vmem:[#allocation54_spill] sm:$0xff] }
 0x3d1   : > { %v6238_v62 = vpack.c.bf16 %v4798_v38, %v4797_v16  ;;  %v6508_v8 = vpop.f32.mrb[36].mxu1  ;;  %v4229_v0 = vpop.f32.mrb[188].mxu0  ;;  %v6756_v55 = vadd.f32 %v8733_v31, %v9164_v26 }
 0x3d2   : > { %6335 = vst [vmem:[%s8710_s11 + $0x148] sm:$0xff] %v6243_v6   ;;  %v4647_v51 = vadd.f32 %v8948_v59, %v6508_v8  ;;  %v4638_v3 = vpop.f32.mrb[37].mxu1  ;;  %v6747_v50 = vadd.f32 %v6746_v41, %v4229_v0  ;;  %v4231_v30 = vpop.f32.mrb[189].mxu0 }
 0x3d3   : > { %6334 = vst [vmem:[%s8710_s11 + $0x140] sm:$0xff] %v6238_v62   ;;  %v4639_v17 = vadd.f32 %v8934_v28, %v4638_v3  ;;  %v6509_v7 = vpop.f32.mrb[38].mxu1  ;;  %v4232_v40 = vpop.f32.mrb[190].mxu0  ;;  %v7561_v30 = vld [vmem:[%s9043_s2] ss:$0 sm:$0xff] }
 0x3d4   : > { %v4650_v46 = vadd.f32 %v8952_v54, %v6509_v7  ;;  %v4641_v49 = vpop.f32.mrb[39].mxu1  ;;  %v6749_v42 = vadd.f32 %v6748_v60, %v4232_v40  ;;  %v4234_v57 = vpop.f32.mrb[191].mxu0  ;;  %v4803_v61 = vmax.f32 %v4647_v51, 0.0 }
 0x3d5   : > { %v4642_v59 = vadd.f32 %v8938_v52, %v4641_v49  ;;  %v4801_v13 = vmax.f32 %v4639_v17, 0.0  ;;  %v9166_v57 = vld [vmem:[#allocation58_spill] sm:$0xff] }
 0x3d6   : > { %v4804_v44 = vmax.f32 %v4650_v46, 0.0 }
 0x3d7   : > { %v4802_v34 = vmax.f32 %v4642_v59, 0.0  ;;  %v6760_v59 = vadd.f32 %v7561_v30, %v9166_v57 }
 0x3d8   : > { %v6253_v37 = vpack.c.bf16 %v4804_v44, %v4803_v61 }
 0x3d9   : > { %v6248_v28 = vpack.c.bf16 %v4802_v34, %v4801_v13  ;;  %v6512_v47 = vpop.f32.mrb[40].mxu1  ;;  %v4237_v24 = vpop.f32.mrb[192].mxu0 }
 0x3da   : > { %6337 = vst [vmem:[%s8710_s11 + $0x158] sm:$0xff] %v6253_v37   ;;  %v4663_v54 = vadd.f32 %v8976_v19, %v6512_v47  ;;  %v4654_v33 = vpop.f32.mrb[41].mxu1  ;;  %v6751_v52 = vadd.f32 %v6750_v53, %v4237_v24  ;;  %v4239_v15 = vpop.f32.mrb[193].mxu0 }
 0x3db   : > { %6336 = vst [vmem:[%s8710_s11 + $0x150] sm:$0xff] %v6248_v28   ;;  %v4655_v14 = vadd.f32 %v8962_v10, %v4654_v33  ;;  %v6513_v1 = vpop.f32.mrb[42].mxu1  ;;  %v4240_v58 = vpop.f32.mrb[194].mxu0  ;;  %v9167_v15 = vld [vmem:[#allocation2_spill] sm:$0xff] }
 0x3dc   : > { %v4666_v12 = vadd.f32 %v8980_v21, %v6513_v1  ;;  %v4657_v23 = vpop.f32.mrb[43].mxu1  ;;  %v6753_v4 = vadd.f32 %v6752_v48, %v4240_v58  ;;  %v4242_v27 = vpop.f32.mrb[195].mxu0  ;;  %v4807_v36 = vmax.f32 %v4663_v54, 0.0 }
 0x3dd   : > { %v4658_v19 = vadd.f32 %v8966_v63, %v4657_v23  ;;  %v4805_v35 = vmax.f32 %v4655_v14, 0.0  ;;  %v6762_v14 = vadd.f32 %v7561_v30, %v9167_v15  ;;  %v9168_v23 = vld [vmem:[#allocation60_spill] sm:$0xff] }
 0x3de   : > { %v4808_v18 = vmax.f32 %v4666_v12, 0.0  ;;  %v6764_v27 = vadd.f32 %v7561_v30, %v9168_v23 }
 0x3df   : > { %v4806_v9 = vmax.f32 %v4658_v19, 0.0 }
 0x3e0   : > { %v6263_v43 = vpack.c.bf16 %v4808_v18, %v4807_v36 }
 0x3e1   : > { %v6258_v10 = vpack.c.bf16 %v4806_v9, %v4805_v35  ;;  %v6516_v20 = vpop.f32.mrb[44].mxu1  ;;  %v4245_v39 = vpop.f32.mrb[196].mxu0 }
 0x3e2   : > { %6339 = vst [vmem:[%s8710_s11 + $0x168] sm:$0xff] %v6263_v43   ;;  %v4679_v11 = vadd.f32 %v6747_v50, %v6516_v20  ;;  %v4670_v21 = vpop.f32.mrb[45].mxu1  ;;  %v6755_v16 = vadd.f32 %v6754_v5, %v4245_v39  ;;  %v4247_v63 = vpop.f32.mrb[197].mxu0 }
 0x3e3   : > { %6338 = vst [vmem:[%s8710_s11 + $0x160] sm:$0xff] %v6258_v10   ;;  %v4671_v38 = vadd.f32 %v8990_v25, %v4670_v21  ;;  %v6517_v6 = vpop.f32.mrb[46].mxu1  ;;  %v4248_v45 = vpop.f32.mrb[198].mxu0  ;;  %v9165_v25 = vld [vmem:[#allocation56_spill] sm:$0xff] }
 0x3e4   : > { %v4682_v41 = vadd.f32 %v6749_v42, %v6517_v6  ;;  %v4673_v62 = vpop.f32.mrb[47].mxu1  ;;  %v6757_v8 = vadd.f32 %v6756_v55, %v4248_v45  ;;  %v4250_v0 = vpop.f32.mrb[199].mxu0  ;;  %v4811_v3 = vmax.f32 %v4679_v11, 0.0  ;;  %v6758_v17 = vadd.f32 %v7561_v30, %v9165_v25 }
 0x3e5   : > { %v4674_v51 = vadd.f32 %v8994_v32, %v4673_v62  ;;  %v4809_v60 = vmax.f32 %v4671_v38, 0.0 }
 0x3e6   : > { %v4812_v22 = vmax.f32 %v4682_v41, 0.0 }
 0x3e7   : > { %v4810_v50 = vmax.f32 %v4674_v51, 0.0 }
 0x3e8   : > { %v6273_v31 = vpack.c.bf16 %v4812_v22, %v4811_v3 }
 0x3e9   : > { %v6268_v7 = vpack.c.bf16 %v4810_v50, %v4809_v60  ;;  %v6520_v40 = vpop.f32.mrb[48].mxu1  ;;  %v4253_v46 = vpop.f32.mrb[200].mxu0 }
 0x3ea   : > { %6341 = vst [vmem:[%s8710_s11 + $0x178] sm:$0xff] %v6273_v31   ;;  %v4695_v49 = vadd.f32 %v6755_v16, %v6520_v40  ;;  %v4686_v42 = vpop.f32.mrb[49].mxu1  ;;  %v6759_v32 = vadd.f32 %v6758_v17, %v4253_v46  ;;  %v4255_v61 = vpop.f32.mrb[201].mxu0 }
 0x3eb   : > { %6340 = vst [vmem:[%s8710_s11 + $0x170] sm:$0xff] %v6268_v7   ;;  %v4687_v44 = vadd.f32 %v6751_v52, %v4686_v42  ;;  %v6521_v13 = vpop.f32.mrb[50].mxu1  ;;  %v4256_v34 = vpop.f32.mrb[202].mxu0 }
 0x3ec   : > { %v4698_v37 = vadd.f32 %v6757_v8, %v6521_v13  ;;  %v4689_v29 = vpop.f32.mrb[51].mxu1  ;;  %v6761_v53 = vadd.f32 %v6760_v59, %v4256_v34  ;;  %v4258_v28 = vpop.f32.mrb[203].mxu0  ;;  %v4815_v24 = vmax.f32 %v4695_v49, 0.0 }
 0x3ed   : > { %v4690_v47 = vadd.f32 %v6753_v4, %v4689_v29  ;;  %v4813_v33 = vmax.f32 %v4687_v44, 0.0 }
 0x3ee   : > { %v4816_v54 = vmax.f32 %v4698_v37, 0.0 }
 0x3ef   : > { %v4814_v2 = vmax.f32 %v4690_v47, 0.0 }
 0x3f0   : > { %v6283_v48 = vpack.c.bf16 %v4816_v54, %v4815_v24 }
 0x3f1   : > { %v6278_v1 = vpack.c.bf16 %v4814_v2, %v4813_v33  ;;  %v6524_v58 = vpop.f32.mrb[52].mxu1  ;;  %v4261_v52 = vpop.f32.mrb[204].mxu0 }
 0x3f2   : > { %6343 = vst [vmem:[%s8710_s11 + $0x188] sm:$0xff] %v6283_v48   ;;  %v4702_v12 = vpop.f32.mrb[53].mxu1  ;;  %v6763_v19 = vadd.f32 %v6762_v14, %v4261_v52  ;;  %v4263_v36 = vpop.f32.mrb[205].mxu0 }
 0x3f3   : > { %6342 = vst [vmem:[%s8710_s11 + $0x180] sm:$0xff] %v6278_v1   ;;  %v4703_v18 = vadd.f32 %v6759_v32, %v4702_v12  ;;  %v6525_v4 = vpop.f32.mrb[54].mxu1  ;;  %v4264_v35 = vpop.f32.mrb[206].mxu0 }
 0x3f4   : > { %v4705_v9 = vpop.f32.mrb[55].mxu1  ;;  %v4711_v43 = vadd.f32 %v6763_v19, %v6524_v58  ;;  %v6765_v56 = vadd.f32 %v6764_v27, %v4264_v35  ;;  %v4266_v5 = vpop.f32.mrb[207].mxu0 }
 0x3f5   : > { %v4706_v10 = vadd.f32 %v6761_v53, %v4705_v9  ;;  %v4817_v20 = vmax.f32 %v4703_v18, 0.0 }
 0x3f6   : > { %v4714_v39 = vadd.f32 %v6765_v56, %v6525_v4  ;;  %v4819_v21 = vmax.f32 %v4711_v43, 0.0 }
 0x3f7   : > { %v4818_v11 = vmax.f32 %v4706_v10, 0.0 }
 0x3f8   : > { %v4820_v26 = vmax.f32 %v4714_v39, 0.0 }
 0x3f9   : > { %v6288_v55 = vpack.c.bf16 %v4818_v11, %v4817_v20 }
 0x3fa   : > { %v6293_v16 = vpack.c.bf16 %v4820_v26, %v4819_v21 }
 0x3fb   : > { %6344 = vst [vmem:[%s8710_s11 + $0x190] sm:$0xff] %v6288_v55  }
 0x3fc   : > { %6345 = vst [vmem:[%s8710_s11 + $0x198] sm:$0xff] %v6293_v16  }
 0x3fd PF: > { %s13_s12 = sadd.s32 1, %s7568_s12  }
 0x3fe   : > { %p10_p4 = scmp.ge.s32.totalorder %s13_s12, 4  }
 0x400   :  { %12 = sbr.rel (!%p10_p4) target bundleno = 1 (0x1), region = 62 }

// kernel: voxel_backbone_8x.17
= control target key start
LH: loop header
LB: loop body
LE: loop exit
PB: predicated region body
PF: predicated region fallthrough
CT: control target
= control target key end

     0   :  { %s2021_s12 = smov 0   ;;  %s2353_s0 = inlined_call_operand.vmem [shape: bf16[224,896], index: 0, kind: input, shape index: {}]   ;;  %s2354_s1 = inlined_call_operand.vmem [shape: bf16[896,128], index: 1, kind: input, shape index: {}]   ;;  %s2355_s2 = inlined_call_operand.vmem [shape: f32[1,128], index: 2, kind: input, shape index: {}]   ;;  %s2356_s3 = inlined_call_operand.vmem [shape: bf16[224,128], index: 3, kind: output, shape index: {}]  }
   0x1 LB: > { %s1437_s13 = sadd.s32 4294967295, %s1997_s12   ;;  %p1441_p0 = scmp.ge.s32.totalorder %s1997_s12, 1  ;;  %s1997_s12 = sphi %s2021_s12, %s13_s12  }
   0x2   : > { %p139_p1 = scmp.lt.s32.totalorder %s1997_s12, 3 }
   0x4   : > { %p140_p2 = pnand %p1441_p0, %p139_p1 }
   0x5   : > { %v1865_v0 = vld [vmem:[%s2354_s1 + $0x40] sm:$0xff] (!%p140_p2)   ;;  %v1869_v4 = vld [vmem:[%s2354_s1 + $0x48] sm:$0xff] (!%p140_p2)   ;;  %v1873_v8 = vld [vmem:[%s2354_s1 + $0x50] sm:$0xff] (!%p140_p2)   ;;  %s164_s15 = smul.u32 (!%p140_p2), 14, %s1437_s13  ;;  %v1999_v38 = vmov (!%p140_p2), 0.0   ;;  %vm2000_vm0 = vmmov (!%p140_p2), 0  }
   0x6   : > { %143 = sbr.rel (%p140_p2) target bundleno = 368 (0x170), region = 32  ;;  %v1866_v1 = vld [vmem:[%s2354_s1] sm:$0xff] (!%p140_p2)   ;;  %1621 = vmatprep.subr.bf16.mxu0 (!%p140_p2), %v1865_v0  ;;  %v1870_v5 = vld [vmem:[%s2354_s1 + $0x8] sm:$0xff] (!%p140_p2)   ;;  %v1874_v9 = vld [vmem:[%s2354_s1 + $0x10] sm:$0xff] (!%p140_p2)  }
   0x7   : > { %v1867_v2 = vld [vmem:[%s2354_s1 + $0xc0] sm:$0xff] (!%p140_p2)   ;;  %1622 = vmatpush3.bf16.msra.mxu0 (!%p140_p2), %v1866_v1  ;;  %v1871_v6 = vld [vmem:[%s2354_s1 + $0xc8] sm:$0xff] (!%p140_p2)   ;;  %v1875_v10 = vld [vmem:[%s2354_s1 + $0xd0] sm:$0xff] (!%p140_p2)   ;;  %p165_p3 = scmp.lt.s32.totalorder (!%p140_p2), %s164_s15, 27 }
   0x8   : > { %v1868_v3 = vld [vmem:[%s2354_s1 + $0x80] sm:$0xff] (!%p140_p2)   ;;  %1679 = vmatprep.subr.bf16.mxu1 (!%p140_p2), %v1867_v2  ;;  %1623 = vmatprep.subr.bf16.mxu0 (!%p140_p2), %v1869_v4  ;;  %v1872_v7 = vld [vmem:[%s2354_s1 + $0x88] sm:$0xff] (!%p140_p2)   ;;  %v1876_v11 = vld [vmem:[%s2354_s1 + $0x90] sm:$0xff] (!%p140_p2)  }
   0x9   : > { %1680 = vmatpush3.bf16.msra.mxu1 (!%p140_p2), %v1868_v3  ;;  %v1877_v12 = vld [vmem:[%s2354_s1 + $0x58] sm:$0xff] (!%p140_p2)   ;;  %v1881_v16 = vld [vmem:[%s2354_s1 + $0x60] sm:$0xff] (!%p140_p2)   ;;  %v1885_v20 = vld [vmem:[%s2354_s1 + $0x68] sm:$0xff] (!%p140_p2)  }
   0xa   : > { %1681 = vmatprep.subr.bf16.mxu1 (!%p140_p2), %v1871_v6  ;;  %v1878_v13 = vld [vmem:[%s2354_s1 + $0x18] sm:$0xff] (!%p140_p2)   ;;  %v1882_v17 = vld [vmem:[%s2354_s1 + $0x20] sm:$0xff] (!%p140_p2)   ;;  %v1886_v21 = vld [vmem:[%s2354_s1 + $0x28] sm:$0xff] (!%p140_p2)  }
   0xb   : > { %1624 = vmatpush3.bf16.msra.mxu0 (!%p140_p2), %v1870_v5  ;;  %v1879_v14 = vld [vmem:[%s2354_s1 + $0xd8] sm:$0xff] (!%p140_p2)   ;;  %v1883_v18 = vld [vmem:[%s2354_s1 + $0xe0] sm:$0xff] (!%p140_p2)   ;;  %v1887_v22 = vld [vmem:[%s2354_s1 + $0xe8] sm:$0xff] (!%p140_p2)  }
   0xc   : > { %1625 = vmatprep.subr.bf16.mxu0 (!%p140_p2), %v1873_v8  ;;  %v1880_v15 = vld [vmem:[%s2354_s1 + $0x98] sm:$0xff] (!%p140_p2)   ;;  %v1884_v19 = vld [vmem:[%s2354_s1 + $0xa0] sm:$0xff] (!%p140_p2)   ;;  %v1888_v23 = vld [vmem:[%s2354_s1 + $0xa8] sm:$0xff] (!%p140_p2)  }
   0xd   : > { %1682 = vmatpush3.bf16.msra.mxu1 %v1872_v7  ;;  %s2358_s15 = smov (!%p165_p3, %s164_s15), 27  ;;  %v1889_v24 = vld [vmem:[%s2354_s1 + $0x70] sm:$0xff]   ;;  %v1893_v28 = vld [vmem:[%s2354_s1 + $0x78] sm:$0xff]   ;;  %v1900_v34 = vld [vmem:[%s2354_s1 + $0x140] sm:$0xff]  }
   0xe   : > { %1683 = vmatprep.subr.bf16.mxu1 %v1875_v10  ;;  %s1854_s14 = smul.u32 28, %s2358_s15  ;;  %v1890_v25 = vld [vmem:[%s2354_s1 + $0x30] sm:$0xff]   ;;  %v1894_v29 = vld [vmem:[%s2354_s1 + $0x38] sm:$0xff]   ;;  %v1904_v37 = vld [vmem:[%s2354_s1 + $0x100] sm:$0xff]  }
   0xf   : > { %1626 = vmatpush3.bf16.msra.mxu0 %v1874_v9  ;;  %v1891_v26 = vld [vmem:[%s2354_s1 + $0xf0] sm:$0xff]   ;;  %v1895_v30 = vld [vmem:[%s2354_s1 + $0xf8] sm:$0xff]   ;;  %v1905_v39 = vld [vmem:[%s2354_s1 + $0x180] sm:$0xff]  }
  0x10   : > { %1627 = vmatprep.subr.bf16.mxu0 %v1877_v12  ;;  %v1892_v27 = vld [vmem:[%s2354_s1 + $0xb0] sm:$0xff]   ;;  %s2122_s25 = scalar_lea.vmem %s2353_s0, %s1854_s14  ;;  %v1899_v33 = vld [vmem:[%s2354_s1 + $0xb8] sm:$0xff]   ;;  %v1908_v41 = vld [vmem:[%s2354_s1 + $0x148] sm:$0xff]  }
  0x11   : > { %1684 = vmatpush3.bf16.msra.mxu1 %v1876_v11  ;;  %v1896_v31 = vld [vmem:[%s2122_s25] ss:$28 sps:$4 sm:$0xff]   ;;  %v1901_v35 = vld [vmem:[%s2122_s25 + $0x8] ss:$28 sps:$4 sm:$0xff]   ;;  %v1909_v42 = vld [vmem:[%s2122_s25 + $0x38] ss:$28 sps:$4 sm:$0xff]  }
  0x12   : > { %1685 = vmatprep.subr.bf16.mxu1 %v1879_v14  ;;  %v1898_v32 = vld [vmem:[%s2122_s25 + $0x4] ss:$28 sps:$4 sm:$0xff]   ;;  %v1903_v36 = vld [vmem:[%s2122_s25 + $0xc] ss:$28 sps:$4 sm:$0xff]   ;;  %v1906_v40 = vld [vmem:[%s2122_s25 + $0x3c] ss:$28 sps:$4 sm:$0xff]  }
  0x13   : > { %1628 = vmatpush3.bf16.msra.mxu0 %v1878_v13  ;;  %973 = vmatprep.mubr.bf16.mxu0 %v1898_v32  ;;  %v1910_v43 = vld [vmem:[%s2354_s1 + $0x108] sm:$0xff]   ;;  %v1911_v44 = vld [vmem:[%s2122_s25 + $0x44] ss:$28 sps:$4 sm:$0xff]   ;;  %v1915_v47 = vld [vmem:[%s2354_s1 + $0x150] sm:$0xff]  }
  0x14   : > { %1629 = vmatprep.subr.bf16.mxu0 %v1881_v16  ;;  %1062 = vmatprep.mubr.bf16.mxu1 %v1903_v36  ;;  %v1913_v45 = vld [vmem:[%s2122_s25 + $0x40] ss:$28 sps:$4 sm:$0xff]   ;;  %v1914_v46 = vld [vmem:[%s2354_s1 + $0x188] sm:$0xff]   ;;  %v1916_v48 = vld [vmem:[%s2122_s25 + $0x74] ss:$28 sps:$4 sm:$0xff]  }
  0x15   : > { %1686 = vmatpush3.bf16.msra.mxu1 %v1880_v15  ;;  %v1918_v49 = vld [vmem:[%s2354_s1 + $0x110] sm:$0xff]   ;;  %v1920_v51 = vld [vmem:[%s2122_s25 + $0x7c] ss:$28 sps:$4 sm:$0xff]   ;;  %v1926_v56 = vld [vmem:[%s2122_s25 + $0xac] ss:$28 sps:$4 sm:$0xff]  }
  0x16   : > { %1687 = vmatprep.subr.bf16.mxu1 %v1883_v18  ;;  %v1919_v50 = vld [vmem:[%s2122_s25 + $0x70] ss:$28 sps:$4 sm:$0xff]   ;;  %v1922_v52 = vld [vmem:[%s2122_s25 + $0x78] ss:$28 sps:$4 sm:$0xff]   ;;  %v1928_v57 = vld [vmem:[%s2122_s25 + $0xa8] ss:$28 sps:$4 sm:$0xff]  }
  0x17   : > { %1630 = vmatpush3.bf16.msra.mxu0 %v1882_v17  ;;  %v1923_v53 = vld [vmem:[%s2354_s1 + $0x190] sm:$0xff]   ;;  %v1924_v54 = vld [vmem:[%s2354_s1 + $0x158] sm:$0xff]   ;;  %v1933_v60 = vld [vmem:[%s2354_s1 + $0x160] sm:$0xff]  }
  0x18   : > { %1631 = vmatprep.subr.bf16.mxu0 %v1885_v20  ;;  %v1925_v55 = vld [vmem:[%s2354_s1 + $0x118] sm:$0xff]   ;;  %v1929_v58 = vld [vmem:[%s2122_s25 + $0xb4] ss:$28 sps:$4 sm:$0xff]   ;;  %v1934_v61 = vld [vmem:[%s2354_s1 + $0x120] sm:$0xff]  }
  0x19   : > { %1688 = vmatpush3.bf16.msra.mxu1 %v1884_v19  ;;  %v1932_v59 = vld [vmem:[%s2354_s1 + $0x198] sm:$0xff]   ;;  %v1935_v62 = vld [vmem:[%s2122_s25 + $0xe4] ss:$28 sps:$4 sm:$0xff]   ;;  %v1931_v63 = vld [vmem:[%s2122_s25 + $0xb0] ss:$28 sps:$4 sm:$0xff]  }
  0x1a   : > { %1689 = vmatprep.subr.bf16.mxu1 %v1887_v22  ;;  %v1938_v0 = vld [vmem:[%s2122_s25 + $0xec] ss:$28 sps:$4 sm:$0xff]   ;;  %v1941_v1 = vld [vmem:[%s2354_s1 + $0x1a0] sm:$0xff]   ;;  %v1944_v6 = vld [vmem:[%s2122_s25 + $0x11c] ss:$28 sps:$4 sm:$0xff]  }
  0x1b   : > { %1632 = vmatpush3.bf16.msra.mxu0 %v1886_v21  ;;  %v1942_v2 = vld [vmem:[%s2354_s1 + $0x168] sm:$0xff]   ;;  %v1937_v4 = vld [vmem:[%s2122_s25 + $0xe0] ss:$28 sps:$4 sm:$0xff]   ;;  %v1951_v9 = vld [vmem:[%s2354_s1 + $0x170] sm:$0xff]  }
  0x1c   : > { %1633 = vmatprep.subr.bf16.mxu0 %v1889_v24  ;;  %v1943_v3 = vld [vmem:[%s2354_s1 + $0x128] sm:$0xff]   ;;  %v1947_v7 = vld [vmem:[%s2122_s25 + $0x124] ss:$28 sps:$4 sm:$0xff]   ;;  %v1952_v10 = vld [vmem:[%s2354_s1 + $0x130] sm:$0xff]  }
  0x1d   : > { %1690 = vmatpush3.bf16.msra.mxu1 %v1888_v23  ;;  %v1940_v5 = vld [vmem:[%s2122_s25 + $0xe8] ss:$28 sps:$4 sm:$0xff]   ;;  %v1956_v11 = vld [vmem:[%s2354_s1 + $0x1b0] sm:$0xff]   ;;  %v1959_v14 = vld [vmem:[%s2354_s1 + $0x178] sm:$0xff]  }
  0x1e   : > { %1691 = vmatprep.subr.bf16.mxu1 %v1891_v26  ;;  %v1949_v8 = vld [vmem:[%s2354_s1 + $0x1a8] sm:$0xff]   ;;  %v1946_v12 = vld [vmem:[%s2122_s25 + $0x118] ss:$28 sps:$4 sm:$0xff]   ;;  %v1950_v16 = vld [vmem:[%s2122_s25 + $0x120] ss:$28 sps:$4 sm:$0xff]  }
  0x1f   : > { %1634 = vmatpush3.bf16.msra.mxu0 %v1890_v25  ;;  %v1953_v13 = vld [vmem:[%s2122_s25 + $0x154] ss:$28 sps:$4 sm:$0xff]   ;;  %v1961_v15 = vld [vmem:[%s2354_s1 + $0x138] sm:$0xff]   ;;  %v1967_v23 = vld [vmem:[%s2122_s25 + $0x4c] ss:$28 sps:$4 sm:$0xff]  }
  0x20   : > { %1635 = vmatprep.subr.bf16.mxu0 %v1893_v28  ;;  %v1957_v17 = vld [vmem:[%s2122_s25 + $0x15c] ss:$28 sps:$4 sm:$0xff]   ;;  %v1955_v19 = vld [vmem:[%s2122_s25 + $0x150] ss:$28 sps:$4 sm:$0xff]   ;;  %v1969_v25 = vld [vmem:[%s2122_s25 + $0x48] ss:$28 sps:$4 sm:$0xff]  }
  0x21   : > { %1692 = vmatpush3.bf16.msra.mxu1 %v1892_v27  ;;  %v1965_v18 = vld [vmem:[%s2354_s1 + $0x1b8] sm:$0xff]   ;;  %v1964_v20 = vld [vmem:[%s2122_s25 + $0x14] ss:$28 sps:$4 sm:$0xff]   ;;  %v1971_v26 = vld [vmem:[%s2122_s25 + $0x84] ss:$28 sps:$4 sm:$0xff]  }
  0x22   : > { %1693 = vmatprep.subr.bf16.mxu1 %v1895_v30  ;;  %v1960_v21 = vld [vmem:[%s2122_s25 + $0x158] ss:$28 sps:$4 sm:$0xff]   ;;  %v1962_v22 = vld [vmem:[%s2122_s25 + $0x10] ss:$28 sps:$4 sm:$0xff]   ;;  %v1973_v28 = vld [vmem:[%s2122_s25 + $0x80] ss:$28 sps:$4 sm:$0xff]  }
  0x23   : > { %1636 = vmatpush3.bf16.msra.mxu0 %v1894_v29  ;;  %v1966_v24 = vld [vmem:[%s2122_s25 + $0x18] ss:$28 sps:$4 sm:$0xff]   ;;  %v1970_v27 = vld [vmem:[%s2122_s25 + $0x50] ss:$28 sps:$4 sm:$0xff]   ;;  %v1974_v30 = vld [vmem:[%s2122_s25 + $0x88] ss:$28 sps:$4 sm:$0xff]  }
  0x24   : > { %1737 = vmatprep.subr.bf16.mxu0 %v1900_v34  ;;  %v1975_v29 = vld [vmem:[%s2122_s25 + $0xbc] ss:$28 sps:$4 sm:$0xff]   ;;  %v1979_v32 = vld [vmem:[%s2122_s25 + $0xf4] ss:$28 sps:$4 sm:$0xff]  }
  0x25   : > { %1694 = vmatpush3.bf16.msra.mxu1 %v1899_v33  ;;  %v1978_v33 = vld [vmem:[%s2122_s25 + $0xc0] ss:$28 sps:$4 sm:$0xff]   ;;  %v1981_v34 = vld [vmem:[%s2122_s25 + $0xf0] ss:$28 sps:$4 sm:$0xff]   ;;  %v1982_v36 = vld [vmem:[%s2122_s25 + $0xf8] ss:$28 sps:$4 sm:$0xff]  }
  0x26   : > { %974 = vmatmul.mubr.bf16.vlgmr.msra.gmra.mrb[0].mxu0 %v1896_v31  ;;  %1810 = vmatprep.subr.bf16.mxu1 %v1999_v38  ;;  %v1977_v31 = vld [vmem:[%s2122_s25 + $0xb8] ss:$28 sps:$4 sm:$0xff]  }
  0x27   : > { %1738 = vmatpush3.bf16.msra.mxu0 %v1904_v37  ;;  %981 = vmatprep.mubr.bf16.mxu0 %v1906_v40  ;;  %v1985_v37 = vld [vmem:[%s2122_s25 + $0x128] ss:$28 sps:$4 sm:$0xff]   ;;  %v1986_v40 = vld [vmem:[%s2122_s25 + $0x130] ss:$28 sps:$4 sm:$0xff]  }
  0x28   : > { %1063 = vmatmul.mubr.bf16.vlgmr.msra.gmra.mrb[0].mxu1 %v1901_v35  ;;  %1739 = vmatprep.subr.bf16.mxu0 %v1908_v41  ;;  %v1983_v35 = vld [vmem:[%s2122_s25 + $0x12c] ss:$28 sps:$4 sm:$0xff]   ;;  %v1989_v41 = vld [vmem:[%s2122_s25 + $0x160] ss:$28 sps:$4 sm:$0xff]  }
  0x29   : > { %1811 = vmatpush3.bf16.msra.mxu1 %v1905_v39  ;;  %1070 = vmatprep.mubr.bf16.mxu1 %v1911_v44  ;;  %v1987_v39 = vld [vmem:[%s2122_s25 + $0x164] ss:$28 sps:$4 sm:$0xff]  }
  0x2a   : > { %1812 = vmatprep.subr.bf16.mxu1 %v1999_v38  ;;  %v2279_v44 = vld [vmem:[%s2355_s2] ss:$0 sm:$0xff] }
  0x2b   : > { %1740 = vmatpush3.bf16.msra.mxu0 %v1910_v43 }
  0x2c   : > { %1741 = vmatprep.subr.bf16.mxu0 %v1915_v47 }
  0x2d   : > { %1813 = vmatpush3.bf16.msra.mxu1 %v1914_v46 }
  0x2e   : > { %982 = vmatmul.mubr.bf16.gmra.mrb[4].mxu0 %v1909_v42  ;;  %1814 = vmatprep.subr.bf16.mxu1 %v1999_v38  ;;  %v1990_v42 = vld [vmem:[%s2122_s25 + $0x168] ss:$28 sps:$4 sm:$0xff]   ;;  %s1443_s25 = sshll.u32 %s2358_s15, 2 }
  0x2f   : > { %989 = vmatprep.mubr.bf16.mxu0 %v1916_v48  ;;  %1742 = vmatpush3.bf16.msra.mxu0 %v1918_v49  ;;  %s2329_s9 = scalar_lea.vmem %s2356_s3, %s1443_s25 }
  0x30   : > { %1071 = vmatmul.mubr.bf16.gmra.mrb[4].mxu1 %v1913_v45  ;;  %1743 = vmatprep.subr.bf16.mxu0 %v1924_v54 }
  0x31   : > { %1078 = vmatprep.mubr.bf16.mxu1 %v1920_v51  ;;  %1815 = vmatpush3.bf16.msra.mxu1 %v1923_v53 }
  0x32   : > { %1816 = vmatprep.subr.bf16.mxu1 %v1999_v38 }
  0x33   : > { %1744 = vmatpush3.bf16.msra.mxu0 %v1925_v55 }
  0x34   : > { %1745 = vmatprep.subr.bf16.mxu0 %v1933_v60 }
  0x35   : > { %1817 = vmatpush3.bf16.msra.mxu1 %v1932_v59 }
  0x36   : > { %990 = vmatmul.mubr.bf16.gmra.mrb[8].mxu0 %v1919_v50  ;;  %1818 = vmatprep.subr.bf16.mxu1 %v1999_v38 }
  0x37   : > { %997 = vmatprep.mubr.bf16.mxu0 %v1926_v56  ;;  %1746 = vmatpush3.bf16.msra.mxu0 %v1934_v61 }
  0x38   : > { %1079 = vmatmul.mubr.bf16.gmra.mrb[8].mxu1 %v1922_v52  ;;  %1747 = vmatprep.subr.bf16.mxu0 %v1942_v2 }
  0x39   : > { %1086 = vmatprep.mubr.bf16.mxu1 %v1929_v58  ;;  %1819 = vmatpush3.bf16.msra.mxu1 %v1941_v1 }
  0x3a   : > { %1820 = vmatprep.subr.bf16.mxu1 %v1999_v38 }
  0x3b   : > { %1748 = vmatpush3.bf16.msra.mxu0 %v1943_v3 }
  0x3c   : > { %1749 = vmatprep.subr.bf16.mxu0 %v1951_v9 }
  0x3d   : > { %1821 = vmatpush3.bf16.msra.mxu1 %v1949_v8 }
  0x3e   : > { %998 = vmatmul.mubr.bf16.gmra.mrb[12].mxu0 %v1928_v57  ;;  %1822 = vmatprep.subr.bf16.mxu1 %v1999_v38 }
  0x3f   : > { %1005 = vmatprep.mubr.bf16.mxu0 %v1935_v62  ;;  %1750 = vmatpush3.bf16.msra.mxu0 %v1952_v10 }
  0x40   : > { %1087 = vmatmul.mubr.bf16.gmra.mrb[12].mxu1 %v1931_v63  ;;  %1751 = vmatprep.subr.bf16.mxu0 %v1959_v14 }
  0x41   : > { %1094 = vmatprep.mubr.bf16.mxu1 %v1938_v0  ;;  %1823 = vmatpush3.bf16.msra.mxu1 %v1956_v11 }
  0x42   : > { %1824 = vmatprep.subr.bf16.mxu1 %v1999_v38 }
  0x43   : > { %1752 = vmatpush3.bf16.msra.mxu0 %v1961_v15 }
  0x45   : > { %1825 = vmatpush3.bf16.msra.mxu1 %v1965_v18 }
  0x46   : > { %1006 = vmatmul.mubr.bf16.gmra.mrb[16].mxu0 %v1937_v4 }
  0x47   : > { %1013 = vmatprep.mubr.bf16.mxu0 %v1944_v6 }
  0x48   : > { %1095 = vmatmul.mubr.bf16.gmra.mrb[16].mxu1 %v1940_v5 }
  0x49   : > { %1102 = vmatprep.mubr.bf16.mxu1 %v1947_v7 }
  0x4e   : > { %1014 = vmatmul.mubr.bf16.gmra.mrb[20].mxu0 %v1946_v12 }
  0x4f   : > { %1021 = vmatprep.mubr.bf16.mxu0 %v1953_v13 }
  0x50   : > { %1103 = vmatmul.mubr.bf16.gmra.mrb[20].mxu1 %v1950_v16 }
  0x51   : > { %1110 = vmatprep.mubr.bf16.mxu1 %v1957_v17 }
  0x56   : > { %1022 = vmatmul.mubr.bf16.gmra.mrb[24].mxu0 %v1955_v19 }
  0x57   : > { %1151 = vmatprep.mubr.bf16.mxu0 %v1964_v20 }
  0x58   : > { %1111 = vmatmul.mubr.bf16.gmra.mrb[24].mxu1 %v1960_v21 }
  0x59   : > { %1826 = vmatprep.mubr.msk.bf16.mxu1 %vm2000_vm0, %v1999_v38 }
  0x5e   : > { %1152 = vmatmul.mubr.bf16.vlgmr.msra.gmra.mrb[28].mxu0 %v1962_v22 }
  0x5f   : > { %1159 = vmatprep.mubr.bf16.mxu0 %v1967_v23 }
  0x60   : > { %1827 = vmatmul.mubr.bf16.vlgmr.msra.gmra.mrb[28].mxu1 %v1966_v24 }
  0x61   : > { %1830 = vmatprep.mubr.msk.bf16.mxu1 %vm2000_vm0, %v1999_v38 }
  0x66   : > { %1160 = vmatmul.mubr.bf16.gmra.mrb[32].mxu0 %v1969_v25 }
  0x67   : > { %1167 = vmatprep.mubr.bf16.mxu0 %v1971_v26 }
  0x68   : > { %1831 = vmatmul.mubr.bf16.gmra.mrb[32].mxu1 %v1970_v27 }
  0x69   : > { %1834 = vmatprep.mubr.msk.bf16.mxu1 %vm2000_vm0, %v1999_v38 }
  0x6e   : > { %1168 = vmatmul.mubr.bf16.gmra.mrb[36].mxu0 %v1973_v28 }
  0x6f   : > { %1175 = vmatprep.mubr.bf16.mxu0 %v1975_v29 }
  0x70   : > { %1835 = vmatmul.mubr.bf16.gmra.mrb[36].mxu1 %v1974_v30 }
  0x71   : > { %1838 = vmatprep.mubr.msk.bf16.mxu1 %vm2000_vm0, %v1999_v38 }
  0x76   : > { %1176 = vmatmul.mubr.bf16.gmra.mrb[40].mxu0 %v1977_v31 }
  0x77   : > { %1183 = vmatprep.mubr.bf16.mxu0 %v1979_v32 }
  0x78   : > { %1839 = vmatmul.mubr.bf16.gmra.mrb[40].mxu1 %v1978_v33 }
  0x79   : > { %1842 = vmatprep.mubr.msk.bf16.mxu1 %vm2000_vm0, %v1999_v38 }
  0x7e   : > { %1184 = vmatmul.mubr.bf16.gmra.mrb[44].mxu0 %v1981_v34 }
  0x7f   : > { %1191 = vmatprep.mubr.bf16.mxu0 %v1983_v35 }
  0x80   : > { %1843 = vmatmul.mubr.bf16.gmra.mrb[44].mxu1 %v1982_v36 }
  0x81   : > { %1846 = vmatprep.mubr.msk.bf16.mxu1 %vm2000_vm0, %v1999_v38 }
  0x86   : > { %1192 = vmatmul.mubr.bf16.gmra.mrb[48].mxu0 %v1985_v37 }
  0x87   : > { %1199 = vmatprep.mubr.bf16.mxu0 %v1987_v39 }
  0x88   : > { %1847 = vmatmul.mubr.bf16.gmra.mrb[48].mxu1 %v1986_v40 }
  0x89   : > { %1850 = vmatprep.mubr.msk.bf16.mxu1 %vm2000_vm0, %v1999_v38 }
  0x8e   : > { %1200 = vmatmul.mubr.bf16.gmra.mrb[52].mxu0 %v1989_v41 }
  0x90   : > { %1851 = vmatmul.mubr.bf16.gmra.mrb[52].mxu1 %v1990_v42 }
  0xf9   : > { %v1637_v43 = vpop.f32.mrb[0].mxu0 }
  0xfa   : > { %v1638_v45 = vpop.f32.mrb[1].mxu0 }
  0xfb   : > { %v1639_v46 = vadd.f32 %v1638_v45, %v1637_v43  ;;  %v1640_v47 = vpop.f32.mrb[2].mxu0  ;;  %v1695_v48 = vpop.f32.mrb[0].mxu1 }
  0xfc   : > { %v1641_v49 = vpop.f32.mrb[3].mxu0  ;;  %v1696_v52 = vpop.f32.mrb[1].mxu1 }
  0xfd   : > { %v976_v50 = vadd.f32 %v1639_v46, %v2279_v44  ;;  %v1642_v51 = vadd.f32 %v1641_v49, %v1640_v47  ;;  %v1697_v53 = vadd.f32 %v1696_v52, %v1695_v48  ;;  %v1698_v38 = vpop.f32.mrb[2].mxu1 }
  0xfe   : > { %v1699_v55 = vpop.f32.mrb[3].mxu1 }
  0xff   : > { %v979_v54 = vadd.f32 %v1642_v51, %v2279_v44  ;;  %v2283_v56 = vadd.f32 %v1697_v53, %v976_v50  ;;  %v1700_v57 = vadd.f32 %v1699_v55, %v1698_v38 }
 0x101   : > { %v1643_v58 = vpop.f32.mrb[4].mxu0  ;;  %v2285_v59 = vadd.f32 %v1700_v57, %v979_v54 }
 0x102   : > { %v1644_v60 = vpop.f32.mrb[5].mxu0 }
 0x103   : > { %v1645_v61 = vadd.f32 %v1644_v60, %v1643_v58  ;;  %v1646_v62 = vpop.f32.mrb[6].mxu0  ;;  %v1701_v63 = vpop.f32.mrb[4].mxu1 }
 0x104   : > { %v1647_v0 = vpop.f32.mrb[7].mxu0  ;;  %v1702_v3 = vpop.f32.mrb[5].mxu1 }
 0x105   : > { %v984_v1 = vadd.f32 %v1645_v61, %v2279_v44  ;;  %v1648_v2 = vadd.f32 %v1647_v0, %v1646_v62  ;;  %v1703_v4 = vadd.f32 %v1702_v3, %v1701_v63  ;;  %v1704_v5 = vpop.f32.mrb[6].mxu1 }
 0x106   : > { %v1705_v7 = vpop.f32.mrb[7].mxu1 }
 0x107   : > { %v987_v6 = vadd.f32 %v1648_v2, %v2279_v44  ;;  %v2289_v8 = vadd.f32 %v1703_v4, %v984_v1  ;;  %v1706_v9 = vadd.f32 %v1705_v7, %v1704_v5 }
 0x109   : > { %v1649_v10 = vpop.f32.mrb[8].mxu0  ;;  %v2291_v11 = vadd.f32 %v1706_v9, %v987_v6 }
 0x10a   : > { %v1650_v12 = vpop.f32.mrb[9].mxu0 }
 0x10b   : > { %v1651_v13 = vadd.f32 %v1650_v12, %v1649_v10  ;;  %v1652_v14 = vpop.f32.mrb[10].mxu0  ;;  %v1707_v15 = vpop.f32.mrb[8].mxu1 }
 0x10c   : > { %v1653_v16 = vpop.f32.mrb[11].mxu0  ;;  %v1708_v19 = vpop.f32.mrb[9].mxu1 }
 0x10d   : > { %v992_v17 = vadd.f32 %v1651_v13, %v2279_v44  ;;  %v1654_v18 = vadd.f32 %v1653_v16, %v1652_v14  ;;  %v1709_v20 = vadd.f32 %v1708_v19, %v1707_v15  ;;  %v1710_v21 = vpop.f32.mrb[10].mxu1 }
 0x10e   : > { %v1711_v23 = vpop.f32.mrb[11].mxu1 }
 0x10f   : > { %v995_v22 = vadd.f32 %v1654_v18, %v2279_v44  ;;  %v2295_v24 = vadd.f32 %v1709_v20, %v992_v17  ;;  %v1712_v25 = vadd.f32 %v1711_v23, %v1710_v21 }
 0x111   : > { %v1655_v26 = vpop.f32.mrb[12].mxu0  ;;  %v2297_v27 = vadd.f32 %v1712_v25, %v995_v22 }
 0x112   : > { %v1656_v28 = vpop.f32.mrb[13].mxu0 }
 0x113   : > { %v1657_v29 = vadd.f32 %v1656_v28, %v1655_v26  ;;  %v1658_v30 = vpop.f32.mrb[14].mxu0  ;;  %v1713_v31 = vpop.f32.mrb[12].mxu1 }
 0x114   : > { %v1659_v32 = vpop.f32.mrb[15].mxu0  ;;  %v1714_v35 = vpop.f32.mrb[13].mxu1 }
 0x115   : > { %v1000_v33 = vadd.f32 %v1657_v29, %v2279_v44  ;;  %v1660_v34 = vadd.f32 %v1659_v32, %v1658_v30  ;;  %v1715_v36 = vadd.f32 %v1714_v35, %v1713_v31  ;;  %v1716_v37 = vpop.f32.mrb[14].mxu1 }
 0x116   : > { %v1717_v40 = vpop.f32.mrb[15].mxu1 }
 0x117   : > { %v1003_v39 = vadd.f32 %v1660_v34, %v2279_v44  ;;  %v2301_v41 = vadd.f32 %v1715_v36, %v1000_v33  ;;  %v1718_v42 = vadd.f32 %v1717_v40, %v1716_v37 }
 0x119   : > { %v1661_v43 = vpop.f32.mrb[16].mxu0  ;;  %v2303_v45 = vadd.f32 %v1718_v42, %v1003_v39 }
 0x11a   : > { %v1662_v46 = vpop.f32.mrb[17].mxu0 }
 0x11b   : > { %v1663_v47 = vadd.f32 %v1662_v46, %v1661_v43  ;;  %v1664_v48 = vpop.f32.mrb[18].mxu0  ;;  %v1719_v49 = vpop.f32.mrb[16].mxu1 }
 0x11c   : > { %v1665_v50 = vpop.f32.mrb[19].mxu0  ;;  %v1720_v53 = vpop.f32.mrb[17].mxu1 }
 0x11d   : > { %v1008_v51 = vadd.f32 %v1663_v47, %v2279_v44  ;;  %v1666_v52 = vadd.f32 %v1665_v50, %v1664_v48  ;;  %v1721_v38 = vadd.f32 %v1720_v53, %v1719_v49  ;;  %v1722_v54 = vpop.f32.mrb[18].mxu1 }
 0x11e   : > { %v1723_v57 = vpop.f32.mrb[19].mxu1 }
 0x11f   : > { %v1011_v55 = vadd.f32 %v1666_v52, %v2279_v44  ;;  %v2307_v58 = vadd.f32 %v1721_v38, %v1008_v51  ;;  %v1724_v60 = vadd.f32 %v1723_v57, %v1722_v54 }
 0x121   : > { %v1667_v61 = vpop.f32.mrb[20].mxu0  ;;  %v2309_v62 = vadd.f32 %v1724_v60, %v1011_v55 }
 0x122   : > { %v1668_v63 = vpop.f32.mrb[21].mxu0 }
 0x123   : > { %v1669_v0 = vadd.f32 %v1668_v63, %v1667_v61  ;;  %v1670_v1 = vpop.f32.mrb[22].mxu0  ;;  %v1725_v2 = vpop.f32.mrb[20].mxu1 }
 0x124   : > { %v1671_v3 = vpop.f32.mrb[23].mxu0  ;;  %v1726_v6 = vpop.f32.mrb[21].mxu1 }
 0x125   : > { %v1016_v4 = vadd.f32 %v1669_v0, %v2279_v44  ;;  %v1672_v5 = vadd.f32 %v1671_v3, %v1670_v1  ;;  %v1727_v7 = vadd.f32 %v1726_v6, %v1725_v2  ;;  %v1728_v9 = vpop.f32.mrb[22].mxu1 }
 0x126   : > { %v1729_v12 = vpop.f32.mrb[23].mxu1 }
 0x127   : > { %v1019_v10 = vadd.f32 %v1672_v5, %v2279_v44  ;;  %v2313_v13 = vadd.f32 %v1727_v7, %v1016_v4  ;;  %v1730_v14 = vadd.f32 %v1729_v12, %v1728_v9 }
 0x129   : > { %v1673_v15 = vpop.f32.mrb[24].mxu0  ;;  %v2315_v16 = vadd.f32 %v1730_v14, %v1019_v10 }
 0x12a   : > { %v1674_v17 = vpop.f32.mrb[25].mxu0 }
 0x12b   : > { %v1675_v18 = vadd.f32 %v1674_v17, %v1673_v15  ;;  %v1676_v19 = vpop.f32.mrb[26].mxu0  ;;  %v1731_v20 = vpop.f32.mrb[24].mxu1 }
 0x12c   : > { %v1677_v21 = vpop.f32.mrb[27].mxu0  ;;  %v1732_v25 = vpop.f32.mrb[25].mxu1 }
 0x12d   : > { %v1024_v22 = vadd.f32 %v1675_v18, %v2279_v44  ;;  %v1678_v23 = vadd.f32 %v1677_v21, %v1676_v19  ;;  %v1733_v26 = vadd.f32 %v1732_v25, %v1731_v20  ;;  %v1734_v28 = vpop.f32.mrb[26].mxu1 }
 0x12e   : > { %v1735_v30 = vpop.f32.mrb[27].mxu1 }
 0x12f   : > { %v1027_v29 = vadd.f32 %v1678_v23, %v2279_v44  ;;  %v2319_v31 = vadd.f32 %v1733_v26, %v1024_v22  ;;  %v1736_v32 = vadd.f32 %v1735_v30, %v1734_v28 }
 0x131   : > { %v1753_v33 = vpop.f32.mrb[28].mxu0  ;;  %v2321_v34 = vadd.f32 %v1736_v32, %v1027_v29 }
 0x132   : > { %v1754_v35 = vpop.f32.mrb[29].mxu0 }
 0x133   : > { %v1755_v36 = vadd.f32 %v1754_v35, %v1753_v33  ;;  %v1756_v37 = vpop.f32.mrb[30].mxu0  ;;  %v1242_v40 = vpop.f32.mrb[28].mxu1 }
 0x134   : > { %v1757_v39 = vpop.f32.mrb[31].mxu0  ;;  %v1828_v46 = vpop.f32.mrb[29].mxu1 }
 0x135   : > { %v1758_v42 = vadd.f32 %v1757_v39, %v1756_v37  ;;  %v1154_v43 = vadd.f32 %v1755_v36, %v2283_v56  ;;  %v1245_v47 = vpop.f32.mrb[30].mxu1 }
 0x136   : > { %v1829_v49 = vpop.f32.mrb[31].mxu1 }
 0x137   : > { %v1243_v48 = vadd.f32 %v1242_v40, %v1154_v43  ;;  %v1157_v44 = vadd.f32 %v1758_v42, %v2285_v59 }
 0x139   : > { %v1246_v50 = vadd.f32 %v1245_v47, %v1157_v44  ;;  %v1759_v51 = vpop.f32.mrb[32].mxu0  ;;  %v1297_v53 = vmax.f32 %v1243_v48, 0.0 }
 0x13a   : > { %v1760_v52 = vpop.f32.mrb[33].mxu0 }
 0x13b   : > { %v1298_v38 = vmax.f32 %v1246_v50, 0.0  ;;  %v1761_v54 = vadd.f32 %v1760_v52, %v1759_v51  ;;  %v1762_v55 = vpop.f32.mrb[34].mxu0  ;;  %v1250_v57 = vpop.f32.mrb[32].mxu1 }
 0x13c   : > { %v1763_v56 = vpop.f32.mrb[35].mxu0  ;;  %v1832_v63 = vpop.f32.mrb[33].mxu1 }
 0x13d   : > { %v1583_v60 = vpack.c.bf16 %v1298_v38, %v1297_v53  ;;  %v1764_v61 = vadd.f32 %v1763_v56, %v1762_v55  ;;  %v1162_v59 = vadd.f32 %v1761_v54, %v2289_v8  ;;  %v1253_v0 = vpop.f32.mrb[34].mxu1 }
 0x13e   : > { %v1833_v3 = vpop.f32.mrb[35].mxu1 }
 0x13f   : > { %1584 = vst [vmem:[%s2329_s9] sm:$0xff] %v1583_v60   ;;  %v1251_v1 = vadd.f32 %v1250_v57, %v1162_v59  ;;  %v1165_v2 = vadd.f32 %v1764_v61, %v2291_v11 }
 0x141   : > { %v1254_v4 = vadd.f32 %v1253_v0, %v1165_v2  ;;  %v1765_v5 = vpop.f32.mrb[36].mxu0  ;;  %v1299_v7 = vmax.f32 %v1251_v1, 0.0 }
 0x142   : > { %v1766_v6 = vpop.f32.mrb[37].mxu0 }
 0x143   : > { %v1300_v9 = vmax.f32 %v1254_v4, 0.0  ;;  %v1767_v10 = vadd.f32 %v1766_v6, %v1765_v5  ;;  %v1768_v12 = vpop.f32.mrb[38].mxu0  ;;  %v1258_v15 = vpop.f32.mrb[36].mxu1 }
 0x144   : > { %v1769_v14 = vpop.f32.mrb[39].mxu0  ;;  %v1836_v19 = vpop.f32.mrb[37].mxu1 }
 0x145   : > { %v1588_v17 = vpack.c.bf16 %v1300_v9, %v1299_v7  ;;  %v1770_v18 = vadd.f32 %v1769_v14, %v1768_v12  ;;  %v1170_v8 = vadd.f32 %v1767_v10, %v2295_v24  ;;  %v1261_v20 = vpop.f32.mrb[38].mxu1 }
 0x146   : > { %v1837_v22 = vpop.f32.mrb[39].mxu1 }
 0x147   : > { %1615 = vst [vmem:[%s2329_s9 + $0x8] sm:$0xff] %v1588_v17   ;;  %v1259_v21 = vadd.f32 %v1258_v15, %v1170_v8  ;;  %v1173_v11 = vadd.f32 %v1770_v18, %v2297_v27 }
 0x149   : > { %v1262_v23 = vadd.f32 %v1261_v20, %v1173_v11  ;;  %v1771_v25 = vpop.f32.mrb[40].mxu0  ;;  %v1301_v28 = vmax.f32 %v1259_v21, 0.0 }
 0x14a   : > { %v1772_v26 = vpop.f32.mrb[41].mxu0 }
 0x14b   : > { %v1302_v29 = vmax.f32 %v1262_v23, 0.0  ;;  %v1773_v30 = vadd.f32 %v1772_v26, %v1771_v25  ;;  %v1774_v32 = vpop.f32.mrb[42].mxu0  ;;  %v1266_v35 = vpop.f32.mrb[40].mxu1 }
 0x14c   : > { %v1775_v33 = vpop.f32.mrb[43].mxu0  ;;  %v1840_v39 = vpop.f32.mrb[41].mxu1 }
 0x14d   : > { %v1593_v36 = vpack.c.bf16 %v1302_v29, %v1301_v28  ;;  %v1776_v37 = vadd.f32 %v1775_v33, %v1774_v32  ;;  %v1178_v24 = vadd.f32 %v1773_v30, %v2301_v41  ;;  %v1269_v40 = vpop.f32.mrb[42].mxu1 }
 0x14e   : > { %v1841_v43 = vpop.f32.mrb[43].mxu1 }
 0x14f   : > { %1616 = vst [vmem:[%s2329_s9 + $0x10] sm:$0xff] %v1593_v36   ;;  %v1267_v42 = vadd.f32 %v1266_v35, %v1178_v24  ;;  %v1181_v27 = vadd.f32 %v1776_v37, %v2303_v45 }
 0x151   : > { %v1270_v46 = vadd.f32 %v1269_v40, %v1181_v27  ;;  %v1777_v47 = vpop.f32.mrb[44].mxu0  ;;  %v1303_v44 = vmax.f32 %v1267_v42, 0.0 }
 0x152   : > { %v1778_v48 = vpop.f32.mrb[45].mxu0 }
 0x153   : > { %v1304_v49 = vmax.f32 %v1270_v46, 0.0  ;;  %v1779_v50 = vadd.f32 %v1778_v48, %v1777_v47  ;;  %v1780_v51 = vpop.f32.mrb[46].mxu0  ;;  %v1274_v53 = vpop.f32.mrb[44].mxu1 }
 0x154   : > { %v1781_v52 = vpop.f32.mrb[47].mxu0  ;;  %v1844_v55 = vpop.f32.mrb[45].mxu1 }
 0x155   : > { %v1598_v38 = vpack.c.bf16 %v1304_v49, %v1303_v44  ;;  %v1782_v54 = vadd.f32 %v1781_v52, %v1780_v51  ;;  %v1186_v41 = vadd.f32 %v1779_v50, %v2307_v58  ;;  %v1277_v56 = vpop.f32.mrb[46].mxu1 }
 0x156   : > { %v1845_v60 = vpop.f32.mrb[47].mxu1 }
 0x157   : > { %1617 = vst [vmem:[%s2329_s9 + $0x18] sm:$0xff] %v1598_v38   ;;  %v1275_v57 = vadd.f32 %v1274_v53, %v1186_v41  ;;  %v1189_v45 = vadd.f32 %v1782_v54, %v2309_v62 }
 0x159   : > { %v1278_v61 = vadd.f32 %v1277_v56, %v1189_v45  ;;  %v1783_v59 = vpop.f32.mrb[48].mxu0  ;;  %v1305_v0 = vmax.f32 %v1275_v57, 0.0 }
 0x15a   : > { %v1784_v63 = vpop.f32.mrb[49].mxu0 }
 0x15b   : > { %v1306_v1 = vmax.f32 %v1278_v61, 0.0  ;;  %v1785_v2 = vadd.f32 %v1784_v63, %v1783_v59  ;;  %v1786_v3 = vpop.f32.mrb[50].mxu0  ;;  %v1282_v5 = vpop.f32.mrb[48].mxu1 }
 0x15c   : > { %v1787_v4 = vpop.f32.mrb[51].mxu0  ;;  %v1848_v9 = vpop.f32.mrb[49].mxu1 }
 0x15d   : > { %v1603_v6 = vpack.c.bf16 %v1306_v1, %v1305_v0  ;;  %v1788_v7 = vadd.f32 %v1787_v4, %v1786_v3  ;;  %v1194_v58 = vadd.f32 %v1785_v2, %v2313_v13  ;;  %v1285_v10 = vpop.f32.mrb[50].mxu1 }
 0x15e   : > { %v1849_v14 = vpop.f32.mrb[51].mxu1 }
 0x15f   : > { %1618 = vst [vmem:[%s2329_s9 + $0x20] sm:$0xff] %v1603_v6   ;;  %v1283_v12 = vadd.f32 %v1282_v5, %v1194_v58  ;;  %v1197_v62 = vadd.f32 %v1788_v7, %v2315_v16 }
 0x161   : > { %v1286_v15 = vadd.f32 %v1285_v10, %v1197_v62  ;;  %v1789_v17 = vpop.f32.mrb[52].mxu0  ;;  %v1307_v8 = vmax.f32 %v1283_v12, 0.0 }
 0x162   : > { %v1790_v18 = vpop.f32.mrb[53].mxu0 }
 0x163   : > { %v1308_v19 = vmax.f32 %v1286_v15, 0.0  ;;  %v1791_v20 = vadd.f32 %v1790_v18, %v1789_v17  ;;  %v1792_v21 = vpop.f32.mrb[54].mxu0  ;;  %v1290_v22 = vpop.f32.mrb[52].mxu1 }
 0x164   : > { %v1793_v11 = vpop.f32.mrb[55].mxu0  ;;  %v1852_v26 = vpop.f32.mrb[53].mxu1 }
 0x165   : > { %v1608_v23 = vpack.c.bf16 %v1308_v19, %v1307_v8  ;;  %v1794_v13 = vadd.f32 %v1793_v11, %v1792_v21  ;;  %v1202_v25 = vadd.f32 %v1791_v20, %v2319_v31  ;;  %v1293_v28 = vpop.f32.mrb[54].mxu1 }
 0x166   : > { %v1853_v30 = vpop.f32.mrb[55].mxu1 }
 0x167   : > { %1619 = vst [vmem:[%s2329_s9 + $0x28] sm:$0xff] %v1608_v23   ;;  %v1291_v16 = vadd.f32 %v1290_v22, %v1202_v25  ;;  %v1205_v29 = vadd.f32 %v1794_v13, %v2321_v34 }
 0x169   : > { %v1294_v32 = vadd.f32 %v1293_v28, %v1205_v29  ;;  %v1309_v33 = vmax.f32 %v1291_v16, 0.0 }
 0x16b   : > { %v1310_v35 = vmax.f32 %v1294_v32, 0.0 }
 0x16d   : > { %v1613_v36 = vpack.c.bf16 %v1310_v35, %v1309_v33 }
 0x16f   : > { %1620 = vst [vmem:[%s2329_s9 + $0x30] sm:$0xff] %v1613_v36  }
 0x170 PF: > { %s13_s12 = sadd.s32 1, %s1997_s12  }
 0x171   : > { %p10_p4 = scmp.ge.s32.totalorder %s13_s12, 4  }
 0x173   :  { %12 = sbr.rel (!%p10_p4) target bundleno = 1 (0x1), region = 62 }

// kernel: voxel_backbone_8x.18
= control target key start
LH: loop header
LB: loop body
LE: loop exit
PB: predicated region body
PF: predicated region fallthrough
CT: control target
= control target key end

     0   :  { %s3439_s12 = smov 0   ;;  %s4032_s0 = inlined_call_operand.vmem [shape: bf16[224,1792], index: 0, kind: input, shape index: {}]   ;;  %s4033_s1 = inlined_call_operand.vmem [shape: bf16[1792,128], index: 1, kind: input, shape index: {}]   ;;  %s4034_s2 = inlined_call_operand.vmem [shape: f32[1,128], index: 2, kind: input, shape index: {}]   ;;  %s4035_s3 = inlined_call_operand.vmem [shape: bf16[224,128], index: 3, kind: output, shape index: {}]  }
   0x1 LB: > { %s2432_s13 = sadd.s32 4294967295, %s3417_s12   ;;  %p2436_p0 = scmp.ge.s32.totalorder %s3417_s12, 1  ;;  %s3417_s12 = sphi %s3439_s12, %s13_s12  }
   0x2   : > { %p139_p1 = scmp.lt.s32.totalorder %s3417_s12, 3 }
   0x4   : > { %p140_p2 = pnand %p2436_p0, %p139_p1 }
   0x5   : > { %v3152_v0 = vld [vmem:[%s4033_s1 + $0x40] sm:$0xff] (!%p140_p2)   ;;  %s164_s16 = smul.u32 (!%p140_p2), 14, %s2432_s13  ;;  %v3154_v2 = vld [vmem:[%s4033_s1 + $0x48] sm:$0xff] (!%p140_p2)   ;;  %v3156_v4 = vld [vmem:[%s4033_s1 + $0x50] sm:$0xff] (!%p140_p2)  }
   0x6   : > { %143 = sbr.rel (%p140_p2) target bundleno = 456 (0x1c8), region = 32  ;;  %v3153_v1 = vld [vmem:[%s4033_s1] sm:$0xff] (!%p140_p2)   ;;  %2721 = vmatprep.subr.bf16.mxu0 (!%p140_p2), %v3152_v0  ;;  %3127 = vmatprep.subr.bf16.mxu1 (!%p140_p2), %v3152_v0  ;;  %v3155_v3 = vld [vmem:[%s4033_s1 + $0x8] sm:$0xff] (!%p140_p2)   ;;  %v3157_v5 = vld [vmem:[%s4033_s1 + $0x10] sm:$0xff] (!%p140_p2)  }
   0x7   : > { %p165_p3 = scmp.lt.s32.totalorder (!%p140_p2), %s164_s16, 27  ;;  %2722 = vmatpush3.bf16.msra.mxu0 (!%p140_p2), %v3153_v1  ;;  %3135 = vmatpush3.bf16.msra.mxu1 (!%p140_p2), %v3153_v1  ;;  %v3158_v6 = vld [vmem:[%s4033_s1 + $0x58] sm:$0xff] (!%p140_p2)   ;;  %v3160_v8 = vld [vmem:[%s4033_s1 + $0x60] sm:$0xff] (!%p140_p2)   ;;  %v3162_v10 = vld [vmem:[%s4033_s1 + $0x68] sm:$0xff] (!%p140_p2)  }
   0x8   : > { %2723 = vmatprep.subr.bf16.mxu0 (!%p140_p2), %v3154_v2  ;;  %3128 = vmatprep.subr.bf16.mxu1 (!%p140_p2), %v3154_v2  ;;  %v3159_v7 = vld [vmem:[%s4033_s1 + $0x18] sm:$0xff] (!%p140_p2)   ;;  %v3161_v9 = vld [vmem:[%s4033_s1 + $0x20] sm:$0xff] (!%p140_p2)   ;;  %v3163_v13 = vld [vmem:[%s4033_s1 + $0x28] sm:$0xff] (!%p140_p2)  }
   0x9   : > { %v3164_v14 = vld [vmem:[%s4033_s1 + $0x70] sm:$0xff] (!%p140_p2)   ;;  %v3166_v16 = vld [vmem:[%s4033_s1 + $0x78] sm:$0xff] (!%p140_p2)   ;;  %v3174_v18 = vld [vmem:[%s4033_s1 + $0xc0] sm:$0xff] (!%p140_p2)  }
   0xa   : > { %v3165_v15 = vld [vmem:[%s4033_s1 + $0x30] sm:$0xff] (!%p140_p2)   ;;  %v3167_v17 = vld [vmem:[%s4033_s1 + $0x38] sm:$0xff] (!%p140_p2)   ;;  %v3175_v21 = vld [vmem:[%s4033_s1 + $0x140] sm:$0xff] (!%p140_p2)  }
   0xb   : > { %2724 = vmatpush3.bf16.msra.mxu0 (!%p140_p2), %v3155_v3  ;;  %3136 = vmatpush3.bf16.msra.mxu1 (!%p140_p2), %v3155_v3  ;;  %v3176_v22 = vld [vmem:[%s4033_s1 + $0x80] sm:$0xff] (!%p140_p2)   ;;  %v3178_v24 = vld [vmem:[%s4033_s1 + $0xc8] sm:$0xff] (!%p140_p2)   ;;  %v3185_v30 = vld [vmem:[%s4033_s1 + $0xd0] sm:$0xff] (!%p140_p2)  }
   0xc   : > { %2725 = vmatprep.subr.bf16.mxu0 (!%p140_p2), %v3156_v4  ;;  %3129 = vmatprep.subr.bf16.mxu1 (!%p140_p2), %v3156_v4  ;;  %v3177_v23 = vld [vmem:[%s4033_s1 + $0x100] sm:$0xff] (!%p140_p2)   ;;  %v3179_v25 = vld [vmem:[%s4033_s1 + $0x148] sm:$0xff] (!%p140_p2)   ;;  %v3186_v32 = vld [vmem:[%s4033_s1 + $0x150] sm:$0xff] (!%p140_p2)  }
   0xd   : > { %s4037_s16 = smov (!%p165_p3, %s164_s16), 27  ;;  %v3180_v26 = vld [vmem:[%s4033_s1 + $0x88] sm:$0xff]   ;;  %v3187_v33 = vld [vmem:[%s4033_s1 + $0x90] sm:$0xff]   ;;  %v3189_v36 = vld [vmem:[%s4033_s1 + $0xd8] sm:$0xff]  }
   0xe   : > { %s3143_s29 = smul.u32 56, %s4037_s16  ;;  %v3181_v27 = vld [vmem:[%s4033_s1 + $0x108] sm:$0xff]   ;;  %v3188_v34 = vld [vmem:[%s4033_s1 + $0x110] sm:$0xff]   ;;  %v3190_v37 = vld [vmem:[%s4033_s1 + $0x158] sm:$0xff]   ;;  %s2438_s27 = sshll.u32 %s4037_s16, 2 }
   0xf   : > { %2726 = vmatpush3.bf16.msra.mxu0 %v3157_v5  ;;  %3137 = vmatpush3.bf16.msra.mxu1 %v3157_v5  ;;  %v3193_v38 = vld [vmem:[%s4033_s1 + $0x98] sm:$0xff]   ;;  %v3199_v41 = vld [vmem:[%s4033_s1 + $0xe0] sm:$0xff]   ;;  %v3203_v47 = vld [vmem:[%s4033_s1 + $0xe8] sm:$0xff]   ;;  %s4008_s30 = scalar_lea.vmem %s4035_s3, %s2438_s27 }
  0x10   : > { %2727 = vmatprep.subr.bf16.mxu0 %v3158_v6  ;;  %3130 = vmatprep.subr.bf16.mxu1 %v3158_v6  ;;  %s3480_s9 = scalar_lea.vmem %s4032_s0, %s3143_s29  ;;  %v3194_v40 = vld [vmem:[%s4033_s1 + $0x118] sm:$0xff]   ;;  %v3200_v43 = vld [vmem:[%s4033_s1 + $0x160] sm:$0xff]   ;;  %v3204_v49 = vld [vmem:[%s4033_s1 + $0x168] sm:$0xff]  }
  0x11   : > { %v3170_v11 = vld [vmem:[%s3480_s9 + $0x4] ss:$56 sps:$4 sm:$0xff]   ;;  %v3168_v19 = vld [vmem:[%s3480_s9] ss:$56 sps:$4 sm:$0xff]   ;;  %v3182_v28 = vld [vmem:[%s3480_s9 + $0x74] ss:$56 sps:$4 sm:$0xff]  }
  0x12   : > { %v3173_v12 = vld [vmem:[%s3480_s9 + $0x1c4] ss:$56 sps:$4 sm:$0xff]   ;;  %1701 = vmatprep.mubr.bf16.mxu0 %v3170_v11  ;;  %v3171_v20 = vld [vmem:[%s3480_s9 + $0x1c0] ss:$56 sps:$4 sm:$0xff]   ;;  %v3191_v29 = vld [vmem:[%s3480_s9 + $0x234] ss:$56 sps:$4 sm:$0xff]  }
  0x13   : > { %2728 = vmatpush3.bf16.msra.mxu0 %v3159_v7  ;;  %3138 = vmatpush3.bf16.msra.mxu1 %v3159_v7  ;;  %v3184_v31 = vld [vmem:[%s3480_s9 + $0x70] ss:$56 sps:$4 sm:$0xff]   ;;  %v3196_v39 = vld [vmem:[%s3480_s9 + $0xe4] ss:$56 sps:$4 sm:$0xff]   ;;  %v3198_v42 = vld [vmem:[%s3480_s9 + $0xe0] ss:$56 sps:$4 sm:$0xff]  }
  0x14   : > { %2729 = vmatprep.subr.bf16.mxu0 %v3160_v8  ;;  %3131 = vmatprep.subr.bf16.mxu1 %v3160_v8  ;;  %v3195_v35 = vld [vmem:[%s3480_s9 + $0x230] ss:$56 sps:$4 sm:$0xff]   ;;  %v3201_v44 = vld [vmem:[%s4033_s1 + $0xa0] sm:$0xff]   ;;  %v3210_v51 = vld [vmem:[%s3480_s9 + $0x154] ss:$56 sps:$4 sm:$0xff]  }
  0x15   : > { %1733 = vmatprep.mubr.bf16.mxu1 %v3173_v12  ;;  %v3205_v45 = vld [vmem:[%s3480_s9 + $0x2a4] ss:$56 sps:$4 sm:$0xff]   ;;  %v3209_v48 = vld [vmem:[%s3480_s9 + $0x2a0] ss:$56 sps:$4 sm:$0xff]   ;;  %v3207_v50 = vld [vmem:[%s4033_s1 + $0xa8] sm:$0xff]  }
  0x16   : > { %v3202_v46 = vld [vmem:[%s4033_s1 + $0x120] sm:$0xff]   ;;  %v3208_v52 = vld [vmem:[%s4033_s1 + $0x128] sm:$0xff]   ;;  %v3213_v53 = vld [vmem:[%s4033_s1 + $0xf0] sm:$0xff]  }
  0x17   : > { %2730 = vmatpush3.bf16.msra.mxu0 %v3161_v9  ;;  %3139 = vmatpush3.bf16.msra.mxu1 %v3161_v9  ;;  %v3212_v54 = vld [vmem:[%s3480_s9 + $0x150] ss:$56 sps:$4 sm:$0xff]   ;;  %v3217_v58 = vld [vmem:[%s4033_s1 + $0xf8] sm:$0xff]   ;;  %v3223_v61 = vld [vmem:[%s3480_s9 + $0xc] ss:$56 sps:$4 sm:$0xff]  }
  0x18   : > { %2731 = vmatprep.subr.bf16.mxu0 %v3162_v10  ;;  %3132 = vmatprep.subr.bf16.mxu1 %v3162_v10  ;;  %v3214_v55 = vld [vmem:[%s4033_s1 + $0x170] sm:$0xff]   ;;  %v3218_v59 = vld [vmem:[%s4033_s1 + $0x178] sm:$0xff]   ;;  %v3221_v0 = vld [vmem:[%s3480_s9 + $0x8] ss:$56 sps:$4 sm:$0xff]  }
  0x19   : > { %v3215_v56 = vld [vmem:[%s4033_s1 + $0xb0] sm:$0xff]   ;;  %v3219_v60 = vld [vmem:[%s4033_s1 + $0xb8] sm:$0xff]   ;;  %v3227_v2 = vld [vmem:[%s4033_s1 + $0x1c0] sm:$0xff]  }
  0x1a   : > { %v3216_v57 = vld [vmem:[%s4033_s1 + $0x130] sm:$0xff]   ;;  %v3220_v62 = vld [vmem:[%s4033_s1 + $0x138] sm:$0xff]   ;;  %v3228_v3 = vld [vmem:[%s4033_s1 + $0x180] sm:$0xff]  }
  0x1b   : > { %2732 = vmatpush3.bf16.msra.mxu0 %v3163_v13  ;;  %3140 = vmatpush3.bf16.msra.mxu1 %v3163_v13  ;;  %v3226_v63 = vld [vmem:[%s3480_s9 + $0x14] ss:$56 sps:$4 sm:$0xff]   ;;  %v3224_v1 = vld [vmem:[%s3480_s9 + $0x10] ss:$56 sps:$4 sm:$0xff]   ;;  %v3229_v4 = vld [vmem:[%s4033_s1 + $0x240] sm:$0xff]  }
  0x1c   : > { %2733 = vmatprep.subr.bf16.mxu0 %v3164_v14  ;;  %3133 = vmatprep.subr.bf16.mxu1 %v3164_v14  ;;  %v3230_v5 = vld [vmem:[%s4033_s1 + $0x200] sm:$0xff]   ;;  %v3231_v6 = vld [vmem:[%s3480_s9 + $0x7c] ss:$56 sps:$4 sm:$0xff]   ;;  %v3235_v8 = vld [vmem:[%s4033_s1 + $0x1c8] sm:$0xff]  }
  0x1d   : > { %v3233_v7 = vld [vmem:[%s3480_s9 + $0x84] ss:$56 sps:$4 sm:$0xff]   ;;  %v3236_v9 = vld [vmem:[%s3480_s9 + $0x78] ss:$56 sps:$4 sm:$0xff]   ;;  %v3238_v11 = vld [vmem:[%s4033_s1 + $0x188] sm:$0xff]  }
  0x1e   : > { %v3237_v10 = vld [vmem:[%s3480_s9 + $0x80] ss:$56 sps:$4 sm:$0xff]   ;;  %v3239_v12 = vld [vmem:[%s4033_s1 + $0x248] sm:$0xff]   ;;  %v3241_v14 = vld [vmem:[%s4033_s1 + $0x1d0] sm:$0xff]  }
  0x1f   : > { %2734 = vmatpush3.bf16.msra.mxu0 %v3165_v15  ;;  %3141 = vmatpush3.bf16.msra.mxu1 %v3165_v15  ;;  %v3240_v13 = vld [vmem:[%s4033_s1 + $0x208] sm:$0xff]  }
  0x20   : > { %2735 = vmatprep.subr.bf16.mxu0 %v3166_v16  ;;  %3134 = vmatprep.subr.bf16.mxu1 %v3166_v16  ;;  %v3242_v15 = vld [vmem:[%s3480_s9 + $0xec] ss:$56 sps:$4 sm:$0xff]  }
  0x21   : > { %v3244_v16 = vld [vmem:[%s3480_s9 + $0xf4] ss:$56 sps:$4 sm:$0xff]  }
  0x23   : > { %2736 = vmatpush3.bf16.msra.mxu0 %v3167_v17  ;;  %3142 = vmatpush3.bf16.msra.mxu1 %v3167_v17  ;;  %v3246_v17 = vld [vmem:[%s4033_s1 + $0x190] sm:$0xff]  }
  0x24   : > { %2779 = vmatprep.subr.bf16.mxu1 %v3174_v18  ;;  %2837 = vmatprep.subr.bf16.mxu0 %v3175_v21  ;;  %v3247_v18 = vld [vmem:[%s3480_s9 + $0xe8] ss:$56 sps:$4 sm:$0xff]   ;;  %v3250_v21 = vld [vmem:[%s4033_s1 + $0x210] sm:$0xff]  }
  0x26   : > { %1702 = vmatmul.mubr.bf16.vlgmr.msra.gmra.mrb[0].mxu0 %v3168_v19  ;;  %1734 = vmatmul.mubr.bf16.vlgmr.msra.gmra.mrb[0].mxu1 %v3171_v20  ;;  %v3248_v19 = vld [vmem:[%s3480_s9 + $0xf0] ss:$56 sps:$4 sm:$0xff]  }
  0x27   : > { %2780 = vmatpush3.bf16.msra.mxu1 %v3176_v22  ;;  %2838 = vmatpush3.bf16.msra.mxu0 %v3177_v23  ;;  %v3249_v20 = vld [vmem:[%s4033_s1 + $0x250] sm:$0xff]   ;;  %v3251_v22 = vld [vmem:[%s4033_s1 + $0x1d8] sm:$0xff]  }
  0x28   : > { %2781 = vmatprep.subr.bf16.mxu1 %v3178_v24  ;;  %2839 = vmatprep.subr.bf16.mxu0 %v3179_v25  ;;  %v3252_v23 = vld [vmem:[%s4033_s1 + $0x198] sm:$0xff]  }
  0x29   : > { %1709 = vmatprep.mubr.bf16.mxu0 %v3182_v28  ;;  %1741 = vmatprep.mubr.bf16.mxu1 %v3191_v29  ;;  %v3253_v24 = vld [vmem:[%s3480_s9 + $0x15c] ss:$56 sps:$4 sm:$0xff]   ;;  %v3258_v28 = vld [vmem:[%s3480_s9 + $0x158] ss:$56 sps:$4 sm:$0xff]  }
  0x2a   : > { %v3255_v25 = vld [vmem:[%s3480_s9 + $0x164] ss:$56 sps:$4 sm:$0xff]   ;;  %v3259_v29 = vld [vmem:[%s3480_s9 + $0x160] ss:$56 sps:$4 sm:$0xff]  }
  0x2b   : > { %2782 = vmatpush3.bf16.msra.mxu1 %v3180_v26  ;;  %2840 = vmatpush3.bf16.msra.mxu0 %v3181_v27  ;;  %v3257_v26 = vld [vmem:[%s4033_s1 + $0x258] sm:$0xff]  }
  0x2c   : > { %2783 = vmatprep.subr.bf16.mxu1 %v3185_v30  ;;  %2841 = vmatprep.subr.bf16.mxu0 %v3186_v32  ;;  %v3260_v27 = vld [vmem:[%s4033_s1 + $0x218] sm:$0xff]   ;;  %v3261_v30 = vld [vmem:[%s4033_s1 + $0x1e0] sm:$0xff]  }
  0x2d   : > { %v3263_v32 = vld [vmem:[%s4033_s1 + $0x260] sm:$0xff]  }
  0x2e   : > { %1710 = vmatmul.mubr.bf16.gmra.mrb[4].mxu0 %v3184_v31  ;;  %1742 = vmatmul.mubr.bf16.gmra.mrb[4].mxu1 %v3195_v35  ;;  %v3262_v31 = vld [vmem:[%s4033_s1 + $0x1a0] sm:$0xff]  }
  0x2f   : > { %2784 = vmatpush3.bf16.msra.mxu1 %v3187_v33  ;;  %2842 = vmatpush3.bf16.msra.mxu0 %v3188_v34  ;;  %v3264_v33 = vld [vmem:[%s3480_s9 + $0x1cc] ss:$56 sps:$4 sm:$0xff]  }
  0x30   : > { %2785 = vmatprep.subr.bf16.mxu1 %v3189_v36  ;;  %2843 = vmatprep.subr.bf16.mxu0 %v3190_v37  ;;  %v3266_v34 = vld [vmem:[%s3480_s9 + $0x1d4] ss:$56 sps:$4 sm:$0xff]   ;;  %v3268_v35 = vld [vmem:[%s4033_s1 + $0x220] sm:$0xff]  }
  0x31   : > { %1717 = vmatprep.mubr.bf16.mxu0 %v3196_v39  ;;  %1749 = vmatprep.mubr.bf16.mxu1 %v3205_v45  ;;  %v3271_v36 = vld [vmem:[%s4033_s1 + $0x1e8] sm:$0xff]   ;;  %v3282_v45 = vld [vmem:[%s4033_s1 + $0x1b0] sm:$0xff]  }
  0x32   : > { %v3269_v37 = vld [vmem:[%s3480_s9 + $0x1c8] ss:$56 sps:$4 sm:$0xff]  }
  0x33   : > { %2786 = vmatpush3.bf16.msra.mxu1 %v3193_v38  ;;  %2844 = vmatpush3.bf16.msra.mxu0 %v3194_v40  ;;  %v3270_v38 = vld [vmem:[%s3480_s9 + $0x1d0] ss:$56 sps:$4 sm:$0xff]  }
  0x34   : > { %2787 = vmatprep.subr.bf16.mxu1 %v3199_v41  ;;  %2845 = vmatprep.subr.bf16.mxu0 %v3200_v43  ;;  %v3272_v39 = vld [vmem:[%s4033_s1 + $0x1a8] sm:$0xff]   ;;  %v3277_v43 = vld [vmem:[%s3480_s9 + $0x244] ss:$56 sps:$4 sm:$0xff]  }
  0x35   : > { %v3273_v40 = vld [vmem:[%s4033_s1 + $0x268] sm:$0xff]  }
  0x36   : > { %1718 = vmatmul.mubr.bf16.gmra.mrb[8].mxu0 %v3198_v42  ;;  %1750 = vmatmul.mubr.bf16.gmra.mrb[8].mxu1 %v3209_v48  ;;  %v3274_v41 = vld [vmem:[%s4033_s1 + $0x228] sm:$0xff]   ;;  %v3275_v42 = vld [vmem:[%s3480_s9 + $0x23c] ss:$56 sps:$4 sm:$0xff]  }
  0x37   : > { %2788 = vmatpush3.bf16.msra.mxu1 %v3201_v44  ;;  %2846 = vmatpush3.bf16.msra.mxu0 %v3202_v46  ;;  %v3281_v44 = vld [vmem:[%s4033_s1 + $0x1f0] sm:$0xff]  }
  0x38   : > { %2789 = vmatprep.subr.bf16.mxu1 %v3203_v47  ;;  %2847 = vmatprep.subr.bf16.mxu0 %v3204_v49  ;;  %v3279_v46 = vld [vmem:[%s3480_s9 + $0x238] ss:$56 sps:$4 sm:$0xff]  }
  0x39   : > { %1725 = vmatprep.mubr.bf16.mxu0 %v3210_v51  ;;  %1790 = vmatprep.mubr.bf16.mxu1 %v3223_v61  ;;  %v3283_v47 = vld [vmem:[%s4033_s1 + $0x270] sm:$0xff]   ;;  %v3280_v49 = vld [vmem:[%s3480_s9 + $0x240] ss:$56 sps:$4 sm:$0xff]  }
  0x3a   : > { %v3284_v48 = vld [vmem:[%s4033_s1 + $0x230] sm:$0xff]   ;;  %v3303_v61 = vld [vmem:[%s4033_s1 + $0x340] sm:$0xff]  }
  0x3b   : > { %2790 = vmatpush3.bf16.msra.mxu1 %v3207_v50  ;;  %2848 = vmatpush3.bf16.msra.mxu0 %v3208_v52  ;;  %v3285_v50 = vld [vmem:[%s3480_s9 + $0x2ac] ss:$56 sps:$4 sm:$0xff]   ;;  %v3291_v52 = vld [vmem:[%s4033_s1 + $0x1f8] sm:$0xff]  }
  0x3c   : > { %2791 = vmatprep.subr.bf16.mxu1 %v3213_v53  ;;  %2849 = vmatprep.subr.bf16.mxu0 %v3214_v55  ;;  %v3287_v51 = vld [vmem:[%s3480_s9 + $0x2b4] ss:$56 sps:$4 sm:$0xff]   ;;  %v3292_v53 = vld [vmem:[%s4033_s1 + $0x1b8] sm:$0xff]  }
  0x3d   : > { %v3294_v55 = vld [vmem:[%s4033_s1 + $0x238] sm:$0xff]  }
  0x3e   : > { %1726 = vmatmul.mubr.bf16.gmra.mrb[12].mxu0 %v3212_v54  ;;  %v3293_v54 = vld [vmem:[%s4033_s1 + $0x278] sm:$0xff]  }
  0x3f   : > { %2792 = vmatpush3.bf16.msra.mxu1 %v3215_v56  ;;  %2850 = vmatpush3.bf16.msra.mxu0 %v3216_v57  ;;  %v3289_v56 = vld [vmem:[%s3480_s9 + $0x2a8] ss:$56 sps:$4 sm:$0xff]  }
  0x40   : > { %2793 = vmatprep.subr.bf16.mxu1 %v3217_v58  ;;  %2851 = vmatprep.subr.bf16.mxu0 %v3218_v59  ;;  %v3290_v57 = vld [vmem:[%s3480_s9 + $0x2b0] ss:$56 sps:$4 sm:$0xff]   ;;  %v3297_v58 = vld [vmem:[%s3480_s9 + $0x1c] ss:$56 sps:$4 sm:$0xff]  }
  0x41   : > { %1879 = vmatprep.mubr.bf16.mxu0 %v3226_v63  ;;  %v3300_v59 = vld [vmem:[%s3480_s9 + $0x24] ss:$56 sps:$4 sm:$0xff]   ;;  %v3298_v63 = vld [vmem:[%s3480_s9 + $0x20] ss:$56 sps:$4 sm:$0xff]  }
  0x43   : > { %2794 = vmatpush3.bf16.msra.mxu1 %v3219_v60  ;;  %2852 = vmatpush3.bf16.msra.mxu0 %v3220_v62  ;;  %v3301_v60 = vld [vmem:[%s4033_s1 + $0x2c0] sm:$0xff]   ;;  %v3295_v62 = vld [vmem:[%s3480_s9 + $0x18] ss:$56 sps:$4 sm:$0xff]  }
  0x44   : > { %2895 = vmatprep.subr.bf16.mxu1 %v3227_v2  ;;  %2953 = vmatprep.subr.bf16.mxu0 %v3229_v4  ;;  %v3305_v2 = vld [vmem:[%s3480_s9 + $0x8c] ss:$56 sps:$4 sm:$0xff]  }
  0x45   : > { %v3309_v4 = vld [vmem:[%s4033_s1 + $0x2c8] sm:$0xff]  }
  0x46   : > { %1791 = vmatmul.mubr.bf16.vlgmr.msra.gmra.mrb[12].mxu1 %v3221_v0  ;;  %1880 = vmatmul.mubr.bf16.vlgmr.msra.gmra.mrb[16].mxu0 %v3224_v1  ;;  %v3302_v0 = vld [vmem:[%s4033_s1 + $0x280] sm:$0xff]  }
  0x47   : > { %2896 = vmatpush3.bf16.msra.mxu1 %v3228_v3  ;;  %2954 = vmatpush3.bf16.msra.mxu0 %v3230_v5  ;;  %v3304_v1 = vld [vmem:[%s4033_s1 + $0x300] sm:$0xff]   ;;  %v3307_v3 = vld [vmem:[%s3480_s9 + $0x94] ss:$56 sps:$4 sm:$0xff]  }
  0x48   : > { %1798 = vmatprep.mubr.bf16.mxu1 %v3231_v6  ;;  %1887 = vmatprep.mubr.bf16.mxu0 %v3233_v7  ;;  %v3313_v5 = vld [vmem:[%s4033_s1 + $0x348] sm:$0xff]  }
  0x49   : > { %2897 = vmatprep.subr.bf16.mxu1 %v3235_v8  ;;  %2955 = vmatprep.subr.bf16.mxu0 %v3239_v12  ;;  %v3312_v6 = vld [vmem:[%s4033_s1 + $0x288] sm:$0xff]   ;;  %v3318_v12 = vld [vmem:[%s3480_s9 + $0x104] ss:$56 sps:$4 sm:$0xff]  }
  0x4a   : > { %v3314_v7 = vld [vmem:[%s4033_s1 + $0x308] sm:$0xff]  }
  0x4b   : > { %2898 = vmatpush3.bf16.msra.mxu1 %v3238_v11  ;;  %2956 = vmatpush3.bf16.msra.mxu0 %v3240_v13  ;;  %v3310_v8 = vld [vmem:[%s3480_s9 + $0x88] ss:$56 sps:$4 sm:$0xff]   ;;  %v3316_v11 = vld [vmem:[%s3480_s9 + $0xfc] ss:$56 sps:$4 sm:$0xff]  }
  0x4c   : > { %2899 = vmatprep.subr.bf16.mxu1 %v3241_v14  ;;  %2957 = vmatprep.subr.bf16.mxu0 %v3249_v20  ;;  %v3323_v13 = vld [vmem:[%s4033_s1 + $0x350] sm:$0xff]   ;;  %v3331_v20 = vld [vmem:[%s4033_s1 + $0x358] sm:$0xff]  }
  0x4d   : > { %v3320_v14 = vld [vmem:[%s4033_s1 + $0x290] sm:$0xff]  }
  0x4e   : > { %1799 = vmatmul.mubr.bf16.gmra.mrb[16].mxu1 %v3236_v9  ;;  %1888 = vmatmul.mubr.bf16.gmra.mrb[20].mxu0 %v3237_v10  ;;  %v3315_v9 = vld [vmem:[%s4033_s1 + $0x2d0] sm:$0xff]  }
  0x4f   : > { %1806 = vmatprep.mubr.bf16.mxu1 %v3242_v15  ;;  %1895 = vmatprep.mubr.bf16.mxu0 %v3244_v16  ;;  %v3311_v10 = vld [vmem:[%s3480_s9 + $0x90] ss:$56 sps:$4 sm:$0xff]   ;;  %v3325_v16 = vld [vmem:[%s4033_s1 + $0x2d8] sm:$0xff]  }
  0x50   : > { %2900 = vmatpush3.bf16.msra.mxu1 %v3246_v17  ;;  %2958 = vmatpush3.bf16.msra.mxu0 %v3250_v21  ;;  %v3324_v15 = vld [vmem:[%s4033_s1 + $0x310] sm:$0xff]   ;;  %v3326_v17 = vld [vmem:[%s4033_s1 + $0x298] sm:$0xff]   ;;  %v3327_v21 = vld [vmem:[%s3480_s9 + $0x16c] ss:$56 sps:$4 sm:$0xff]  }
  0x51   : > { %2901 = vmatprep.subr.bf16.mxu1 %v3251_v22  ;;  %2959 = vmatprep.subr.bf16.mxu0 %v3257_v26  ;;  %v3329_v22 = vld [vmem:[%s3480_s9 + $0x174] ss:$56 sps:$4 sm:$0xff]   ;;  %v3337_v26 = vld [vmem:[%s4033_s1 + $0x360] sm:$0xff]  }
  0x54   : > { %2902 = vmatpush3.bf16.msra.mxu1 %v3252_v23  ;;  %2960 = vmatpush3.bf16.msra.mxu0 %v3260_v27  ;;  %v3334_v23 = vld [vmem:[%s4033_s1 + $0x318] sm:$0xff]   ;;  %v3332_v27 = vld [vmem:[%s3480_s9 + $0x168] ss:$56 sps:$4 sm:$0xff]  }
  0x55   : > { %2903 = vmatprep.subr.bf16.mxu1 %v3261_v30  ;;  %2961 = vmatprep.subr.bf16.mxu0 %v3263_v32  ;;  %v3338_v30 = vld [vmem:[%s3480_s9 + $0x1dc] ss:$56 sps:$4 sm:$0xff]   ;;  %v3345_v32 = vld [vmem:[%s4033_s1 + $0x2e8] sm:$0xff]  }
  0x56   : > { %1807 = vmatmul.mubr.bf16.gmra.mrb[20].mxu1 %v3247_v18  ;;  %1896 = vmatmul.mubr.bf16.gmra.mrb[24].mxu0 %v3248_v19  ;;  %v3321_v18 = vld [vmem:[%s3480_s9 + $0xf8] ss:$56 sps:$4 sm:$0xff]  }
  0x57   : > { %1814 = vmatprep.mubr.bf16.mxu1 %v3253_v24  ;;  %1903 = vmatprep.mubr.bf16.mxu0 %v3255_v25  ;;  %v3322_v19 = vld [vmem:[%s3480_s9 + $0x100] ss:$56 sps:$4 sm:$0xff]  }
  0x58   : > { %2904 = vmatpush3.bf16.msra.mxu1 %v3262_v31  ;;  %2962 = vmatpush3.bf16.msra.mxu0 %v3268_v35  ;;  %v3335_v24 = vld [vmem:[%s4033_s1 + $0x2e0] sm:$0xff]   ;;  %v3348_v35 = vld [vmem:[%s4033_s1 + $0x328] sm:$0xff]  }
  0x59   : > { %2905 = vmatprep.subr.bf16.mxu1 %v3271_v36  ;;  %2963 = vmatprep.subr.bf16.mxu0 %v3273_v40  ;;  %v3336_v25 = vld [vmem:[%s4033_s1 + $0x2a0] sm:$0xff]   ;;  %v3343_v36 = vld [vmem:[%s3480_s9 + $0x1d8] ss:$56 sps:$4 sm:$0xff]   ;;  %v3351_v40 = vld [vmem:[%s3480_s9 + $0x254] ss:$56 sps:$4 sm:$0xff]  }
  0x5a   : > { %v3340_v31 = vld [vmem:[%s3480_s9 + $0x1e4] ss:$56 sps:$4 sm:$0xff]  }
  0x5c   : > { %2906 = vmatpush3.bf16.msra.mxu1 %v3272_v39  ;;  %2964 = vmatpush3.bf16.msra.mxu0 %v3274_v41  ;;  %v3349_v39 = vld [vmem:[%s3480_s9 + $0x24c] ss:$56 sps:$4 sm:$0xff]   ;;  %v3356_v41 = vld [vmem:[%s4033_s1 + $0x2b0] sm:$0xff]  }
  0x5d   : > { %2907 = vmatprep.subr.bf16.mxu1 %v3281_v44  ;;  %2965 = vmatprep.subr.bf16.mxu0 %v3283_v47  ;;  %v3365_v44 = vld [vmem:[%s4033_s1 + $0x2f8] sm:$0xff]  }
  0x5e   : > { %1815 = vmatmul.mubr.bf16.gmra.mrb[24].mxu1 %v3258_v28  ;;  %1904 = vmatmul.mubr.bf16.gmra.mrb[28].mxu0 %v3259_v29  ;;  %v3333_v28 = vld [vmem:[%s3480_s9 + $0x170] ss:$56 sps:$4 sm:$0xff]   ;;  %v3342_v29 = vld [vmem:[%s4033_s1 + $0x320] sm:$0xff]   ;;  %v3366_v47 = vld [vmem:[%s4033_s1 + $0x2b8] sm:$0xff]  }
  0x5f   : > { %1822 = vmatprep.mubr.bf16.mxu1 %v3264_v33  ;;  %1911 = vmatprep.mubr.bf16.mxu0 %v3266_v34  ;;  %v3346_v33 = vld [vmem:[%s4033_s1 + $0x2a8] sm:$0xff]  }
  0x60   : > { %2908 = vmatpush3.bf16.msra.mxu1 %v3282_v45  ;;  %2966 = vmatpush3.bf16.msra.mxu0 %v3284_v48  ;;  %v3347_v34 = vld [vmem:[%s4033_s1 + $0x368] sm:$0xff]   ;;  %v3367_v48 = vld [vmem:[%s4033_s1 + $0x378] sm:$0xff]  }
  0x61   : > { %2909 = vmatprep.subr.bf16.mxu1 %v3291_v52  ;;  %2967 = vmatprep.subr.bf16.mxu0 %v3293_v54  ;;  %v3353_v45 = vld [vmem:[%s3480_s9 + $0x248] ss:$56 sps:$4 sm:$0xff]   ;;  %v3363_v52 = vld [vmem:[%s3480_s9 + $0x2b8] ss:$56 sps:$4 sm:$0xff]   ;;  %v3371_v54 = vld [vmem:[%s3480_s9 + $0x2c] ss:$56 sps:$4 sm:$0xff]  }
  0x64   : > { %2910 = vmatpush3.bf16.msra.mxu1 %v3292_v53  ;;  %2968 = vmatpush3.bf16.msra.mxu0 %v3294_v55  ;;  %v3364_v53 = vld [vmem:[%s3480_s9 + $0x2c0] ss:$56 sps:$4 sm:$0xff]   ;;  %v3374_v55 = vld [vmem:[%s3480_s9 + $0x34] ss:$56 sps:$4 sm:$0xff]  }
  0x65   : > { %3011 = vmatprep.subr.bf16.mxu1 %v3301_v60  ;;  %3069 = vmatprep.subr.bf16.mxu0 %v3303_v61  ;;  %v3379_v60 = vld [vmem:[%s3480_s9 + $0x98] ss:$56 sps:$4 sm:$0xff]  }
  0x66   : > { %1823 = vmatmul.mubr.bf16.gmra.mrb[28].mxu1 %v3269_v37  ;;  %1912 = vmatmul.mubr.bf16.gmra.mrb[32].mxu0 %v3270_v38  ;;  %v3344_v37 = vld [vmem:[%s3480_s9 + $0x1e0] ss:$56 sps:$4 sm:$0xff]   ;;  %v3355_v38 = vld [vmem:[%s4033_s1 + $0x2f0] sm:$0xff]  }
  0x67   : > { %1830 = vmatprep.mubr.bf16.mxu1 %v3275_v42  ;;  %1919 = vmatprep.mubr.bf16.mxu0 %v3277_v43  ;;  %v3357_v42 = vld [vmem:[%s4033_s1 + $0x370] sm:$0xff]   ;;  %v3380_v61 = vld [vmem:[%s3480_s9 + $0xa0] ss:$56 sps:$4 sm:$0xff]  }
  0x68   : > { %v3358_v43 = vld [vmem:[%s4033_s1 + $0x330] sm:$0xff]  }
  0x6e   : > { %1831 = vmatmul.mubr.bf16.gmra.mrb[32].mxu1 %v3279_v46  ;;  %1920 = vmatmul.mubr.bf16.gmra.mrb[36].mxu0 %v3280_v49  ;;  %v3354_v46 = vld [vmem:[%s3480_s9 + $0x250] ss:$56 sps:$4 sm:$0xff]   ;;  %v3368_v49 = vld [vmem:[%s4033_s1 + $0x338] sm:$0xff]  }
  0x6f   : > { %1838 = vmatprep.mubr.bf16.mxu1 %v3285_v50  ;;  %1927 = vmatprep.mubr.bf16.mxu0 %v3287_v51  ;;  %v3359_v50 = vld [vmem:[%s3480_s9 + $0x2bc] ss:$56 sps:$4 sm:$0xff]  }
  0x70   : > { %v3361_v51 = vld [vmem:[%s3480_s9 + $0x2c4] ss:$56 sps:$4 sm:$0xff]  }
  0x76   : > { %1839 = vmatmul.mubr.bf16.gmra.mrb[36].mxu1 %v3289_v56  ;;  %1928 = vmatmul.mubr.bf16.gmra.mrb[40].mxu0 %v3290_v57  ;;  %v3369_v56 = vld [vmem:[%s3480_s9 + $0x28] ss:$56 sps:$4 sm:$0xff]  }
  0x77   : > { %1968 = vmatprep.mubr.bf16.mxu1 %v3297_v58  ;;  %2057 = vmatprep.mubr.bf16.mxu0 %v3300_v59  ;;  %v3372_v57 = vld [vmem:[%s3480_s9 + $0x30] ss:$56 sps:$4 sm:$0xff]   ;;  %v3375_v58 = vld [vmem:[%s3480_s9 + $0x9c] ss:$56 sps:$4 sm:$0xff]  }
  0x78   : > { %v3377_v59 = vld [vmem:[%s3480_s9 + $0xa4] ss:$56 sps:$4 sm:$0xff]  }
  0x7e   : > { %1969 = vmatmul.mubr.bf16.vlgmr.msra.gmra.mrb[40].mxu1 %v3295_v62  ;;  %2058 = vmatmul.mubr.bf16.vlgmr.msra.gmra.mrb[44].mxu0 %v3298_v63  ;;  %v3381_v62 = vld [vmem:[%s3480_s9 + $0x10c] ss:$56 sps:$4 sm:$0xff]  }
  0x7f   : > { %3012 = vmatpush3.bf16.msra.mxu1 %v3302_v0  ;;  %3070 = vmatpush3.bf16.msra.mxu0 %v3304_v1  ;;  %v3383_v63 = vld [vmem:[%s3480_s9 + $0x114] ss:$56 sps:$4 sm:$0xff]   ;;  %v3385_v0 = vld [vmem:[%s3480_s9 + $0x108] ss:$56 sps:$4 sm:$0xff]  }
  0x80   : > { %1976 = vmatprep.mubr.bf16.mxu1 %v3305_v2  ;;  %2065 = vmatprep.mubr.bf16.mxu0 %v3307_v3  ;;  %v3386_v1 = vld [vmem:[%s3480_s9 + $0x110] ss:$56 sps:$4 sm:$0xff]   ;;  %v3387_v2 = vld [vmem:[%s3480_s9 + $0x17c] ss:$56 sps:$4 sm:$0xff]  }
  0x81   : > { %3013 = vmatprep.subr.bf16.mxu1 %v3309_v4  ;;  %3071 = vmatprep.subr.bf16.mxu0 %v3313_v5  ;;  %v3389_v3 = vld [vmem:[%s3480_s9 + $0x184] ss:$56 sps:$4 sm:$0xff]   ;;  %v3391_v4 = vld [vmem:[%s3480_s9 + $0x178] ss:$56 sps:$4 sm:$0xff]  }
  0x82   : > { %v3392_v5 = vld [vmem:[%s3480_s9 + $0x180] ss:$56 sps:$4 sm:$0xff]  }
  0x83   : > { %3014 = vmatpush3.bf16.msra.mxu1 %v3312_v6  ;;  %3072 = vmatpush3.bf16.msra.mxu0 %v3314_v7  ;;  %v3393_v6 = vld [vmem:[%s3480_s9 + $0x1ec] ss:$56 sps:$4 sm:$0xff]  }
  0x84   : > { %3015 = vmatprep.subr.bf16.mxu1 %v3315_v9  ;;  %3073 = vmatprep.subr.bf16.mxu0 %v3323_v13  ;;  %v3395_v7 = vld [vmem:[%s3480_s9 + $0x1f4] ss:$56 sps:$4 sm:$0xff]   ;;  %v3398_v9 = vld [vmem:[%s3480_s9 + $0x1f0] ss:$56 sps:$4 sm:$0xff]   ;;  %v3404_v13 = vld [vmem:[%s3480_s9 + $0x260] ss:$56 sps:$4 sm:$0xff]  }
  0x86   : > { %1977 = vmatmul.mubr.bf16.gmra.mrb[44].mxu1 %v3310_v8  ;;  %2066 = vmatmul.mubr.bf16.gmra.mrb[48].mxu0 %v3311_v10  ;;  %v3397_v8 = vld [vmem:[%s3480_s9 + $0x1e8] ss:$56 sps:$4 sm:$0xff]   ;;  %v3399_v10 = vld [vmem:[%s3480_s9 + $0x25c] ss:$56 sps:$4 sm:$0xff]  }
  0x87   : > { %1984 = vmatprep.mubr.bf16.mxu1 %v3316_v11  ;;  %2073 = vmatprep.mubr.bf16.mxu0 %v3318_v12  ;;  %v3401_v11 = vld [vmem:[%s3480_s9 + $0x264] ss:$56 sps:$4 sm:$0xff]   ;;  %v3403_v12 = vld [vmem:[%s3480_s9 + $0x258] ss:$56 sps:$4 sm:$0xff]  }
  0x88   : > { %3016 = vmatpush3.bf16.msra.mxu1 %v3320_v14  ;;  %3074 = vmatpush3.bf16.msra.mxu0 %v3324_v15  ;;  %v3405_v14 = vld [vmem:[%s3480_s9 + $0x2cc] ss:$56 sps:$4 sm:$0xff]  }
  0x89   : > { %3017 = vmatprep.subr.bf16.mxu1 %v3325_v16  ;;  %3075 = vmatprep.subr.bf16.mxu0 %v3331_v20  ;;  %v3407_v15 = vld [vmem:[%s3480_s9 + $0x2d4] ss:$56 sps:$4 sm:$0xff]   ;;  %v3409_v16 = vld [vmem:[%s3480_s9 + $0x2c8] ss:$56 sps:$4 sm:$0xff]  }
  0x8c   : > { %3018 = vmatpush3.bf16.msra.mxu1 %v3326_v17  ;;  %3076 = vmatpush3.bf16.msra.mxu0 %v3334_v23  ;;  %v3410_v17 = vld [vmem:[%s3480_s9 + $0x2d0] ss:$56 sps:$4 sm:$0xff]  }
  0x8d   : > { %3019 = vmatprep.subr.bf16.mxu1 %v3335_v24  ;;  %3077 = vmatprep.subr.bf16.mxu0 %v3337_v26 }
  0x8e   : > { %1985 = vmatmul.mubr.bf16.gmra.mrb[48].mxu1 %v3321_v18  ;;  %2074 = vmatmul.mubr.bf16.gmra.mrb[52].mxu0 %v3322_v19 }
  0x8f   : > { %1992 = vmatprep.mubr.bf16.mxu1 %v3327_v21  ;;  %2081 = vmatprep.mubr.bf16.mxu0 %v3329_v22 }
  0x90   : > { %3020 = vmatpush3.bf16.msra.mxu1 %v3336_v25  ;;  %3078 = vmatpush3.bf16.msra.mxu0 %v3342_v29 }
  0x91   : > { %3021 = vmatprep.subr.bf16.mxu1 %v3345_v32  ;;  %3079 = vmatprep.subr.bf16.mxu0 %v3347_v34 }
  0x94   : > { %3022 = vmatpush3.bf16.msra.mxu1 %v3346_v33  ;;  %3080 = vmatpush3.bf16.msra.mxu0 %v3348_v35 }
  0x95   : > { %3023 = vmatprep.subr.bf16.mxu1 %v3355_v38  ;;  %3081 = vmatprep.subr.bf16.mxu0 %v3357_v42 }
  0x96   : > { %1993 = vmatmul.mubr.bf16.gmra.mrb[52].mxu1 %v3332_v27  ;;  %2082 = vmatmul.mubr.bf16.gmra.mrb[56].mxu0 %v3333_v28 }
  0x97   : > { %2000 = vmatprep.mubr.bf16.mxu1 %v3338_v30  ;;  %2089 = vmatprep.mubr.bf16.mxu0 %v3340_v31 }
  0x98   : > { %3024 = vmatpush3.bf16.msra.mxu1 %v3356_v41  ;;  %3082 = vmatpush3.bf16.msra.mxu0 %v3358_v43 }
  0x99   : > { %3025 = vmatprep.subr.bf16.mxu1 %v3365_v44  ;;  %3083 = vmatprep.subr.bf16.mxu0 %v3367_v48 }
  0x9c   : > { %3026 = vmatpush3.bf16.msra.mxu1 %v3366_v47  ;;  %3084 = vmatpush3.bf16.msra.mxu0 %v3368_v49 }
  0x9e   : > { %2001 = vmatmul.mubr.bf16.gmra.mrb[56].mxu1 %v3343_v36  ;;  %2090 = vmatmul.mubr.bf16.gmra.mrb[60].mxu0 %v3344_v37 }
  0x9f   : > { %2008 = vmatprep.mubr.bf16.mxu1 %v3349_v39  ;;  %2097 = vmatprep.mubr.bf16.mxu0 %v3351_v40 }
  0xa6   : > { %2009 = vmatmul.mubr.bf16.gmra.mrb[60].mxu1 %v3353_v45  ;;  %2098 = vmatmul.mubr.bf16.gmra.mrb[64].mxu0 %v3354_v46 }
  0xa7   : > { %2016 = vmatprep.mubr.bf16.mxu1 %v3359_v50  ;;  %2105 = vmatprep.mubr.bf16.mxu0 %v3361_v51 }
  0xae   : > { %2017 = vmatmul.mubr.bf16.gmra.mrb[64].mxu1 %v3363_v52  ;;  %2106 = vmatmul.mubr.bf16.gmra.mrb[68].mxu0 %v3364_v53 }
  0xaf   : > { %2146 = vmatprep.mubr.bf16.mxu1 %v3371_v54  ;;  %2235 = vmatprep.mubr.bf16.mxu0 %v3374_v55 }
  0xb6   : > { %2147 = vmatmul.mubr.bf16.vlgmr.msra.gmra.mrb[68].mxu1 %v3369_v56  ;;  %2236 = vmatmul.mubr.bf16.vlgmr.msra.gmra.mrb[72].mxu0 %v3372_v57 }
  0xb7   : > { %2154 = vmatprep.mubr.bf16.mxu1 %v3375_v58  ;;  %2243 = vmatprep.mubr.bf16.mxu0 %v3377_v59 }
  0xbe   : > { %2155 = vmatmul.mubr.bf16.gmra.mrb[72].mxu1 %v3379_v60  ;;  %2244 = vmatmul.mubr.bf16.gmra.mrb[76].mxu0 %v3380_v61  ;;  %v3908_v60 = vld [vmem:[%s4034_s2] ss:$0 sm:$0xff] }
  0xbf   : > { %2162 = vmatprep.mubr.bf16.mxu1 %v3381_v62  ;;  %2251 = vmatprep.mubr.bf16.mxu0 %v3383_v63 }
  0xc6   : > { %2163 = vmatmul.mubr.bf16.gmra.mrb[76].mxu1 %v3385_v0  ;;  %2252 = vmatmul.mubr.bf16.gmra.mrb[80].mxu0 %v3386_v1 }
  0xc7   : > { %2170 = vmatprep.mubr.bf16.mxu1 %v3387_v2  ;;  %2259 = vmatprep.mubr.bf16.mxu0 %v3389_v3 }
  0xce   : > { %2171 = vmatmul.mubr.bf16.gmra.mrb[80].mxu1 %v3391_v4  ;;  %2260 = vmatmul.mubr.bf16.gmra.mrb[84].mxu0 %v3392_v5 }
  0xcf   : > { %2178 = vmatprep.mubr.bf16.mxu1 %v3393_v6  ;;  %2267 = vmatprep.mubr.bf16.mxu0 %v3395_v7 }
  0xd6   : > { %2179 = vmatmul.mubr.bf16.gmra.mrb[84].mxu1 %v3397_v8  ;;  %2268 = vmatmul.mubr.bf16.gmra.mrb[88].mxu0 %v3398_v9 }
  0xd7   : > { %2186 = vmatprep.mubr.bf16.mxu1 %v3399_v10  ;;  %2275 = vmatprep.mubr.bf16.mxu0 %v3401_v11 }
  0xde   : > { %2187 = vmatmul.mubr.bf16.gmra.mrb[88].mxu1 %v3403_v12  ;;  %2276 = vmatmul.mubr.bf16.gmra.mrb[92].mxu0 %v3404_v13 }
  0xdf   : > { %2194 = vmatprep.mubr.bf16.mxu1 %v3405_v14  ;;  %2283 = vmatprep.mubr.bf16.mxu0 %v3407_v15 }
  0xe6   : > { %2195 = vmatmul.mubr.bf16.gmra.mrb[92].mxu1 %v3409_v16  ;;  %2284 = vmatmul.mubr.bf16.gmra.mrb[96].mxu0 %v3410_v17 }
  0xf9   : > { %v2737_v18 = vpop.f32.mrb[0].mxu0  ;;  %v2761_v19 = vpop.f32.mrb[0].mxu1 }
  0xfa   : > { %v2738_v20 = vpop.f32.mrb[1].mxu0  ;;  %v2762_v21 = vpop.f32.mrb[1].mxu1 }
  0xfb   : > { %v2739_v22 = vadd.f32 %v2738_v20, %v2737_v18  ;;  %v3889_v23 = vadd.f32 %v2762_v21, %v2761_v19  ;;  %v2740_v24 = vpop.f32.mrb[2].mxu0  ;;  %v2764_v25 = vpop.f32.mrb[2].mxu1 }
  0xfc   : > { %v2741_v26 = vpop.f32.mrb[3].mxu0  ;;  %v2765_v27 = vpop.f32.mrb[3].mxu1 }
  0xfd   : > { %v2742_v28 = vadd.f32 %v2741_v26, %v2740_v24  ;;  %v3891_v29 = vadd.f32 %v2765_v27, %v2764_v25  ;;  %v1704_v1 = vadd.f32 %v2739_v22, %v3908_v60 }
  0xff   : > { %v1707_v8 = vadd.f32 %v2742_v28, %v3908_v60 }
 0x101   : > { %v2743_v30 = vpop.f32.mrb[4].mxu0  ;;  %v2767_v31 = vpop.f32.mrb[4].mxu1 }
 0x102   : > { %v2744_v32 = vpop.f32.mrb[5].mxu0  ;;  %v2768_v33 = vpop.f32.mrb[5].mxu1 }
 0x103   : > { %v2745_v34 = vadd.f32 %v2744_v32, %v2743_v30  ;;  %v2746_v35 = vpop.f32.mrb[6].mxu0  ;;  %v3893_v36 = vadd.f32 %v2768_v33, %v2767_v31  ;;  %v2770_v37 = vpop.f32.mrb[6].mxu1 }
 0x104   : > { %v2747_v38 = vpop.f32.mrb[7].mxu0  ;;  %v2771_v39 = vpop.f32.mrb[7].mxu1 }
 0x105   : > { %v2748_v40 = vadd.f32 %v2747_v38, %v2746_v35  ;;  %v3895_v41 = vadd.f32 %v2771_v39, %v2770_v37  ;;  %v1712_v19 = vadd.f32 %v2745_v34, %v3908_v60 }
 0x107   : > { %v1715_v27 = vadd.f32 %v2748_v40, %v3908_v60 }
 0x109   : > { %v2749_v42 = vpop.f32.mrb[8].mxu0  ;;  %v2773_v43 = vpop.f32.mrb[8].mxu1 }
 0x10a   : > { %v2750_v44 = vpop.f32.mrb[9].mxu0  ;;  %v2774_v45 = vpop.f32.mrb[9].mxu1 }
 0x10b   : > { %v2751_v46 = vadd.f32 %v2750_v44, %v2749_v42  ;;  %v2752_v47 = vpop.f32.mrb[10].mxu0  ;;  %v3897_v48 = vadd.f32 %v2774_v45, %v2773_v43  ;;  %v2776_v49 = vpop.f32.mrb[10].mxu1 }
 0x10c   : > { %v2753_v50 = vpop.f32.mrb[11].mxu0  ;;  %v2777_v51 = vpop.f32.mrb[11].mxu1 }
 0x10d   : > { %v2754_v52 = vadd.f32 %v2753_v50, %v2752_v47  ;;  %v3899_v53 = vadd.f32 %v2777_v51, %v2776_v49  ;;  %v1720_v42 = vadd.f32 %v2751_v46, %v3908_v60 }
 0x10f   : > { %v1723_v50 = vadd.f32 %v2754_v52, %v3908_v60 }
 0x111   : > { %v2755_v54 = vpop.f32.mrb[12].mxu0 }
 0x112   : > { %v2756_v55 = vpop.f32.mrb[13].mxu0 }
 0x113   : > { %v3901_v56 = vadd.f32 %v2756_v55, %v2755_v54  ;;  %v2758_v57 = vpop.f32.mrb[14].mxu0 }
 0x114   : > { %v2759_v58 = vpop.f32.mrb[15].mxu0 }
 0x115   : > { %v3903_v59 = vadd.f32 %v2759_v58, %v2758_v57 }
 0x119   : > { %v2795_v61 = vpop.f32.mrb[12].mxu1  ;;  %v2853_v62 = vpop.f32.mrb[16].mxu0 }
 0x11a   : > { %v2796_v63 = vpop.f32.mrb[13].mxu1  ;;  %v2854_v0 = vpop.f32.mrb[17].mxu0 }
 0x11b   : > { %v2797_v2 = vadd.f32 %v2796_v63, %v2795_v61  ;;  %v2855_v3 = vadd.f32 %v2854_v0, %v2853_v62  ;;  %v2798_v4 = vpop.f32.mrb[14].mxu1  ;;  %v2856_v5 = vpop.f32.mrb[18].mxu0 }
 0x11c   : > { %v2799_v6 = vpop.f32.mrb[15].mxu1  ;;  %v2857_v7 = vpop.f32.mrb[19].mxu0 }
 0x11d   : > { %v1793_v9 = vadd.f32 %v2797_v2, %v1704_v1  ;;  %v2800_v10 = vadd.f32 %v2799_v6, %v2798_v4  ;;  %v2858_v11 = vadd.f32 %v2857_v7, %v2856_v5  ;;  %v1728_v1 = vadd.f32 %v3901_v56, %v3908_v60 }
 0x11e   : > { %v1731_v7 = vadd.f32 %v3903_v59, %v3908_v60 }
 0x11f   : > { %v3912_v12 = vadd.f32 %v2855_v3, %v1793_v9  ;;  %v1796_v13 = vadd.f32 %v2800_v10, %v1707_v8 }
 0x121   : > { %v3914_v14 = vadd.f32 %v2858_v11, %v1796_v13  ;;  %v2801_v15 = vpop.f32.mrb[16].mxu1  ;;  %v2859_v16 = vpop.f32.mrb[20].mxu0 }
 0x122   : > { %v2802_v17 = vpop.f32.mrb[17].mxu1  ;;  %v2860_v18 = vpop.f32.mrb[21].mxu0 }
 0x123   : > { %v2803_v20 = vadd.f32 %v2802_v17, %v2801_v15  ;;  %v2861_v21 = vadd.f32 %v2860_v18, %v2859_v16  ;;  %v2804_v22 = vpop.f32.mrb[18].mxu1  ;;  %v2862_v24 = vpop.f32.mrb[22].mxu0 }
 0x124   : > { %v2805_v25 = vpop.f32.mrb[19].mxu1  ;;  %v2863_v26 = vpop.f32.mrb[23].mxu0 }
 0x125   : > { %v1801_v28 = vadd.f32 %v2803_v20, %v1712_v19  ;;  %v2806_v30 = vadd.f32 %v2805_v25, %v2804_v22  ;;  %v2864_v31 = vadd.f32 %v2863_v26, %v2862_v24  ;;  %v1736_v19 = vadd.f32 %v3889_v23, %v3908_v60 }
 0x126   : > { %v1739_v26 = vadd.f32 %v3891_v29, %v3908_v60 }
 0x127   : > { %v3918_v32 = vadd.f32 %v2861_v21, %v1801_v28  ;;  %v1804_v33 = vadd.f32 %v2806_v30, %v1715_v27 }
 0x129   : > { %v3920_v35 = vadd.f32 %v2864_v31, %v1804_v33  ;;  %v2807_v37 = vpop.f32.mrb[20].mxu1  ;;  %v2865_v38 = vpop.f32.mrb[24].mxu0 }
 0x12a   : > { %v2808_v39 = vpop.f32.mrb[21].mxu1  ;;  %v2866_v34 = vpop.f32.mrb[25].mxu0 }
 0x12b   : > { %v2809_v43 = vadd.f32 %v2808_v39, %v2807_v37  ;;  %v2867_v44 = vadd.f32 %v2866_v34, %v2865_v38  ;;  %v2810_v45 = vpop.f32.mrb[22].mxu1  ;;  %v2868_v47 = vpop.f32.mrb[26].mxu0 }
 0x12c   : > { %v2811_v49 = vpop.f32.mrb[23].mxu1  ;;  %v2869_v40 = vpop.f32.mrb[27].mxu0 }
 0x12d   : > { %v1809_v51 = vadd.f32 %v2809_v43, %v1720_v42  ;;  %v2812_v54 = vadd.f32 %v2811_v49, %v2810_v45  ;;  %v2870_v55 = vadd.f32 %v2869_v40, %v2868_v47  ;;  %v1744_v42 = vadd.f32 %v3893_v36, %v3908_v60 }
 0x12e   : > { %v1747_v40 = vadd.f32 %v3895_v41, %v3908_v60 }
 0x12f   : > { %v3924_v57 = vadd.f32 %v2867_v44, %v1809_v51  ;;  %v1812_v58 = vadd.f32 %v2812_v54, %v1723_v50 }
 0x131   : > { %v3926_v61 = vadd.f32 %v2870_v55, %v1812_v58  ;;  %v2813_v62 = vpop.f32.mrb[24].mxu1  ;;  %v2871_v63 = vpop.f32.mrb[28].mxu0 }
 0x132   : > { %v2814_v0 = vpop.f32.mrb[25].mxu1  ;;  %v2872_v46 = vpop.f32.mrb[29].mxu0 }
 0x133   : > { %v2815_v2 = vadd.f32 %v2814_v0, %v2813_v62  ;;  %v2873_v3 = vadd.f32 %v2872_v46, %v2871_v63  ;;  %v2816_v4 = vpop.f32.mrb[26].mxu1  ;;  %v2874_v5 = vpop.f32.mrb[30].mxu0 }
 0x134   : > { %v2817_v52 = vpop.f32.mrb[27].mxu1  ;;  %v2875_v6 = vpop.f32.mrb[31].mxu0 }
 0x135   : > { %v1817_v8 = vadd.f32 %v2815_v2, %v1728_v1  ;;  %v2818_v9 = vadd.f32 %v2817_v52, %v2816_v4  ;;  %v2876_v10 = vadd.f32 %v2875_v6, %v2874_v5  ;;  %v1752_v1 = vadd.f32 %v3897_v48, %v3908_v60 }
 0x136   : > { %v1755_v6 = vadd.f32 %v3899_v53, %v3908_v60 }
 0x137   : > { %v3932_v11 = vadd.f32 %v2873_v3, %v1817_v8  ;;  %v1820_v13 = vadd.f32 %v2818_v9, %v1731_v7 }
 0x139   : > { %v3934_v15 = vadd.f32 %v2876_v10, %v1820_v13  ;;  %v2819_v16 = vpop.f32.mrb[28].mxu1  ;;  %v2877_v17 = vpop.f32.mrb[32].mxu0 }
 0x13a   : > { %v2820_v56 = vpop.f32.mrb[29].mxu1  ;;  %v2878_v18 = vpop.f32.mrb[33].mxu0 }
 0x13b   : > { %v2821_v20 = vadd.f32 %v2820_v56, %v2819_v16  ;;  %v2879_v21 = vadd.f32 %v2878_v18, %v2877_v17  ;;  %v2822_v22 = vpop.f32.mrb[30].mxu1  ;;  %v2880_v24 = vpop.f32.mrb[34].mxu0 }
 0x13c   : > { %v2823_v59 = vpop.f32.mrb[31].mxu1  ;;  %v2881_v25 = vpop.f32.mrb[35].mxu0 }
 0x13d   : > { %v1825_v27 = vadd.f32 %v2821_v20, %v1736_v19  ;;  %v2824_v28 = vadd.f32 %v2823_v59, %v2822_v22  ;;  %v2882_v30 = vadd.f32 %v2881_v25, %v2880_v24 }
 0x13f   : > { %v3940_v31 = vadd.f32 %v2879_v21, %v1825_v27  ;;  %v1828_v33 = vadd.f32 %v2824_v28, %v1739_v26 }
 0x141   : > { %v3942_v37 = vadd.f32 %v2882_v30, %v1828_v33  ;;  %v2825_v38 = vpop.f32.mrb[32].mxu1  ;;  %v2883_v39 = vpop.f32.mrb[36].mxu0 }
 0x142   : > { %v2826_v23 = vpop.f32.mrb[33].mxu1  ;;  %v2884_v34 = vpop.f32.mrb[37].mxu0 }
 0x143   : > { %v2827_v43 = vadd.f32 %v2826_v23, %v2825_v38  ;;  %v2885_v44 = vadd.f32 %v2884_v34, %v2883_v39  ;;  %v2828_v45 = vpop.f32.mrb[34].mxu1  ;;  %v2886_v47 = vpop.f32.mrb[38].mxu0 }
 0x144   : > { %v2829_v29 = vpop.f32.mrb[35].mxu1  ;;  %v2887_v49 = vpop.f32.mrb[39].mxu0 }
 0x145   : > { %v1833_v50 = vadd.f32 %v2827_v43, %v1744_v42  ;;  %v2830_v51 = vadd.f32 %v2829_v29, %v2828_v45  ;;  %v2888_v54 = vadd.f32 %v2887_v49, %v2886_v47 }
 0x147   : > { %v3948_v55 = vadd.f32 %v2885_v44, %v1833_v50  ;;  %v1836_v58 = vadd.f32 %v2830_v51, %v1747_v40 }
 0x149   : > { %v3950_v62 = vadd.f32 %v2888_v54, %v1836_v58  ;;  %v2831_v63 = vpop.f32.mrb[36].mxu1  ;;  %v2889_v0 = vpop.f32.mrb[40].mxu0 }
 0x14a   : > { %v2832_v36 = vpop.f32.mrb[37].mxu1  ;;  %v2890_v46 = vpop.f32.mrb[41].mxu0 }
 0x14b   : > { %v2833_v2 = vadd.f32 %v2832_v36, %v2831_v63  ;;  %v2891_v3 = vadd.f32 %v2890_v46, %v2889_v0  ;;  %v2834_v4 = vpop.f32.mrb[38].mxu1  ;;  %v2892_v5 = vpop.f32.mrb[42].mxu0 }
 0x14c   : > { %v2835_v41 = vpop.f32.mrb[39].mxu1  ;;  %v2893_v52 = vpop.f32.mrb[43].mxu0 }
 0x14d   : > { %v1841_v7 = vadd.f32 %v2833_v2, %v1752_v1  ;;  %v2836_v8 = vadd.f32 %v2835_v41, %v2834_v4  ;;  %v2894_v9 = vadd.f32 %v2893_v52, %v2892_v5 }
 0x14f   : > { %v3956_v10 = vadd.f32 %v2891_v3, %v1841_v7  ;;  %v1844_v13 = vadd.f32 %v2836_v8, %v1755_v6 }
 0x151   : > { %v3958_v16 = vadd.f32 %v2894_v9, %v1844_v13  ;;  %v2911_v17 = vpop.f32.mrb[40].mxu1  ;;  %v2969_v56 = vpop.f32.mrb[44].mxu0 }
 0x152   : > { %v2912_v48 = vpop.f32.mrb[41].mxu1  ;;  %v2970_v18 = vpop.f32.mrb[45].mxu0 }
 0x153   : > { %v2913_v19 = vadd.f32 %v2912_v48, %v2911_v17  ;;  %v2971_v20 = vadd.f32 %v2970_v18, %v2969_v56  ;;  %v2914_v21 = vpop.f32.mrb[42].mxu1  ;;  %v2972_v22 = vpop.f32.mrb[46].mxu0 }
 0x154   : > { %v2915_v24 = vpop.f32.mrb[43].mxu1  ;;  %v2973_v59 = vpop.f32.mrb[47].mxu0 }
 0x155   : > { %v1971_v53 = vadd.f32 %v2913_v19, %v3912_v12  ;;  %v2916_v60 = vadd.f32 %v2915_v24, %v2914_v21  ;;  %v2974_v25 = vadd.f32 %v2973_v59, %v2972_v22 }
 0x157   : > { %v3961_v26 = vadd.f32 %v2971_v20, %v1971_v53  ;;  %v1974_v27 = vadd.f32 %v2916_v60, %v3914_v14 }
 0x159   : > { %v3964_v28 = vadd.f32 %v2974_v25, %v1974_v27  ;;  %v2917_v30 = vpop.f32.mrb[44].mxu1  ;;  %v2975_v33 = vpop.f32.mrb[48].mxu0 }
 0x15a   : > { %v2918_v38 = vpop.f32.mrb[45].mxu1  ;;  %v2976_v39 = vpop.f32.mrb[49].mxu0 }
 0x15b   : > { %v2919_v23 = vadd.f32 %v2918_v38, %v2917_v30  ;;  %v2977_v34 = vadd.f32 %v2976_v39, %v2975_v33  ;;  %v2920_v42 = vpop.f32.mrb[46].mxu1  ;;  %v2978_v43 = vpop.f32.mrb[50].mxu0 }
 0x15c   : > { %v2921_v44 = vpop.f32.mrb[47].mxu1  ;;  %v2979_v45 = vpop.f32.mrb[51].mxu0 }
 0x15d   : > { %v1979_v12 = vadd.f32 %v2919_v23, %v3918_v32  ;;  %v2922_v47 = vadd.f32 %v2921_v44, %v2920_v42  ;;  %v2980_v29 = vadd.f32 %v2979_v45, %v2978_v43 }
 0x15f   : > { %v3967_v49 = vadd.f32 %v2977_v34, %v1979_v12  ;;  %v1982_v14 = vadd.f32 %v2922_v47, %v3920_v35 }
 0x161   : > { %v3970_v40 = vadd.f32 %v2980_v29, %v1982_v14  ;;  %v2923_v50 = vpop.f32.mrb[48].mxu1  ;;  %v2981_v51 = vpop.f32.mrb[52].mxu0 }
 0x162   : > { %v2924_v54 = vpop.f32.mrb[49].mxu1  ;;  %v2982_v58 = vpop.f32.mrb[53].mxu0 }
 0x163   : > { %v2925_v63 = vadd.f32 %v2924_v54, %v2923_v50  ;;  %v2983_v0 = vadd.f32 %v2982_v58, %v2981_v51  ;;  %v2926_v36 = vpop.f32.mrb[50].mxu1  ;;  %v2984_v46 = vpop.f32.mrb[54].mxu0 }
 0x164   : > { %v2927_v1 = vpop.f32.mrb[51].mxu1  ;;  %v2985_v2 = vpop.f32.mrb[55].mxu0 }
 0x165   : > { %v1987_v32 = vadd.f32 %v2925_v63, %v3924_v57  ;;  %v2928_v3 = vadd.f32 %v2927_v1, %v2926_v36  ;;  %v2986_v4 = vadd.f32 %v2985_v2, %v2984_v46 }
 0x167   : > { %v3973_v5 = vadd.f32 %v2983_v0, %v1987_v32  ;;  %v1990_v35 = vadd.f32 %v2928_v3, %v3926_v61 }
 0x169   : > { %v3976_v41 = vadd.f32 %v2986_v4, %v1990_v35  ;;  %v2929_v52 = vpop.f32.mrb[52].mxu1  ;;  %v2987_v6 = vpop.f32.mrb[56].mxu0 }
 0x16a   : > { %v2930_v7 = vpop.f32.mrb[53].mxu1  ;;  %v2988_v8 = vpop.f32.mrb[57].mxu0 }
 0x16b   : > { %v2931_v9 = vadd.f32 %v2930_v7, %v2929_v52  ;;  %v2989_v13 = vadd.f32 %v2988_v8, %v2987_v6  ;;  %v2932_v17 = vpop.f32.mrb[54].mxu1  ;;  %v2990_v56 = vpop.f32.mrb[58].mxu0 }
 0x16c   : > { %v2933_v48 = vpop.f32.mrb[55].mxu1  ;;  %v2991_v18 = vpop.f32.mrb[59].mxu0 }
 0x16d   : > { %v1995_v57 = vadd.f32 %v2931_v9, %v3932_v11  ;;  %v2934_v19 = vadd.f32 %v2933_v48, %v2932_v17  ;;  %v2992_v20 = vadd.f32 %v2991_v18, %v2990_v56 }
 0x16f   : > { %v3979_v21 = vadd.f32 %v2989_v13, %v1995_v57  ;;  %v1998_v61 = vadd.f32 %v2934_v19, %v3934_v15 }
 0x171   : > { %v3982_v22 = vadd.f32 %v2992_v20, %v1998_v61  ;;  %v2935_v24 = vpop.f32.mrb[56].mxu1  ;;  %v2993_v59 = vpop.f32.mrb[60].mxu0 }
 0x172   : > { %v2936_v53 = vpop.f32.mrb[57].mxu1  ;;  %v2994_v60 = vpop.f32.mrb[61].mxu0 }
 0x173   : > { %v2937_v25 = vadd.f32 %v2936_v53, %v2935_v24  ;;  %v2995_v27 = vadd.f32 %v2994_v60, %v2993_v59  ;;  %v2938_v30 = vpop.f32.mrb[58].mxu1  ;;  %v2996_v33 = vpop.f32.mrb[62].mxu0 }
 0x174   : > { %v2939_v38 = vpop.f32.mrb[59].mxu1  ;;  %v2997_v39 = vpop.f32.mrb[63].mxu0 }
 0x175   : > { %v2003_v11 = vadd.f32 %v2937_v25, %v3940_v31  ;;  %v2940_v23 = vadd.f32 %v2939_v38, %v2938_v30  ;;  %v2998_v34 = vadd.f32 %v2997_v39, %v2996_v33 }
 0x177   : > { %v3985_v42 = vadd.f32 %v2995_v27, %v2003_v11  ;;  %v2006_v15 = vadd.f32 %v2940_v23, %v3942_v37 }
 0x179   : > { %v3988_v43 = vadd.f32 %v2998_v34, %v2006_v15  ;;  %v2941_v44 = vpop.f32.mrb[60].mxu1  ;;  %v2999_v45 = vpop.f32.mrb[64].mxu0 }
 0x17a   : > { %v2942_v12 = vpop.f32.mrb[61].mxu1  ;;  %v3000_v47 = vpop.f32.mrb[65].mxu0 }
 0x17b   : > { %v2943_v29 = vadd.f32 %v2942_v12, %v2941_v44  ;;  %v3001_v14 = vadd.f32 %v3000_v47, %v2999_v45  ;;  %v2944_v50 = vpop.f32.mrb[62].mxu1  ;;  %v3002_v51 = vpop.f32.mrb[66].mxu0 }
 0x17c   : > { %v2945_v54 = vpop.f32.mrb[63].mxu1  ;;  %v3003_v58 = vpop.f32.mrb[67].mxu0 }
 0x17d   : > { %v2011_v31 = vadd.f32 %v2943_v29, %v3948_v55  ;;  %v2946_v63 = vadd.f32 %v2945_v54, %v2944_v50  ;;  %v3004_v0 = vadd.f32 %v3003_v58, %v3002_v51 }
 0x17f   : > { %v3991_v36 = vadd.f32 %v3001_v14, %v2011_v31  ;;  %v2014_v37 = vadd.f32 %v2946_v63, %v3950_v62 }
 0x181   : > { %v3994_v46 = vadd.f32 %v3004_v0, %v2014_v37  ;;  %v2947_v1 = vpop.f32.mrb[64].mxu1  ;;  %v3005_v2 = vpop.f32.mrb[68].mxu0 }
 0x182   : > { %v2948_v32 = vpop.f32.mrb[65].mxu1  ;;  %v3006_v3 = vpop.f32.mrb[69].mxu0 }
 0x183   : > { %v2949_v4 = vadd.f32 %v2948_v32, %v2947_v1  ;;  %v3007_v35 = vadd.f32 %v3006_v3, %v3005_v2  ;;  %v2950_v52 = vpop.f32.mrb[66].mxu1  ;;  %v3008_v6 = vpop.f32.mrb[70].mxu0 }
 0x184   : > { %v2951_v7 = vpop.f32.mrb[67].mxu1  ;;  %v3009_v8 = vpop.f32.mrb[71].mxu0 }
 0x185   : > { %v2019_v55 = vadd.f32 %v2949_v4, %v3956_v10  ;;  %v2952_v9 = vadd.f32 %v2951_v7, %v2950_v52  ;;  %v3010_v13 = vadd.f32 %v3009_v8, %v3008_v6 }
 0x187   : > { %v3997_v17 = vadd.f32 %v3007_v35, %v2019_v55  ;;  %v2022_v62 = vadd.f32 %v2952_v9, %v3958_v16 }
 0x189   : > { %v4000_v56 = vadd.f32 %v3010_v13, %v2022_v62  ;;  %v3027_v48 = vpop.f32.mrb[68].mxu1  ;;  %v3085_v18 = vpop.f32.mrb[72].mxu0 }
 0x18a   : > { %v3028_v57 = vpop.f32.mrb[69].mxu1  ;;  %v3086_v19 = vpop.f32.mrb[73].mxu0 }
 0x18b   : > { %v3029_v20 = vadd.f32 %v3028_v57, %v3027_v48  ;;  %v3087_v61 = vadd.f32 %v3086_v19, %v3085_v18  ;;  %v3030_v24 = vpop.f32.mrb[70].mxu1  ;;  %v3088_v59 = vpop.f32.mrb[74].mxu0 }
 0x18c   : > { %v3031_v53 = vpop.f32.mrb[71].mxu1  ;;  %v3089_v60 = vpop.f32.mrb[75].mxu0 }
 0x18d   : > { %v2149_v10 = vadd.f32 %v3029_v20, %v3961_v26  ;;  %v3032_v25 = vadd.f32 %v3031_v53, %v3030_v24  ;;  %v3090_v27 = vadd.f32 %v3089_v60, %v3088_v59 }
 0x18f   : > { %v2238_v30 = vadd.f32 %v3087_v61, %v2149_v10  ;;  %v2152_v16 = vadd.f32 %v3032_v25, %v3964_v28 }
 0x191   : > { %v2241_v33 = vadd.f32 %v3090_v27, %v2152_v16  ;;  %v3033_v38 = vpop.f32.mrb[72].mxu1  ;;  %v3091_v39 = vpop.f32.mrb[76].mxu0  ;;  %v2292_v34 = vmax.f32 %v2238_v30, 0.0 }
 0x192   : > { %v3034_v11 = vpop.f32.mrb[73].mxu1  ;;  %v3092_v23 = vpop.f32.mrb[77].mxu0 }
 0x193   : > { %v2293_v15 = vmax.f32 %v2241_v33, 0.0  ;;  %v3035_v44 = vadd.f32 %v3034_v11, %v3033_v38  ;;  %v3093_v45 = vadd.f32 %v3092_v23, %v3091_v39  ;;  %v3036_v12 = vpop.f32.mrb[74].mxu1  ;;  %v3094_v47 = vpop.f32.mrb[78].mxu0 }
 0x194   : > { %v3037_v26 = vpop.f32.mrb[75].mxu1  ;;  %v3095_v28 = vpop.f32.mrb[79].mxu0 }
 0x195   : > { %v2683_v29 = vpack.c.bf16 %v2293_v15, %v2292_v34  ;;  %v2157_v14 = vadd.f32 %v3035_v44, %v3967_v49  ;;  %v3038_v50 = vadd.f32 %v3037_v26, %v3036_v12  ;;  %v3096_v51 = vadd.f32 %v3095_v28, %v3094_v47 }
 0x197   : > { %2684 = vst [vmem:[%s4008_s30] sm:$0xff] %v2683_v29   ;;  %v2246_v54 = vadd.f32 %v3093_v45, %v2157_v14  ;;  %v2160_v58 = vadd.f32 %v3038_v50, %v3970_v40 }
 0x199   : > { %v2249_v31 = vadd.f32 %v3096_v51, %v2160_v58  ;;  %v3039_v63 = vpop.f32.mrb[76].mxu1  ;;  %v3097_v0 = vpop.f32.mrb[80].mxu0  ;;  %v2294_v2 = vmax.f32 %v2246_v54, 0.0 }
 0x19a   : > { %v3040_v37 = vpop.f32.mrb[77].mxu1  ;;  %v3098_v1 = vpop.f32.mrb[81].mxu0 }
 0x19b   : > { %v2295_v32 = vmax.f32 %v2249_v31, 0.0  ;;  %v3041_v3 = vadd.f32 %v3040_v37, %v3039_v63  ;;  %v3099_v4 = vadd.f32 %v3098_v1, %v3097_v0  ;;  %v3042_v35 = vpop.f32.mrb[78].mxu1  ;;  %v3100_v52 = vpop.f32.mrb[82].mxu0 }
 0x19c   : > { %v3043_v6 = vpop.f32.mrb[79].mxu1  ;;  %v3101_v49 = vpop.f32.mrb[83].mxu0 }
 0x19d   : > { %v2688_v7 = vpack.c.bf16 %v2295_v32, %v2294_v2  ;;  %v2165_v8 = vadd.f32 %v3041_v3, %v3973_v5  ;;  %v3044_v55 = vadd.f32 %v3043_v6, %v3042_v35  ;;  %v3102_v9 = vadd.f32 %v3101_v49, %v3100_v52 }
 0x19f   : > { %2715 = vst [vmem:[%s4008_s30 + $0x8] sm:$0xff] %v2688_v7   ;;  %v2254_v40 = vadd.f32 %v3099_v4, %v2165_v8  ;;  %v2168_v13 = vadd.f32 %v3044_v55, %v3976_v41 }
 0x1a1   : > { %v2257_v62 = vadd.f32 %v3102_v9, %v2168_v13  ;;  %v3045_v48 = vpop.f32.mrb[80].mxu1  ;;  %v3103_v18 = vpop.f32.mrb[84].mxu0  ;;  %v2296_v20 = vmax.f32 %v2254_v40, 0.0 }
 0x1a2   : > { %v3046_v57 = vpop.f32.mrb[81].mxu1  ;;  %v3104_v19 = vpop.f32.mrb[85].mxu0 }
 0x1a3   : > { %v2297_v61 = vmax.f32 %v2257_v62, 0.0  ;;  %v3047_v24 = vadd.f32 %v3046_v57, %v3045_v48  ;;  %v3105_v59 = vadd.f32 %v3104_v19, %v3103_v18  ;;  %v3048_v53 = vpop.f32.mrb[82].mxu1  ;;  %v3106_v60 = vpop.f32.mrb[86].mxu0 }
 0x1a4   : > { %v3049_v10 = vpop.f32.mrb[83].mxu1  ;;  %v3107_v5 = vpop.f32.mrb[87].mxu0 }
 0x1a5   : > { %v2693_v25 = vpack.c.bf16 %v2297_v61, %v2296_v20  ;;  %v2173_v27 = vadd.f32 %v3047_v24, %v3979_v21  ;;  %v3050_v30 = vadd.f32 %v3049_v10, %v3048_v53  ;;  %v3108_v16 = vadd.f32 %v3107_v5, %v3106_v60 }
 0x1a7   : > { %2716 = vst [vmem:[%s4008_s30 + $0x10] sm:$0xff] %v2693_v25   ;;  %v2262_v41 = vadd.f32 %v3105_v59, %v2173_v27  ;;  %v2176_v33 = vadd.f32 %v3050_v30, %v3982_v22 }
 0x1a9   : > { %v2265_v38 = vadd.f32 %v3108_v16, %v2176_v33  ;;  %v3051_v39 = vpop.f32.mrb[84].mxu1  ;;  %v3109_v11 = vpop.f32.mrb[88].mxu0  ;;  %v2298_v15 = vmax.f32 %v2262_v41, 0.0 }
 0x1aa   : > { %v3052_v23 = vpop.f32.mrb[85].mxu1  ;;  %v3110_v34 = vpop.f32.mrb[89].mxu0 }
 0x1ab   : > { %v2299_v44 = vmax.f32 %v2265_v38, 0.0  ;;  %v3053_v45 = vadd.f32 %v3052_v23, %v3051_v39  ;;  %v3111_v12 = vadd.f32 %v3110_v34, %v3109_v11  ;;  %v3054_v47 = vpop.f32.mrb[86].mxu1  ;;  %v3112_v26 = vpop.f32.mrb[90].mxu0 }
 0x1ac   : > { %v3055_v28 = vpop.f32.mrb[87].mxu1  ;;  %v3113_v21 = vpop.f32.mrb[91].mxu0 }
 0x1ad   : > { %v2698_v29 = vpack.c.bf16 %v2299_v44, %v2298_v15  ;;  %v2181_v14 = vadd.f32 %v3053_v45, %v3985_v42  ;;  %v3056_v50 = vadd.f32 %v3055_v28, %v3054_v47  ;;  %v3114_v51 = vadd.f32 %v3113_v21, %v3112_v26 }
 0x1af   : > { %2717 = vst [vmem:[%s4008_s30 + $0x18] sm:$0xff] %v2698_v29   ;;  %v2270_v22 = vadd.f32 %v3111_v12, %v2181_v14  ;;  %v2184_v54 = vadd.f32 %v3056_v50, %v3988_v43 }
 0x1b1   : > { %v2273_v58 = vadd.f32 %v3114_v51, %v2184_v54  ;;  %v3057_v31 = vpop.f32.mrb[88].mxu1  ;;  %v3115_v63 = vpop.f32.mrb[92].mxu0  ;;  %v2300_v1 = vmax.f32 %v2270_v22, 0.0 }
 0x1b2   : > { %v3058_v0 = vpop.f32.mrb[89].mxu1  ;;  %v3116_v37 = vpop.f32.mrb[93].mxu0 }
 0x1b3   : > { %v2301_v2 = vmax.f32 %v2273_v58, 0.0  ;;  %v3059_v32 = vadd.f32 %v3058_v0, %v3057_v31  ;;  %v3117_v3 = vadd.f32 %v3116_v37, %v3115_v63  ;;  %v3060_v4 = vpop.f32.mrb[90].mxu1  ;;  %v3118_v35 = vpop.f32.mrb[94].mxu0 }
 0x1b4   : > { %v3061_v52 = vpop.f32.mrb[91].mxu1  ;;  %v3119_v42 = vpop.f32.mrb[95].mxu0 }
 0x1b5   : > { %v2703_v6 = vpack.c.bf16 %v2301_v2, %v2300_v1  ;;  %v2189_v49 = vadd.f32 %v3059_v32, %v3991_v36  ;;  %v3062_v7 = vadd.f32 %v3061_v52, %v3060_v4  ;;  %v3120_v8 = vadd.f32 %v3119_v42, %v3118_v35 }
 0x1b7   : > { %2718 = vst [vmem:[%s4008_s30 + $0x20] sm:$0xff] %v2703_v6   ;;  %v2278_v43 = vadd.f32 %v3117_v3, %v2189_v49  ;;  %v2192_v55 = vadd.f32 %v3062_v7, %v3994_v46 }
 0x1b9   : > { %v2281_v9 = vadd.f32 %v3120_v8, %v2192_v55  ;;  %v3063_v40 = vpop.f32.mrb[92].mxu1  ;;  %v3121_v13 = vpop.f32.mrb[96].mxu0  ;;  %v2302_v18 = vmax.f32 %v2278_v43, 0.0 }
 0x1ba   : > { %v3064_v62 = vpop.f32.mrb[93].mxu1  ;;  %v3122_v48 = vpop.f32.mrb[97].mxu0 }
 0x1bb   : > { %v2303_v57 = vmax.f32 %v2281_v9, 0.0  ;;  %v3065_v19 = vadd.f32 %v3064_v62, %v3063_v40  ;;  %v3123_v20 = vadd.f32 %v3122_v48, %v3121_v13  ;;  %v3066_v61 = vpop.f32.mrb[94].mxu1  ;;  %v3124_v24 = vpop.f32.mrb[98].mxu0 }
 0x1bc   : > { %v3067_v36 = vpop.f32.mrb[95].mxu1  ;;  %v3125_v59 = vpop.f32.mrb[99].mxu0 }
 0x1bd   : > { %v2708_v53 = vpack.c.bf16 %v2303_v57, %v2302_v18  ;;  %v2197_v60 = vadd.f32 %v3065_v19, %v3997_v17  ;;  %v3068_v10 = vadd.f32 %v3067_v36, %v3066_v61  ;;  %v3126_v46 = vadd.f32 %v3125_v59, %v3124_v24 }
 0x1bf   : > { %2719 = vst [vmem:[%s4008_s30 + $0x28] sm:$0xff] %v2708_v53   ;;  %v2286_v5 = vadd.f32 %v3123_v20, %v2197_v60  ;;  %v2200_v25 = vadd.f32 %v3068_v10, %v4000_v56 }
 0x1c1   : > { %v2289_v27 = vadd.f32 %v3126_v46, %v2200_v25  ;;  %v2304_v30 = vmax.f32 %v2286_v5, 0.0 }
 0x1c3   : > { %v2305_v16 = vmax.f32 %v2289_v27, 0.0 }
 0x1c5   : > { %v2713_v41 = vpack.c.bf16 %v2305_v16, %v2304_v30 }
 0x1c7   : > { %2720 = vst [vmem:[%s4008_s30 + $0x30] sm:$0xff] %v2713_v41  }
 0x1c8 PF: > { %s13_s12 = sadd.s32 1, %s3417_s12  }
 0x1c9   : > { %p10_p4 = scmp.ge.s32.totalorder %s13_s12, 4  }
 0x1cb   :  { %12 = sbr.rel (!%p10_p4) target bundleno = 1 (0x1), region = 62 }

// kernel: voxel_backbone_8x.20
= control target key start
LH: loop header
LB: loop body
LE: loop exit
PB: predicated region body
PF: predicated region fallthrough
CT: control target
= control target key end

     0   :  { %s2356_s1 = inlined_call_operand.vmem [shape: bf16[1792,128], index: 1, kind: input, shape index: {}]   ;;  %s2357_s0 = inlined_call_operand.vmem [shape: bf16[24,1792], index: 0, kind: input, shape index: {}]   ;;  %s2358_s2 = inlined_call_operand.vmem [shape: f32[1,128], index: 2, kind: input, shape index: {}]   ;;  %s2359_s3 = inlined_call_operand.vmem [shape: bf16[24,128], index: 3, kind: output, shape index: {}]  }
   0x1   :  { %v1781_v0 = vld [vmem:[%s2356_s1 + $0x40] sm:$0xff]   ;;  %v1785_v4 = vld [vmem:[%s2356_s1 + $0x48] sm:$0xff]   ;;  %v1789_v8 = vld [vmem:[%s2356_s1 + $0x50] sm:$0xff]  }
   0x2   :  { %v1782_v1 = vld [vmem:[%s2356_s1 + $0xc0] sm:$0xff]   ;;  %1569 = vmatprep.subr.bf16.mxu0 %v1781_v0  ;;  %v1786_v5 = vld [vmem:[%s2356_s1 + $0xc8] sm:$0xff]   ;;  %v1790_v9 = vld [vmem:[%s2356_s1 + $0xd0] sm:$0xff]  }
   0x3   :  { %v1783_v2 = vld [vmem:[%s2356_s1] sm:$0xff]   ;;  %1597 = vmatprep.subr.bf16.mxu1 %v1782_v1  ;;  %v1787_v6 = vld [vmem:[%s2356_s1 + $0x8] sm:$0xff]   ;;  %v1791_v10 = vld [vmem:[%s2356_s1 + $0x10] sm:$0xff]  }
   0x4   :  { %v1784_v3 = vld [vmem:[%s2356_s1 + $0x80] sm:$0xff]   ;;  %1570 = vmatpush3.bf16.msra.mxu0 %v1783_v2  ;;  %v1788_v7 = vld [vmem:[%s2356_s1 + $0x88] sm:$0xff]   ;;  %v1792_v11 = vld [vmem:[%s2356_s1 + $0x90] sm:$0xff]  }
   0x5   :  { %1598 = vmatpush3.bf16.msra.mxu1 %v1784_v3  ;;  %1571 = vmatprep.subr.bf16.mxu0 %v1785_v4  ;;  %v1793_v12 = vld [vmem:[%s2356_s1 + $0x58] sm:$0xff]   ;;  %v1797_v16 = vld [vmem:[%s2356_s1 + $0x60] sm:$0xff]   ;;  %v1801_v20 = vld [vmem:[%s2356_s1 + $0x68] sm:$0xff]  }
   0x6   :  { %1599 = vmatprep.subr.bf16.mxu1 %v1786_v5  ;;  %v1794_v13 = vld [vmem:[%s2356_s1 + $0xd8] sm:$0xff]   ;;  %v1798_v17 = vld [vmem:[%s2356_s1 + $0xe0] sm:$0xff]   ;;  %v1802_v21 = vld [vmem:[%s2356_s1 + $0xe8] sm:$0xff]  }
   0x7   :  { %v1795_v14 = vld [vmem:[%s2356_s1 + $0x18] sm:$0xff]   ;;  %v1799_v18 = vld [vmem:[%s2356_s1 + $0x20] sm:$0xff]   ;;  %v1803_v22 = vld [vmem:[%s2356_s1 + $0x28] sm:$0xff]  }
   0x8   :  { %1572 = vmatpush3.bf16.msra.mxu0 %v1787_v6  ;;  %v1796_v15 = vld [vmem:[%s2356_s1 + $0x98] sm:$0xff]   ;;  %v1800_v19 = vld [vmem:[%s2356_s1 + $0xa0] sm:$0xff]   ;;  %v1804_v23 = vld [vmem:[%s2356_s1 + $0xa8] sm:$0xff]  }
   0x9   :  { %1600 = vmatpush3.bf16.msra.mxu1 %v1788_v7  ;;  %1573 = vmatprep.subr.bf16.mxu0 %v1789_v8  ;;  %v1805_v24 = vld [vmem:[%s2356_s1 + $0x70] sm:$0xff]   ;;  %v1809_v28 = vld [vmem:[%s2356_s1 + $0x78] sm:$0xff]   ;;  %v1816_v34 = vld [vmem:[%s2357_s0 + $0x8] ss:$56 sps:$4 sm:$0xff]  }
   0xa   :  { %1601 = vmatprep.subr.bf16.mxu1 %v1790_v9  ;;  %v1806_v25 = vld [vmem:[%s2356_s1 + $0xf0] sm:$0xff]   ;;  %v1810_v29 = vld [vmem:[%s2356_s1 + $0xf8] sm:$0xff]   ;;  %v1818_v35 = vld [vmem:[%s2357_s0 + $0xc] ss:$56 sps:$4 sm:$0xff]  }
   0xb   :  { %v1807_v26 = vld [vmem:[%s2356_s1 + $0x30] sm:$0xff]   ;;  %v1811_v30 = vld [vmem:[%s2356_s1 + $0x38] sm:$0xff]   ;;  %v1819_v36 = vld [vmem:[%s2356_s1 + $0x140] sm:$0xff]   ;;  %1138 = vmatprep.mubr.bf16.mxu1 %v1818_v35 }
   0xc   :  { %1574 = vmatpush3.bf16.msra.mxu0 %v1791_v10  ;;  %v1808_v27 = vld [vmem:[%s2356_s1 + $0xb0] sm:$0xff]   ;;  %v1812_v31 = vld [vmem:[%s2356_s1 + $0xb8] sm:$0xff]   ;;  %v1820_v37 = vld [vmem:[%s2356_s1 + $0x1c0] sm:$0xff]  }
   0xd   :  { %1602 = vmatpush3.bf16.msra.mxu1 %v1792_v11  ;;  %1575 = vmatprep.subr.bf16.mxu0 %v1793_v12  ;;  %v1813_v32 = vld [vmem:[%s2357_s0] ss:$56 sps:$4 sm:$0xff]   ;;  %v1815_v33 = vld [vmem:[%s2357_s0 + $0x4] ss:$56 sps:$4 sm:$0xff]   ;;  %v1823_v40 = vld [vmem:[%s2356_s1 + $0x148] sm:$0xff]  }
   0xe   :  { %1603 = vmatprep.subr.bf16.mxu1 %v1794_v13  ;;  %1090 = vmatprep.mubr.bf16.mxu0 %v1815_v33  ;;  %v1821_v38 = vld [vmem:[%s2356_s1 + $0x100] sm:$0xff]   ;;  %v1824_v41 = vld [vmem:[%s2356_s1 + $0x1c8] sm:$0xff]   ;;  %v1827_v44 = vld [vmem:[%s2356_s1 + $0x150] sm:$0xff]  }
   0xf   :  { %v1822_v39 = vld [vmem:[%s2356_s1 + $0x180] sm:$0xff]   ;;  %v1825_v42 = vld [vmem:[%s2356_s1 + $0x108] sm:$0xff]   ;;  %v1828_v45 = vld [vmem:[%s2356_s1 + $0x1d0] sm:$0xff]  }
  0x10   :  { %1576 = vmatpush3.bf16.msra.mxu0 %v1795_v14  ;;  %v1826_v43 = vld [vmem:[%s2356_s1 + $0x188] sm:$0xff]   ;;  %v1829_v46 = vld [vmem:[%s2356_s1 + $0x110] sm:$0xff]   ;;  %v1831_v48 = vld [vmem:[%s2356_s1 + $0x158] sm:$0xff]  }
  0x11   :  { %1604 = vmatpush3.bf16.msra.mxu1 %v1796_v15  ;;  %1577 = vmatprep.subr.bf16.mxu0 %v1797_v16  ;;  %v1830_v47 = vld [vmem:[%s2356_s1 + $0x190] sm:$0xff]   ;;  %v1832_v49 = vld [vmem:[%s2356_s1 + $0x1d8] sm:$0xff]   ;;  %v1835_v52 = vld [vmem:[%s2356_s1 + $0x160] sm:$0xff]  }
  0x12   :  { %1605 = vmatprep.subr.bf16.mxu1 %v1798_v17  ;;  %v1833_v50 = vld [vmem:[%s2356_s1 + $0x118] sm:$0xff]   ;;  %v1836_v53 = vld [vmem:[%s2356_s1 + $0x1e0] sm:$0xff]   ;;  %v1839_v56 = vld [vmem:[%s2356_s1 + $0x168] sm:$0xff]  }
  0x13   :  { %v1834_v51 = vld [vmem:[%s2356_s1 + $0x198] sm:$0xff]   ;;  %v1837_v54 = vld [vmem:[%s2356_s1 + $0x120] sm:$0xff]   ;;  %v1840_v57 = vld [vmem:[%s2356_s1 + $0x1e8] sm:$0xff]  }
  0x14   :  { %1578 = vmatpush3.bf16.msra.mxu0 %v1799_v18  ;;  %v1838_v55 = vld [vmem:[%s2356_s1 + $0x1a0] sm:$0xff]   ;;  %v29_v58 = vld [vmem:[%s2357_s0 + $0x70] sm:$0xff]  ;;  %v1842_v60 = vld [vmem:[%s2356_s1 + $0x128] sm:$0xff]  }
  0x15   :  { %1606 = vmatpush3.bf16.msra.mxu1 %v1800_v19  ;;  %1579 = vmatprep.subr.bf16.mxu0 %v1801_v20  ;;  %v1433_v59 = vcombine.high %v29_v58, %v29_v58  ;;  %v1432_v61 = vcombine.low %v29_v58, %v29_v58  ;;  %v1843_v62 = vld [vmem:[%s2356_s1 + $0x1a8] sm:$0xff]   ;;  %v30_v63 = vld [vmem:[%s2357_s0 + $0x78] sm:$0xff]  ;;  %v1847_v2 = vld [vmem:[%s2356_s1 + $0x170] sm:$0xff]  }
  0x16   :  { %1607 = vmatprep.subr.bf16.mxu1 %v1802_v21  ;;  %v1435_v0 = vcombine.high %v30_v63, %v30_v63  ;;  %v1434_v1 = vcombine.low %v30_v63, %v30_v63  ;;  %v1848_v3 = vld [vmem:[%s2356_s1 + $0x1f0] sm:$0xff]   ;;  %v1851_v6 = vld [vmem:[%s2356_s1 + $0x178] sm:$0xff]   ;;  %v1861_v14 = vld [vmem:[%s2356_s1 + $0x240] sm:$0xff]  }
  0x17   :  { %v1849_v4 = vld [vmem:[%s2356_s1 + $0x130] sm:$0xff]   ;;  %v1852_v7 = vld [vmem:[%s2356_s1 + $0x1f8] sm:$0xff]   ;;  %v1862_v15 = vld [vmem:[%s2356_s1 + $0x2c0] sm:$0xff]  }
  0x18   :  { %1580 = vmatpush3.bf16.msra.mxu0 %v1803_v22  ;;  %v1850_v5 = vld [vmem:[%s2356_s1 + $0x1b0] sm:$0xff]   ;;  %v1853_v8 = vld [vmem:[%s2356_s1 + $0x138] sm:$0xff]   ;;  %v1863_v16 = vld [vmem:[%s2356_s1 + $0x200] sm:$0xff]  }
  0x19   :  { %1608 = vmatpush3.bf16.msra.mxu1 %v1804_v23  ;;  %1581 = vmatprep.subr.bf16.mxu0 %v1805_v24  ;;  %v1854_v9 = vld [vmem:[%s2356_s1 + $0x1b8] sm:$0xff]   ;;  %v1855_v10 = vld [vmem:[%s2357_s0 + $0x10] ss:$56 sps:$4 sm:$0xff]   ;;  %v1857_v11 = vld [vmem:[%s2357_s0 + $0x14] ss:$56 sps:$4 sm:$0xff]  }
  0x1a   :  { %1609 = vmatprep.subr.bf16.mxu1 %v1806_v25  ;;  %v1858_v12 = vld [vmem:[%s2357_s0 + $0x18] ss:$56 sps:$4 sm:$0xff]   ;;  %v1860_v13 = vld [vmem:[%s2357_s0 + $0x1c] ss:$56 sps:$4 sm:$0xff]   ;;  %v1864_v17 = vld [vmem:[%s2356_s1 + $0x280] sm:$0xff]  }
  0x1b   :  { %v1865_v18 = vld [vmem:[%s2356_s1 + $0x248] sm:$0xff]   ;;  %v31_v22 = vld [vmem:[%s2357_s0 + $0x80] sm:$0xff]  ;;  %v1871_v25 = vld [vmem:[%s2356_s1 + $0x250] sm:$0xff]  }
  0x1c   :  { %1582 = vmatpush3.bf16.msra.mxu0 %v1807_v26  ;;  %v1866_v19 = vld [vmem:[%s2356_s1 + $0x2c8] sm:$0xff]   ;;  %v1437_v23 = vcombine.high %v31_v22, %v31_v22  ;;  %v1436_v24 = vcombine.low %v31_v22, %v31_v22  ;;  %v1872_v26 = vld [vmem:[%s2356_s1 + $0x2d0] sm:$0xff]   ;;  %v1878_v33 = vld [vmem:[%s2356_s1 + $0x2d8] sm:$0xff]  }
  0x1d   :  { %1610 = vmatpush3.bf16.msra.mxu1 %v1808_v27  ;;  %1583 = vmatprep.subr.bf16.mxu0 %v1809_v28  ;;  %v1867_v20 = vld [vmem:[%s2356_s1 + $0x208] sm:$0xff]   ;;  %v1880_v35 = vld [vmem:[%s2356_s1 + $0x298] sm:$0xff]  }
  0x1e   :  { %1611 = vmatprep.subr.bf16.mxu1 %v1810_v29  ;;  %v1868_v21 = vld [vmem:[%s2356_s1 + $0x288] sm:$0xff]   ;;  %v1874_v29 = vld [vmem:[%s2356_s1 + $0x210] sm:$0xff]   ;;  %v34_v63 = vld [vmem:[%s2357_s0 + $0x98] sm:$0xff] }
  0x1f   :  { %v32_v27 = vld [vmem:[%s2357_s0 + $0x88] sm:$0xff] }
  0x20   :  { %1584 = vmatpush3.bf16.msra.mxu0 %v1811_v30  ;;  %v1439_v28 = vcombine.high %v32_v27, %v32_v27  ;;  %v1438_v30 = vcombine.low %v32_v27, %v32_v27  ;;  %v1905_v58 = vld [vmem:[%s2356_s1 + $0x348] sm:$0xff]  }
  0x21   :  { %1612 = vmatpush3.bf16.msra.mxu1 %v1812_v31  ;;  %1625 = vmatprep.subr.bf16.mxu0 %v1819_v36  ;;  %v1875_v31 = vld [vmem:[%s2356_s1 + $0x290] sm:$0xff]   ;;  %v1881_v36 = vld [vmem:[%s2356_s1 + $0x260] sm:$0xff]  }
  0x22   :  { %1653 = vmatprep.subr.bf16.mxu1 %v1820_v37  ;;  %v1882_v37 = vld [vmem:[%s2356_s1 + $0x2e0] sm:$0xff]  }
  0x23   :  { %1091 = vmatmul.mubr.bf16.vlgmr.msra.gmra.mrb[0].mxu0 %v1813_v32  ;;  %v1877_v32 = vld [vmem:[%s2356_s1 + $0x258] sm:$0xff]  }
  0x24   :  { %1139 = vmatmul.mubr.bf16.vlgmr.msra.gmra.mrb[0].mxu1 %v1816_v34  ;;  %1626 = vmatpush3.bf16.msra.mxu0 %v1821_v38  ;;  %v1879_v34 = vld [vmem:[%s2356_s1 + $0x218] sm:$0xff]   ;;  %v1883_v38 = vld [vmem:[%s2356_s1 + $0x220] sm:$0xff]  }
  0x25   :  { %1654 = vmatpush3.bf16.msra.mxu1 %v1822_v39  ;;  %1627 = vmatprep.subr.bf16.mxu0 %v1823_v40  ;;  %v1884_v39 = vld [vmem:[%s2356_s1 + $0x2a0] sm:$0xff]   ;;  %v1885_v40 = vld [vmem:[%s2356_s1 + $0x268] sm:$0xff]  }
  0x26   :  { %1655 = vmatprep.subr.bf16.mxu1 %v1824_v41  ;;  %1098 = vmatprep.mubr.bf16.mxu0 %v1433_v59  ;;  %v1886_v41 = vld [vmem:[%s2356_s1 + $0x2e8] sm:$0xff]  }
  0x27   :  { %1146 = vmatprep.mubr.bf16.mxu1 %v1435_v0  ;;  %v1906_v59 = vld [vmem:[%s2356_s1 + $0x308] sm:$0xff]   ;;  %v1909_v0 = vld [vmem:[%s2356_s1 + $0x350] sm:$0xff]  }
  0x28   :  { %1628 = vmatpush3.bf16.msra.mxu0 %v1825_v42  ;;  %v1887_v42 = vld [vmem:[%s2356_s1 + $0x228] sm:$0xff]  }
  0x29   :  { %1656 = vmatpush3.bf16.msra.mxu1 %v1826_v43  ;;  %1629 = vmatprep.subr.bf16.mxu0 %v1827_v44  ;;  %v1888_v43 = vld [vmem:[%s2356_s1 + $0x2a8] sm:$0xff]   ;;  %v1889_v44 = vld [vmem:[%s2356_s1 + $0x270] sm:$0xff]  }
  0x2a   :  { %1657 = vmatprep.subr.bf16.mxu1 %v1828_v45  ;;  %v1890_v45 = vld [vmem:[%s2356_s1 + $0x2f0] sm:$0xff]  }
  0x2b   :  { %1099 = vmatmul.mubr.bf16.gmra.mrb[4].mxu0 %v1432_v61 }
  0x2c   :  { %1630 = vmatpush3.bf16.msra.mxu0 %v1829_v46  ;;  %1147 = vmatmul.mubr.bf16.gmra.mrb[4].mxu1 %v1434_v1  ;;  %v1891_v46 = vld [vmem:[%s2356_s1 + $0x230] sm:$0xff]   ;;  %v1443_v1 = vcombine.high %v34_v63, %v34_v63 }
  0x2d   :  { %1658 = vmatpush3.bf16.msra.mxu1 %v1830_v47  ;;  %1631 = vmatprep.subr.bf16.mxu0 %v1831_v48  ;;  %v1892_v47 = vld [vmem:[%s2356_s1 + $0x2b0] sm:$0xff]   ;;  %v1893_v48 = vld [vmem:[%s2356_s1 + $0x278] sm:$0xff]  }
  0x2e   :  { %1659 = vmatprep.subr.bf16.mxu1 %v1832_v49  ;;  %1186 = vmatprep.mubr.bf16.mxu0 %v1857_v11  ;;  %v1894_v49 = vld [vmem:[%s2356_s1 + $0x2f8] sm:$0xff]  }
  0x2f   :  { %1234 = vmatprep.mubr.bf16.mxu1 %v1860_v13  ;;  %v1919_v13 = vld [vmem:[%s2356_s1 + $0x370] sm:$0xff]  }
  0x30   :  { %1632 = vmatpush3.bf16.msra.mxu0 %v1833_v50  ;;  %v1895_v50 = vld [vmem:[%s2356_s1 + $0x238] sm:$0xff]  }
  0x31   :  { %1660 = vmatpush3.bf16.msra.mxu1 %v1834_v51  ;;  %1633 = vmatprep.subr.bf16.mxu0 %v1835_v52  ;;  %v1896_v51 = vld [vmem:[%s2356_s1 + $0x2b8] sm:$0xff]  }
  0x32   :  { %1661 = vmatprep.subr.bf16.mxu1 %v1836_v53  ;;  %v1897_v52 = vld [vmem:[%s2357_s0 + $0x20] ss:$56 sps:$4 sm:$0xff]   ;;  %v1899_v53 = vld [vmem:[%s2357_s0 + $0x24] ss:$56 sps:$4 sm:$0xff]  }
  0x34   :  { %1634 = vmatpush3.bf16.msra.mxu0 %v1837_v54  ;;  %v1900_v54 = vld [vmem:[%s2357_s0 + $0x28] ss:$56 sps:$4 sm:$0xff]  }
  0x35   :  { %1662 = vmatpush3.bf16.msra.mxu1 %v1838_v55  ;;  %1635 = vmatprep.subr.bf16.mxu0 %v1839_v56  ;;  %v1902_v55 = vld [vmem:[%s2357_s0 + $0x2c] ss:$56 sps:$4 sm:$0xff]  }
  0x36   :  { %1663 = vmatprep.subr.bf16.mxu1 %v1840_v57  ;;  %v1903_v56 = vld [vmem:[%s2356_s1 + $0x340] sm:$0xff]  }
  0x37   :  { %v1904_v57 = vld [vmem:[%s2356_s1 + $0x300] sm:$0xff]  }
  0x38   :  { %1636 = vmatpush3.bf16.msra.mxu0 %v1842_v60  ;;  %v33_v60 = vld [vmem:[%s2357_s0 + $0x90] sm:$0xff] }
  0x39   :  { %1664 = vmatpush3.bf16.msra.mxu1 %v1843_v62  ;;  %1637 = vmatprep.subr.bf16.mxu0 %v1847_v2  ;;  %v1441_v61 = vcombine.high %v33_v60, %v33_v60  ;;  %v1440_v62 = vcombine.low %v33_v60, %v33_v60  ;;  %v1442_v2 = vcombine.low %v34_v63, %v34_v63 }
  0x3a   :  { %1665 = vmatprep.subr.bf16.mxu1 %v1848_v3  ;;  %v1911_v3 = vld [vmem:[%s2356_s1 + $0x310] sm:$0xff]  }
  0x3c   :  { %1638 = vmatpush3.bf16.msra.mxu0 %v1849_v4  ;;  %v1913_v4 = vld [vmem:[%s2356_s1 + $0x358] sm:$0xff]  }
  0x3d   :  { %1666 = vmatpush3.bf16.msra.mxu1 %v1850_v5  ;;  %1639 = vmatprep.subr.bf16.mxu0 %v1851_v6  ;;  %v1914_v5 = vld [vmem:[%s2356_s1 + $0x318] sm:$0xff]   ;;  %v1915_v6 = vld [vmem:[%s2356_s1 + $0x360] sm:$0xff]  }
  0x3e   :  { %1667 = vmatprep.subr.bf16.mxu1 %v1852_v7  ;;  %v1916_v7 = vld [vmem:[%s2356_s1 + $0x320] sm:$0xff]  }
  0x40   :  { %1640 = vmatpush3.bf16.msra.mxu0 %v1853_v8  ;;  %v1917_v8 = vld [vmem:[%s2356_s1 + $0x368] sm:$0xff]  }
  0x41   :  { %1668 = vmatpush3.bf16.msra.mxu1 %v1854_v9  ;;  %1681 = vmatprep.subr.bf16.mxu0 %v1861_v14  ;;  %v1925_v9 = vld [vmem:[%s2357_s0 + $0x34] ss:$56 sps:$4 sm:$0xff]  }
  0x42   :  { %1709 = vmatprep.subr.bf16.mxu1 %v1862_v15  ;;  %v1920_v14 = vld [vmem:[%s2356_s1 + $0x330] sm:$0xff]   ;;  %v1921_v15 = vld [vmem:[%s2356_s1 + $0x378] sm:$0xff]  }
  0x43   :  { %1187 = vmatmul.mubr.bf16.vlgmr.msra.gmra.mrb[8].mxu0 %v1855_v10  ;;  %v35_v10 = vld [vmem:[%s2357_s0 + $0xa0] sm:$0xff] }
  0x44   :  { %1235 = vmatmul.mubr.bf16.vlgmr.msra.gmra.mrb[8].mxu1 %v1858_v12  ;;  %1682 = vmatpush3.bf16.msra.mxu0 %v1863_v16  ;;  %v1445_v11 = vcombine.high %v35_v10, %v35_v10  ;;  %v1918_v12 = vld [vmem:[%s2356_s1 + $0x328] sm:$0xff]   ;;  %v1922_v16 = vld [vmem:[%s2356_s1 + $0x338] sm:$0xff]  }
  0x45   :  { %1710 = vmatpush3.bf16.msra.mxu1 %v1864_v17  ;;  %1683 = vmatprep.subr.bf16.mxu0 %v1865_v18  ;;  %v1923_v17 = vld [vmem:[%s2357_s0 + $0x30] ss:$56 sps:$4 sm:$0xff]   ;;  %v1444_v18 = vcombine.low %v35_v10, %v35_v10 }
  0x46   :  { %1711 = vmatprep.subr.bf16.mxu1 %v1866_v19  ;;  %1194 = vmatprep.mubr.bf16.mxu0 %v1437_v23 }
  0x47   :  { %1242 = vmatprep.mubr.bf16.mxu1 %v1439_v28 }
  0x48   :  { %1684 = vmatpush3.bf16.msra.mxu0 %v1867_v20 }
  0x49   :  { %1712 = vmatpush3.bf16.msra.mxu1 %v1868_v21  ;;  %1685 = vmatprep.subr.bf16.mxu0 %v1871_v25  ;;  %v1417_v21 = vld [vmem:[%s2358_s2] ss:$0 sm:$0xff] }
  0x4a   :  { %1713 = vmatprep.subr.bf16.mxu1 %v1872_v26 }
  0x4b   :  { %1195 = vmatmul.mubr.bf16.gmra.mrb[12].mxu0 %v1436_v24 }
  0x4c   :  { %1686 = vmatpush3.bf16.msra.mxu0 %v1874_v29  ;;  %1243 = vmatmul.mubr.bf16.gmra.mrb[12].mxu1 %v1438_v30 }
  0x4d   :  { %1714 = vmatpush3.bf16.msra.mxu1 %v1875_v31  ;;  %1687 = vmatprep.subr.bf16.mxu0 %v1877_v32 }
  0x4e   :  { %1715 = vmatprep.subr.bf16.mxu1 %v1878_v33  ;;  %1282 = vmatprep.mubr.bf16.mxu0 %v1899_v53 }
  0x4f   :  { %1330 = vmatprep.mubr.bf16.mxu1 %v1902_v55 }
  0x50   :  { %1688 = vmatpush3.bf16.msra.mxu0 %v1879_v34 }
  0x51   :  { %1716 = vmatpush3.bf16.msra.mxu1 %v1880_v35  ;;  %1689 = vmatprep.subr.bf16.mxu0 %v1881_v36 }
  0x52   :  { %1717 = vmatprep.subr.bf16.mxu1 %v1882_v37 }
  0x54   :  { %1690 = vmatpush3.bf16.msra.mxu0 %v1883_v38 }
  0x55   :  { %1718 = vmatpush3.bf16.msra.mxu1 %v1884_v39  ;;  %1691 = vmatprep.subr.bf16.mxu0 %v1885_v40 }
  0x56   :  { %1719 = vmatprep.subr.bf16.mxu1 %v1886_v41 }
  0x58   :  { %1692 = vmatpush3.bf16.msra.mxu0 %v1887_v42 }
  0x59   :  { %1720 = vmatpush3.bf16.msra.mxu1 %v1888_v43  ;;  %1693 = vmatprep.subr.bf16.mxu0 %v1889_v44 }
  0x5a   :  { %1721 = vmatprep.subr.bf16.mxu1 %v1890_v45 }
  0x5c   :  { %1694 = vmatpush3.bf16.msra.mxu0 %v1891_v46 }
  0x5d   :  { %1722 = vmatpush3.bf16.msra.mxu1 %v1892_v47  ;;  %1695 = vmatprep.subr.bf16.mxu0 %v1893_v48 }
  0x5e   :  { %1723 = vmatprep.subr.bf16.mxu1 %v1894_v49 }
  0x60   :  { %1696 = vmatpush3.bf16.msra.mxu0 %v1895_v50 }
  0x61   :  { %1724 = vmatpush3.bf16.msra.mxu1 %v1896_v51  ;;  %1737 = vmatprep.subr.bf16.mxu0 %v1903_v56 }
  0x62   :  { %1765 = vmatprep.subr.bf16.mxu1 %v1903_v56 }
  0x63   :  { %1283 = vmatmul.mubr.bf16.vlgmr.msra.gmra.mrb[16].mxu0 %v1897_v52 }
  0x64   :  { %1331 = vmatmul.mubr.bf16.vlgmr.msra.gmra.mrb[16].mxu1 %v1900_v54  ;;  %1738 = vmatpush3.bf16.msra.mxu0 %v1904_v57 }
  0x65   :  { %1773 = vmatpush3.bf16.msra.mxu1 %v1904_v57  ;;  %1739 = vmatprep.subr.bf16.mxu0 %v1905_v58 }
  0x66   :  { %1766 = vmatprep.subr.bf16.mxu1 %v1905_v58  ;;  %1290 = vmatprep.mubr.bf16.mxu0 %v1441_v61 }
  0x67   :  { %1338 = vmatprep.mubr.bf16.mxu1 %v1443_v1 }
  0x68   :  { %1740 = vmatpush3.bf16.msra.mxu0 %v1906_v59 }
  0x69   :  { %1774 = vmatpush3.bf16.msra.mxu1 %v1906_v59  ;;  %1741 = vmatprep.subr.bf16.mxu0 %v1909_v0 }
  0x6a   :  { %1767 = vmatprep.subr.bf16.mxu1 %v1909_v0 }
  0x6b   :  { %1291 = vmatmul.mubr.bf16.gmra.mrb[20].mxu0 %v1440_v62 }
  0x6c   :  { %1339 = vmatmul.mubr.bf16.gmra.mrb[20].mxu1 %v1442_v2  ;;  %1742 = vmatpush3.bf16.msra.mxu0 %v1911_v3 }
  0x6d   :  { %1775 = vmatpush3.bf16.msra.mxu1 %v1911_v3  ;;  %1743 = vmatprep.subr.bf16.mxu0 %v1913_v4 }
  0x6e   :  { %1768 = vmatprep.subr.bf16.mxu1 %v1913_v4  ;;  %1378 = vmatprep.mubr.bf16.mxu0 %v1925_v9 }
  0x6f   :  { %1386 = vmatprep.mubr.bf16.mxu1 %v1445_v11 }
  0x70   :  { %1744 = vmatpush3.bf16.msra.mxu0 %v1914_v5 }
  0x71   :  { %1776 = vmatpush3.bf16.msra.mxu1 %v1914_v5  ;;  %1745 = vmatprep.subr.bf16.mxu0 %v1915_v6 }
  0x72   :  { %1769 = vmatprep.subr.bf16.mxu1 %v1915_v6 }
  0x74   :  { %1746 = vmatpush3.bf16.msra.mxu0 %v1916_v7 }
  0x75   :  { %1777 = vmatpush3.bf16.msra.mxu1 %v1916_v7  ;;  %1747 = vmatprep.subr.bf16.mxu0 %v1917_v8 }
  0x76   :  { %1770 = vmatprep.subr.bf16.mxu1 %v1917_v8 }
  0x78   :  { %1748 = vmatpush3.bf16.msra.mxu0 %v1918_v12 }
  0x79   :  { %1778 = vmatpush3.bf16.msra.mxu1 %v1918_v12  ;;  %1749 = vmatprep.subr.bf16.mxu0 %v1919_v13 }
  0x7a   :  { %1771 = vmatprep.subr.bf16.mxu1 %v1919_v13 }
  0x7c   :  { %1750 = vmatpush3.bf16.msra.mxu0 %v1920_v14 }
  0x7d   :  { %1779 = vmatpush3.bf16.msra.mxu1 %v1920_v14  ;;  %1751 = vmatprep.subr.bf16.mxu0 %v1921_v15 }
  0x7e   :  { %1772 = vmatprep.subr.bf16.mxu1 %v1921_v15 }
  0x80   :  { %1752 = vmatpush3.bf16.msra.mxu0 %v1922_v16 }
  0x81   :  { %1780 = vmatpush3.bf16.msra.mxu1 %v1922_v16 }
  0x83   :  { %1379 = vmatmul.mubr.bf16.vlgmr.msra.gmra.mrb[24].mxu0 %v1923_v17 }
  0x84   :  { %1387 = vmatmul.mubr.bf16.vlgmr.msra.gmra.mrb[24].mxu1 %v1444_v18 }
  0xf6   :  { %v1585_v19 = vpop.f32.mrb[0].mxu0 }
  0xf7   :  { %v1613_v20 = vpop.f32.mrb[0].mxu1  ;;  %v1586_v22 = vpop.f32.mrb[1].mxu0 }
  0xf8   :  { %v1587_v23 = vadd.f32 %v1586_v22, %v1585_v19  ;;  %v1614_v24 = vpop.f32.mrb[1].mxu1  ;;  %v1588_v25 = vpop.f32.mrb[2].mxu0 }
  0xf9   :  { %v1615_v26 = vadd.f32 %v1614_v24, %v1613_v20  ;;  %v1616_v27 = vpop.f32.mrb[2].mxu1  ;;  %v1589_v28 = vpop.f32.mrb[3].mxu0 }
  0xfa   :  { %v1093_v29 = vadd.f32 %v1587_v23, %v1417_v21  ;;  %v1590_v30 = vadd.f32 %v1589_v28, %v1588_v25  ;;  %v1617_v31 = vpop.f32.mrb[3].mxu1 }
  0xfb   :  { %v1618_v32 = vadd.f32 %v1617_v31, %v1616_v27 }
  0xfc   :  { %v1141_v33 = vadd.f32 %v1615_v26, %v1093_v29  ;;  %v1096_v34 = vadd.f32 %v1590_v30, %v1417_v21 }
  0xfe   :  { %v1144_v35 = vadd.f32 %v1618_v32, %v1096_v34  ;;  %v1591_v36 = vpop.f32.mrb[4].mxu0 }
  0xff   :  { %v1592_v37 = vpop.f32.mrb[5].mxu0  ;;  %v1619_v40 = vpop.f32.mrb[4].mxu1 }
 0x100   :  { %v1593_v38 = vadd.f32 %v1592_v37, %v1591_v36  ;;  %v1594_v39 = vpop.f32.mrb[6].mxu0  ;;  %v1620_v43 = vpop.f32.mrb[5].mxu1 }
 0x101   :  { %v1595_v41 = vpop.f32.mrb[7].mxu0  ;;  %v1621_v44 = vadd.f32 %v1620_v43, %v1619_v40  ;;  %v1622_v45 = vpop.f32.mrb[6].mxu1 }
 0x102   :  { %v1101_v42 = vadd.f32 %v1593_v38, %v1417_v21  ;;  %v1623_v46 = vpop.f32.mrb[7].mxu1 }
 0x104   :  { %v1149_v47 = vadd.f32 %v1621_v44, %v1101_v42 }
 0x116   :  { %v1641_v48 = vpop.f32.mrb[8].mxu0 }
 0x117   :  { %v1669_v49 = vpop.f32.mrb[8].mxu1  ;;  %v1642_v50 = vpop.f32.mrb[9].mxu0 }
 0x118   :  { %v1643_v51 = vadd.f32 %v1642_v50, %v1641_v48  ;;  %v1670_v52 = vpop.f32.mrb[9].mxu1  ;;  %v1644_v53 = vpop.f32.mrb[10].mxu0 }
 0x119   :  { %v1671_v54 = vadd.f32 %v1670_v52, %v1669_v49  ;;  %v1672_v55 = vpop.f32.mrb[10].mxu1  ;;  %v1645_v56 = vpop.f32.mrb[11].mxu0 }
 0x11a   :  { %v1189_v57 = vadd.f32 %v1643_v51, %v1141_v33  ;;  %v1646_v58 = vadd.f32 %v1645_v56, %v1644_v53  ;;  %v1673_v59 = vpop.f32.mrb[11].mxu1 }
 0x11b   :  { %v1674_v60 = vadd.f32 %v1673_v59, %v1672_v55 }
 0x11c   :  { %v1237_v61 = vadd.f32 %v1671_v54, %v1189_v57  ;;  %v1192_v62 = vadd.f32 %v1646_v58, %v1144_v35 }
 0x11e   :  { %v1240_v63 = vadd.f32 %v1674_v60, %v1192_v62  ;;  %v1647_v0 = vpop.f32.mrb[12].mxu0 }
 0x11f   :  { %v1648_v1 = vpop.f32.mrb[13].mxu0  ;;  %v1675_v4 = vpop.f32.mrb[12].mxu1 }
 0x120   :  { %v1649_v2 = vadd.f32 %v1648_v1, %v1647_v0  ;;  %v1650_v3 = vpop.f32.mrb[14].mxu0  ;;  %v1676_v7 = vpop.f32.mrb[13].mxu1 }
 0x121   :  { %v1651_v5 = vpop.f32.mrb[15].mxu0  ;;  %v1677_v8 = vadd.f32 %v1676_v7, %v1675_v4  ;;  %v1678_v9 = vpop.f32.mrb[14].mxu1 }
 0x122   :  { %v1197_v6 = vadd.f32 %v1649_v2, %v1149_v47  ;;  %v1679_v10 = vpop.f32.mrb[15].mxu1 }
 0x124   :  { %v1245_v11 = vadd.f32 %v1677_v8, %v1197_v6 }
 0x136   :  { %v1697_v12 = vpop.f32.mrb[16].mxu0 }
 0x137   :  { %v1698_v13 = vpop.f32.mrb[17].mxu0  ;;  %v1725_v14 = vpop.f32.mrb[16].mxu1 }
 0x138   :  { %v1699_v15 = vadd.f32 %v1698_v13, %v1697_v12  ;;  %v1700_v16 = vpop.f32.mrb[18].mxu0  ;;  %v1726_v17 = vpop.f32.mrb[17].mxu1 }
 0x139   :  { %v1701_v18 = vpop.f32.mrb[19].mxu0  ;;  %v1727_v20 = vadd.f32 %v1726_v17, %v1725_v14  ;;  %v1728_v21 = vpop.f32.mrb[18].mxu1 }
 0x13a   :  { %v1285_v19 = vadd.f32 %v1699_v15, %v1237_v61  ;;  %v1702_v22 = vadd.f32 %v1701_v18, %v1700_v16  ;;  %v1729_v23 = vpop.f32.mrb[19].mxu1 }
 0x13b   :  { %v1730_v26 = vadd.f32 %v1729_v23, %v1728_v21 }
 0x13c   :  { %v1333_v24 = vadd.f32 %v1727_v20, %v1285_v19  ;;  %v1288_v25 = vadd.f32 %v1702_v22, %v1240_v63 }
 0x13e   :  { %v1336_v27 = vadd.f32 %v1730_v26, %v1288_v25  ;;  %v1703_v28 = vpop.f32.mrb[20].mxu0 }
 0x13f   :  { %v1704_v29 = vpop.f32.mrb[21].mxu0  ;;  %v1731_v31 = vpop.f32.mrb[20].mxu1 }
 0x140   :  { %v1705_v30 = vadd.f32 %v1704_v29, %v1703_v28  ;;  %v1706_v32 = vpop.f32.mrb[22].mxu0  ;;  %v1732_v33 = vpop.f32.mrb[21].mxu1 }
 0x141   :  { %v1707_v34 = vpop.f32.mrb[23].mxu0  ;;  %v1733_v36 = vadd.f32 %v1732_v33, %v1731_v31  ;;  %v1734_v37 = vpop.f32.mrb[22].mxu1 }
 0x142   :  { %v1293_v35 = vadd.f32 %v1705_v30, %v1245_v11  ;;  %v1735_v38 = vpop.f32.mrb[23].mxu1 }
 0x144   :  { %v1341_v39 = vadd.f32 %v1733_v36, %v1293_v35 }
 0x156   :  { %v1753_v40 = vpop.f32.mrb[24].mxu0 }
 0x157   :  { %v1759_v41 = vpop.f32.mrb[24].mxu1  ;;  %v1754_v42 = vpop.f32.mrb[25].mxu0 }
 0x158   :  { %v1755_v43 = vadd.f32 %v1754_v42, %v1753_v40  ;;  %v1760_v44 = vpop.f32.mrb[25].mxu1  ;;  %v1756_v45 = vpop.f32.mrb[26].mxu0 }
 0x159   :  { %v1761_v46 = vadd.f32 %v1760_v44, %v1759_v41  ;;  %v1762_v47 = vpop.f32.mrb[26].mxu1  ;;  %v1757_v48 = vpop.f32.mrb[27].mxu0 }
 0x15a   :  { %v1381_v49 = vadd.f32 %v1755_v43, %v1333_v24  ;;  %v1758_v50 = vadd.f32 %v1757_v48, %v1756_v45  ;;  %v1763_v51 = vpop.f32.mrb[27].mxu1 }
 0x15b   :  { %v1389_v52 = vadd.f32 %v1761_v46, %v1341_v39 }
 0x15c   :  { %v1384_v53 = vadd.f32 %v1758_v50, %v1336_v27  ;;  %v1394_v55 = vmax.f32 %v1381_v49, 0.0 }
 0x15d   :  { %v1396_v54 = vmax.f32 %v1389_v52, 0.0 }
 0x15e   :  { %v1395_v56 = vmax.f32 %v1384_v53, 0.0 }
 0x15f   :  { %v1563_v57 = vpack.c.bf16 %v1396_v54, %v1396_v54 }
 0x160   :  { %v1567_v58 = vpack.c.bf16 %v1395_v56, %v1394_v55 }
 0x161   :  { %1412 = vst [vmem:[%s2359_s3 + $0x8] sm:$0xf] %v1563_v57 }
 0x162   :  { %1568 = vst [vmem:[%s2359_s3] sm:$0xff] %v1567_v58  }

// kernel: voxel_backbone_8x.23
= control target key start
LH: loop header
LB: loop body
LE: loop exit
PB: predicated region body
PF: predicated region fallthrough
CT: control target
= control target key end

     0   :  { %s341_s1 = inlined_call_operand.vmem [shape: bf16[256,128], index: 1, kind: input, shape index: {}]   ;;  %s342_s0 = inlined_call_operand.vmem [shape: bf16[8,256], index: 0, kind: input, shape index: {}]   ;;  %s343_s2 = inlined_call_operand.vmem [shape: f32[1,128], index: 2, kind: input, shape index: {}]   ;;  %s344_s3 = inlined_call_operand.vmem [shape: bf16[8,128], index: 3, kind: output, shape index: {}]  }
   0x1   :  { %v246_v0 = vld [vmem:[%s341_s1 + $0x40] sm:$0xff]   ;;  %v248_v2 = vld [vmem:[%s341_s1 + $0x48] sm:$0xff]   ;;  %v250_v4 = vld [vmem:[%s341_s1 + $0x50] sm:$0xff]  }
   0x2   :  { %v247_v1 = vld [vmem:[%s341_s1] sm:$0xff]   ;;  %224 = vmatprep.subr.bf16.mxu0 %v246_v0  ;;  %v249_v3 = vld [vmem:[%s341_s1 + $0x8] sm:$0xff]   ;;  %v251_v5 = vld [vmem:[%s341_s1 + $0x10] sm:$0xff]  }
   0x3   :  { %225 = vmatpush3.bf16.msra.mxu0 %v247_v1  ;;  %v252_v6 = vld [vmem:[%s341_s1 + $0x58] sm:$0xff]   ;;  %v254_v8 = vld [vmem:[%s341_s1 + $0x60] sm:$0xff]   ;;  %v256_v10 = vld [vmem:[%s341_s1 + $0x68] sm:$0xff]  }
   0x4   :  { %226 = vmatprep.subr.bf16.mxu0 %v248_v2  ;;  %v253_v7 = vld [vmem:[%s341_s1 + $0x18] sm:$0xff]   ;;  %v255_v9 = vld [vmem:[%s341_s1 + $0x20] sm:$0xff]   ;;  %v257_v13 = vld [vmem:[%s341_s1 + $0x28] sm:$0xff]  }
   0x5   :  { %v15_v11 = vld [vmem:[%s342_s0] sm:$0xff]  ;;  %v258_v14 = vld [vmem:[%s341_s1 + $0x70] sm:$0xff]   ;;  %v260_v16 = vld [vmem:[%s341_s1 + $0x78] sm:$0xff]  }
   0x6   :  { %v207_v12 = vcombine.high %v15_v11, %v15_v11  ;;  %v259_v15 = vld [vmem:[%s341_s1 + $0x30] sm:$0xff]   ;;  %v261_v17 = vld [vmem:[%s341_s1 + $0x38] sm:$0xff]   ;;  %v206_v18 = vcombine.low %v15_v11, %v15_v11  ;;  %v205_v20 = vld [vmem:[%s343_s2] ss:$0 sm:$0xff] }
   0x7   :  { %227 = vmatpush3.bf16.msra.mxu0 %v249_v3 }
   0x8   :  { %228 = vmatprep.subr.bf16.mxu0 %v250_v4  ;;  %190 = vmatprep.mubr.bf16.mxu0 %v207_v12 }
   0xb   :  { %229 = vmatpush3.bf16.msra.mxu0 %v251_v5 }
   0xc   :  { %230 = vmatprep.subr.bf16.mxu0 %v252_v6 }
   0xf   :  { %231 = vmatpush3.bf16.msra.mxu0 %v253_v7 }
  0x10   :  { %232 = vmatprep.subr.bf16.mxu0 %v254_v8 }
  0x13   :  { %233 = vmatpush3.bf16.msra.mxu0 %v255_v9 }
  0x14   :  { %234 = vmatprep.subr.bf16.mxu0 %v256_v10 }
  0x17   :  { %235 = vmatpush3.bf16.msra.mxu0 %v257_v13 }
  0x18   :  { %236 = vmatprep.subr.bf16.mxu0 %v258_v14 }
  0x1b   :  { %237 = vmatpush3.bf16.msra.mxu0 %v259_v15 }
  0x1c   :  { %238 = vmatprep.subr.bf16.mxu0 %v260_v16 }
  0x1f   :  { %239 = vmatpush3.bf16.msra.mxu0 %v261_v17 }
  0x22   :  { %191 = vmatmul.mubr.bf16.vlgmr.msra.gmra.mrb[0].mxu0 %v206_v18 }
  0xf5   :  { %v240_v19 = vpop.f32.mrb[0].mxu0 }
  0xf6   :  { %v241_v21 = vpop.f32.mrb[1].mxu0 }
  0xf7   :  { %v242_v22 = vadd.f32 %v241_v21, %v240_v19  ;;  %v243_v23 = vpop.f32.mrb[2].mxu0 }
  0xf8   :  { %v244_v24 = vpop.f32.mrb[3].mxu0 }
  0xf9   :  { %v193_v25 = vadd.f32 %v242_v22, %v205_v20 }
  0xfb   :  { %v198_v26 = vmax.f32 %v193_v25, 0.0 }
  0xfd   :  { %v199_v27 = vpack.c.bf16 %v198_v26, %v198_v26 }
  0xff   :  { %200 = vst [vmem:[%s344_s3] sm:$0xf] %v199_v27 }

</bundles_post_ra>
